<compile_context>
chip_gen: v7x
topology: tpu7x:2x2x1
jax: 0.10.0
libtpu: 0.0.40
codegen_flags: <defaults>
</compile_context>

<pallas_src>
import jax
import jax.numpy as jnp
from jax.experimental import pallas as pl
from jax.experimental.pallas import tpu as pltpu

NEG_SLOPE = 0.2
IN_DIM = 100
OUT_DIM = 784
DIMS = (IN_DIM, 256, 512, 1024, OUT_DIM)

K_PAD = 128   # latent dim padded to a full lane width
N_PAD = 896   # output dim padded to a multiple of 128 (7 * 128)
DIMS_PAD = (K_PAD, 256, 512, 1024, N_PAD)


def _round_up(x, m):
    return (x + m - 1) // m * m


def _leaky_relu(x):
    return jnp.where(x > 0, x, NEG_SLOPE * x)


def generator_kernel(x_ref,
                     w1_ref, b1_ref,
                     w2_ref, b2_ref,
                     w3_ref, b3_ref,
                     w4_ref, b4_ref,
                     o_ref):
    # 4 MXU matmuls (bf16 inputs, f32 accumulation) + VPU/EUP activations.
    h = jnp.dot(x_ref[...].astype(jnp.bfloat16), w1_ref[...],
                preferred_element_type=jnp.float32)
    h = _leaky_relu(h + b1_ref[...])
    h = jnp.dot(h.astype(jnp.bfloat16), w2_ref[...],
                preferred_element_type=jnp.float32)
    h = _leaky_relu(h + b2_ref[...])
    h = jnp.dot(h.astype(jnp.bfloat16), w3_ref[...],
                preferred_element_type=jnp.float32)
    h = _leaky_relu(h + b3_ref[...])
    h = jnp.dot(h.astype(jnp.bfloat16), w4_ref[...],
                preferred_element_type=jnp.float32)
    o_ref[...] = jnp.tanh(h + b4_ref[...])


def generator_forward(x, params, tb=128):
    """x: (B, 100) f32; params: padded/bf16 tuple from prepare_params()."""
    B = x.shape[0]
    tb = min(tb, _round_up(B, 8))       # batch tile (multiple of 8 sublanes)
    Bp = _round_up(B, tb)

    # Zero-pad: batch rows to a multiple of tb, latent 100 -> 128 lanes.
    xp = jnp.pad(x, ((0, Bp - B), (0, K_PAD - IN_DIM)))

    grid = (Bp // tb,)

    # x / out tiles walk the batch; weights/biases use a constant index_map
    # so Pallas keeps them VMEM-resident across grid steps.
    x_spec = pl.BlockSpec((tb, K_PAD), lambda i: (i, 0))
    w_specs = [pl.BlockSpec(p.shape, lambda i: (0, 0)) for p in params]
    out_spec = pl.BlockSpec((tb, N_PAD), lambda i: (i, 0))

    weight_bytes = sum(int(p.size) * p.dtype.itemsize for p in params)
    flops = 2 * Bp * sum(DIMS_PAD[i] * DIMS_PAD[i + 1]
                         for i in range(len(DIMS_PAD) - 1))
    cost = pl.CostEstimate(
        flops=flops,
        transcendentals=Bp * N_PAD,  # tanh
        bytes_accessed=weight_bytes + Bp * (K_PAD + N_PAD) * 4,
    )

    out_padded = pl.pallas_call(
        generator_kernel,
        out_shape=jax.ShapeDtypeStruct((Bp, N_PAD), jnp.float32),
        grid_spec=pltpu.PrefetchScalarGridSpec(
            num_scalar_prefetch=0,
            grid=grid,
            in_specs=[x_spec] + w_specs,
            out_specs=out_spec,
        ),
        compiler_params=pltpu.CompilerParams(
            dimension_semantics=("parallel",)),
        cost_estimate=cost,
    )(xp, *params)

    return out_padded[:B, :OUT_DIM]


def init_params(key):
    """f32 params mimicking PyTorch Linear default init (uniform +/- 1/sqrt(in))."""
    params = []
    for i in range(len(DIMS) - 1):
        fan_in, fan_out = DIMS[i], DIMS[i + 1]
        key, kw, kb = jax.random.split(key, 3)
        bound = 1.0 / jnp.sqrt(fan_in)
        w = jax.random.uniform(kw, (fan_in, fan_out), jnp.float32, -bound, bound)
        b = jax.random.uniform(kb, (1, fan_out), jnp.float32, -bound, bound)
        params += [w, b]
    return tuple(params)


def prepare_params(params_f32):
    """Pad lane dims (100->128 rows of w1, 784->896 cols of w4/b4) and cast
    weights to bf16. Zero padding is mathematically exact."""
    w1, b1, w2, b2, w3, b3, w4, b4 = params_f32
    w1p = jnp.pad(w1, ((0, K_PAD - IN_DIM), (0, 0))).astype(jnp.bfloat16)
    w2p = w2.astype(jnp.bfloat16)
    w3p = w3.astype(jnp.bfloat16)
    w4p = jnp.pad(w4, ((0, 0), (0, N_PAD - OUT_DIM))).astype(jnp.bfloat16)
    b4p = jnp.pad(b4, ((0, 0), (0, N_PAD - OUT_DIM)))
    return (w1p, b1, w2p, b2, w3p, b3, w4p, b4p)


def reference_forward(x, params):
    """Plain-XLA reference using the exact same mixed-precision recipe."""
    w1, b1, w2, b2, w3, b3, w4, b4 = params
    xp = jnp.pad(x, ((0, 0), (0, K_PAD - IN_DIM)))
    h = jnp.dot(xp.astype(jnp.bfloat16), w1,
                preferred_element_type=jnp.float32) + b1
    h = jnp.where(h > 0, h, NEG_SLOPE * h)
    h = jnp.dot(h.astype(jnp.bfloat16), w2,
                preferred_element_type=jnp.float32) + b2
    h = jnp.where(h > 0, h, NEG_SLOPE * h)
    h = jnp.dot(h.astype(jnp.bfloat16), w3,
                preferred_element_type=jnp.float32) + b3
    h = jnp.where(h > 0, h, NEG_SLOPE * h)
    y = jnp.tanh(jnp.dot(h.astype(jnp.bfloat16), w4,
                         preferred_element_type=jnp.float32) + b4)
    return y[:, :OUT_DIM]


if __name__ == "__main__":
    key = jax.random.PRNGKey(0)
    key, kx = jax.random.split(key)

    B = 256  # exercises the batch grid (2 tiles of 128 rows)
    x = jax.random.normal(kx, (B, IN_DIM), jnp.float32)

    params_f32 = init_params(key)
    params = prepare_params(params_f32)

    out = jax.block_until_ready(generator_forward(x, params))
    ref = jax.block_until_ready(reference_forward(x, params))

    assert out.shape == (B, OUT_DIM), out.shape
    max_err = float(jnp.max(jnp.abs(out - ref)))
    assert max_err < 2e-3, max_err
    print("KERNEL_OK")
</pallas_src>

<mosaic_0001>
module attributes {stable_mosaic.version = 11 : i64} {
  func.func @generator_kernel(%arg0: i32, %arg1: memref<128x128xf32, #tpu.memory_space<vmem>>, %arg2: memref<128x256xbf16, #tpu.memory_space<vmem>>, %arg3: memref<1x256xf32, #tpu.memory_space<vmem>>, %arg4: memref<256x512xbf16, #tpu.memory_space<vmem>>, %arg5: memref<1x512xf32, #tpu.memory_space<vmem>>, %arg6: memref<512x1024xbf16, #tpu.memory_space<vmem>>, %arg7: memref<1x1024xf32, #tpu.memory_space<vmem>>, %arg8: memref<1024x896xbf16, #tpu.memory_space<vmem>>, %arg9: memref<1x896xf32, #tpu.memory_space<vmem>>, %arg10: memref<128x896xf32, #tpu.memory_space<vmem>>) attributes {dimension_semantics = [#tpu.dimension_semantics<parallel>], iteration_bounds = array<i64: 2>, scalar_prefetch = 0 : i64, scratch_operands = 0 : i64, tpu.core_type = #tpu.core_type<tc>, window_params = [{transform_indices = @transform_0, window_bounds = array<i64: 128, 128>}, {pipeline_mode = #tpu.pipeline_mode<synchronous>, transform_indices = @transform_1, window_bounds = array<i64: 128, 256>}, {pipeline_mode = #tpu.pipeline_mode<synchronous>, transform_indices = @transform_2, window_bounds = array<i64: 1, 256>}, {pipeline_mode = #tpu.pipeline_mode<synchronous>, transform_indices = @transform_3, window_bounds = array<i64: 256, 512>}, {pipeline_mode = #tpu.pipeline_mode<synchronous>, transform_indices = @transform_4, window_bounds = array<i64: 1, 512>}, {pipeline_mode = #tpu.pipeline_mode<synchronous>, transform_indices = @transform_5, window_bounds = array<i64: 512, 1024>}, {pipeline_mode = #tpu.pipeline_mode<synchronous>, transform_indices = @transform_6, window_bounds = array<i64: 1, 1024>}, {pipeline_mode = #tpu.pipeline_mode<synchronous>, transform_indices = @transform_7, window_bounds = array<i64: 1024, 896>}, {pipeline_mode = #tpu.pipeline_mode<synchronous>, transform_indices = @transform_8, window_bounds = array<i64: 1, 896>}, {transform_indices = @transform_9, window_bounds = array<i64: 128, 896>}]} {
    %c0 = arith.constant 0 : index
    %c0_0 = arith.constant 0 : index
    %0 = vector.load %arg1[%c0, %c0_0] : memref<128x128xf32, #tpu.memory_space<vmem>>, vector<128x128xf32>
    %1 = arith.truncf %0 : vector<128x128xf32> to vector<128x128xbf16>
    %c0_1 = arith.constant 0 : index
    %c0_2 = arith.constant 0 : index
    %2 = vector.load %arg2[%c0_1, %c0_2] : memref<128x256xbf16, #tpu.memory_space<vmem>>, vector<128x256xbf16>
    %cst = arith.constant dense<0.000000e+00> : vector<128x256xf32>
    %3 = tpu.matmul %1, %2, %cst {dimension_numbers = #tpu.dot_dimension_numbers<[1], [0], [0], [1], [0, 0, 1, 1], [], []>} : vector<128x128xbf16>, vector<128x256xbf16>, vector<128x256xf32> -> vector<128x256xf32>
    %c0_3 = arith.constant 0 : index
    %c0_4 = arith.constant 0 : index
    %4 = vector.load %arg3[%c0_3, %c0_4] : memref<1x256xf32, #tpu.memory_space<vmem>>, vector<1x256xf32>
    %5 = vector.broadcast %4 : vector<1x256xf32> to vector<128x256xf32>
    %6 = arith.addf %3, %5 : vector<128x256xf32>
    %cst_5 = arith.constant 0.000000e+00 : f32
    %7 = vector.broadcast %cst_5 : f32 to vector<128x256xf32>
    %8 = arith.cmpf ogt, %6, %7 : vector<128x256xf32>
    %cst_6 = arith.constant 2.000000e-01 : f32
    %9 = vector.broadcast %cst_6 : f32 to vector<128x256xf32>
    %10 = arith.mulf %9, %6 : vector<128x256xf32>
    %11 = arith.select %8, %6, %10 : vector<128x256xi1>, vector<128x256xf32>
    %12 = arith.truncf %11 : vector<128x256xf32> to vector<128x256xbf16>
    %c0_7 = arith.constant 0 : index
    %c0_8 = arith.constant 0 : index
    %13 = vector.load %arg4[%c0_7, %c0_8] : memref<256x512xbf16, #tpu.memory_space<vmem>>, vector<256x512xbf16>
    %cst_9 = arith.constant dense<0.000000e+00> : vector<128x512xf32>
    %14 = tpu.matmul %12, %13, %cst_9 {dimension_numbers = #tpu.dot_dimension_numbers<[1], [0], [0], [1], [0, 0, 1, 1], [], []>} : vector<128x256xbf16>, vector<256x512xbf16>, vector<128x512xf32> -> vector<128x512xf32>
    %c0_10 = arith.constant 0 : index
    %c0_11 = arith.constant 0 : index
    %15 = vector.load %arg5[%c0_10, %c0_11] : memref<1x512xf32, #tpu.memory_space<vmem>>, vector<1x512xf32>
    %16 = vector.broadcast %15 : vector<1x512xf32> to vector<128x512xf32>
    %17 = arith.addf %14, %16 : vector<128x512xf32>
    %cst_12 = arith.constant 0.000000e+00 : f32
    %18 = vector.broadcast %cst_12 : f32 to vector<128x512xf32>
    %19 = arith.cmpf ogt, %17, %18 : vector<128x512xf32>
    %cst_13 = arith.constant 2.000000e-01 : f32
    %20 = vector.broadcast %cst_13 : f32 to vector<128x512xf32>
    %21 = arith.mulf %20, %17 : vector<128x512xf32>
    %22 = arith.select %19, %17, %21 : vector<128x512xi1>, vector<128x512xf32>
    %23 = arith.truncf %22 : vector<128x512xf32> to vector<128x512xbf16>
    %c0_14 = arith.constant 0 : index
    %c0_15 = arith.constant 0 : index
    %24 = vector.load %arg6[%c0_14, %c0_15] : memref<512x1024xbf16, #tpu.memory_space<vmem>>, vector<512x1024xbf16>
    %cst_16 = arith.constant dense<0.000000e+00> : vector<128x1024xf32>
    %25 = tpu.matmul %23, %24, %cst_16 {dimension_numbers = #tpu.dot_dimension_numbers<[1], [0], [0], [1], [0, 0, 1, 1], [], []>} : vector<128x512xbf16>, vector<512x1024xbf16>, vector<128x1024xf32> -> vector<128x1024xf32>
    %c0_17 = arith.constant 0 : index
    %c0_18 = arith.constant 0 : index
    %26 = vector.load %arg7[%c0_17, %c0_18] : memref<1x1024xf32, #tpu.memory_space<vmem>>, vector<1x1024xf32>
    %27 = vector.broadcast %26 : vector<1x1024xf32> to vector<128x1024xf32>
    %28 = arith.addf %25, %27 : vector<128x1024xf32>
    %cst_19 = arith.constant 0.000000e+00 : f32
    %29 = vector.broadcast %cst_19 : f32 to vector<128x1024xf32>
    %30 = arith.cmpf ogt, %28, %29 : vector<128x1024xf32>
    %cst_20 = arith.constant 2.000000e-01 : f32
    %31 = vector.broadcast %cst_20 : f32 to vector<128x1024xf32>
    %32 = arith.mulf %31, %28 : vector<128x1024xf32>
    %33 = arith.select %30, %28, %32 : vector<128x1024xi1>, vector<128x1024xf32>
    %34 = arith.truncf %33 : vector<128x1024xf32> to vector<128x1024xbf16>
    %c0_21 = arith.constant 0 : index
    %c0_22 = arith.constant 0 : index
    %35 = vector.load %arg8[%c0_21, %c0_22] : memref<1024x896xbf16, #tpu.memory_space<vmem>>, vector<1024x896xbf16>
    %cst_23 = arith.constant dense<0.000000e+00> : vector<128x896xf32>
    %36 = tpu.matmul %34, %35, %cst_23 {dimension_numbers = #tpu.dot_dimension_numbers<[1], [0], [0], [1], [0, 0, 1, 1], [], []>} : vector<128x1024xbf16>, vector<1024x896xbf16>, vector<128x896xf32> -> vector<128x896xf32>
    %c0_24 = arith.constant 0 : index
    %c0_25 = arith.constant 0 : index
    %37 = vector.load %arg9[%c0_24, %c0_25] : memref<1x896xf32, #tpu.memory_space<vmem>>, vector<1x896xf32>
    %38 = vector.broadcast %37 : vector<1x896xf32> to vector<128x896xf32>
    %39 = arith.addf %36, %38 : vector<128x896xf32>
    %40 = math.tanh %39 : vector<128x896xf32>
    %c0_26 = arith.constant 0 : index
    %c0_27 = arith.constant 0 : index
    %41 = vector.load %arg10[%c0_26, %c0_27] : memref<128x896xf32, #tpu.memory_space<vmem>>, vector<128x896xf32>
    tpu.vector_store %arg10[%c0_26, %c0_27], %40 {strides = array<i32>} : memref<128x896xf32, #tpu.memory_space<vmem>>, vector<128x896xf32>,
    return
  }
  func.func @transform_0(%arg0: i32) -> (i32, i32) {
    %c0_i32 = arith.constant 0 : i32
    %c0_i32_0 = arith.constant 0 : i32
    return %arg0, %c0_i32 : i32, i32
  }
  func.func @transform_1(%arg0: i32) -> (i32, i32) {
    %c0_i32 = arith.constant 0 : i32
    %c0_i32_0 = arith.constant 0 : i32
    %c0_i32_1 = arith.constant 0 : i32
    return %c0_i32, %c0_i32_0 : i32, i32
  }
  func.func @transform_2(%arg0: i32) -> (i32, i32) {
    %c0_i32 = arith.constant 0 : i32
    %c0_i32_0 = arith.constant 0 : i32
    %c0_i32_1 = arith.constant 0 : i32
    return %c0_i32, %c0_i32_0 : i32, i32
  }
  func.func @transform_3(%arg0: i32) -> (i32, i32) {
    %c0_i32 = arith.constant 0 : i32
    %c0_i32_0 = arith.constant 0 : i32
    %c0_i32_1 = arith.constant 0 : i32
    return %c0_i32, %c0_i32_0 : i32, i32
  }
  func.func @transform_4(%arg0: i32) -> (i32, i32) {
    %c0_i32 = arith.constant 0 : i32
    %c0_i32_0 = arith.constant 0 : i32
    %c0_i32_1 = arith.constant 0 : i32
    return %c0_i32, %c0_i32_0 : i32, i32
  }
  func.func @transform_5(%arg0: i32) -> (i32, i32) {
    %c0_i32 = arith.constant 0 : i32
    %c0_i32_0 = arith.constant 0 : i32
    %c0_i32_1 = arith.constant 0 : i32
    return %c0_i32, %c0_i32_0 : i32, i32
  }
  func.func @transform_6(%arg0: i32) -> (i32, i32) {
    %c0_i32 = arith.constant 0 : i32
    %c0_i32_0 = arith.constant 0 : i32
    %c0_i32_1 = arith.constant 0 : i32
    return %c0_i32, %c0_i32_0 : i32, i32
  }
  func.func @transform_7(%arg0: i32) -> (i32, i32) {
    %c0_i32 = arith.constant 0 : i32
    %c0_i32_0 = arith.constant 0 : i32
    %c0_i32_1 = arith.constant 0 : i32
    return %c0_i32, %c0_i32_0 : i32, i32
  }
  func.func @transform_8(%arg0: i32) -> (i32, i32) {
    %c0_i32 = arith.constant 0 : i32
    %c0_i32_0 = arith.constant 0 : i32
    %c0_i32_1 = arith.constant 0 : i32
    return %c0_i32, %c0_i32_0 : i32, i32
  }
  func.func @transform_9(%arg0: i32) -> (i32, i32) {
    %c0_i32 = arith.constant 0 : i32
    %c0_i32_0 = arith.constant 0 : i32
    return %arg0, %c0_i32 : i32, i32
  }
}

</mosaic_0001>

<bundles_post_ra>
// kernel: tpu_custom_call.1
= control target key start
LH: loop header
LB: loop body
LE: loop exit
PB: predicated region body
PF: predicated region fallthrough
CT: control target
= control target key end

     0   :  { %s15038_s0 = inlined_call_operand.hbm [shape: f32[256,128], index: 0, kind: input, shape index: {}]   ;;  %s15039_s1 = inlined_call_operand.hbm [shape: bf16[128,256], index: 1, kind: input, shape index: {}]   ;;  %s15040_s2 = inlined_call_operand.hbm [shape: f32[1,256], index: 2, kind: input, shape index: {}]   ;;  %s15041_s3 = inlined_call_operand.hbm [shape: bf16[256,512], index: 3, kind: input, shape index: {}]   ;;  %s15042_s4 = inlined_call_operand.hbm [shape: f32[1,512], index: 4, kind: input, shape index: {}]   ;;  %s15043_s5 = inlined_call_operand.hbm [shape: bf16[512,1024], index: 5, kind: input, shape index: {}]   ;;  %s15044_s6 = inlined_call_operand.hbm [shape: f32[1,1024], index: 6, kind: input, shape index: {}]   ;;  %s15045_s7 = inlined_call_operand.hbm [shape: bf16[1024,896], index: 7, kind: input, shape index: {}]   ;;  %s15046_s8 = inlined_call_operand.hbm [shape: f32[1,896], index: 8, kind: input, shape index: {}]   ;;  %s15047_s9 = inlined_call_operand.hbm [shape: f32[256,896], index: 9, kind: output, shape index: {}]  }
   0x1   :  { %15184 = sst [smem:[#allocation60_spill]] %s15047_s9 }
   0x2   :  { %14 = vsyncpa [#allocation3], 0 }
   0x3   :  { %16 = vsyncpa [#allocation3 + $0x1], 0 }
   0x4   :  { %17 = vsyncpa [#allocation6], 0 }
   0x5   :  { %18 = vsyncpa [#allocation9], 0 }
   0x6   :  { %19 = vsyncpa [#allocation12], 0 }
   0x7   :  { %20 = vsyncpa [#allocation15], 0 }
   0x8   :  { %21 = vsyncpa [#allocation4], 0 }
   0x9   :  { %23 = vsyncpa [#allocation4 + $0x1], 0  ;;  %s12867_s30 = smov 0   ;;  %s12869_s10 = smov 0  }
   0xa   :  { %s12871_s11 = smov 0   ;;  %s12873_s12 = smov 0  }
   0xb LB: > { %s12796_s13 = smov [#allocation5]   ;;  %s12888_s15 = sadd.s32 4294967295, %s12794_s12   ;;  %s12794_s12 = sphi %s12873_s12, %s15402_s12   ;;  %s12790_s11 = sphi %s12871_s11, %s15401_s11   ;;  %s12786_s10 = sphi %s12869_s10, %s15400_s10   ;;  %s12782_s30 = sphi %s12867_s30, %s15399_s30  }
   0xc   : > { %s266_s14 = sshll.u32 %s12796_s13, 4  ;;  %p9591_p0 = scmp.ge.s32.totalorder %s12794_s12, 1  ;;  %s12893_s14 = int_to_ptr.vmem [resolvable:$true] %s266_s14 }
   0xd   : > { %p15050_p1 = scmp.eq.s32.totalorder %s12888_s15, 0  ;;  %p254_p2 = scmp.lt.s32.totalorder %s12794_s12, 3 }
   0xe   : > { %s12797_s17 = smov [#allocation8]   ;;  %s12798_s20 = smov [#allocation11]  }
   0xf   : > { %p12895_p3 = pnand %p9591_p0, %p254_p2  ;;  %s290_s18 = sshll.u32 %s12797_s17, 4  ;;  %s12908_s18 = int_to_ptr.vmem [resolvable:$true] %s290_s18 }
  0x10   : > { %s12910_s21 = sshll.u32 %s12798_s20, 4  ;;  %s12458_s24 = scalar_lea.hbm %s15039_s1, 2048  ;;  %s315_s21 = int_to_ptr.vmem [resolvable:$true] %s12910_s21 }
  0x11   : > { %s15185_s16 = scalar_select %p12895_p3, 1, 0 }
  0x12   : > { %p11354_p5 = pneg %p12895_p3  ;;  %p12459_p7 = scmp.ne.s32.totalorder %s15039_s1, %s12458_s24 }
  0x13   : > { %p12465_p11 = scmp.lt.u32.totalorder %s12458_s24, %s15039_s1 }
  0x14   : > { %p12904_p6 = pnand %p11354_p5, %p15050_p1 }
  0x16   : > { %p12920_p8 = pneg %p12904_p6 }
  0x18   : > { %p12461_p9 = pnand %p12920_p8, %p12459_p7 }
  0x1a   : > { %p12462_p10 = pneg %p12461_p9 }
  0x1c   : > { %p12467_p12 = pnand %p12465_p11, %p12462_p10 }
  0x1e   : > { %12470 = shalt.err (!%p12467_p12)
}
  0x1f   : > { %s12471_s13 = scalar_lea.vmem %s12893_s14, 2048  ;;  %p12479_p5 = scmp.lt.s32.totalorder %s12893_s14, %s12893_s14 }
  0x20   : > { %p12472_p13 = scmp.ne.s32.totalorder %s12893_s14, %s12471_s13  ;;  %p12480_p4 = scmp.lt.s32.totalorder %s12471_s13, %s12471_s13 }
  0x22   : > { %p12474_p0 = pnand %p12472_p13, %p12920_p8  ;;  %p12481_p7 = por %p12480_p4, %p12479_p5 }
  0x24   : > { %p12475_p2 = pneg %p12474_p0 }
  0x26   : > { %p12482_p9 = pnand %p12481_p7, %p12475_p2 }
  0x28   : > { %12485 = shalt.err (!%p12482_p9)
}
  0x29   : > { %s15049_s17 = smov 128   ;;  %s15052_s20 = smov 8  }
  0x2a   : > { %11357 = dma.hbm_to_vmem [thread:$0]  (!%p12904_p6), %s15039_s1, 2048, %s12893_s14, [#allocation6], %s15049_s17, %s15049_s17, %s15052_s20  }
  0x2b   : > { %s12486_s26 = scalar_lea.hbm %s15041_s3, 8192 }
  0x2c   : > { %p12487_p4 = scmp.ne.s32.totalorder %s15041_s3, %s12486_s26  ;;  %p12493_p12 = scmp.lt.u32.totalorder %s12486_s26, %s15041_s3 }
  0x2e   : > { %p12489_p10 = pnand %p12487_p4, %p12920_p8 }
  0x30   : > { %p12490_p11 = pneg %p12489_p10 }
  0x32   : > { %p12495_p13 = pnand %p12493_p12, %p12490_p11 }
  0x34   : > { %12498 = shalt.err (!%p12495_p13)
}
  0x35   : > { %s12499_s14 = scalar_lea.vmem %s12908_s18, 8192  ;;  %p12507_p7 = scmp.lt.s32.totalorder %s12908_s18, %s12908_s18 }
  0x36   : > { %p12500_p0 = scmp.ne.s32.totalorder %s12908_s18, %s12499_s14  ;;  %p12508_p9 = scmp.lt.s32.totalorder %s12499_s14, %s12499_s14 }
  0x38   : > { %p12502_p2 = pnand %p12500_p0, %p12920_p8  ;;  %p12509_p4 = por %p12508_p9, %p12507_p7 }
  0x3a   : > { %p12503_p5 = pneg %p12502_p2 }
  0x3c   : > { %p12510_p10 = pnand %p12509_p4, %p12503_p5 }
  0x3e   : > { %12513 = shalt.err (!%p12510_p10)
}
  0x3f   : > { %s12801_s22 = smov 256   ;;  %s12802_s9 = smov 16  }
  0x40   : > { %11363 = dma.hbm_to_vmem [thread:$0]  (!%p12904_p6), %s15041_s3, 8192, %s12908_s18, [#allocation9], %s12801_s22, %s12801_s22, %s12802_s9  }
  0x41   : > { %s12514_s28 = scalar_lea.hbm %s15043_s5, 32768 }
  0x42   : > { %p12515_p11 = scmp.ne.s32.totalorder %s15043_s5, %s12514_s28  ;;  %p12521_p0 = scmp.lt.u32.totalorder %s12514_s28, %s15043_s5 }
  0x44   : > { %p12517_p12 = pnand %p12515_p11, %p12920_p8 }
  0x46   : > { %p12518_p13 = pneg %p12517_p12 }
  0x48   : > { %p12523_p2 = pnand %p12521_p0, %p12518_p13 }
  0x4a   : > { %12526 = shalt.err (!%p12523_p2)
}
  0x4b   : > { %s12527_s23 = scalar_lea.vmem %s315_s21, 32768  ;;  %p12535_p4 = scmp.lt.s32.totalorder %s315_s21, %s315_s21 }
  0x4c   : > { %p12528_p5 = scmp.ne.s32.totalorder %s315_s21, %s12527_s23  ;;  %p12536_p10 = scmp.lt.s32.totalorder %s12527_s23, %s12527_s23 }
  0x4e   : > { %p12530_p7 = pnand %p12528_p5, %p12920_p8  ;;  %p12537_p1 = por %p12536_p10, %p12535_p4 }
  0x50   : > { %p12531_p9 = pneg %p12530_p7 }
  0x52   : > { %p12538_p3 = pnand %p12537_p1, %p12531_p9 }
  0x54   : > { %12541 = shalt.err (!%p12538_p3)
}
  0x55   : > { %s12803_s18 = smov 512   ;;  %s12804_s22 = smov 32  }
  0x56   : > { %11369 = dma.hbm_to_vmem [thread:$0]  (!%p12904_p6), %s15043_s5, 32768, %s315_s21, [#allocation12], %s12803_s18, %s12803_s18, %s12804_s22  }
  0x57   : > { %s12805_s24 = smov [#allocation14]   ;;  %s12542_s29 = scalar_lea.hbm %s15045_s7, 57344 }
  0x58   : > { %s338_s25 = sshll.u32 %s12805_s24, 4  ;;  %p12543_p1 = scmp.ne.s32.totalorder %s15045_s7, %s12542_s29  ;;  %s339_s25 = int_to_ptr.vmem [resolvable:$true] %s338_s25 }
  0x59   : > { %p12549_p12 = scmp.lt.u32.totalorder %s12542_s29, %s15045_s7 }
  0x5a   : > { %p12545_p3 = pnand %p12543_p1, %p12920_p8 }
  0x5c   : > { %p12546_p11 = pneg %p12545_p3 }
  0x5e   : > { %p12551_p13 = pnand %p12549_p12, %p12546_p11 }
  0x60   : > { %12554 = shalt.err (!%p12551_p13)
}
  0x61   : > { %s12555_s21 = scalar_lea.vmem %s339_s25, 57344  ;;  %p12563_p7 = scmp.lt.s32.totalorder %s339_s25, %s339_s25 }
  0x62   : > { %p12556_p0 = scmp.ne.s32.totalorder %s339_s25, %s12555_s21  ;;  %p12564_p9 = scmp.lt.s32.totalorder %s12555_s21, %s12555_s21 }
  0x64   : > { %p12558_p2 = pnand %p12556_p0, %p12920_p8  ;;  %p12565_p4 = por %p12564_p9, %p12563_p7 }
  0x66   : > { %p12559_p5 = pneg %p12558_p2 }
  0x68   : > { %p12566_p10 = pnand %p12565_p4, %p12559_p5 }
  0x6a   : > { %12569 = shalt.err (!%p12566_p10)
}
  0x6b   : > { %s12806_s18 = smov 448   ;;  %s12807_s22 = smov 28  }
  0x6c   : > { %11375 = dma.hbm_to_vmem [thread:$0]  (!%p12904_p6), %s15045_s7, 57344, %s339_s25, [#allocation15], %s12806_s18, %s12806_s18, %s12807_s22  }
  0x6d   : > { %s12808_s9 = smov [#allocation7]   ;;  %s12809_s26 = smov [#allocation10]  }
  0x6e   : > { %s280_s24 = sshll.u32 %s12808_s9, 4  ;;  %s304_s28 = sshll.u32 %s12809_s26, 4  ;;  %s281_s24 = int_to_ptr.vmem [resolvable:$true] %s280_s24  ;;  %s13004_s28 = int_to_ptr.vmem [resolvable:$true] %s304_s28 }
  0x6f   : > { %s12570_s14 = scalar_lea.hbm %s15040_s2, 32 }
  0x70   : > { %p12571_p1 = scmp.ne.s32.totalorder %s15040_s2, %s12570_s14  ;;  %p12577_p12 = scmp.lt.u32.totalorder %s12570_s14, %s15040_s2 }
  0x72   : > { %p12573_p3 = pnand %p12571_p1, %p12920_p8 }
  0x74   : > { %p12574_p11 = pneg %p12573_p3 }
  0x76   : > { %p12579_p13 = pnand %p12577_p12, %p12574_p11 }
  0x78   : > { %12582 = shalt.err (!%p12579_p13)
}
  0x79   : > { %s12583_s18 = scalar_lea.vmem %s281_s24, 32  ;;  %p12591_p7 = scmp.lt.s32.totalorder %s281_s24, %s281_s24 }
  0x7a   : > { %p12584_p0 = scmp.ne.s32.totalorder %s281_s24, %s12583_s18  ;;  %p12592_p9 = scmp.lt.s32.totalorder %s12583_s18, %s12583_s18 }
  0x7c   : > { %p12586_p2 = pnand %p12584_p0, %p12920_p8  ;;  %p12593_p4 = por %p12592_p9, %p12591_p7 }
  0x7e   : > { %p12587_p5 = pneg %p12586_p2 }
  0x80   : > { %p12594_p10 = pnand %p12593_p4, %p12587_p5 }
  0x82   : > { %12597 = shalt.err (!%p12594_p10)
}
  0x83   : > { %11360 = dma.hbm_to_vmem [thread:$0]  (!%p12904_p6), %s15040_s2, 32, %s281_s24, [#allocation6]  }
  0x84   : > { %s12598_s29 = scalar_lea.hbm %s15042_s4, 64 }
  0x85   : > { %p12599_p1 = scmp.ne.s32.totalorder %s15042_s4, %s12598_s29  ;;  %p12605_p12 = scmp.lt.u32.totalorder %s12598_s29, %s15042_s4 }
  0x87   : > { %p12601_p3 = pnand %p12599_p1, %p12920_p8 }
  0x89   : > { %p12602_p11 = pneg %p12601_p3 }
  0x8b   : > { %p12607_p13 = pnand %p12605_p12, %p12602_p11 }
  0x8d   : > { %12610 = shalt.err (!%p12607_p13)
}
  0x8e   : > { %s12611_s24 = scalar_lea.vmem %s13004_s28, 64  ;;  %p12619_p7 = scmp.lt.s32.totalorder %s13004_s28, %s13004_s28 }
  0x8f   : > { %p12612_p0 = scmp.ne.s32.totalorder %s13004_s28, %s12611_s24  ;;  %p12620_p9 = scmp.lt.s32.totalorder %s12611_s24, %s12611_s24 }
  0x91   : > { %p12614_p2 = pnand %p12612_p0, %p12920_p8  ;;  %p12621_p4 = por %p12620_p9, %p12619_p7 }
  0x93   : > { %p12615_p5 = pneg %p12614_p2 }
  0x95   : > { %p12622_p10 = pnand %p12621_p4, %p12615_p5 }
  0x97   : > { %12625 = shalt.err (!%p12622_p10)
}
  0x98   : > { %11366 = dma.hbm_to_vmem [thread:$0]  (!%p12904_p6), %s15042_s4, 64, %s13004_s28, [#allocation9]  }
  0x99   : > { %s12810_s18 = smov [#allocation13]   ;;  %s12811_s17 = smov [#allocation16]  }
  0x9a   : > { %s328_s22 = sshll.u32 %s12810_s18, 4  ;;  %s352_s9 = sshll.u32 %s12811_s17, 4  ;;  %s329_s22 = int_to_ptr.vmem [resolvable:$true] %s328_s22  ;;  %s13047_s9 = int_to_ptr.vmem [resolvable:$true] %s352_s9 }
  0x9b   : > { %s12626_s13 = scalar_lea.hbm %s15044_s6, 128 }
  0x9c   : > { %p12627_p1 = scmp.ne.s32.totalorder %s15044_s6, %s12626_s13  ;;  %p12633_p12 = scmp.lt.u32.totalorder %s12626_s13, %s15044_s6 }
  0x9e   : > { %p12629_p3 = pnand %p12627_p1, %p12920_p8 }
  0xa0   : > { %p12630_p11 = pneg %p12629_p3 }
  0xa2   : > { %p12635_p13 = pnand %p12633_p12, %p12630_p11 }
  0xa4   : > { %12638 = shalt.err (!%p12635_p13)
}
  0xa5   : > { %s12639_s24 = scalar_lea.vmem %s329_s22, 128  ;;  %p12647_p7 = scmp.lt.s32.totalorder %s329_s22, %s329_s22 }
  0xa6   : > { %p12640_p0 = scmp.ne.s32.totalorder %s329_s22, %s12639_s24  ;;  %p12648_p9 = scmp.lt.s32.totalorder %s12639_s24, %s12639_s24 }
  0xa8   : > { %p12642_p2 = pnand %p12640_p0, %p12920_p8  ;;  %p12649_p4 = por %p12648_p9, %p12647_p7 }
  0xaa   : > { %p12643_p5 = pneg %p12642_p2 }
  0xac   : > { %p12650_p10 = pnand %p12649_p4, %p12643_p5 }
  0xae   : > { %12653 = shalt.err (!%p12650_p10)
}
  0xaf   : > { %11372 = dma.hbm_to_vmem [thread:$0]  (!%p12904_p6), %s15044_s6, 128, %s329_s22, [#allocation12]  }
  0xb0   : > { %s12654_s26 = scalar_lea.hbm %s15046_s8, 112 }
  0xb1   : > { %p12655_p1 = scmp.ne.s32.totalorder %s15046_s8, %s12654_s26  ;;  %p12661_p12 = scmp.lt.u32.totalorder %s12654_s26, %s15046_s8 }
  0xb3   : > { %p12657_p3 = pnand %p12655_p1, %p12920_p8 }
  0xb5   : > { %p12658_p11 = pneg %p12657_p3 }
  0xb7   : > { %p12663_p13 = pnand %p12661_p12, %p12658_p11 }
  0xb9   : > { %12666 = shalt.err (!%p12663_p13)
}
  0xba   : > { %s12667_s22 = scalar_lea.vmem %s13047_s9, 112  ;;  %s12674_s21 = scalar_lea.vmem %s13047_s9, 128 }
  0xbb   : > { %p12668_p0 = scmp.ne.s32.totalorder %s13047_s9, %s12667_s22  ;;  %p12675_p7 = scmp.lt.s32.totalorder %s13047_s9, %s13047_s9 }
  0xbc   : > { %p12676_p9 = scmp.lt.s32.totalorder %s12674_s21, %s12667_s22 }
  0xbd   : > { %p12670_p2 = pnand %p12668_p0, %p12920_p8 }
  0xbe   : > { %p12677_p4 = por %p12676_p9, %p12675_p7 }
  0xbf   : > { %p12671_p5 = pneg %p12670_p2 }
  0xc1   : > { %p12678_p10 = pnand %p12677_p4, %p12671_p5 }
  0xc3   : > { %12681 = shalt.err (!%p12678_p10)
}
  0xc4   : > { %11378 = dma.hbm_to_vmem [thread:$0]  (!%p12904_p6), %s15046_s8, 112, %s13047_s9, [#allocation15]  }
  0xc5   : > { %s9590_s19 = sadd.s32 4294967294, %s12794_s12   ;;  %s13093_s27 = sadd.s32 1, %s12794_s12  }
  0xc6   : > { %s33_s20 = ssub.s32 %s12794_s12, %s13093_s27  ;;  %s36_s25 = sadd.s32 1, %s12790_s11 }
  0xc7   : > { %p34_p8 = scmp.eq.s32.totalorder %s33_s20, 0  ;;  %p43_p1 = scmp.ne.s32.totalorder %s12790_s11, %s12786_s10 }
  0xc8   : > { %p44_p3 = scmp.eq.s32.totalorder %s12794_s12, 0  ;;  %p49_p11 = scmp.ne.s32.totalorder %s12786_s10, %s12782_s30 }
  0xc9   : > { %s13104_s18 = scalar_select %p34_p8, %s12790_s11, %s36_s25  }
  0xca   : > { %p13106_p12 = por %p44_p3, %p43_p1  ;;  %p15189_p13 = scmp.eq.s32.totalorder %s12888_s15, 0 }
  0xcb   : > { %p241_p0 = scmp.eq.s32.totalorder %s12888_s15, 1  ;;  %p247_p2 = scmp.eq.s32.totalorder %s9590_s19, 1 }
  0xcc   : > { %p13112_p6 = por %p15189_p13, %p49_p11  ;;  %p11395_p5 = scmp.lt.s32.totalorder %s12794_s12, 2 }
  0xcd   : > { %s363_s26 = sand.u32 1, %s12790_s11   ;;  %p13119_p7 = por %p241_p0, %p43_p1 }
  0xce   : > { %p13123_p9 = por %p247_p2, %p49_p11  ;;  %s9601_s14 = sshll.u32 %s363_s26, 7 }
  0xcf   : > { %s15191_s29 = scalar_select %p13119_p7, 1, 0 }
  0xd0   : > { %s15192_s13 = scalar_select %p13123_p9, 1, 0 }
  0xd1   : > { %s10403_s23 = sshll.u32 %s12794_s12, 11  ;;  %s367_s24 = scalar_lea.vmem [#allocation2], %s9601_s14 }
  0xd2   : > { %s13131_s28 = scalar_lea.hbm %s15038_s0, %s10403_s23  ;;  %s374_s19 = sshll.u32 %s367_s24, 4  ;;  %s13133_s19 = int_to_ptr.vmem [resolvable:$true] %s374_s19 }
  0xd3   : > { %p13137_p4 = pnand %p11395_p5, %p13106_p12  ;;  %s13141_s25 = scalar_lea.sflag [#allocation3], %s363_s26 }
  0xd4   : > { %s12682_s22 = scalar_lea.hbm %s13131_s28, 2048  ;;  %s12687_s17 = scalar_lea.hbm %s15038_s0, 4096 }
  0xd5   : > { %p12683_p10 = scmp.ne.s32.totalorder %s13131_s28, %s12682_s22  ;;  %p12684_p8 = pneg %p13137_p4 }
  0xd6   : > { %p12688_p11 = scmp.lt.u32.totalorder %s13131_s28, %s15038_s0  ;;  %p12689_p12 = scmp.lt.u32.totalorder %s12687_s17, %s12682_s22 }
  0xd7   : > { %p12685_p1 = pnand %p12684_p8, %p12683_p10  ;;  %p12691_p0 = scmp.lt.u32.totalorder %s12682_s22, %s13131_s28 }
  0xd8   : > { %p12690_p13 = por %p12689_p12, %p12688_p11 }
  0xd9   : > { %p12686_p3 = pneg %p12685_p1 }
  0xda   : > { %p12692_p2 = por %p12691_p0, %p12690_p13 }
  0xdc   : > { %p12693_p5 = pnand %p12692_p2, %p12686_p3 }
  0xde   : > { %12696 = shalt.err (!%p12693_p5)
}
  0xdf   : > { %s12697_s26 = scalar_lea.vmem %s13133_s19, 2048  ;;  %s12812_s14 = smov [#allocation2]  }
  0xe0   : > { %p12698_p10 = scmp.ne.s32.totalorder %s13133_s19, %s12697_s26  ;;  %s12702_s23 = sshll.u32 %s12812_s14, 4  ;;  %s12703_s23 = int_to_ptr.vmem [resolvable:$false] %s12702_s23 }
  0xe1   : > { %s12704_s21 = scalar_lea.vmem %s12703_s23, 4096  ;;  %p12705_p7 = scmp.lt.s32.totalorder %s13133_s19, %s12703_s23 }
  0xe2   : > { %p12700_p1 = pnand %p12698_p10, %p12684_p8  ;;  %p12706_p11 = scmp.lt.s32.totalorder %s12704_s21, %s12697_s26 }
  0xe4   : > { %p12701_p9 = pneg %p12700_p1  ;;  %p12707_p12 = por %p12706_p11, %p12705_p7 }
  0xe6   : > { %p12708_p13 = pnand %p12707_p12, %p12701_p9 }
  0xe8   : > { %12711 = shalt.err (!%p12708_p13)
}
  0xe9   : > { %s15194_s22 = smov 8   ;;  %s15195_s17 = smov 128  }
  0xea   : > { %11382 = dma.hbm_to_vmem [thread:$0]  (!%p13137_p4), %s13131_s28, 2048, %s13133_s19, %s13141_s25, %s15195_s17, %s15195_s17, %s15194_s22  }
  0xeb   : > { %p15196_p8 = scmp.ne.s32.totalorder %s15185_s16, 0 }
  0xed   : > { %386 = sbr.rel (%p15196_p8) target bundleno = 1834 (0x72a), region = 56 }
  0xf4   : > { %s13175_s24 = sand.u32 1, %s12786_s10  }
  0xf5   : > { %s9605_s26 = sshll.u32 %s13175_s24, 7  ;;  %s389_s14 = scalar_lea.sflag [#allocation3], %s13175_s24 }
  0xf6   : > { %s13179_s23 = scalar_lea.vmem [#allocation2], %s9605_s26 }
  0xf7   : > { %12757 = dma.done.wait (%p13112_p6), %s389_s14, 2048  }
  0xf8   : > { %12759 = vsyncadd (%p13112_p6), %s389_s14, 4294965248  ;;  %p15197_p7 = scmp.eq.s32.totalorder %s12888_s15, 0 }
  0xfa   : > { %12761 = dma.done.wait (%p15197_p7), [#allocation6], 2080   ;;  %p15198_p9 = pmov %p15197_p7 }
  0xfb   : > { %p15199_p4 = pmov %p15197_p7 }
  0xfc   : > { %12763 = vsyncadd (%p15198_p9), [#allocation6], 4294965216 }
  0xfd   : > { %12765 = dma.done.wait (%p15199_p4), [#allocation9], 8256   ;;  %p15200_p3 = pmov %p15199_p4 }
  0xff   : > { %12767 = vsyncadd (%p15200_p3), [#allocation9], 4294959040  ;;  %p15201_p0 = pmov %p15200_p3 }
 0x101   : > { %12769 = dma.done.wait (%p15201_p0), [#allocation12], 32896   ;;  %p15202_p2 = pmov %p15201_p0 }
 0x102   : > { %p15203_p6 = pmov %p15201_p0 }
 0x103   : > { %12771 = vsyncadd (%p15202_p2), [#allocation12], 4294934400 }
 0x104   : > { %12773 = dma.done.wait (%p15203_p6), [#allocation15], 57456   ;;  %p15204_p5 = pmov %p15201_p0 }
 0x105   : > { %v12813_v0 = vmov 0   ;;  %v11456_v1 = vld [vmem:[#allocation5 + $0x4] ss:$8 sps:$4 sm:$0xff]   ;;  %v11458_v2 = vld [vmem:[#allocation5] ss:$8 sps:$4 sm:$0xff]   ;;  %v464_v34 = vld [vmem:[%s13179_s23 + $0x10] sm:$0xff] }
 0x106   : > { %12775 = vsyncadd (%p15204_p5), [#allocation15], 4294909840  ;;  %626 = vmatprep.mubr.bf16.mxu0 %v12813_v0  ;;  %594 = vmatprep.subr.bf16.mxu0 %v11456_v1  ;;  %v11459_v3 = vld [vmem:[#allocation5 + $0x14] ss:$8 sps:$4 sm:$0xff]   ;;  %v11461_v4 = vld [vmem:[#allocation5 + $0x10] ss:$8 sps:$4 sm:$0xff]  }
 0x107   : > { %595 = vmatpush1.bf16.msra.mxu0 %v11458_v2  ;;  %v11462_v5 = vld [vmem:[#allocation5 + $0x24] ss:$8 sps:$4 sm:$0xff]   ;;  %v11464_v6 = vld [vmem:[#allocation5 + $0x20] ss:$8 sps:$4 sm:$0xff]   ;;  %v11465_v7 = vld [vmem:[#allocation5 + $0x34] ss:$8 sps:$4 sm:$0xff]  }
 0x108   : > { %596 = vmatprep.subr.bf16.mxu0 %v11459_v3  ;;  %v11467_v8 = vld [vmem:[#allocation5 + $0x30] ss:$8 sps:$4 sm:$0xff]   ;;  %v11468_v9 = vld [vmem:[#allocation5 + $0x44] ss:$8 sps:$4 sm:$0xff]   ;;  %v11470_v10 = vld [vmem:[#allocation5 + $0x40] ss:$8 sps:$4 sm:$0xff]  }
 0x109   : > { %v11471_v11 = vld [vmem:[#allocation5 + $0x54] ss:$8 sps:$4 sm:$0xff]   ;;  %v11473_v13 = vld [vmem:[#allocation5 + $0x50] ss:$8 sps:$4 sm:$0xff]   ;;  %v11474_v16 = vld [vmem:[#allocation5 + $0x64] ss:$8 sps:$4 sm:$0xff]  }
 0x10a   : > { %v11480_v12 = vld [vmem:[#allocation8 + $0x4] ss:$16 sps:$4 sm:$0xff]   ;;  %v11485_v14 = vld [vmem:[#allocation8] ss:$16 sps:$4 sm:$0xff]   ;;  %v11484_v26 = vld [vmem:[#allocation8 + $0xc] ss:$16 sps:$4 sm:$0xff]  }
 0x10b   : > { %597 = vmatpush1.bf16.msra.mxu0 %v11461_v4  ;;  %1225 = vmatprep.subr.bf16.mxu1 %v11480_v12  ;;  %v11486_v15 = vld [vmem:[#allocation8 + $0x24] ss:$16 sps:$4 sm:$0xff]   ;;  %v11491_v17 = vld [vmem:[#allocation8 + $0x20] ss:$16 sps:$4 sm:$0xff]   ;;  %v11482_v30 = vld [vmem:[#allocation8 + $0x8] ss:$16 sps:$4 sm:$0xff]  }
 0x10c   : > { %598 = vmatprep.subr.bf16.mxu0 %v11462_v5  ;;  %1226 = vmatpush1.bf16.msra.mxu1 %v11485_v14  ;;  %v11492_v18 = vld [vmem:[#allocation8 + $0x44] ss:$16 sps:$4 sm:$0xff]   ;;  %v11497_v21 = vld [vmem:[#allocation8 + $0x40] ss:$16 sps:$4 sm:$0xff]   ;;  %v11490_v31 = vld [vmem:[#allocation8 + $0x2c] ss:$16 sps:$4 sm:$0xff]  }
 0x10d   : > { %1227 = vmatprep.subr.bf16.mxu1 %v11486_v15  ;;  %v11476_v19 = vld [vmem:[#allocation5 + $0x60] ss:$8 sps:$4 sm:$0xff]   ;;  %v11477_v20 = vld [vmem:[#allocation5 + $0x74] ss:$8 sps:$4 sm:$0xff]   ;;  %v11479_v23 = vld [vmem:[#allocation5 + $0x70] ss:$8 sps:$4 sm:$0xff]  }
 0x10e   : > { %v11498_v22 = vld [vmem:[#allocation8 + $0x64] ss:$16 sps:$4 sm:$0xff]   ;;  %v11503_v27 = vld [vmem:[#allocation8 + $0x60] ss:$16 sps:$4 sm:$0xff]   ;;  %v11488_v36 = vld [vmem:[#allocation8 + $0x28] ss:$16 sps:$4 sm:$0xff]  }
 0x10f   : > { %599 = vmatpush1.bf16.msra.mxu0 %v11464_v6  ;;  %v462_v24 = vld [vmem:[%s13179_s23] sm:$0xff]  ;;  %v463_v25 = vld [vmem:[%s13179_s23 + $0x8] sm:$0xff]  ;;  %v465_v35 = vld [vmem:[%s13179_s23 + $0x18] sm:$0xff]  ;;  %s11316_s16 = smul.u32 896, %s13175_s24  ;;  %s15395_s21 = sld [smem:[#allocation60_spill]] }
 0x110   : > { %600 = vmatprep.subr.bf16.mxu0 %v11465_v7  ;;  %1228 = vmatpush1.bf16.msra.mxu1 %v11491_v17  ;;  %v11504_v28 = vld [vmem:[#allocation8 + $0x84] ss:$16 sps:$4 sm:$0xff]   ;;  %v478_v29 = vpack.c.bf16 %v463_v25, %v462_v24  ;;  %v11509_v32 = vld [vmem:[#allocation8 + $0x80] ss:$16 sps:$4 sm:$0xff]   ;;  %v11496_v37 = vld [vmem:[#allocation8 + $0x4c] ss:$16 sps:$4 sm:$0xff]   ;;  %v479_v40 = vpack.c.bf16 %v465_v35, %v464_v34 }
 0x111   : > { %1229 = vmatprep.subr.bf16.mxu1 %v11492_v18  ;;  %v11510_v33 = vld [vmem:[#allocation8 + $0xa4] ss:$16 sps:$4 sm:$0xff]   ;;  %v11515_v38 = vld [vmem:[#allocation8 + $0xa0] ss:$16 sps:$4 sm:$0xff]   ;;  %v11494_v41 = vld [vmem:[#allocation8 + $0x48] ss:$16 sps:$4 sm:$0xff]  }
 0x112   : > { %v11516_v39 = vld [vmem:[#allocation8 + $0xc4] ss:$16 sps:$4 sm:$0xff]   ;;  %v11502_v42 = vld [vmem:[#allocation8 + $0x6c] ss:$16 sps:$4 sm:$0xff]   ;;  %v11521_v43 = vld [vmem:[#allocation8 + $0xc0] ss:$16 sps:$4 sm:$0xff]  }
 0x113   : > { %601 = vmatpush1.bf16.msra.mxu0 %v11467_v8  ;;  %v11522_v44 = vld [vmem:[#allocation8 + $0xe4] ss:$16 sps:$4 sm:$0xff]   ;;  %v11500_v47 = vld [vmem:[#allocation8 + $0x68] ss:$16 sps:$4 sm:$0xff]   ;;  %v11508_v48 = vld [vmem:[#allocation8 + $0x8c] ss:$16 sps:$4 sm:$0xff]  }
 0x114   : > { %602 = vmatprep.subr.bf16.mxu0 %v11468_v9  ;;  %1230 = vmatpush1.bf16.msra.mxu1 %v11497_v21  ;;  %v466_v45 = vld [vmem:[%s13179_s23 + $0x20] sm:$0xff]  ;;  %v467_v46 = vld [vmem:[%s13179_s23 + $0x28] sm:$0xff]  ;;  %v468_v55 = vld [vmem:[%s13179_s23 + $0x30] sm:$0xff]  ;;  %s14625_s9 = scalar_lea.vmem [#allocation17], %s11316_s16  ;;  %s11317_s28 = smul.u32 14336, %s12888_s15 }
 0x115   : > { %1231 = vmatprep.subr.bf16.mxu1 %v11498_v22  ;;  %v11527_v49 = vld [vmem:[#allocation8 + $0xe0] ss:$16 sps:$4 sm:$0xff]   ;;  %v11528_v50 = vld [vmem:[#allocation8 + $0x104] ss:$16 sps:$4 sm:$0xff]   ;;  %v480_v51 = vpack.c.bf16 %v467_v46, %v466_v45  ;;  %v11506_v52 = vld [vmem:[#allocation8 + $0x88] ss:$16 sps:$4 sm:$0xff]  }
 0x116   : > { %v11514_v53 = vld [vmem:[#allocation8 + $0xac] ss:$16 sps:$4 sm:$0xff]   ;;  %v11533_v54 = vld [vmem:[#allocation8 + $0x100] ss:$16 sps:$4 sm:$0xff]   ;;  %v11534_v57 = vld [vmem:[#allocation8 + $0x124] ss:$16 sps:$4 sm:$0xff]   ;;  %s14990_s22 = scalar_lea.hbm %s15395_s21, %s11317_s28 }
 0x117   : > { %603 = vmatpush1.bf16.msra.mxu0 %v11470_v10  ;;  %v469_v56 = vld [vmem:[%s13179_s23 + $0x38] sm:$0xff]  ;;  %v11539_v60 = vld [vmem:[#allocation8 + $0x120] ss:$16 sps:$4 sm:$0xff]   ;;  %v471_v5 = vld [vmem:[%s13179_s23 + $0x48] sm:$0xff]  ;;  %s9441_s19 = sshll.u32 %s14625_s9, 4  ;;  %s9427_s17 = scalar_lea.sflag [#allocation4], %s13175_s24  ;;  %s14993_s19 = int_to_ptr.vmem [resolvable:$true] %s9441_s19 }
 0x118   : > { %604 = vmatprep.subr.bf16.mxu0 %v11471_v11  ;;  %1232 = vmatpush1.bf16.msra.mxu1 %v11503_v27  ;;  %v11512_v58 = vld [vmem:[#allocation8 + $0xa8] ss:$16 sps:$4 sm:$0xff]   ;;  %v11520_v59 = vld [vmem:[#allocation8 + $0xcc] ss:$16 sps:$4 sm:$0xff]   ;;  %v11540_v61 = vld [vmem:[#allocation8 + $0x144] ss:$16 sps:$4 sm:$0xff]   ;;  %v481_v63 = vpack.c.bf16 %v469_v56, %v468_v55 }
 0x119   : > { %1233 = vmatprep.subr.bf16.mxu1 %v11504_v28  ;;  %v11518_v62 = vld [vmem:[#allocation8 + $0xc8] ss:$16 sps:$4 sm:$0xff]   ;;  %v11526_v1 = vld [vmem:[#allocation8 + $0xec] ss:$16 sps:$4 sm:$0xff]   ;;  %v11545_v2 = vld [vmem:[#allocation8 + $0x140] ss:$16 sps:$4 sm:$0xff]  }
 0x11a   : > { %v11546_v3 = vld [vmem:[#allocation8 + $0x164] ss:$16 sps:$4 sm:$0xff]   ;;  %v11524_v6 = vld [vmem:[#allocation8 + $0xe8] ss:$16 sps:$4 sm:$0xff]   ;;  %v11532_v7 = vld [vmem:[#allocation8 + $0x10c] ss:$16 sps:$4 sm:$0xff]  }
 0x11b   : > { %605 = vmatpush1.bf16.msra.mxu0 %v11473_v13  ;;  %v470_v4 = vld [vmem:[%s13179_s23 + $0x40] sm:$0xff]  ;;  %v11530_v10 = vld [vmem:[#allocation8 + $0x108] ss:$16 sps:$4 sm:$0xff]   ;;  %v472_v14 = vld [vmem:[%s13179_s23 + $0x50] sm:$0xff]  ;;  %s12712_s26 = scalar_lea.vmem %s14993_s19, 14336  ;;  %p15396_p1 = scmp.ne.s32.totalorder %s15191_s29, 0 }
 0x11c   : > { %606 = vmatprep.subr.bf16.mxu0 %v11474_v16  ;;  %1234 = vmatpush1.bf16.msra.mxu1 %v11509_v32  ;;  %v11551_v8 = vld [vmem:[#allocation8 + $0x160] ss:$16 sps:$4 sm:$0xff]   ;;  %v11552_v9 = vld [vmem:[#allocation8 + $0x184] ss:$16 sps:$4 sm:$0xff]   ;;  %v482_v11 = vpack.c.bf16 %v471_v5, %v470_v4  ;;  %v11538_v12 = vld [vmem:[#allocation8 + $0x12c] ss:$16 sps:$4 sm:$0xff]   ;;  %p12713_p10 = scmp.ne.s32.totalorder %s14993_s19, %s12712_s26 }
 0x11d   : > { %1235 = vmatprep.subr.bf16.mxu1 %v11510_v33  ;;  %v11557_v13 = vld [vmem:[#allocation8 + $0x180] ss:$16 sps:$4 sm:$0xff]   ;;  %v473_v15 = vld [vmem:[%s13179_s23 + $0x58] sm:$0xff]  ;;  %v475_v22 = vld [vmem:[%s13179_s23 + $0x68] sm:$0xff]  ;;  %s12814_s15 = smov [#allocation17]  }
 0x11e   : > { %v11536_v16 = vld [vmem:[#allocation8 + $0x128] ss:$16 sps:$4 sm:$0xff]   ;;  %v11544_v17 = vld [vmem:[#allocation8 + $0x14c] ss:$16 sps:$4 sm:$0xff]   ;;  %v11563_v33 = vld [vmem:[#allocation8 + $0x1a0] ss:$16 sps:$4 sm:$0xff]   ;;  %p12714_p11 = pnand %p12713_p10, %p15396_p1 }
 0x11f   : > { %607 = vmatpush1.bf16.msra.mxu0 %v11476_v19  ;;  %v11542_v18 = vld [vmem:[#allocation8 + $0x148] ss:$16 sps:$4 sm:$0xff]   ;;  %v483_v19 = vpack.c.bf16 %v473_v15, %v472_v14  ;;  %v474_v21 = vld [vmem:[%s13179_s23 + $0x60] sm:$0xff]  ;;  %v476_v27 = vld [vmem:[%s13179_s23 + $0x70] sm:$0xff]  ;;  %s12716_s14 = sshll.u32 %s12814_s15, 4  ;;  %s12717_s14 = int_to_ptr.vmem [resolvable:$false] %s12716_s14 }
 0x120   : > { %608 = vmatprep.subr.bf16.mxu0 %v11477_v20  ;;  %1236 = vmatpush1.bf16.msra.mxu1 %v11515_v38  ;;  %v11550_v20 = vld [vmem:[#allocation8 + $0x16c] ss:$16 sps:$4 sm:$0xff]   ;;  %v11554_v25 = vld [vmem:[#allocation8 + $0x188] ss:$16 sps:$4 sm:$0xff]   ;;  %v11564_v34 = vld [vmem:[#allocation8 + $0x1c4] ss:$16 sps:$4 sm:$0xff]   ;;  %p12715_p12 = pneg %p12714_p11  ;;  %p12719_p13 = scmp.lt.s32.totalorder %s14993_s19, %s12717_s14 }
 0x121   : > { %1237 = vmatprep.subr.bf16.mxu1 %v11516_v39  ;;  %v11556_v24 = vld [vmem:[#allocation8 + $0x18c] ss:$16 sps:$4 sm:$0xff]   ;;  %v11560_v32 = vld [vmem:[#allocation8 + $0x1a8] ss:$16 sps:$4 sm:$0xff]  }
 0x122   : > { %v477_v28 = vld [vmem:[%s13179_s23 + $0x78] sm:$0xff]  ;;  %v13235_v46 = vld [vmem:[#allocation11 + $0x28] sm:$0xff]  ;;  %v1683_v5 = vld [vmem:[#allocation11 + $0x40] sm:$0xff]  ;;  %s12718_s23 = scalar_lea.vmem %s12717_s14, 28672 }
 0x123   : > { %609 = vmatpush1.bf16.msra.mxu0 %v11479_v23  ;;  %v11548_v23 = vld [vmem:[#allocation8 + $0x168] ss:$16 sps:$4 sm:$0xff]   ;;  %v11568_v35 = vld [vmem:[#allocation8 + $0x1cc] ss:$16 sps:$4 sm:$0xff]   ;;  %p12720_p8 = scmp.lt.s32.totalorder %s12718_s23, %s12712_s26 }
 0x124   : > { %1338 = vmatprep.subr.bf16.mxu0 %v11484_v26  ;;  %1238 = vmatpush1.bf16.msra.mxu1 %v11521_v43  ;;  %v484_v26 = vpack.c.bf16 %v475_v22, %v474_v21  ;;  %v11574_v38 = vld [vmem:[#allocation8 + $0x1ec] ss:$16 sps:$4 sm:$0xff]   ;;  %v11572_v39 = vld [vmem:[#allocation8 + $0x1e8] ss:$16 sps:$4 sm:$0xff]  }
 0x125   : > { %1239 = vmatprep.subr.bf16.mxu1 %v11522_v44  ;;  %v13229_v43 = vld [vmem:[#allocation11 + $0x8] sm:$0xff]  ;;  %v13261_v22 = vld [vmem:[#allocation11 + $0x80] sm:$0xff]  ;;  %p12721_p7 = por %p12720_p8, %p12719_p13 }
 0x126   : > { %627 = vmatmul.mubr.bf16.vlgmr.msra.gmra.mrb[0].mxu0 %v478_v29  ;;  %v485_v29 = vpack.c.bf16 %v477_v28, %v476_v27  ;;  %v1692_v27 = vld [vmem:[#allocation11 + $0x88] sm:$0xff] }
 0x127   : > { %636 = vmatprep.mubr.bf16.mxu0 %v12813_v0  ;;  %1339 = vmatpush1.bf16.msra.mxu0 %v11482_v30  ;;  %v11558_v30 = vld [vmem:[#allocation8 + $0x1a4] ss:$16 sps:$4 sm:$0xff]   ;;  %v1696_v28 = vld [vmem:[#allocation11 + $0xa8] sm:$0xff]  ;;  %p12722_p9 = pnand %p12721_p7, %p12715_p12 }
 0x128   : > { %1340 = vmatprep.subr.bf16.mxu0 %v11490_v31  ;;  %1240 = vmatpush1.bf16.msra.mxu1 %v11527_v49  ;;  %v11562_v31 = vld [vmem:[#allocation8 + $0x1ac] ss:$16 sps:$4 sm:$0xff]   ;;  %v504_v49 = vlaneseq }
 0x129   : > { %1241 = vmatprep.subr.bf16.mxu1 %v11528_v50 }
 0x12a   : > { %v13241_v50 = vshrl.u32 %v504_v49, 7 }
 0x12b   : > { %1341 = vmatpush1.bf16.msra.mxu0 %v11488_v36  ;;  %v11566_v36 = vld [vmem:[#allocation8 + $0x1c8] ss:$16 sps:$4 sm:$0xff]  }
 0x12c   : > { %1342 = vmatprep.subr.bf16.mxu0 %v11496_v37  ;;  %1242 = vmatpush1.bf16.msra.mxu1 %v11533_v54  ;;  %v11569_v37 = vld [vmem:[#allocation8 + $0x1c0] ss:$16 sps:$4 sm:$0xff]   ;;  %15205 = vst [vmem:[#allocation24_spill] sm:$0xff] %v13241_v50 }
 0x12d   : > { %1243 = vmatprep.subr.bf16.mxu1 %v11534_v57 }
 0x12e   : > { %637 = vmatmul.mubr.bf16.gmra.mrb[4].mxu0 %v479_v40  ;;  %v11575_v40 = vld [vmem:[#allocation8 + $0x1e0] ss:$16 sps:$4 sm:$0xff]  }
 0x12f   : > { %646 = vmatprep.mubr.bf16.mxu0 %v12813_v0  ;;  %1343 = vmatpush1.bf16.msra.mxu0 %v11494_v41  ;;  %v13225_v41 = vld [vmem:[#allocation11] sm:$0xff] }
 0x130   : > { %1344 = vmatprep.subr.bf16.mxu0 %v11502_v42  ;;  %1244 = vmatpush1.bf16.msra.mxu1 %v11539_v60  ;;  %v13227_v42 = vld [vmem:[#allocation11 + $0x20] sm:$0xff] }
 0x131   : > { %1245 = vmatprep.subr.bf16.mxu1 %v11540_v61  ;;  %v9694_v44 = vcombine.low %v13225_v41, %v13227_v42  ;;  %v9695_v45 = vcombine.high %v13225_v41, %v13227_v42 }
 0x133   : > { %1345 = vmatpush1.bf16.msra.mxu0 %v11500_v47  ;;  %v9696_v47 = vcombine.low %v13229_v43, %v13235_v46 }
 0x134   : > { %1346 = vmatprep.subr.bf16.mxu0 %v11508_v48  ;;  %1246 = vmatpush1.bf16.msra.mxu1 %v11545_v2  ;;  %v9697_v48 = vcombine.high %v13229_v43, %v13235_v46  ;;  %v1704_v43 = vld [vmem:[#allocation11 + $0xe8] sm:$0xff] }
 0x135   : > { %1247 = vmatprep.subr.bf16.mxu1 %v11546_v3 }
 0x136   : > { %647 = vmatmul.mubr.bf16.gmra.mrb[8].mxu0 %v480_v51  ;;  %v502_v51 = vld [vmem:[#allocation7] sm:$0x3] }
 0x137   : > { %656 = vmatprep.mubr.bf16.mxu0 %v12813_v0  ;;  %1347 = vmatpush1.bf16.msra.mxu0 %v11506_v52  ;;  %v13244_v52 = vsub.s32 0, %v13241_v50 }
 0x138   : > { %1348 = vmatprep.subr.bf16.mxu0 %v11514_v53  ;;  %1248 = vmatpush1.bf16.msra.mxu1 %v11551_v8  ;;  %v13247_v53 = vsub.s32 1, %v13241_v50  ;;  %v1687_v8 = vld [vmem:[#allocation11 + $0x60] sm:$0xff] }
 0x139   : > { %1249 = vmatprep.subr.bf16.mxu1 %v11552_v9  ;;  %15206 = vst [vmem:[#allocation25_spill] sm:$0xff] %v13244_v52  ;;  %v13250_v54 = vrot.slane %v502_v51, %v13244_v52  ;;  %v1684_v9 = vld [vmem:[#allocation11 + $0x48] sm:$0xff] }
 0x13a   : > { %15207 = vst [vmem:[#allocation26_spill] sm:$0xff] %v13247_v53  ;;  %v13253_v55 = vrot.slane %v502_v51, %v13247_v53  ;;  %v9712_v51 = vcombine.low %v1692_v27, %v1696_v28 }
 0x13b   : > { %1349 = vmatpush1.bf16.msra.mxu0 %v11512_v58 }
 0x13c   : > { %1350 = vmatprep.subr.bf16.mxu0 %v11520_v59  ;;  %1250 = vmatpush1.bf16.msra.mxu1 %v11557_v13 }
 0x13d   : > { %1251 = vmatprep.subr.bf16.mxu1 %v11558_v30 }
 0x13e   : > { %657 = vmatmul.mubr.bf16.gmra.mrb[12].mxu0 %v481_v63 }
 0x13f   : > { %666 = vmatprep.mubr.bf16.mxu0 %v12813_v0  ;;  %1351 = vmatpush1.bf16.msra.mxu0 %v11518_v62 }
 0x140   : > { %1352 = vmatprep.subr.bf16.mxu0 %v11526_v1  ;;  %1252 = vmatpush1.bf16.msra.mxu1 %v11563_v33 }
 0x141   : > { %1253 = vmatprep.subr.bf16.mxu1 %v11564_v34 }
 0x143   : > { %1353 = vmatpush1.bf16.msra.mxu0 %v11524_v6 }
 0x144   : > { %1354 = vmatprep.subr.bf16.mxu0 %v11532_v7  ;;  %1254 = vmatpush1.bf16.msra.mxu1 %v11569_v37  ;;  %v13269_v37 = vld [vmem:[#allocation11 + $0xc0] sm:$0xff] }
 0x146   : > { %667 = vmatmul.mubr.bf16.gmra.mrb[16].mxu0 %v482_v11 }
 0x147   : > { %676 = vmatprep.mubr.bf16.mxu0 %v12813_v0  ;;  %1355 = vmatpush1.bf16.msra.mxu0 %v11530_v10  ;;  %v1688_v10 = vld [vmem:[#allocation11 + $0x68] sm:$0xff] }
 0x148   : > { %1356 = vmatprep.subr.bf16.mxu0 %v11538_v12  ;;  %v9705_v21 = vcombine.high %v1684_v9, %v1688_v10  ;;  %v9704_v33 = vcombine.low %v1684_v9, %v1688_v10 }
 0x14b   : > { %1357 = vmatpush1.bf16.msra.mxu0 %v11536_v16 }
 0x14c   : > { %1358 = vmatprep.subr.bf16.mxu0 %v11544_v17 }
 0x14e   : > { %677 = vmatmul.mubr.bf16.gmra.mrb[20].mxu0 %v483_v19 }
 0x14f   : > { %686 = vmatprep.mubr.bf16.mxu0 %v12813_v0  ;;  %1359 = vmatpush1.bf16.msra.mxu0 %v11542_v18 }
 0x150   : > { %1360 = vmatprep.subr.bf16.mxu0 %v11550_v20  ;;  %v9703_v20 = vcombine.high %v1683_v5, %v1687_v8 }
 0x153   : > { %1361 = vmatpush1.bf16.msra.mxu0 %v11548_v23 }
 0x154   : > { %1362 = vmatprep.subr.bf16.mxu0 %v11556_v24 }
 0x156   : > { %687 = vmatmul.mubr.bf16.gmra.mrb[24].mxu0 %v484_v26  ;;  %v1695_v26 = vld [vmem:[#allocation11 + $0xa0] sm:$0xff] }
 0x157   : > { %696 = vmatprep.mubr.bf16.mxu0 %v12813_v0  ;;  %1363 = vmatpush1.bf16.msra.mxu0 %v11554_v25  ;;  %v11570_v0 = vld [vmem:[#allocation8 + $0x1e4] ss:$16 sps:$4 sm:$0xff]   ;;  %v9710_v46 = vcombine.low %v13261_v22, %v1695_v26 }
 0x158   : > { %1364 = vmatprep.subr.bf16.mxu0 %v11562_v31  ;;  %1255 = vmatprep.subr.bf16.mxu1 %v11570_v0  ;;  %v9702_v31 = vcombine.low %v1683_v5, %v1687_v8 }
 0x159   : > { %1256 = vmatpush1.bf16.msra.mxu1 %v11575_v40  ;;  %v1700_v40 = vld [vmem:[#allocation11 + $0xc8] sm:$0xff] }
 0x15a   : > { %3253 = vmatprep.subr.bf16.mxu1 %v9695_v45  ;;  %v9720_v8 = vcombine.low %v1700_v40, %v1704_v43 }
 0x15b   : > { %1365 = vmatpush1.bf16.msra.mxu0 %v11560_v32 }
 0x15c   : > { %1366 = vmatprep.subr.bf16.mxu0 %v11568_v35  ;;  %v9711_v35 = vcombine.high %v13261_v22, %v1695_v26 }
 0x15e   : > { %697 = vmatmul.mubr.bf16.gmra.mrb[28].mxu0 %v485_v29 }
 0x15f   : > { %1367 = vmatpush1.bf16.msra.mxu0 %v11566_v36  ;;  %v9713_v36 = vcombine.high %v1692_v27, %v1696_v28 }
 0x160   : > { %1368 = vmatprep.subr.bf16.mxu0 %v11574_v38 }
 0x163   : > { %1369 = vmatpush1.bf16.msra.mxu0 %v11572_v39  ;;  %v1703_v39 = vld [vmem:[#allocation11 + $0xe0] sm:$0xff] }
 0x164   : > { %3479 = vmatprep.subr.bf16.mxu0 %v9697_v48 }
 0x1f9   : > { %v628_v56 = vpop.f32.mrb[0].mxu0 }
 0x1fa   : > { %v629_v57 = vadd.f32 %v628_v56, %v13250_v54  ;;  %v630_v58 = vpop.f32.mrb[1].mxu0 }
 0x1fb   : > { %v631_v59 = vadd.f32 %v630_v58, %v13253_v55  ;;  %v632_v60 = vpop.f32.mrb[2].mxu0  ;;  %v9719_v58 = vcombine.high %v13269_v37, %v1703_v39 }
 0x1fc   : > { %v739_v61 = vmul.f32 0.2, %v629_v57  ;;  %v633_v62 = vadd.f32 %v632_v60, %v13250_v54  ;;  %v634_v63 = vpop.f32.mrb[3].mxu0  ;;  %vm707_vm0 = vcmp.gt.f32.partialorder %v629_v57, 0.0  ;;  %v13276_v60 = vld [vmem:[#allocation11 + $0x100] sm:$0xff] }
 0x1fd   : > { %v635_v1 = vadd.f32 %v634_v63, %v13253_v55  ;;  %v740_v2 = vmul.f32 0.2, %v631_v59  ;;  %vm708_vm1 = vcmp.gt.f32.partialorder %v631_v59, 0.0 }
 0x1fe   : > { %v741_v3 = vmul.f32 0.2, %v633_v62  ;;  %vm709_vm2 = vcmp.gt.f32.partialorder %v633_v62, 0.0  ;;  %v771_v6 = vsel %vm707_vm0, %v629_v57, %v739_v61 }
 0x1ff   : > { %vm710_vm3 = vcmp.gt.f32.partialorder %v635_v1, 0.0  ;;  %v742_v4 = vmul.f32 0.2, %v635_v1  ;;  %v772_v12 = vsel %vm708_vm1, %v631_v59, %v740_v2  ;;  %v9721_v59 = vcombine.high %v1700_v40, %v1704_v43  ;;  %v1708_v2 = vld [vmem:[#allocation11 + $0x108] sm:$0xff] }
 0x200   : > { %v773_v7 = vsel %vm709_vm2, %v633_v62, %v741_v3  ;;  %v1712_v3 = vld [vmem:[#allocation11 + $0x128] sm:$0xff] }
 0x201   : > { %v638_v11 = vpop.f32.mrb[4].mxu0  ;;  %v774_v13 = vsel %vm710_vm3, %v635_v1, %v742_v4  ;;  %v803_v14 = vpack.c.bf16 %v773_v7, %v771_v6  ;;  %v1711_v1 = vld [vmem:[#allocation11 + $0x120] sm:$0xff]  ;;  %v9718_v6 = vcombine.low %v13269_v37, %v1703_v39  ;;  %v9728_v26 = vcombine.low %v1708_v2, %v1712_v3  ;;  %v1728_v37 = vld [vmem:[#allocation11 + $0x1a8] sm:$0xff] }
 0x202   : > { %v639_v15 = vadd.f32 %v638_v11, %v13250_v54  ;;  %v640_v16 = vpop.f32.mrb[5].mxu0  ;;  %v804_v17 = vpack.c.bf16 %v774_v13, %v772_v12  ;;  %v9727_v10 = vcombine.high %v13276_v60, %v1711_v1  ;;  %v9729_v11 = vcombine.high %v1708_v2, %v1712_v3  ;;  %v13282_v12 = vld [vmem:[#allocation11 + $0x140] sm:$0xff] }
 0x203   : > { %v641_v18 = vadd.f32 %v640_v16, %v13253_v55  ;;  %v642_v19 = vpop.f32.mrb[6].mxu0  ;;  %v1716_v16 = vld [vmem:[#allocation11 + $0x148] sm:$0xff]  ;;  %v9726_v22 = vcombine.low %v13276_v60, %v1711_v1 }
 0x204   : > { %v743_v23 = vmul.f32 0.2, %v639_v15  ;;  %v643_v24 = vadd.f32 %v642_v19, %v13250_v54  ;;  %v644_v25 = vpop.f32.mrb[7].mxu0  ;;  %1257 = vmatprep.mubr.bf16.mxu1 %v804_v17  ;;  %1370 = vmatprep.mubr.bf16.mxu0 %v804_v17  ;;  %vm711_vm4 = vcmp.gt.f32.partialorder %v639_v15, 0.0  ;;  %v1720_v17 = vld [vmem:[#allocation11 + $0x168] sm:$0xff] }
 0x205   : > { %v744_v29 = vmul.f32 0.2, %v641_v18  ;;  %v645_v30 = vadd.f32 %v644_v25, %v13253_v55  ;;  %1258 = vmatmul.mubr.bf16.vlgmr.msra.gmra.mrb[0].mxu1 %v803_v14  ;;  %1371 = vmatmul.mubr.bf16.vlgmr.msra.gmra.mrb[32].mxu0 %v803_v14  ;;  %vm712_vm5 = vcmp.gt.f32.partialorder %v641_v18, 0.0  ;;  %v9736_v43 = vcombine.low %v1716_v16, %v1720_v17 }
 0x206   : > { %v745_v32 = vmul.f32 0.2, %v643_v24  ;;  %vm713_vm6 = vcmp.gt.f32.partialorder %v643_v24, 0.0  ;;  %3254 = vmatpush1.bf16.msra.mxu1 %v9694_v44  ;;  %3480 = vmatpush1.bf16.msra.mxu0 %v9696_v47  ;;  %v775_v0 = vsel %vm711_vm4, %v639_v15, %v743_v23  ;;  %v1719_v15 = vld [vmem:[#allocation11 + $0x160] sm:$0xff] }
 0x207   : > { %v746_v34 = vmul.f32 0.2, %v645_v30  ;;  %vm714_vm7 = vcmp.gt.f32.partialorder %v645_v30, 0.0  ;;  %3255 = vmatprep.subr.bf16.mxu1 %v9703_v20  ;;  %3481 = vmatprep.subr.bf16.mxu0 %v9705_v21  ;;  %v776_v41 = vsel %vm712_vm5, %v641_v18, %v744_v29  ;;  %v9735_v29 = vcombine.high %v13282_v12, %v1719_v15 }
 0x208   : > { %v777_v38 = vsel %vm713_vm6, %v643_v24, %v745_v32  ;;  %v9734_v39 = vcombine.low %v13282_v12, %v1719_v15  ;;  %v1744_v12 = vld [vmem:[#allocation11 + $0x228] sm:$0xff] }
 0x209   : > { %v648_v45 = vpop.f32.mrb[8].mxu0  ;;  %v778_v42 = vsel %vm714_vm7, %v645_v30, %v746_v34  ;;  %v805_v44 = vpack.c.bf16 %v777_v38, %v775_v0  ;;  %v9737_v30 = vcombine.high %v1716_v16, %v1720_v17 }
 0x20a   : > { %v649_v47 = vadd.f32 %v648_v45, %v13250_v54  ;;  %v650_v48 = vpop.f32.mrb[9].mxu0  ;;  %v806_v49 = vpack.c.bf16 %v778_v42, %v776_v41  ;;  %3256 = vmatpush1.bf16.msra.mxu1 %v9702_v31  ;;  %3482 = vmatpush1.bf16.msra.mxu0 %v9704_v33  ;;  %v13289_v31 = vld [vmem:[#allocation11 + $0x180] sm:$0xff] }
 0x20b   : > { %v651_v56 = vadd.f32 %v650_v48, %v13253_v55  ;;  %v652_v57 = vpop.f32.mrb[10].mxu0  ;;  %3257 = vmatprep.subr.bf16.mxu1 %v9711_v35  ;;  %3483 = vmatprep.subr.bf16.mxu0 %v9713_v36  ;;  %v1727_v35 = vld [vmem:[#allocation11 + $0x1a0] sm:$0xff]  ;;  %v1724_v36 = vld [vmem:[#allocation11 + $0x188] sm:$0xff] }
 0x20c   : > { %v747_v61 = vmul.f32 0.2, %v649_v47  ;;  %v653_v62 = vadd.f32 %v652_v57, %v13250_v54  ;;  %v654_v63 = vpop.f32.mrb[11].mxu0  ;;  %1267 = vmatprep.mubr.bf16.mxu1 %v806_v49  ;;  %1380 = vmatprep.mubr.bf16.mxu0 %v806_v49  ;;  %vm715_vm8 = vcmp.gt.f32.partialorder %v649_v47, 0.0  ;;  %v9743_v41 = vcombine.high %v13289_v31, %v1727_v35  ;;  %v1735_v48 = vld [vmem:[#allocation11 + $0x1e0] sm:$0xff]  ;;  %v1732_v49 = vld [vmem:[#allocation11 + $0x1c8] sm:$0xff] }
 0x20d   : > { %v748_v4 = vmul.f32 0.2, %v651_v56  ;;  %v655_v5 = vadd.f32 %v654_v63, %v13253_v55  ;;  %1268 = vmatmul.mubr.bf16.gmra.mrb[4].mxu1 %v805_v44  ;;  %1381 = vmatmul.mubr.bf16.gmra.mrb[36].mxu0 %v805_v44  ;;  %vm716_vm9 = vcmp.gt.f32.partialorder %v651_v56, 0.0  ;;  %v9745_v42 = vcombine.high %v1724_v36, %v1728_v37  ;;  %v13295_v44 = vld [vmem:[#allocation11 + $0x1c0] sm:$0xff] }
 0x20e   : > { %v749_v7 = vmul.f32 0.2, %v653_v62  ;;  %vm717_vm10 = vcmp.gt.f32.partialorder %v653_v62, 0.0  ;;  %3258 = vmatpush1.bf16.msra.mxu1 %v9710_v46  ;;  %3484 = vmatpush1.bf16.msra.mxu0 %v9712_v51  ;;  %v779_v13 = vsel %vm715_vm8, %v649_v47, %v747_v61  ;;  %v1736_v51 = vld [vmem:[#allocation11 + $0x1e8] sm:$0xff]  ;;  %v9742_v60 = vcombine.low %v13289_v31, %v1727_v35 }
 0x20f   : > { %v750_v9 = vmul.f32 0.2, %v655_v5  ;;  %vm718_vm11 = vcmp.gt.f32.partialorder %v655_v5, 0.0  ;;  %3259 = vmatprep.subr.bf16.mxu1 %v9719_v58  ;;  %3485 = vmatprep.subr.bf16.mxu0 %v9721_v59  ;;  %v780_v19 = vsel %vm716_vm9, %v651_v56, %v748_v4  ;;  %v9744_v1 = vcombine.low %v1724_v36, %v1728_v37 }
 0x210   : > { %v781_v14 = vsel %vm717_vm10, %v653_v62, %v749_v7  ;;  %v9751_v4 = vcombine.high %v13295_v44, %v1735_v48  ;;  %v9750_v15 = vcombine.low %v13295_v44, %v1735_v48  ;;  %v9752_v17 = vcombine.low %v1732_v49, %v1736_v51  ;;  %v1760_v44 = vld [vmem:[#allocation11 + $0x2a8] sm:$0xff] }
 0x211   : > { %v658_v18 = vpop.f32.mrb[12].mxu0  ;;  %v782_v20 = vsel %vm718_vm11, %v655_v5, %v750_v9  ;;  %v807_v21 = vpack.c.bf16 %v781_v14, %v779_v13  ;;  %v9753_v5 = vcombine.high %v1732_v49, %v1736_v51 }
 0x212   : > { %v659_v23 = vadd.f32 %v658_v18, %v13250_v54  ;;  %v660_v24 = vpop.f32.mrb[13].mxu0  ;;  %v808_v25 = vpack.c.bf16 %v782_v20, %v780_v19  ;;  %3260 = vmatpush1.bf16.msra.mxu1 %v9718_v6  ;;  %3486 = vmatpush1.bf16.msra.mxu0 %v9720_v8  ;;  %v13302_v6 = vld [vmem:[#allocation11 + $0x200] sm:$0xff] }
 0x213   : > { %v661_v27 = vadd.f32 %v660_v24, %v13253_v55  ;;  %v662_v28 = vpop.f32.mrb[14].mxu0  ;;  %3261 = vmatprep.subr.bf16.mxu1 %v9727_v10  ;;  %3487 = vmatprep.subr.bf16.mxu0 %v9729_v11  ;;  %v1743_v10 = vld [vmem:[#allocation11 + $0x220] sm:$0xff]  ;;  %v1740_v11 = vld [vmem:[#allocation11 + $0x208] sm:$0xff] }
 0x214   : > { %v751_v32 = vmul.f32 0.2, %v659_v23  ;;  %v663_v33 = vadd.f32 %v662_v28, %v13250_v54  ;;  %v664_v34 = vpop.f32.mrb[15].mxu0  ;;  %1277 = vmatprep.mubr.bf16.mxu1 %v808_v25  ;;  %1390 = vmatprep.mubr.bf16.mxu0 %v808_v25  ;;  %vm719_vm12 = vcmp.gt.f32.partialorder %v659_v23, 0.0  ;;  %v9759_v19 = vcombine.high %v13302_v6, %v1743_v10  ;;  %v1751_v24 = vld [vmem:[#allocation11 + $0x260] sm:$0xff]  ;;  %v1748_v25 = vld [vmem:[#allocation11 + $0x248] sm:$0xff] }
 0x215   : > { %v752_v0 = vmul.f32 0.2, %v661_v27  ;;  %v665_v38 = vadd.f32 %v664_v34, %v13253_v55  ;;  %1278 = vmatmul.mubr.bf16.gmra.mrb[8].mxu1 %v807_v21  ;;  %1391 = vmatmul.mubr.bf16.gmra.mrb[40].mxu0 %v807_v21  ;;  %vm720_vm13 = vcmp.gt.f32.partialorder %v661_v27, 0.0  ;;  %v9761_v20 = vcombine.high %v1740_v11, %v1744_v12  ;;  %v13308_v21 = vld [vmem:[#allocation11 + $0x240] sm:$0xff] }
 0x216   : > { %v753_v40 = vmul.f32 0.2, %v663_v33  ;;  %vm721_vm14 = vcmp.gt.f32.partialorder %v663_v33, 0.0  ;;  %3262 = vmatpush1.bf16.msra.mxu1 %v9726_v22  ;;  %3488 = vmatpush1.bf16.msra.mxu0 %v9728_v26  ;;  %v783_v46 = vsel %vm719_vm12, %v659_v23, %v751_v32  ;;  %v1752_v26 = vld [vmem:[#allocation11 + $0x268] sm:$0xff]  ;;  %v9758_v31 = vcombine.low %v13302_v6, %v1743_v10 }
 0x217   : > { %v754_v45 = vmul.f32 0.2, %v665_v38  ;;  %vm722_vm15 = vcmp.gt.f32.partialorder %v665_v38, 0.0  ;;  %3263 = vmatprep.subr.bf16.mxu1 %v9735_v29  ;;  %3489 = vmatprep.subr.bf16.mxu0 %v9737_v30  ;;  %v784_v57 = vsel %vm720_vm13, %v661_v27, %v752_v0  ;;  %v9760_v35 = vcombine.low %v1740_v11, %v1744_v12 }
 0x218   : > { %v785_v47 = vsel %vm721_vm14, %v663_v33, %v753_v40  ;;  %v9767_v0 = vcombine.high %v13308_v21, %v1751_v24  ;;  %v9766_v48 = vcombine.low %v13308_v21, %v1751_v24  ;;  %v9768_v51 = vcombine.low %v1748_v25, %v1752_v26  ;;  %v1776_v21 = vld [vmem:[#allocation11 + $0x328] sm:$0xff] }
 0x219   : > { %v668_v56 = vpop.f32.mrb[16].mxu0  ;;  %v786_v58 = vsel %vm722_vm15, %v665_v38, %v754_v45  ;;  %v809_v59 = vpack.c.bf16 %v785_v47, %v783_v46  ;;  %v9769_v38 = vcombine.high %v1748_v25, %v1752_v26 }
 0x21a   : > { %v669_v61 = vadd.f32 %v668_v56, %v13250_v54  ;;  %v670_v62 = vpop.f32.mrb[17].mxu0  ;;  %v810_v63 = vpack.c.bf16 %v786_v58, %v784_v57  ;;  %3264 = vmatpush1.bf16.msra.mxu1 %v9734_v39  ;;  %3490 = vmatpush1.bf16.msra.mxu0 %v9736_v43  ;;  %v13315_v39 = vld [vmem:[#allocation11 + $0x280] sm:$0xff] }
 0x21b   : > { %v671_v2 = vadd.f32 %v670_v62, %v13253_v55  ;;  %v672_v3 = vpop.f32.mrb[18].mxu0  ;;  %3265 = vmatprep.subr.bf16.mxu1 %v9743_v41  ;;  %3491 = vmatprep.subr.bf16.mxu0 %v9745_v42  ;;  %v1759_v41 = vld [vmem:[#allocation11 + $0x2a0] sm:$0xff]  ;;  %v1756_v42 = vld [vmem:[#allocation11 + $0x288] sm:$0xff] }
 0x21c   : > { %v755_v7 = vmul.f32 0.2, %v669_v61  ;;  %v673_v8 = vadd.f32 %v672_v3, %v13250_v54  ;;  %v674_v9 = vpop.f32.mrb[19].mxu0  ;;  %1287 = vmatprep.mubr.bf16.mxu1 %v810_v63  ;;  %1400 = vmatprep.mubr.bf16.mxu0 %v810_v63  ;;  %vm723_vm0 = vcmp.gt.f32.partialorder %v669_v61, 0.0  ;;  %v9775_v57 = vcombine.high %v13315_v39, %v1759_v41  ;;  %v1767_v62 = vld [vmem:[#allocation11 + $0x2e0] sm:$0xff]  ;;  %v1764_v63 = vld [vmem:[#allocation11 + $0x2c8] sm:$0xff] }
 0x21d   : > { %v756_v13 = vmul.f32 0.2, %v671_v2  ;;  %v675_v14 = vadd.f32 %v674_v9, %v13253_v55  ;;  %1288 = vmatmul.mubr.bf16.gmra.mrb[12].mxu1 %v809_v59  ;;  %1401 = vmatmul.mubr.bf16.gmra.mrb[44].mxu0 %v809_v59  ;;  %vm724_vm1 = vcmp.gt.f32.partialorder %v671_v2, 0.0  ;;  %v9777_v58 = vcombine.high %v1756_v42, %v1760_v44  ;;  %v1763_v59 = vld [vmem:[#allocation11 + $0x2c0] sm:$0xff] }
 0x21e   : > { %v757_v16 = vmul.f32 0.2, %v673_v8  ;;  %vm725_vm2 = vcmp.gt.f32.partialorder %v673_v8, 0.0  ;;  %3266 = vmatpush1.bf16.msra.mxu1 %v9742_v60  ;;  %3492 = vmatpush1.bf16.msra.mxu0 %v9744_v1  ;;  %v787_v22 = vsel %vm723_vm0, %v669_v61, %v755_v7  ;;  %v1768_v1 = vld [vmem:[#allocation11 + $0x2e8] sm:$0xff]  ;;  %v9774_v6 = vcombine.low %v13315_v39, %v1759_v41 }
 0x21f   : > { %v758_v18 = vmul.f32 0.2, %v675_v14  ;;  %vm726_vm3 = vcmp.gt.f32.partialorder %v675_v14, 0.0  ;;  %3267 = vmatprep.subr.bf16.mxu1 %v9751_v4  ;;  %3493 = vmatprep.subr.bf16.mxu0 %v9753_v5  ;;  %v788_v28 = vsel %vm724_vm1, %v671_v2, %v756_v13  ;;  %v9776_v10 = vcombine.low %v1756_v42, %v1760_v44 }
 0x220   : > { %v789_v23 = vsel %vm725_vm2, %v673_v8, %v757_v16  ;;  %v9783_v13 = vcombine.high %v1763_v59, %v1767_v62  ;;  %v9782_v24 = vcombine.low %v1763_v59, %v1767_v62  ;;  %v9784_v26 = vcombine.low %v1764_v63, %v1768_v1 }
 0x221   : > { %v678_v27 = vpop.f32.mrb[20].mxu0  ;;  %v790_v29 = vsel %vm726_vm3, %v675_v14, %v758_v18  ;;  %v811_v30 = vpack.c.bf16 %v789_v23, %v787_v22  ;;  %v9785_v14 = vcombine.high %v1764_v63, %v1768_v1  ;;  %v1784_v63 = vld [vmem:[#allocation11 + $0x368] sm:$0xff] }
 0x222   : > { %v679_v32 = vadd.f32 %v678_v27, %v13250_v54  ;;  %v680_v33 = vpop.f32.mrb[21].mxu0  ;;  %v812_v34 = vpack.c.bf16 %v790_v29, %v788_v28  ;;  %3268 = vmatpush1.bf16.msra.mxu1 %v9750_v15  ;;  %3494 = vmatpush1.bf16.msra.mxu0 %v9752_v17  ;;  %v1771_v15 = vld [vmem:[#allocation11 + $0x300] sm:$0xff] }
 0x223   : > { %v681_v36 = vadd.f32 %v680_v33, %v13253_v55  ;;  %v682_v37 = vpop.f32.mrb[22].mxu0  ;;  %3269 = vmatprep.subr.bf16.mxu1 %v9759_v19  ;;  %3495 = vmatprep.subr.bf16.mxu0 %v9761_v20  ;;  %v1775_v19 = vld [vmem:[#allocation11 + $0x320] sm:$0xff]  ;;  %v1772_v20 = vld [vmem:[#allocation11 + $0x308] sm:$0xff] }
 0x224   : > { %v759_v40 = vmul.f32 0.2, %v679_v32  ;;  %v683_v43 = vadd.f32 %v682_v37, %v13250_v54  ;;  %v684_v45 = vpop.f32.mrb[23].mxu0  ;;  %1297 = vmatprep.mubr.bf16.mxu1 %v812_v34  ;;  %1410 = vmatprep.mubr.bf16.mxu0 %v812_v34  ;;  %vm727_vm4 = vcmp.gt.f32.partialorder %v679_v32, 0.0  ;;  %v9791_v28 = vcombine.high %v1771_v15, %v1775_v19  ;;  %v1783_v33 = vld [vmem:[#allocation11 + $0x360] sm:$0xff] }
 0x225   : > { %v760_v46 = vmul.f32 0.2, %v681_v36  ;;  %v685_v47 = vadd.f32 %v684_v45, %v13253_v55  ;;  %1298 = vmatmul.mubr.bf16.gmra.mrb[16].mxu1 %v811_v30  ;;  %1411 = vmatmul.mubr.bf16.gmra.mrb[48].mxu0 %v811_v30  ;;  %vm728_vm5 = vcmp.gt.f32.partialorder %v681_v36, 0.0  ;;  %v9793_v29 = vcombine.high %v1772_v20, %v1776_v21 }
 0x226   : > { %v761_v49 = vmul.f32 0.2, %v683_v43  ;;  %vm729_vm6 = vcmp.gt.f32.partialorder %v683_v43, 0.0  ;;  %3270 = vmatpush1.bf16.msra.mxu1 %v9758_v31  ;;  %3496 = vmatpush1.bf16.msra.mxu0 %v9760_v35  ;;  %v791_v60 = vsel %vm727_vm4, %v679_v32, %v759_v40  ;;  %v1779_v32 = vld [vmem:[#allocation11 + $0x340] sm:$0xff] }
 0x227   : > { %v762_v56 = vmul.f32 0.2, %v685_v47  ;;  %vm730_vm7 = vcmp.gt.f32.partialorder %v685_v47, 0.0  ;;  %3271 = vmatprep.subr.bf16.mxu1 %v9767_v0  ;;  %3497 = vmatprep.subr.bf16.mxu0 %v9769_v38  ;;  %v792_v3 = vsel %vm728_vm5, %v681_v36, %v760_v46  ;;  %v9790_v0 = vcombine.low %v1771_v15, %v1775_v19  ;;  %v1800_v15 = vld [vmem:[#allocation11 + $0x3e8] sm:$0xff]  ;;  %v13333_v19 = vld [vmem:[#allocation11 + $0x400] sm:$0xff] }
 0x228   : > { %v793_v61 = vsel %vm729_vm6, %v683_v43, %v761_v49  ;;  %v9792_v43 = vcombine.low %v1772_v20, %v1776_v21  ;;  %v9799_v42 = vcombine.high %v1779_v32, %v1783_v33  ;;  %v13335_v20 = vld [vmem:[#allocation11 + $0x420] sm:$0xff]  ;;  %v13337_v21 = vld [vmem:[#allocation11 + $0x408] sm:$0xff] }
 0x229   : > { %v688_v2 = vpop.f32.mrb[24].mxu0  ;;  %v794_v4 = vsel %vm730_vm7, %v685_v47, %v762_v56  ;;  %v813_v5 = vpack.c.bf16 %v793_v61, %v791_v60  ;;  %v9798_v56 = vcombine.low %v1779_v32, %v1783_v33  ;;  %v13358_v32 = vld [vmem:[#allocation11 + $0x468] sm:$0xff]  ;;  %v13361_v33 = vsub.s32 3, %v13241_v50 }
 0x22a   : > { %v689_v7 = vadd.f32 %v688_v2, %v13250_v54  ;;  %v690_v8 = vpop.f32.mrb[25].mxu0  ;;  %v814_v9 = vpack.c.bf16 %v794_v4, %v792_v3  ;;  %3272 = vmatpush1.bf16.msra.mxu1 %v9766_v48  ;;  %3498 = vmatpush1.bf16.msra.mxu0 %v9768_v51  ;;  %v1787_v3 = vld [vmem:[#allocation11 + $0x380] sm:$0xff] }
 0x22b   : > { %v691_v11 = vadd.f32 %v690_v8, %v13253_v55  ;;  %v692_v12 = vpop.f32.mrb[26].mxu0  ;;  %3273 = vmatprep.subr.bf16.mxu1 %v9775_v57  ;;  %3499 = vmatprep.subr.bf16.mxu0 %v9777_v58  ;;  %v1791_v4 = vld [vmem:[#allocation11 + $0x3a0] sm:$0xff]  ;;  %15209 = vst [vmem:[#allocation28_spill] sm:$0xff] %v13361_v33 }
 0x22c   : > { %v763_v16 = vmul.f32 0.2, %v689_v7  ;;  %v693_v17 = vadd.f32 %v692_v12, %v13250_v54  ;;  %v694_v18 = vpop.f32.mrb[27].mxu0  ;;  %1307 = vmatprep.mubr.bf16.mxu1 %v814_v9  ;;  %1420 = vmatprep.mubr.bf16.mxu0 %v814_v9  ;;  %vm731_vm8 = vcmp.gt.f32.partialorder %v689_v7, 0.0  ;;  %v9806_v8 = vcombine.low %v1787_v3, %v1791_v4  ;;  %v1799_v12 = vld [vmem:[#allocation11 + $0x3e0] sm:$0xff] }
 0x22d   : > { %v764_v22 = vmul.f32 0.2, %v691_v11  ;;  %v695_v23 = vadd.f32 %v694_v18, %v13253_v55  ;;  %1308 = vmatmul.mubr.bf16.gmra.mrb[20].mxu1 %v813_v5  ;;  %1421 = vmatmul.mubr.bf16.gmra.mrb[52].mxu0 %v813_v5  ;;  %vm732_vm9 = vcmp.gt.f32.partialorder %v691_v11, 0.0  ;;  %v1788_v5 = vld [vmem:[#allocation11 + $0x388] sm:$0xff] }
 0x22e   : > { %vm733_vm10 = vcmp.gt.f32.partialorder %v693_v17, 0.0  ;;  %v765_v25 = vmul.f32 0.2, %v693_v17  ;;  %3274 = vmatpush1.bf16.msra.mxu1 %v9774_v6  ;;  %3500 = vmatpush1.bf16.msra.mxu0 %v9776_v10  ;;  %v795_v30 = vsel %vm731_vm8, %v689_v7, %v763_v16  ;;  %v9807_v6 = vcombine.high %v1787_v3, %v1791_v4  ;;  %v1792_v7 = vld [vmem:[#allocation11 + $0x3a8] sm:$0xff]  ;;  %v13429_v4 = vld [vmem:[#allocation11 + $0x5c0] sm:$0xff] }
 0x22f   : > { %vm734_vm11 = vcmp.gt.f32.partialorder %v695_v23, 0.0  ;;  %v766_v27 = vmul.f32 0.2, %v695_v23  ;;  %3275 = vmatprep.subr.bf16.mxu1 %v9783_v13  ;;  %3501 = vmatprep.subr.bf16.mxu0 %v9785_v14  ;;  %v796_v35 = vsel %vm732_vm9, %v691_v11, %v764_v22  ;;  %v9808_v9 = vcombine.low %v1788_v5, %v1792_v7  ;;  %v1795_v11 = vld [vmem:[#allocation11 + $0x3c0] sm:$0xff]  ;;  %v1796_v13 = vld [vmem:[#allocation11 + $0x3c8] sm:$0xff] }
 0x230   : > { %v797_v31 = vsel %vm733_vm10, %v693_v17, %v765_v25  ;;  %v9809_v10 = vcombine.high %v1788_v5, %v1792_v7  ;;  %v9815_v14 = vcombine.high %v1795_v11, %v1799_v12  ;;  %v9814_v16 = vcombine.low %v1795_v11, %v1799_v12  ;;  %v13431_v5 = vld [vmem:[#allocation11 + $0x5e0] sm:$0xff]  ;;  %v13443_v11 = vld [vmem:[#allocation11 + $0x5e8] sm:$0xff] }
 0x231   : > { %v698_v34 = vpop.f32.mrb[28].mxu0  ;;  %v798_v36 = vsel %vm734_vm11, %v695_v23, %v766_v27  ;;  %v815_v37 = vpack.c.bf16 %v797_v31, %v795_v30  ;;  %v9816_v17 = vcombine.low %v1796_v13, %v1800_v15  ;;  %v9817_v18 = vcombine.high %v1796_v13, %v1800_v15  ;;  %v13341_v23 = vld [vmem:[#allocation11 + $0x428] sm:$0xff]  ;;  %v883_v27 = vld [vmem:[#allocation10] sm:$0xf]  ;;  %v13354_v30 = vld [vmem:[#allocation11 + $0x460] sm:$0xff] }
 0x232   : > { %v699_v38 = vadd.f32 %v698_v34, %v13250_v54  ;;  %v700_v39 = vpop.f32.mrb[29].mxu0  ;;  %v816_v40 = vpack.c.bf16 %v798_v36, %v796_v35  ;;  %3276 = vmatpush1.bf16.msra.mxu1 %v9782_v24  ;;  %3502 = vmatpush1.bf16.msra.mxu0 %v9784_v26  ;;  %v9823_v22 = vcombine.high %v13333_v19, %v13335_v20  ;;  %v13356_v31 = vld [vmem:[#allocation11 + $0x448] sm:$0xff]  ;;  %v13363_v34 = vld [vmem:[#allocation11 + $0x480] sm:$0xff] }
 0x233   : > { %v701_v45 = vadd.f32 %v700_v39, %v13253_v55  ;;  %v702_v41 = vpop.f32.mrb[30].mxu0  ;;  %3277 = vmatprep.subr.bf16.mxu1 %v9791_v28  ;;  %3503 = vmatprep.subr.bf16.mxu0 %v9793_v29  ;;  %v9825_v26 = vcombine.high %v13337_v21, %v13341_v23  ;;  %v13350_v28 = vsub.s32 2, %v13241_v50  ;;  %v13352_v29 = vld [vmem:[#allocation11 + $0x440] sm:$0xff]  ;;  %v13367_v36 = vld [vmem:[#allocation11 + $0x488] sm:$0xff] }
 0x234   : > { %v767_v44 = vmul.f32 0.2, %v699_v38  ;;  %v703_v46 = vadd.f32 %v702_v41, %v13250_v54  ;;  %v704_v47 = vpop.f32.mrb[31].mxu0  ;;  %1317 = vmatprep.mubr.bf16.mxu1 %v816_v40  ;;  %1430 = vmatprep.mubr.bf16.mxu0 %v816_v40  ;;  %vm735_vm12 = vcmp.gt.f32.partialorder %v699_v38, 0.0  ;;  %v13365_v35 = vld [vmem:[#allocation11 + $0x4a0] sm:$0xff]  ;;  %v13375_v39 = vld [vmem:[#allocation11 + $0x4c8] sm:$0xff] }
 0x235   : > { %v768_v48 = vmul.f32 0.2, %v701_v45  ;;  %v705_v49 = vadd.f32 %v704_v47, %v13253_v55  ;;  %1318 = vmatmul.mubr.bf16.gmra.mrb[24].mxu1 %v815_v37  ;;  %1431 = vmatmul.mubr.bf16.gmra.mrb[56].mxu0 %v815_v37  ;;  %vm736_vm13 = vcmp.gt.f32.partialorder %v701_v45, 0.0  ;;  %v1780_v55 = vld [vmem:[#allocation11 + $0x348] sm:$0xff]  ;;  %15208 = vst [vmem:[#allocation27_spill] sm:$0xff] %v13350_v28  ;;  %v13394_v47 = vrot.slane %v883_v27, %v13247_v53  ;;  %v13445_v12 = vld [vmem:[#allocation11 + $0x600] sm:$0xff] }
 0x236   : > { %vm737_vm14 = vcmp.gt.f32.partialorder %v703_v46, 0.0  ;;  %v769_v51 = vmul.f32 0.2, %v703_v46  ;;  %3278 = vmatpush1.bf16.msra.mxu1 %v9790_v0  ;;  %3504 = vmatpush1.bf16.msra.mxu0 %v9792_v43  ;;  %v799_v58 = vsel %vm735_vm12, %v699_v38, %v767_v44  ;;  %v9801_v1 = vcombine.high %v1780_v55, %v1784_v63  ;;  %v13369_v37 = vld [vmem:[#allocation11 + $0x4a8] sm:$0xff]  ;;  %v13371_v0 = vld [vmem:[#allocation11 + $0x4c0] sm:$0xff]  ;;  %15210 = vst [vmem:[#allocation29_spill] sm:$0xff] %v13445_v12 }
 0x237   : > { %vm738_vm15 = vcmp.gt.f32.partialorder %v705_v49, 0.0  ;;  %v770_v57 = vmul.f32 0.2, %v705_v49  ;;  %3279 = vmatprep.subr.bf16.mxu1 %v9799_v42  ;;  %v800_v59 = vsel %vm736_vm13, %v701_v45, %v768_v48  ;;  %v9800_v2 = vcombine.low %v1780_v55, %v1784_v63  ;;  %v13373_v38 = vld [vmem:[#allocation11 + $0x4e0] sm:$0xff]  ;;  %v13377_v40 = vld [vmem:[#allocation11 + $0x4e8] sm:$0xff] }
 0x238   : > { %v801_v54 = vsel %vm737_vm14, %v703_v46, %v769_v51  ;;  %3505 = vmatprep.subr.bf16.mxu0 %v9801_v1  ;;  %v13379_v43 = vld [vmem:[#allocation11 + $0x500] sm:$0xff]  ;;  %v13383_v41 = vld [vmem:[#allocation11 + $0x508] sm:$0xff]  ;;  %v13388_v44 = vrot.slane %v883_v27, %v13244_v52  ;;  %v13391_v46 = vrot.slane %v883_v27, %v13350_v28 }
 0x239   : > { %v802_v60 = vsel %vm738_vm15, %v705_v49, %v770_v57  ;;  %v817_v61 = vpack.c.bf16 %v801_v54, %v799_v58  ;;  %v13381_v45 = vld [vmem:[#allocation11 + $0x520] sm:$0xff]  ;;  %v13385_v42 = vld [vmem:[#allocation11 + $0x528] sm:$0xff]  ;;  %v13405_v57 = vrot.slane %v883_v27, %v13361_v33 }
 0x23a   : > { %v818_v62 = vpack.c.bf16 %v802_v60, %v800_v59  ;;  %3280 = vmatpush1.bf16.msra.mxu1 %v9798_v56  ;;  %3506 = vmatpush1.bf16.msra.mxu0 %v9800_v2  ;;  %v13396_v48 = vld [vmem:[#allocation11 + $0x540] sm:$0xff]  ;;  %v13400_v51 = vld [vmem:[#allocation11 + $0x548] sm:$0xff] }
 0x23b   : > { %3281 = vmatprep.subr.bf16.mxu1 %v9807_v6  ;;  %3507 = vmatprep.subr.bf16.mxu0 %v9809_v10  ;;  %v13398_v49 = vld [vmem:[#allocation11 + $0x560] sm:$0xff]  ;;  %v13402_v56 = vld [vmem:[#allocation11 + $0x568] sm:$0xff] }
 0x23c   : > { %1327 = vmatprep.mubr.bf16.mxu1 %v818_v62  ;;  %1440 = vmatprep.mubr.bf16.mxu0 %v818_v62  ;;  %v13413_v60 = vld [vmem:[#allocation11 + $0x580] sm:$0xff]  ;;  %v13417_v62 = vld [vmem:[#allocation11 + $0x588] sm:$0xff] }
 0x23d   : > { %1328 = vmatmul.mubr.bf16.gmra.mrb[28].mxu1 %v817_v61  ;;  %1441 = vmatmul.mubr.bf16.gmra.mrb[60].mxu0 %v817_v61  ;;  %v13415_v61 = vld [vmem:[#allocation11 + $0x5a0] sm:$0xff]  ;;  %v13419_v55 = vld [vmem:[#allocation11 + $0x5a8] sm:$0xff] }
 0x23e   : > { %3282 = vmatpush1.bf16.msra.mxu1 %v9806_v8  ;;  %3508 = vmatpush1.bf16.msra.mxu0 %v9808_v9  ;;  %v13433_v6 = vld [vmem:[#allocation11 + $0x5c8] sm:$0xff]  ;;  %v13447_v13 = vld [vmem:[#allocation11 + $0x620] sm:$0xff] }
 0x23f   : > { %3283 = vmatprep.subr.bf16.mxu1 %v9815_v14  ;;  %3509 = vmatprep.subr.bf16.mxu0 %v9817_v18  ;;  %15211 = vst [vmem:[#allocation30_spill] sm:$0xff] %v13447_v13  ;;  %v13457_v18 = vld [vmem:[#allocation11 + $0x608] sm:$0xff]  ;;  %v13471_v14 = vld [vmem:[#allocation11 + $0x660] sm:$0xff] }
 0x240   : > { %15212 = vst [vmem:[#allocation31_spill] sm:$0xff] %v13457_v18  ;;  %15215 = vst [vmem:[#allocation34_spill] sm:$0xff] %v13471_v14  ;;  %v13475_v8 = vld [vmem:[#allocation11 + $0x668] sm:$0xff]  ;;  %v13485_v3 = vld [vmem:[#allocation11 + $0x680] sm:$0xff] }
 0x241   : > { %15217 = vst [vmem:[#allocation36_spill] sm:$0xff] %v13475_v8  ;;  %15218 = vst [vmem:[#allocation37_spill] sm:$0xff] %v13485_v3  ;;  %v13489_v1 = vld [vmem:[#allocation11 + $0x688] sm:$0xff]  ;;  %v13501_v15 = vld [vmem:[#allocation11 + $0x6c0] sm:$0xff] }
 0x242   : > { %3284 = vmatpush1.bf16.msra.mxu1 %v9814_v16  ;;  %3510 = vmatpush1.bf16.msra.mxu0 %v9816_v17  ;;  %v13473_v17 = vld [vmem:[#allocation11 + $0x648] sm:$0xff]  ;;  %v13487_v16 = vld [vmem:[#allocation11 + $0x6a0] sm:$0xff]  ;;  %15220 = vst [vmem:[#allocation39_spill] sm:$0xff] %v13489_v1  ;;  %15222 = vst [vmem:[#allocation41_spill] sm:$0xff] %v13501_v15 }
 0x243   : > { %3366 = vmatprep.subr.bf16.mxu1 %v9823_v22  ;;  %3592 = vmatprep.subr.bf16.mxu0 %v9825_v26  ;;  %v13459_v22 = vld [vmem:[#allocation11 + $0x628] sm:$0xff]  ;;  %v13461_v26 = vld [vmem:[#allocation11 + $0x640] sm:$0xff]  ;;  %15216 = vst [vmem:[#allocation35_spill] sm:$0xff] %v13473_v17  ;;  %15219 = vst [vmem:[#allocation38_spill] sm:$0xff] %v13487_v16 }
 0x244   : > { %15213 = vst [vmem:[#allocation32_spill] sm:$0xff] %v13459_v22  ;;  %15214 = vst [vmem:[#allocation33_spill] sm:$0xff] %v13461_v26  ;;  %v13499_v2 = vld [vmem:[#allocation11 + $0x6a8] sm:$0xff]  ;;  %v13503_v59 = vld [vmem:[#allocation11 + $0x6e0] sm:$0xff] }
 0x245   : > { %15221 = vst [vmem:[#allocation40_spill] sm:$0xff] %v13499_v2  ;;  %15223 = vst [vmem:[#allocation42_spill] sm:$0xff] %v13503_v59  ;;  %v13513_v63 = vld [vmem:[#allocation11 + $0x6c8] sm:$0xff]  ;;  %v13517_v54 = vld [vmem:[#allocation11 + $0x700] sm:$0xff] }
 0x246   : > { %15224 = vst [vmem:[#allocation43_spill] sm:$0xff] %v13513_v63  ;;  %v13515_v10 = vld [vmem:[#allocation11 + $0x6e8] sm:$0xff]  ;;  %15226 = vst [vmem:[#allocation45_spill] sm:$0xff] %v13517_v54  ;;  %v13527_v24 = vld [vmem:[#allocation11 + $0x720] sm:$0xff] }
 0x247   : > { %15225 = vst [vmem:[#allocation44_spill] sm:$0xff] %v13515_v10  ;;  %15227 = vst [vmem:[#allocation46_spill] sm:$0xff] %v13527_v24  ;;  %v13529_v27 = vld [vmem:[#allocation11 + $0x708] sm:$0xff]  ;;  %v13541_v53 = vld [vmem:[#allocation11 + $0x740] sm:$0xff] }
 0x248   : > { %15228 = vst [vmem:[#allocation47_spill] sm:$0xff] %v13529_v27  ;;  %v13531_v50 = vld [vmem:[#allocation11 + $0x728] sm:$0xff]  ;;  %15230 = vst [vmem:[#allocation49_spill] sm:$0xff] %v13541_v53  ;;  %v13543_v9 = vld [vmem:[#allocation11 + $0x760] sm:$0xff] }
 0x249   : > { %15229 = vst [vmem:[#allocation48_spill] sm:$0xff] %v13531_v50  ;;  %15231 = vst [vmem:[#allocation50_spill] sm:$0xff] %v13543_v9  ;;  %v13553_v58 = vld [vmem:[#allocation11 + $0x748] sm:$0xff]  ;;  %v13571_v10 = vld [vmem:[#allocation11 + $0x780] sm:$0xff] }
 0x24a   : > { %15232 = vst [vmem:[#allocation51_spill] sm:$0xff] %v13553_v58  ;;  %v13555_v16 = vld [vmem:[#allocation11 + $0x768] sm:$0xff]  ;;  %15234 = vst [vmem:[#allocation53_spill] sm:$0xff] %v13571_v10  ;;  %v13573_v28 = vld [vmem:[#allocation11 + $0x7a0] sm:$0xff] }
 0x24b   : > { %15233 = vst [vmem:[#allocation52_spill] sm:$0xff] %v13555_v16  ;;  %15235 = vst [vmem:[#allocation54_spill] sm:$0xff] %v13573_v28 }
 0x2d8   : > { %v1259_v7 = vpop.f32.mrb[0].mxu1  ;;  %v1372_v3 = vpop.f32.mrb[32].mxu0 }
 0x2d9   : > { %v1260_v25 = vadd.f32 %v1259_v7, %v13388_v44  ;;  %v1373_v59 = vadd.f32 %v1372_v3, %v13391_v46  ;;  %v1261_v15 = vpop.f32.mrb[1].mxu1  ;;  %v1374_v2 = vpop.f32.mrb[33].mxu0 }
 0x2da   : > { %v1262_v52 = vadd.f32 %v1261_v15, %v13394_v47  ;;  %v1375_v33 = vadd.f32 %v1374_v2, %v13405_v57  ;;  %v1263_v63 = vpop.f32.mrb[2].mxu1  ;;  %v1376_v7 = vpop.f32.mrb[34].mxu0 }
 0x2db   : > { %vm1451_vm0 = vcmp.gt.f32.partialorder %v1260_v25, 0.0  ;;  %v1515_v1 = vmul.f32 0.2, %v1260_v25  ;;  %vm1453_vm1 = vcmp.gt.f32.partialorder %v1373_v59, 0.0  ;;  %v1517_v8 = vmul.f32 0.2, %v1373_v59 }
 0x2dc   : > { %vm1452_vm2 = vcmp.gt.f32.partialorder %v1262_v52, 0.0  ;;  %v1516_v50 = vmul.f32 0.2, %v1262_v52  ;;  %vm1454_vm3 = vcmp.gt.f32.partialorder %v1375_v33, 0.0  ;;  %v1518_v15 = vmul.f32 0.2, %v1375_v33 }
 0x2dd   : > { %v1264_v54 = vadd.f32 %v1263_v63, %v13388_v44  ;;  %v1377_v3 = vadd.f32 %v1376_v7, %v13391_v46  ;;  %v1265_v9 = vpop.f32.mrb[3].mxu1  ;;  %v1378_v24 = vpop.f32.mrb[35].mxu0  ;;  %v1579_v53 = vsel %vm1451_vm0, %v1260_v25, %v1515_v1  ;;  %v1581_v17 = vsel %vm1453_vm1, %v1373_v59, %v1517_v8 }
 0x2de   : > { %v1266_v14 = vadd.f32 %v1265_v9, %v13394_v47  ;;  %v1379_v26 = vadd.f32 %v1378_v24, %v13405_v57  ;;  %v1580_v63 = vsel %vm1452_vm2, %v1262_v52, %v1516_v50  ;;  %v1582_v7 = vsel %vm1454_vm3, %v1375_v33, %v1518_v15 }
 0x2df   : > { %vm1455_vm4 = vcmp.gt.f32.partialorder %v1264_v54, 0.0  ;;  %v1519_v22 = vmul.f32 0.2, %v1264_v54  ;;  %vm1457_vm5 = vcmp.gt.f32.partialorder %v1377_v3, 0.0  ;;  %v1521_v27 = vmul.f32 0.2, %v1377_v3 }
 0x2e0   : > { %vm1456_vm6 = vcmp.gt.f32.partialorder %v1266_v14, 0.0  ;;  %v1520_v2 = vmul.f32 0.2, %v1266_v14  ;;  %vm1458_vm7 = vcmp.gt.f32.partialorder %v1379_v26, 0.0  ;;  %v1522_v16 = vmul.f32 0.2, %v1379_v26 }
 0x2e1   : > { %v1583_v58 = vsel %vm1455_vm4, %v1264_v54, %v1519_v22  ;;  %v1585_v10 = vsel %vm1457_vm5, %v1377_v3, %v1521_v27  ;;  %v1269_v25 = vpop.f32.mrb[4].mxu1  ;;  %v1382_v59 = vpop.f32.mrb[36].mxu0  ;;  %v15236_v15 = vcombine.low %v13333_v19, %v13335_v20 }
 0x2e2   : > { %v13591_v1 = vpack.c.bf16 %v1583_v58, %v1579_v53  ;;  %v13593_v8 = vpack.c.bf16 %v1585_v10, %v1581_v17  ;;  %v1584_v24 = vsel %vm1456_vm6, %v1266_v14, %v1520_v2  ;;  %v1586_v9 = vsel %vm1458_vm7, %v1379_v26, %v1522_v16  ;;  %v1271_v28 = vpop.f32.mrb[5].mxu1  ;;  %v1384_v18 = vpop.f32.mrb[37].mxu0 }
 0x2e3   : > { %v13595_v13 = vpack.c.bf16 %v1584_v24, %v1580_v63  ;;  %v13597_v12 = vpack.c.bf16 %v1586_v9, %v1582_v7  ;;  %v1270_v50 = vadd.f32 %v1269_v25, %v13388_v44  ;;  %v1383_v52 = vadd.f32 %v1382_v59, %v13391_v46  ;;  %v1273_v33 = vpop.f32.mrb[6].mxu1  ;;  %v1386_v54 = vpop.f32.mrb[38].mxu0 }
 0x2e4   : > { %v1272_v22 = vadd.f32 %v1271_v28, %v13394_v47  ;;  %v1385_v53 = vadd.f32 %v1384_v18, %v13405_v57  ;;  %v1274_v58 = vadd.f32 %v1273_v33, %v13388_v44  ;;  %v1387_v10 = vadd.f32 %v1386_v54, %v13391_v46  ;;  %v1275_v14 = vpop.f32.mrb[7].mxu1  ;;  %v1388_v16 = vpop.f32.mrb[39].mxu0 }
 0x2e5   : > { %vm1459_vm8 = vcmp.gt.f32.partialorder %v1270_v50, 0.0  ;;  %v1523_v17 = vmul.f32 0.2, %v1270_v50  ;;  %vm1461_vm9 = vcmp.gt.f32.partialorder %v1383_v52, 0.0  ;;  %v1525_v26 = vmul.f32 0.2, %v1383_v52  ;;  %3285 = vmatprep.mubr.bf16.mxu1 %v13595_v13  ;;  %3511 = vmatprep.mubr.bf16.mxu0 %v13595_v13 }
 0x2e6   : > { %vm1460_vm10 = vcmp.gt.f32.partialorder %v1272_v22, 0.0  ;;  %v1524_v27 = vmul.f32 0.2, %v1272_v22  ;;  %vm1462_vm11 = vcmp.gt.f32.partialorder %v1385_v53, 0.0  ;;  %v1526_v28 = vmul.f32 0.2, %v1385_v53  ;;  %3286 = vmatmul.mubr.bf16.vlgmr.msra.gmra.mrb[32].mxu1 %v13591_v1  ;;  %3512 = vmatmul.mubr.bf16.vlgmr.msra.gmra.mrb[64].mxu0 %v13591_v1 }
 0x2e7   : > { %v1587_v18 = vsel %vm1459_vm8, %v1270_v50, %v1523_v17  ;;  %v1589_v3 = vsel %vm1461_vm9, %v1383_v52, %v1525_v26  ;;  %vm1463_vm12 = vcmp.gt.f32.partialorder %v1274_v58, 0.0  ;;  %v1527_v2 = vmul.f32 0.2, %v1274_v58  ;;  %3367 = vmatpush1.bf16.msra.mxu1 %v15236_v15 }
 0x2e8   : > { %v15237_v63 = vcombine.low %v13337_v21, %v13341_v23  ;;  %v1588_v7 = vsel %vm1460_vm10, %v1272_v22, %v1524_v27  ;;  %v1590_v25 = vsel %vm1462_vm11, %v1385_v53, %v1526_v28  ;;  %vm1465_vm13 = vcmp.gt.f32.partialorder %v1387_v10, 0.0  ;;  %v1279_v9 = vpop.f32.mrb[8].mxu1  ;;  %v1392_v50 = vpop.f32.mrb[40].mxu0 }
 0x2e9   : > { %v1529_v59 = vmul.f32 0.2, %v1387_v10  ;;  %v15238_v24 = vcombine.high %v13352_v29, %v13354_v30  ;;  %v15239_v52 = vcombine.high %v13356_v31, %v13358_v32  ;;  %v1591_v19 = vsel %vm1463_vm12, %v1274_v58, %v1527_v2  ;;  %v1281_v33 = vpop.f32.mrb[9].mxu1  ;;  %v1394_v54 = vpop.f32.mrb[41].mxu0 }
 0x2ea   : > { %3593 = vmatpush1.bf16.msra.mxu0 %v15237_v63  ;;  %v1276_v20 = vadd.f32 %v1275_v14, %v13394_v47  ;;  %v1389_v21 = vadd.f32 %v1388_v16, %v13405_v57  ;;  %v1280_v23 = vadd.f32 %v1279_v9, %v13388_v44  ;;  %v13624_v22 = vpack.c.bf16 %v1591_v19, %v1587_v18  ;;  %v1283_v27 = vpop.f32.mrb[10].mxu1  ;;  %v1396_v28 = vpop.f32.mrb[42].mxu0 }
 0x2eb   : > { %3368 = vmatprep.subr.bf16.mxu1 %v15238_v24  ;;  %3594 = vmatprep.subr.bf16.mxu0 %v15239_v52  ;;  %v1593_v53 = vsel %vm1465_vm13, %v1387_v10, %v1529_v59  ;;  %v1393_v17 = vadd.f32 %v1392_v50, %v13391_v46  ;;  %v1282_v26 = vadd.f32 %v1281_v33, %v13394_v47  ;;  %v1285_v10 = vpop.f32.mrb[11].mxu1  ;;  %v1398_v18 = vpop.f32.mrb[43].mxu0 }
 0x2ec   : > { %v13628_v15 = vpack.c.bf16 %v1593_v53, %v1589_v3  ;;  %vm1464_vm14 = vcmp.gt.f32.partialorder %v1276_v20, 0.0  ;;  %v1528_v58 = vmul.f32 0.2, %v1276_v20  ;;  %vm1466_vm15 = vcmp.gt.f32.partialorder %v1389_v21, 0.0 }
 0x2ed   : > { %v15240_v14 = vcombine.low %v13352_v29, %v13354_v30  ;;  %v15241_v16 = vcombine.low %v13356_v31, %v13358_v32  ;;  %v1530_v2 = vmul.f32 0.2, %v1389_v21  ;;  %vm1467_vm0 = vcmp.gt.f32.partialorder %v1280_v23, 0.0 }
 0x2ee   : > { %v1531_v63 = vmul.f32 0.2, %v1280_v23  ;;  %vm1469_vm1 = vcmp.gt.f32.partialorder %v1393_v17, 0.0  ;;  %v15242_v3 = vcombine.high %v13363_v34, %v13365_v35  ;;  %v15243_v59 = vcombine.high %v13367_v36, %v13369_v37 }
 0x2ef   : > { %3369 = vmatpush1.bf16.msra.mxu1 %v15240_v14  ;;  %3595 = vmatpush1.bf16.msra.mxu0 %v15241_v16  ;;  %v1592_v29 = vsel %vm1464_vm14, %v1276_v20, %v1528_v58  ;;  %v1533_v30 = vmul.f32 0.2, %v1393_v17  ;;  %vm1468_vm2 = vcmp.gt.f32.partialorder %v1282_v26, 0.0  ;;  %v1532_v24 = vmul.f32 0.2, %v1282_v26 }
 0x2f0   : > { %3370 = vmatprep.subr.bf16.mxu1 %v15242_v3  ;;  %3596 = vmatprep.subr.bf16.mxu0 %v15243_v59  ;;  %v13642_v31 = vpack.c.bf16 %v1592_v29, %v1588_v7  ;;  %v1594_v32 = vsel %vm1466_vm15, %v1389_v21, %v1530_v2  ;;  %v1595_v9 = vsel %vm1467_vm0, %v1280_v23, %v1531_v63  ;;  %v1402_v21 = vpop.f32.mrb[44].mxu0 }
 0x2f1   : > { %v1395_v50 = vadd.f32 %v1394_v54, %v13405_v57  ;;  %v13646_v52 = vpack.c.bf16 %v1594_v32, %v1590_v25  ;;  %v1597_v19 = vsel %vm1469_vm1, %v1393_v17, %v1533_v30  ;;  %v1596_v33 = vsel %vm1468_vm2, %v1282_v26, %v1532_v24  ;;  %v1289_v25 = vpop.f32.mrb[12].mxu1  ;;  %v1404_v17 = vpop.f32.mrb[45].mxu0 }
 0x2f2   : > { %v1284_v53 = vadd.f32 %v1283_v27, %v13388_v44  ;;  %v15244_v14 = vcombine.low %v13363_v34, %v13365_v35  ;;  %v1397_v7 = vadd.f32 %v1396_v28, %v13391_v46  ;;  %v1286_v58 = vadd.f32 %v1285_v10, %v13394_v47  ;;  %3295 = vmatprep.mubr.bf16.mxu1 %v13642_v31  ;;  %v1291_v35 = vpop.f32.mrb[13].mxu1 }
 0x2f3   : > { %vm1470_vm3 = vcmp.gt.f32.partialorder %v1395_v50, 0.0  ;;  %v1534_v20 = vmul.f32 0.2, %v1395_v50  ;;  %3521 = vmatprep.mubr.bf16.mxu0 %v13642_v31  ;;  %v1399_v54 = vadd.f32 %v1398_v18, %v13405_v57  ;;  %3296 = vmatmul.mubr.bf16.gmra.mrb[36].mxu1 %v13624_v22  ;;  %v1290_v34 = vadd.f32 %v1289_v25, %v13388_v44  ;;  %v1293_v10 = vpop.f32.mrb[14].mxu1  ;;  %v1406_v18 = vpop.f32.mrb[46].mxu0 }
 0x2f4   : > { %3371 = vmatpush1.bf16.msra.mxu1 %v15244_v14  ;;  %vm1471_vm4 = vcmp.gt.f32.partialorder %v1284_v53, 0.0  ;;  %v1535_v23 = vmul.f32 0.2, %v1284_v53  ;;  %3522 = vmatmul.mubr.bf16.gmra.mrb[68].mxu0 %v13624_v22  ;;  %vm1473_vm5 = vcmp.gt.f32.partialorder %v1397_v7, 0.0  ;;  %v1537_v27 = vmul.f32 0.2, %v1397_v7 }
 0x2f5   : > { %v1598_v26 = vsel %vm1470_vm3, %v1395_v50, %v1534_v20  ;;  %vm1472_vm6 = vcmp.gt.f32.partialorder %v1286_v58, 0.0  ;;  %v15245_v28 = vcombine.low %v13367_v36, %v13369_v37  ;;  %v15246_v16 = vcombine.high %v13371_v0, %v13373_v38  ;;  %v1295_v36 = vpop.f32.mrb[15].mxu1  ;;  %v1408_v32 = vpop.f32.mrb[47].mxu0 }
 0x2f6   : > { %v1599_v2 = vsel %vm1471_vm4, %v1284_v53, %v1535_v23  ;;  %v1536_v63 = vmul.f32 0.2, %v1286_v58  ;;  %vm1474_vm7 = vcmp.gt.f32.partialorder %v1399_v54, 0.0  ;;  %v1538_v3 = vmul.f32 0.2, %v1399_v54 }
 0x2f7   : > { %3597 = vmatpush1.bf16.msra.mxu0 %v15245_v28  ;;  %3372 = vmatprep.subr.bf16.mxu1 %v15246_v16  ;;  %v15247_v59 = vcombine.low %v13371_v0, %v13373_v38  ;;  %v15248_v29 = vcombine.high %v13375_v39, %v13377_v40  ;;  %v13674_v37 = vpack.c.bf16 %v1599_v2, %v1595_v9  ;;  %vm1475_vm8 = vcmp.gt.f32.partialorder %v1290_v34, 0.0 }
 0x2f8   : > { %v1601_v30 = vsel %vm1473_vm5, %v1397_v7, %v1537_v27  ;;  %v1539_v24 = vmul.f32 0.2, %v1290_v34  ;;  %v15249_v50 = vcombine.high %v13379_v43, %v13381_v45  ;;  %v1600_v0 = vsel %vm1472_vm6, %v1286_v58, %v1536_v63 }
 0x2f9   : > { %3373 = vmatpush1.bf16.msra.mxu1 %v15247_v59  ;;  %3598 = vmatprep.subr.bf16.mxu0 %v15248_v29  ;;  %v13679_v53 = vpack.c.bf16 %v1601_v30, %v1597_v19  ;;  %v1602_v38 = vsel %vm1474_vm7, %v1399_v54, %v1538_v3  ;;  %v1403_v14 = vadd.f32 %v1402_v21, %v13391_v46 }
 0x2fa   : > { %3374 = vmatprep.subr.bf16.mxu1 %v15249_v50  ;;  %v13683_v20 = vpack.c.bf16 %v1600_v0, %v1596_v33  ;;  %v13685_v25 = vpack.c.bf16 %v1602_v38, %v1598_v26  ;;  %v1603_v9 = vsel %vm1475_vm8, %v1290_v34, %v1539_v24  ;;  %v1292_v7 = vadd.f32 %v1291_v35, %v13394_v47  ;;  %v1412_v35 = vpop.f32.mrb[48].mxu0 }
 0x2fb   : > { %v15250_v23 = vcombine.low %v13375_v39, %v13377_v40  ;;  %vm1477_vm9 = vcmp.gt.f32.partialorder %v1403_v14, 0.0  ;;  %v1541_v27 = vmul.f32 0.2, %v1403_v14  ;;  %v1405_v19 = vadd.f32 %v1404_v17, %v13405_v57  ;;  %v1299_v40 = vpop.f32.mrb[16].mxu1  ;;  %v1414_v26 = vpop.f32.mrb[49].mxu0 }
 0x2fc   : > { %v1294_v58 = vadd.f32 %v1293_v10, %v13388_v44  ;;  %v15251_v21 = vcombine.low %v13379_v43, %v13381_v45  ;;  %v15252_v33 = vcombine.high %v13383_v41, %v13385_v42  ;;  %vm1476_vm10 = vcmp.gt.f32.partialorder %v1292_v7, 0.0  ;;  %3305 = vmatprep.mubr.bf16.mxu1 %v13683_v20  ;;  %3531 = vmatprep.mubr.bf16.mxu0 %v13683_v20  ;;  %v1301_v45 = vpop.f32.mrb[17].mxu1 }
 0x2fd   : > { %3599 = vmatpush1.bf16.msra.mxu0 %v15250_v23  ;;  %v1540_v54 = vmul.f32 0.2, %v1292_v7  ;;  %v1407_v34 = vadd.f32 %v1406_v18, %v13391_v46  ;;  %v1296_v39 = vadd.f32 %v1295_v36, %v13394_v47  ;;  %v1605_v17 = vsel %vm1477_vm9, %v1403_v14, %v1541_v27  ;;  %3306 = vmatmul.mubr.bf16.gmra.mrb[40].mxu1 %v13674_v37  ;;  %v1303_v63 = vpop.f32.mrb[18].mxu1 }
 0x2fe   : > { %3375 = vmatpush1.bf16.msra.mxu1 %v15251_v21  ;;  %3600 = vmatprep.subr.bf16.mxu0 %v15252_v33  ;;  %vm1478_vm11 = vcmp.gt.f32.partialorder %v1405_v19, 0.0  ;;  %v1542_v43 = vmul.f32 0.2, %v1405_v19  ;;  %vm1479_vm12 = vcmp.gt.f32.partialorder %v1294_v58, 0.0  ;;  %v1543_v16 = vmul.f32 0.2, %v1294_v58 }
 0x2ff   : > { %3532 = vmatmul.mubr.bf16.gmra.mrb[72].mxu0 %v13674_v37  ;;  %v1604_v28 = vsel %vm1476_vm10, %v1292_v7, %v1540_v54  ;;  %vm1481_vm13 = vcmp.gt.f32.partialorder %v1407_v34, 0.0  ;;  %v1545_v10 = vmul.f32 0.2, %v1407_v34  ;;  %v15253_v18 = vcombine.low %v13383_v41, %v13385_v42  ;;  %v1416_v41 = vpop.f32.mrb[50].mxu0  ;;  %v1305_v42 = vpop.f32.mrb[19].mxu1 }
 0x300   : > { %v15254_v2 = vcombine.high %v13396_v48, %v13398_v49  ;;  %v1606_v3 = vsel %vm1478_vm11, %v1405_v19, %v1542_v43  ;;  %vm1480_vm14 = vcmp.gt.f32.partialorder %v1296_v39, 0.0  ;;  %v1544_v59 = vmul.f32 0.2, %v1296_v39  ;;  %v1418_v14 = vpop.f32.mrb[51].mxu0 }
 0x301   : > { %3601 = vmatpush1.bf16.msra.mxu0 %v15253_v18  ;;  %v1409_v29 = vadd.f32 %v1408_v32, %v13405_v57  ;;  %v15255_v36 = vcombine.low %v13396_v48, %v13398_v49  ;;  %v15256_v30 = vcombine.high %v13400_v51, %v13402_v56  ;;  %v1607_v24 = vsel %vm1479_vm12, %v1294_v58, %v1543_v16 }
 0x302   : > { %3376 = vmatprep.subr.bf16.mxu1 %v15254_v2  ;;  %v1609_v50 = vsel %vm1481_vm13, %v1407_v34, %v1545_v10  ;;  %v1300_v0 = vadd.f32 %v1299_v40, %v13388_v44  ;;  %v1413_v38 = vadd.f32 %v1412_v35, %v13391_v46  ;;  %v15257_v32 = vcombine.high %v13413_v60, %v13415_v61 }
 0x303   : > { %3377 = vmatpush1.bf16.msra.mxu1 %v15255_v36  ;;  %3602 = vmatprep.subr.bf16.mxu0 %v15256_v30  ;;  %v13725_v48 = vpack.c.bf16 %v1607_v24, %v1603_v9  ;;  %v13727_v49 = vpack.c.bf16 %v1609_v50, %v1605_v17  ;;  %v1608_v7 = vsel %vm1480_vm14, %v1296_v39, %v1544_v59  ;;  %vm1482_vm15 = vcmp.gt.f32.partialorder %v1409_v29, 0.0  ;;  %v1422_v17 = vpop.f32.mrb[52].mxu0 }
 0x304   : > { %3378 = vmatprep.subr.bf16.mxu1 %v15257_v32  ;;  %v13729_v23 = vpack.c.bf16 %v1608_v7, %v1604_v28  ;;  %v1546_v27 = vmul.f32 0.2, %v1409_v29  ;;  %vm1483_vm0 = vcmp.gt.f32.partialorder %v1300_v0, 0.0  ;;  %v1547_v19 = vmul.f32 0.2, %v1300_v0  ;;  %v15266_v32 = vld [vmem:[#allocation30_spill] sm:$0xff] }
 0x305   : > { %v15258_v58 = vcombine.low %v13400_v51, %v13402_v56  ;;  %vm1485_vm1 = vcmp.gt.f32.partialorder %v1413_v38, 0.0  ;;  %v1549_v21 = vmul.f32 0.2, %v1413_v38  ;;  %v1302_v33 = vadd.f32 %v1301_v45, %v13394_v47  ;;  %v1309_v56 = vpop.f32.mrb[20].mxu1 }
 0x306   : > { %v1415_v9 = vadd.f32 %v1414_v26, %v13405_v57  ;;  %v15259_v54 = vcombine.low %v13413_v60, %v13415_v61  ;;  %v15260_v34 = vcombine.high %v13417_v62, %v13419_v55  ;;  %v1610_v39 = vsel %vm1482_vm15, %v1409_v29, %v1546_v27  ;;  %3315 = vmatprep.mubr.bf16.mxu1 %v13729_v23  ;;  %v1311_v61 = vpop.f32.mrb[21].mxu1  ;;  %v1424_v26 = vpop.f32.mrb[53].mxu0 }
 0x307   : > { %3603 = vmatpush1.bf16.msra.mxu0 %v15258_v58  ;;  %v1611_v40 = vsel %vm1483_vm0, %v1300_v0, %v1547_v19  ;;  %v1304_v35 = vadd.f32 %v1303_v63, %v13388_v44  ;;  %v1417_v51 = vadd.f32 %v1416_v41, %v13391_v46  ;;  %v13745_v43 = vpack.c.bf16 %v1610_v39, %v1606_v3  ;;  %v1313_v29 = vpop.f32.mrb[22].mxu1  ;;  %v1426_v36 = vpop.f32.mrb[54].mxu0 }
 0x308   : > { %3379 = vmatpush1.bf16.msra.mxu1 %v15259_v54  ;;  %3604 = vmatprep.subr.bf16.mxu0 %v15260_v34  ;;  %v1613_v45 = vsel %vm1485_vm1, %v1413_v38, %v1549_v21  ;;  %vm1484_vm2 = vcmp.gt.f32.partialorder %v1302_v33, 0.0  ;;  %v1548_v60 = vmul.f32 0.2, %v1302_v33  ;;  %vm1486_vm3 = vcmp.gt.f32.partialorder %v1415_v9, 0.0  ;;  %v1428_v38 = vpop.f32.mrb[55].mxu0 }
 0x309   : > { %3541 = vmatprep.mubr.bf16.mxu0 %v13729_v23  ;;  %3316 = vmatmul.mubr.bf16.gmra.mrb[44].mxu1 %v13725_v48  ;;  %v1550_v28 = vmul.f32 0.2, %v1415_v9  ;;  %vm1487_vm4 = vcmp.gt.f32.partialorder %v1304_v35, 0.0  ;;  %v1551_v16 = vmul.f32 0.2, %v1304_v35  ;;  %v15261_v10 = vcombine.high %v13429_v4, %v13431_v5 }
 0x30a   : > { %3542 = vmatmul.mubr.bf16.gmra.mrb[76].mxu0 %v13725_v48  ;;  %v1612_v18 = vsel %vm1484_vm2, %v1302_v33, %v1548_v60  ;;  %vm1489_vm5 = vcmp.gt.f32.partialorder %v1417_v51, 0.0  ;;  %v1553_v2 = vmul.f32 0.2, %v1417_v51  ;;  %v1306_v63 = vadd.f32 %v1305_v42, %v13394_v47  ;;  %v1315_v42 = vpop.f32.mrb[23].mxu1  ;;  %v1432_v60 = vpop.f32.mrb[56].mxu0 }
 0x30b   : > { %3380 = vmatprep.subr.bf16.mxu1 %v15261_v10  ;;  %v15262_v3 = vcombine.low %v13417_v62, %v13419_v55  ;;  %v15263_v59 = vcombine.low %v13429_v4, %v13431_v5  ;;  %v1614_v30 = vsel %vm1486_vm3, %v1415_v9, %v1550_v28  ;;  %v1615_v41 = vsel %vm1487_vm4, %v1304_v35, %v1551_v16  ;;  %v15265_v5 = vld [vmem:[#allocation29_spill] sm:$0xff]  ;;  %v15274_v28 = vld [vmem:[#allocation34_spill] sm:$0xff] }
 0x30c   : > { %v1419_v24 = vadd.f32 %v1418_v14, %v13405_v57  ;;  %v1310_v50 = vadd.f32 %v1309_v56, %v13388_v44  ;;  %v15264_v0 = vcombine.high %v13433_v6, %v13443_v11  ;;  %v13765_v62 = vpack.c.bf16 %v1615_v41, %v1611_v40  ;;  %v15271_v56 = vld [vmem:[#allocation32_spill] sm:$0xff] }
 0x30d   : > { %3605 = vmatpush1.bf16.msra.mxu0 %v15262_v3  ;;  %3381 = vmatpush1.bf16.msra.mxu1 %v15263_v59  ;;  %v1617_v55 = vsel %vm1489_vm5, %v1417_v51, %v1553_v2  ;;  %vm1488_vm6 = vcmp.gt.f32.partialorder %v1306_v63, 0.0  ;;  %v1552_v4 = vmul.f32 0.2, %v1306_v63  ;;  %v15267_v7 = vcombine.high %v15265_v5, %v15266_v32  ;;  %v15270_v51 = vld [vmem:[#allocation31_spill] sm:$0xff]  ;;  %v15276_v2 = vld [vmem:[#allocation54_spill] sm:$0xff] }
 0x30e   : > { %3606 = vmatprep.subr.bf16.mxu0 %v15264_v0  ;;  %v13770_v27 = vpack.c.bf16 %v1617_v55, %v1613_v45  ;;  %vm1490_vm7 = vcmp.gt.f32.partialorder %v1419_v24, 0.0  ;;  %v1554_v14 = vmul.f32 0.2, %v1419_v24  ;;  %vm1491_vm8 = vcmp.gt.f32.partialorder %v1310_v50, 0.0  ;;  %v1319_v45 = vpop.f32.mrb[24].mxu1 }
 0x30f   : > { %3382 = vmatprep.subr.bf16.mxu1 %v15267_v7  ;;  %v1616_v19 = vsel %vm1488_vm6, %v1306_v63, %v1552_v4  ;;  %v1555_v58 = vmul.f32 0.2, %v1310_v50  ;;  %v1423_v21 = vadd.f32 %v1422_v17, %v13391_v46  ;;  %v1312_v33 = vadd.f32 %v1311_v61, %v13394_v47  ;;  %v1321_v10 = vpop.f32.mrb[25].mxu1 }
 0x310   : > { %v15268_v9 = vcombine.low %v13433_v6, %v13443_v11  ;;  %v15269_v54 = vcombine.low %v15265_v5, %v15266_v32  ;;  %v13780_v34 = vpack.c.bf16 %v1616_v19, %v1612_v18  ;;  %v1618_v39 = vsel %vm1490_vm7, %v1419_v24, %v1554_v14  ;;  %v15273_v11 = vld [vmem:[#allocation33_spill] sm:$0xff]  ;;  %v1434_v18 = vpop.f32.mrb[57].mxu0  ;;  %v1323_v24 = vpop.f32.mrb[26].mxu1 }
 0x311   : > { %v1425_v40 = vadd.f32 %v1424_v26, %v13405_v57  ;;  %v1314_v35 = vadd.f32 %v1313_v29, %v13388_v44  ;;  %v15272_v17 = vcombine.high %v15270_v51, %v15271_v56  ;;  %v13787_v61 = vpack.c.bf16 %v1618_v39, %v1614_v30  ;;  %v15277_v26 = vld [vmem:[#allocation53_spill] sm:$0xff]  ;;  %v1436_v0 = vpop.f32.mrb[58].mxu0  ;;  %v1325_v7 = vpop.f32.mrb[27].mxu1 }
 0x312   : > { %3607 = vmatpush1.bf16.msra.mxu0 %v15268_v9  ;;  %3383 = vmatpush1.bf16.msra.mxu1 %v15269_v54  ;;  %vm1493_vm9 = vcmp.gt.f32.partialorder %v1423_v21, 0.0  ;;  %v1557_v6 = vmul.f32 0.2, %v1423_v21  ;;  %v15275_v16 = vcombine.high %v15273_v11, %v15274_v28  ;;  %v1619_v3 = vsel %vm1491_vm8, %v1310_v50, %v1555_v58  ;;  %v1438_v14 = vpop.f32.mrb[59].mxu0  ;;  %v15284_v39 = vld [vmem:[#allocation37_spill] sm:$0xff] }
 0x313   : > { %3608 = vmatprep.subr.bf16.mxu0 %v15272_v17  ;;  %vm1492_vm10 = vcmp.gt.f32.partialorder %v1312_v33, 0.0  ;;  %v1556_v59 = vmul.f32 0.2, %v1312_v33  ;;  %v1558_v29 = vmul.f32 0.2, %v1425_v40  ;;  %3325 = vmatprep.mubr.bf16.mxu1 %v13780_v34  ;;  %vm1494_vm11 = vcmp.gt.f32.partialorder %v1425_v40, 0.0 }
 0x314   : > { %3384 = vmatprep.subr.bf16.mxu1 %v15275_v16  ;;  %3551 = vmatprep.mubr.bf16.mxu0 %v13780_v34  ;;  %vm1495_vm12 = vcmp.gt.f32.partialorder %v1314_v35, 0.0  ;;  %v1559_v30 = vmul.f32 0.2, %v1314_v35  ;;  %v1427_v41 = vadd.f32 %v1426_v36, %v13391_v46  ;;  %v1621_v50 = vsel %vm1493_vm9, %v1423_v21, %v1557_v6  ;;  %v15280_v21 = vld [vmem:[#allocation35_spill] sm:$0xff] }
 0x315   : > { %3326 = vmatmul.mubr.bf16.gmra.mrb[48].mxu1 %v13765_v62  ;;  %3552 = vmatmul.mubr.bf16.gmra.mrb[80].mxu0 %v13765_v62  ;;  %v1620_v55 = vsel %vm1492_vm10, %v1312_v33, %v1556_v59  ;;  %v1316_v4 = vadd.f32 %v1315_v42, %v13394_v47  ;;  %v1429_v5 = vadd.f32 %v1428_v38, %v13405_v57  ;;  %v15281_v33 = vld [vmem:[#allocation36_spill] sm:$0xff]  ;;  %v1329_v59 = vpop.f32.mrb[28].mxu1 }
 0x316   : > { %v15278_v32 = vcombine.low %v15270_v51, %v15271_v56  ;;  %v1623_v36 = vsel %vm1495_vm12, %v1314_v35, %v1559_v30  ;;  %vm1497_vm13 = vcmp.gt.f32.partialorder %v1427_v41, 0.0  ;;  %v1561_v19 = vmul.f32 0.2, %v1427_v41  ;;  %v15285_v51 = vld [vmem:[#allocation38_spill] sm:$0xff]  ;;  %v1442_v30 = vpop.f32.mrb[60].mxu0 }
 0x317   : > { %v1320_v58 = vadd.f32 %v1319_v45, %v13388_v44  ;;  %v15279_v9 = vcombine.low %v15273_v11, %v15274_v28  ;;  %v15282_v42 = vcombine.high %v15280_v21, %v15281_v33  ;;  %v13813_v38 = vpack.c.bf16 %v1623_v36, %v1619_v3 }
 0x318   : > { %3609 = vmatpush1.bf16.msra.mxu0 %v15278_v32  ;;  %vm1496_vm14 = vcmp.gt.f32.partialorder %v1316_v4, 0.0  ;;  %v1560_v54 = vmul.f32 0.2, %v1316_v4  ;;  %vm1498_vm15 = vcmp.gt.f32.partialorder %v1429_v5, 0.0  ;;  %v15286_v35 = vcombine.high %v15284_v39, %v15285_v51 }
 0x319   : > { %3385 = vmatpush1.bf16.msra.mxu1 %v15279_v9  ;;  %3610 = vmatprep.subr.bf16.mxu0 %v15282_v42  ;;  %15283 = vst [vmem:[#allocation29_spill] sm:$0xff] %v13813_v38  ;;  %v1625_v56 = vsel %vm1497_vm13, %v1427_v41, %v1561_v19  ;;  %v1562_v17 = vmul.f32 0.2, %v1429_v5  ;;  %vm1499_vm0 = vcmp.gt.f32.partialorder %v1320_v58, 0.0  ;;  %v1563_v45 = vmul.f32 0.2, %v1320_v58 }
 0x31a   : > { %3386 = vmatprep.subr.bf16.mxu1 %v15286_v35  ;;  %v13818_v6 = vpack.c.bf16 %v1625_v56, %v1621_v50  ;;  %v1624_v11 = vsel %vm1496_vm14, %v1316_v4, %v1560_v54  ;;  %v1433_v28 = vadd.f32 %v1432_v60, %v13391_v46  ;;  %v1322_v16 = vadd.f32 %v1321_v10, %v13394_v47  ;;  %v1331_v60 = vpop.f32.mrb[29].mxu1  ;;  %v1444_v4 = vpop.f32.mrb[61].mxu0 }
 0x31b   : > { %v15287_v3 = vcombine.low %v15280_v21, %v15281_v33  ;;  %v1622_v32 = vsel %vm1494_vm11, %v1425_v40, %v1558_v29  ;;  %v13826_v36 = vpack.c.bf16 %v1624_v11, %v1620_v55  ;;  %v1626_v41 = vsel %vm1498_vm15, %v1429_v5, %v1562_v17  ;;  %v15289_v21 = vld [vmem:[#allocation39_spill] sm:$0xff]  ;;  %v15290_v33 = vld [vmem:[#allocation40_spill] sm:$0xff]  ;;  %v15292_v40 = vld [vmem:[#allocation41_spill] sm:$0xff]  ;;  %v1446_v5 = vpop.f32.mrb[62].mxu0 }
 0x31c   : > { %v1435_v19 = vadd.f32 %v1434_v18, %v13405_v57  ;;  %v15288_v50 = vcombine.low %v15284_v39, %v15285_v51  ;;  %v13832_v10 = vpack.c.bf16 %v1626_v41, %v1622_v32  ;;  %vm1501_vm1 = vcmp.gt.f32.partialorder %v1433_v28, 0.0  ;;  %v15293_v29 = vld [vmem:[#allocation42_spill] sm:$0xff]  ;;  %v1333_v18 = vpop.f32.mrb[30].mxu1  ;;  %v1448_v32 = vpop.f32.mrb[63].mxu0 }
 0x31d   : > { %3611 = vmatpush1.bf16.msra.mxu0 %v15287_v3  ;;  %v1565_v9 = vmul.f32 0.2, %v1433_v28  ;;  %vm1500_vm2 = vcmp.gt.f32.partialorder %v1322_v16, 0.0  ;;  %v15291_v42 = vcombine.high %v15289_v21, %v15290_v33  ;;  %v15294_v55 = vcombine.high %v15292_v40, %v15293_v29  ;;  %3335 = vmatprep.mubr.bf16.mxu1 %v13826_v36  ;;  %v1335_v35 = vpop.f32.mrb[31].mxu1 }
 0x31e   : > { %3387 = vmatpush1.bf16.msra.mxu1 %v15288_v50  ;;  %v1627_v54 = vsel %vm1499_vm0, %v1320_v58, %v1563_v45  ;;  %v1564_v39 = vmul.f32 0.2, %v1322_v16  ;;  %vm1502_vm3 = vcmp.gt.f32.partialorder %v1435_v19, 0.0  ;;  %v1324_v51 = vadd.f32 %v1323_v24, %v13388_v44  ;;  %3561 = vmatprep.mubr.bf16.mxu0 %v13826_v36  ;;  %v15297_v50 = vld [vmem:[#allocation45_spill] sm:$0xff] }
 0x31f   : > { %3612 = vmatprep.subr.bf16.mxu0 %v15291_v42  ;;  %3388 = vmatprep.subr.bf16.mxu1 %v15294_v55  ;;  %v1566_v56 = vmul.f32 0.2, %v1435_v19  ;;  %v1437_v17 = vadd.f32 %v1436_v0, %v13391_v46  ;;  %v1326_v11 = vadd.f32 %v1325_v7, %v13394_v47  ;;  %v1439_v3 = vadd.f32 %v1438_v14, %v13405_v57 }
 0x320   : > { %3336 = vmatmul.mubr.bf16.gmra.mrb[52].mxu1 %v13813_v38  ;;  %v1629_v58 = vsel %vm1501_vm1, %v1433_v28, %v1565_v9  ;;  %v1628_v45 = vsel %vm1500_vm2, %v1322_v16, %v1564_v39  ;;  %vm1503_vm4 = vcmp.gt.f32.partialorder %v1324_v51, 0.0  ;;  %v1567_v24 = vmul.f32 0.2, %v1324_v51  ;;  %3562 = vmatmul.mubr.bf16.gmra.mrb[84].mxu0 %v13813_v38  ;;  %v15298_v28 = vld [vmem:[#allocation46_spill] sm:$0xff]  ;;  %v15300_v39 = vld [vmem:[#allocation43_spill] sm:$0xff] }
 0x321   : > { %v15295_v41 = vcombine.low %v15292_v40, %v15293_v29  ;;  %vm1505_vm5 = vcmp.gt.f32.partialorder %v1437_v17, 0.0  ;;  %v1569_v0 = vmul.f32 0.2, %v1437_v17  ;;  %vm1504_vm6 = vcmp.gt.f32.partialorder %v1326_v11, 0.0  ;;  %v15301_v40 = vld [vmem:[#allocation44_spill] sm:$0xff] }
 0x322   : > { %v1568_v7 = vmul.f32 0.2, %v1326_v11  ;;  %v15296_v14 = vcombine.low %v15289_v21, %v15290_v33  ;;  %v15299_v9 = vcombine.high %v15297_v50, %v15298_v28  ;;  %v1631_v16 = vsel %vm1503_vm4, %v1324_v51, %v1567_v24  ;;  %v13875_v24 = vld [vmem:[#allocation11 + $0x7c0] sm:$0xff] }
 0x323   : > { %3389 = vmatpush1.bf16.msra.mxu1 %v15295_v41  ;;  %vm1506_vm7 = vcmp.gt.f32.partialorder %v1439_v3, 0.0  ;;  %v1570_v42 = vmul.f32 0.2, %v1439_v3  ;;  %v1330_v55 = vadd.f32 %v1329_v59, %v13388_v44  ;;  %v15302_v29 = vcombine.high %v15300_v39, %v15301_v40 }
 0x324   : > { %3613 = vmatpush1.bf16.msra.mxu0 %v15296_v14  ;;  %3390 = vmatprep.subr.bf16.mxu1 %v15299_v9  ;;  %v13864_v41 = vpack.c.bf16 %v1631_v16, %v1627_v54  ;;  %v1633_v63 = vsel %vm1505_vm5, %v1437_v17, %v1569_v0  ;;  %v1632_v38 = vsel %vm1504_vm6, %v1326_v11, %v1568_v7 }
 0x325   : > { %3614 = vmatprep.subr.bf16.mxu0 %v15302_v29  ;;  %v1443_v21 = vadd.f32 %v1442_v30, %v13391_v46  ;;  %v1630_v33 = vsel %vm1502_vm3, %v1435_v19, %v1566_v56  ;;  %v13868_v14 = vpack.c.bf16 %v1633_v63, %v1629_v58  ;;  %v13870_v9 = vpack.c.bf16 %v1632_v38, %v1628_v45  ;;  %v13877_v29 = vld [vmem:[#allocation11 + $0x7e0] sm:$0xff]  ;;  %v15305_v38 = vld [vmem:[#allocation49_spill] sm:$0xff] }
 0x326   : > { %v1634_v51 = vsel %vm1506_vm7, %v1439_v3, %v1570_v42  ;;  %v15303_v59 = vcombine.low %v15297_v50, %v15298_v28  ;;  %vm1507_vm8 = vcmp.gt.f32.partialorder %v1330_v55, 0.0  ;;  %v1571_v17 = vmul.f32 0.2, %v1330_v55  ;;  %v15306_v19 = vld [vmem:[#allocation50_spill] sm:$0xff] }
 0x327   : > { %v13879_v54 = vpack.c.bf16 %v1634_v51, %v1630_v33  ;;  %v1573_v30 = vmul.f32 0.2, %v1443_v21  ;;  %v15304_v63 = vcombine.low %v15300_v39, %v15301_v40  ;;  %v15307_v56 = vcombine.high %v15305_v38, %v15306_v19  ;;  %3345 = vmatprep.mubr.bf16.mxu1 %v13870_v9  ;;  %3571 = vmatprep.mubr.bf16.mxu0 %v13870_v9  ;;  %v1920_v39 = vld [vmem:[#allocation11 + $0x7a8] sm:$0xff] }
 0x328   : > { %3391 = vmatpush1.bf16.msra.mxu1 %v15303_v59  ;;  %v1332_v11 = vadd.f32 %v1331_v60, %v13394_v47  ;;  %v1445_v3 = vadd.f32 %v1444_v4, %v13405_v57  ;;  %v1334_v58 = vadd.f32 %v1333_v18, %v13388_v44  ;;  %v1447_v45 = vadd.f32 %v1446_v5, %v13391_v46  ;;  %v15309_v18 = vld [vmem:[#allocation48_spill] sm:$0xff]  ;;  %v15314_v59 = vld [vmem:[#allocation51_spill] sm:$0xff] }
 0x329   : > { %3615 = vmatpush1.bf16.msra.mxu0 %v15304_v63  ;;  %3392 = vmatprep.subr.bf16.mxu1 %v15307_v56  ;;  %vm1509_vm9 = vcmp.gt.f32.partialorder %v1443_v21, 0.0  ;;  %v1336_v0 = vadd.f32 %v1335_v35, %v13394_v47  ;;  %v1449_v7 = vadd.f32 %v1448_v32, %v13405_v57  ;;  %v9943_v50 = vcombine.high %v13875_v24, %v13877_v29  ;;  %v15308_v47 = vld [vmem:[#allocation47_spill] sm:$0xff] }
 0x32a   : > { %v1635_v28 = vsel %vm1507_vm8, %v1330_v55, %v1571_v17  ;;  %vm1508_vm10 = vcmp.gt.f32.partialorder %v1332_v11, 0.0  ;;  %v1572_v60 = vmul.f32 0.2, %v1332_v11  ;;  %v1574_v4 = vmul.f32 0.2, %v1445_v3  ;;  %3346 = vmatmul.mubr.bf16.gmra.mrb[56].mxu1 %v13864_v41  ;;  %3572 = vmatmul.mubr.bf16.gmra.mrb[88].mxu0 %v13864_v41  ;;  %v1916_v55 = vld [vmem:[#allocation11 + $0x788] sm:$0xff] }
 0x32b   : > { %vm1511_vm11 = vcmp.gt.f32.partialorder %v1334_v58, 0.0  ;;  %v1575_v44 = vmul.f32 0.2, %v1334_v58  ;;  %vm1513_vm12 = vcmp.gt.f32.partialorder %v1447_v45, 0.0  ;;  %v1577_v46 = vmul.f32 0.2, %v1447_v45 }
 0x32c   : > { %v15310_v57 = vcombine.high %v15308_v47, %v15309_v18  ;;  %v15311_v5 = vcombine.low %v15305_v38, %v15306_v19  ;;  %v1637_v35 = vsel %vm1509_vm9, %v1443_v21, %v1573_v30  ;;  %vm1510_vm13 = vcmp.gt.f32.partialorder %v1445_v3, 0.0  ;;  %v15315_v17 = vld [vmem:[#allocation52_spill] sm:$0xff]  ;;  %v1924_v56 = vld [vmem:[#allocation11 + $0x7c8] sm:$0xff] }
 0x32d   : > { %vm1512_vm14 = vcmp.gt.f32.partialorder %v1336_v0, 0.0  ;;  %v1576_v32 = vmul.f32 0.2, %v1336_v0  ;;  %v15312_v16 = vcombine.low %v15308_v47, %v15309_v18  ;;  %v15313_v42 = vcombine.high %v15277_v26, %v15276_v2  ;;  %v1928_v47 = vld [vmem:[#allocation11 + $0x7e8] sm:$0xff] }
 0x32e   : > { %3616 = vmatprep.subr.bf16.mxu0 %v15310_v57  ;;  %3393 = vmatpush1.bf16.msra.mxu1 %v15311_v5  ;;  %v1639_v40 = vsel %vm1511_vm11, %v1334_v58, %v1575_v44  ;;  %v1641_v33 = vsel %vm1513_vm12, %v1447_v45, %v1577_v46  ;;  %vm1514_vm15 = vcmp.gt.f32.partialorder %v1449_v7, 0.0  ;;  %v1578_v51 = vmul.f32 0.2, %v1449_v7  ;;  %v1677_v46 = vld [vmem:[#allocation11 + $0x10] sm:$0xff] }
 0x32f   : > { %3617 = vmatpush1.bf16.msra.mxu0 %v15312_v16  ;;  %3394 = vmatprep.subr.bf16.mxu1 %v15313_v42  ;;  %v15316_v21 = vcombine.high %v15314_v59, %v15315_v17  ;;  %v1636_v30 = vsel %vm1508_vm10, %v1332_v11, %v1572_v60  ;;  %v13916_v63 = vpack.c.bf16 %v1639_v40, %v1635_v28  ;;  %v1681_v5 = vld [vmem:[#allocation11 + $0x30] sm:$0xff]  ;;  %v1682_v60 = vld [vmem:[#allocation11 + $0x38] sm:$0xff] }
 0x330   : > { %v13918_v38 = vpack.c.bf16 %v1641_v33, %v1637_v35  ;;  %v1640_v19 = vsel %vm1512_vm14, %v1336_v0, %v1576_v32  ;;  %v1638_v18 = vsel %vm1510_vm13, %v1445_v3, %v1574_v4  ;;  %v1642_v58 = vsel %vm1514_vm15, %v1449_v7, %v1578_v51  ;;  %v1678_v7 = vld [vmem:[#allocation11 + $0x18] sm:$0xff]  ;;  %v1697_v40 = vld [vmem:[#allocation11 + $0xb0] sm:$0xff] }
 0x331   : > { %3618 = vmatprep.subr.bf16.mxu0 %v15316_v21  ;;  %v13921_v57 = vpack.c.bf16 %v1640_v19, %v1636_v30  ;;  %v15317_v45 = vcombine.low %v15277_v26, %v15276_v2  ;;  %v9937_v44 = vcombine.high %v1916_v55, %v1920_v39  ;;  %v13926_v11 = vpack.c.bf16 %v1642_v58, %v1638_v18  ;;  %v1686_v32 = vld [vmem:[#allocation11 + $0x58] sm:$0xff] }
 0x332   : > { %v15318_v28 = vcombine.low %v15314_v59, %v15315_v17  ;;  %v9936_v0 = vcombine.low %v1916_v55, %v1920_v39  ;;  %v9942_v3 = vcombine.low %v13875_v24, %v13877_v29  ;;  %v9945_v2 = vcombine.high %v1924_v56, %v1928_v47  ;;  %v1685_v24 = vld [vmem:[#allocation11 + $0x50] sm:$0xff]  ;;  %v1690_v16 = vld [vmem:[#allocation11 + $0x78] sm:$0xff] }
 0x333   : > { %3395 = vmatpush1.bf16.msra.mxu1 %v15317_v45  ;;  %3355 = vmatprep.mubr.bf16.mxu1 %v13921_v57  ;;  %v9699_v26 = vcombine.high %v1677_v46, %v1681_v5  ;;  %v9701_v4 = vcombine.high %v1678_v7, %v1682_v60  ;;  %v1689_v29 = vld [vmem:[#allocation11 + $0x70] sm:$0xff]  ;;  %v9698_v35 = vcombine.low %v1677_v46, %v1681_v5  ;;  %v1694_v59 = vld [vmem:[#allocation11 + $0x98] sm:$0xff] }
 0x334   : > { %3619 = vmatpush1.bf16.msra.mxu0 %v15318_v28  ;;  %3396 = vmatprep.subr.bf16.mxu1 %v9943_v50  ;;  %v9944_v50 = vcombine.low %v1924_v56, %v1928_v47  ;;  %v9700_v42 = vcombine.low %v1678_v7, %v1682_v60  ;;  %v9707_v55 = vcombine.high %v1685_v24, %v1689_v29  ;;  %v1693_v39 = vld [vmem:[#allocation11 + $0x90] sm:$0xff]  ;;  %v1698_v17 = vld [vmem:[#allocation11 + $0xb8] sm:$0xff] }
 0x335   : > { %3581 = vmatprep.mubr.bf16.mxu0 %v13921_v57  ;;  %3356 = vmatmul.mubr.bf16.gmra.mrb[60].mxu1 %v13916_v63  ;;  %v9709_v33 = vcombine.high %v1686_v32, %v1690_v16  ;;  %v9706_v51 = vcombine.low %v1685_v24, %v1689_v29  ;;  %v9715_v21 = vcombine.high %v1693_v39, %v1697_v40  ;;  %v1701_v56 = vld [vmem:[#allocation11 + $0xd0] sm:$0xff]  ;;  %v1702_v58 = vld [vmem:[#allocation11 + $0xd8] sm:$0xff] }
 0x336   : > { %3582 = vmatmul.mubr.bf16.gmra.mrb[92].mxu0 %v13916_v63  ;;  %3620 = vmatprep.subr.bf16.mxu0 %v9937_v44  ;;  %v9708_v30 = vcombine.low %v1686_v32, %v1690_v16  ;;  %v9717_v19 = vcombine.high %v1694_v59, %v1698_v17  ;;  %v1705_v47 = vld [vmem:[#allocation11 + $0xf0] sm:$0xff]  ;;  %v9714_v18 = vcombine.low %v1693_v39, %v1697_v40  ;;  %v1706_v45 = vld [vmem:[#allocation11 + $0xf8] sm:$0xff] }
 0x337   : > { %3398 = vmatprep.mubr.bf16.mxu1 %v13597_v12  ;;  %3624 = vmatprep.mubr.bf16.mxu0 %v13597_v12  ;;  %v9716_v44 = vcombine.low %v1694_v59, %v1698_v17  ;;  %v9723_v46 = vcombine.high %v1701_v56, %v1705_v47  ;;  %v1709_v5 = vld [vmem:[#allocation11 + $0x110] sm:$0xff]  ;;  %v9724_v60 = vcombine.low %v1702_v58, %v1706_v45  ;;  %v1722_v32 = vld [vmem:[#allocation11 + $0x178] sm:$0xff] }
 0x338   : > { %3621 = vmatpush1.bf16.msra.mxu0 %v9936_v0  ;;  %3397 = vmatpush1.bf16.msra.mxu1 %v9942_v3  ;;  %v1713_v28 = vld [vmem:[#allocation11 + $0x130] sm:$0xff]  ;;  %v9725_v0 = vcombine.high %v1702_v58, %v1706_v45  ;;  %v9722_v3 = vcombine.low %v1701_v56, %v1705_v47  ;;  %v1730_v59 = vld [vmem:[#allocation11 + $0x1b8] sm:$0xff] }
 0x339   : > { %3622 = vmatprep.subr.bf16.mxu0 %v9945_v2  ;;  %3705 = vmatprep.subr.bf16.mxu1 %v9699_v26  ;;  %v1710_v2 = vld [vmem:[#allocation11 + $0x118] sm:$0xff]  ;;  %v9731_v7 = vcombine.high %v1709_v5, %v1713_v28  ;;  %v1721_v24 = vld [vmem:[#allocation11 + $0x170] sm:$0xff]  ;;  %v9730_v29 = vcombine.low %v1709_v5, %v1713_v28 }
 0x33a   : > { %v1714_v26 = vld [vmem:[#allocation11 + $0x138] sm:$0xff]  ;;  %v1729_v39 = vld [vmem:[#allocation11 + $0x1b0] sm:$0xff] }
 0x33b   : > { %v9732_v16 = vcombine.low %v1710_v2, %v1714_v26  ;;  %v1737_v56 = vld [vmem:[#allocation11 + $0x1f0] sm:$0xff]  ;;  %v1738_v58 = vld [vmem:[#allocation11 + $0x1f8] sm:$0xff] }
 0x33c   : > { %3623 = vmatpush1.bf16.msra.mxu0 %v9944_v50  ;;  %v9733_v50 = vcombine.high %v1710_v2, %v1714_v26  ;;  %v1745_v5 = vld [vmem:[#allocation11 + $0x230] sm:$0xff]  ;;  %v1746_v2 = vld [vmem:[#allocation11 + $0x238] sm:$0xff] }
 0x33d   : > { %3931 = vmatprep.subr.bf16.mxu0 %v9701_v4  ;;  %3399 = vmatmul.mubr.bf16.vlgmr.msra.gmra.mrb[32].mxu1 %v13593_v8  ;;  %v1717_v4 = vld [vmem:[#allocation11 + $0x150] sm:$0xff] }
 0x33e   : > { %3706 = vmatpush1.bf16.msra.mxu1 %v9698_v35  ;;  %3408 = vmatprep.mubr.bf16.mxu1 %v13646_v52  ;;  %v1718_v35 = vld [vmem:[#allocation11 + $0x158] sm:$0xff] }
 0x33f   : > { %3625 = vmatmul.mubr.bf16.vlgmr.msra.gmra.mrb[64].mxu0 %v13593_v8  ;;  %3707 = vmatprep.subr.bf16.mxu1 %v9707_v55  ;;  %v1725_v55 = vld [vmem:[#allocation11 + $0x190] sm:$0xff]  ;;  %v9741_v40 = vcombine.high %v1718_v35, %v1722_v32 }
 0x340   : > { %3634 = vmatprep.mubr.bf16.mxu0 %v13646_v52  ;;  %3932 = vmatpush1.bf16.msra.mxu0 %v9700_v42  ;;  %v9739_v42 = vcombine.high %v1717_v4, %v1721_v24  ;;  %v9747_v17 = vcombine.high %v1725_v55, %v1729_v39  ;;  %v9746_v47 = vcombine.low %v1725_v55, %v1729_v39  ;;  %v1761_v55 = vld [vmem:[#allocation11 + $0x2b0] sm:$0xff] }
 0x341   : > { %3933 = vmatprep.subr.bf16.mxu0 %v9709_v33  ;;  %v9738_v33 = vcombine.low %v1717_v4, %v1721_v24  ;;  %v1753_v4 = vld [vmem:[#allocation11 + $0x270] sm:$0xff] }
 0x342   : > { %3708 = vmatpush1.bf16.msra.mxu1 %v9706_v51  ;;  %v1726_v51 = vld [vmem:[#allocation11 + $0x198] sm:$0xff] }
 0x343   : > { %3709 = vmatprep.subr.bf16.mxu1 %v9715_v21  ;;  %v9740_v21 = vcombine.low %v1718_v35, %v1722_v32  ;;  %v9748_v45 = vcombine.low %v1726_v51, %v1730_v59  ;;  %v1754_v35 = vld [vmem:[#allocation11 + $0x278] sm:$0xff] }
 0x344   : > { %3934 = vmatpush1.bf16.msra.mxu0 %v9708_v30  ;;  %v9749_v30 = vcombine.high %v1726_v51, %v1730_v59  ;;  %v1762_v51 = vld [vmem:[#allocation11 + $0x2b8] sm:$0xff] }
 0x345   : > { %3409 = vmatmul.mubr.bf16.gmra.mrb[36].mxu1 %v13628_v15  ;;  %3935 = vmatprep.subr.bf16.mxu0 %v9717_v19  ;;  %v1733_v19 = vld [vmem:[#allocation11 + $0x1d0] sm:$0xff] }
 0x346   : > { %3710 = vmatpush1.bf16.msra.mxu1 %v9714_v18  ;;  %3418 = vmatprep.mubr.bf16.mxu1 %v13685_v25  ;;  %v1734_v18 = vld [vmem:[#allocation11 + $0x1d8] sm:$0xff] }
 0x347   : > { %3635 = vmatmul.mubr.bf16.gmra.mrb[68].mxu0 %v13628_v15  ;;  %3711 = vmatprep.subr.bf16.mxu1 %v9723_v46  ;;  %v1741_v46 = vld [vmem:[#allocation11 + $0x210] sm:$0xff]  ;;  %v9757_v28 = vcombine.high %v1734_v18, %v1738_v58 }
 0x348   : > { %3644 = vmatprep.mubr.bf16.mxu0 %v13685_v25  ;;  %3936 = vmatpush1.bf16.msra.mxu0 %v9716_v44  ;;  %v9755_v44 = vcombine.high %v1733_v19, %v1737_v56  ;;  %v9763_v26 = vcombine.high %v1741_v46, %v1745_v5  ;;  %v9762_v24 = vcombine.low %v1741_v46, %v1745_v5  ;;  %v1777_v46 = vld [vmem:[#allocation11 + $0x330] sm:$0xff] }
 0x349   : > { %3937 = vmatprep.subr.bf16.mxu0 %v9725_v0  ;;  %v9754_v0 = vcombine.low %v1733_v19, %v1737_v56  ;;  %v1769_v19 = vld [vmem:[#allocation11 + $0x2f0] sm:$0xff] }
 0x34a   : > { %3712 = vmatpush1.bf16.msra.mxu1 %v9722_v3  ;;  %v1742_v3 = vld [vmem:[#allocation11 + $0x218] sm:$0xff] }
 0x34b   : > { %3713 = vmatprep.subr.bf16.mxu1 %v9731_v7  ;;  %v9756_v7 = vcombine.low %v1734_v18, %v1738_v58  ;;  %v9764_v32 = vcombine.low %v1742_v3, %v1746_v2  ;;  %v1770_v18 = vld [vmem:[#allocation11 + $0x2f8] sm:$0xff] }
 0x34c   : > { %3938 = vmatpush1.bf16.msra.mxu0 %v9724_v60  ;;  %v9765_v60 = vcombine.high %v1742_v3, %v1746_v2  ;;  %v1778_v3 = vld [vmem:[#allocation11 + $0x338] sm:$0xff] }
 0x34d   : > { %3419 = vmatmul.mubr.bf16.gmra.mrb[40].mxu1 %v13679_v53  ;;  %3939 = vmatprep.subr.bf16.mxu0 %v9733_v50  ;;  %v1749_v50 = vld [vmem:[#allocation11 + $0x250] sm:$0xff] }
 0x34e   : > { %3714 = vmatpush1.bf16.msra.mxu1 %v9730_v29  ;;  %3428 = vmatprep.mubr.bf16.mxu1 %v13745_v43  ;;  %v1750_v29 = vld [vmem:[#allocation11 + $0x258] sm:$0xff] }
 0x34f   : > { %3645 = vmatmul.mubr.bf16.gmra.mrb[72].mxu0 %v13679_v53  ;;  %3715 = vmatprep.subr.bf16.mxu1 %v9739_v42  ;;  %v1757_v42 = vld [vmem:[#allocation11 + $0x290] sm:$0xff]  ;;  %v9773_v39 = vcombine.high %v1750_v29, %v1754_v35 }
 0x350   : > { %3654 = vmatprep.mubr.bf16.mxu0 %v13745_v43  ;;  %3940 = vmatpush1.bf16.msra.mxu0 %v9732_v16  ;;  %v9771_v16 = vcombine.high %v1749_v50, %v1753_v4  ;;  %v9779_v59 = vcombine.high %v1757_v42, %v1761_v55  ;;  %v9778_v56 = vcombine.low %v1757_v42, %v1761_v55  ;;  %v1793_v42 = vld [vmem:[#allocation11 + $0x3b0] sm:$0xff] }
 0x351   : > { %3941 = vmatprep.subr.bf16.mxu0 %v9741_v40  ;;  %v9770_v40 = vcombine.low %v1749_v50, %v1753_v4  ;;  %v1785_v50 = vld [vmem:[#allocation11 + $0x370] sm:$0xff] }
 0x352   : > { %3716 = vmatpush1.bf16.msra.mxu1 %v9738_v33  ;;  %v1758_v33 = vld [vmem:[#allocation11 + $0x298] sm:$0xff] }
 0x353   : > { %3717 = vmatprep.subr.bf16.mxu1 %v9747_v17  ;;  %v9772_v17 = vcombine.low %v1750_v29, %v1754_v35  ;;  %v9780_v58 = vcombine.low %v1758_v33, %v1762_v51  ;;  %v1786_v29 = vld [vmem:[#allocation11 + $0x378] sm:$0xff] }
 0x354   : > { %3942 = vmatpush1.bf16.msra.mxu0 %v9740_v21  ;;  %v9781_v21 = vcombine.high %v1758_v33, %v1762_v51  ;;  %v1794_v33 = vld [vmem:[#allocation11 + $0x3b8] sm:$0xff] }
 0x355   : > { %3429 = vmatmul.mubr.bf16.gmra.mrb[44].mxu1 %v13727_v49  ;;  %3943 = vmatprep.subr.bf16.mxu0 %v9749_v30  ;;  %v1765_v30 = vld [vmem:[#allocation11 + $0x2d0] sm:$0xff] }
 0x356   : > { %3718 = vmatpush1.bf16.msra.mxu1 %v9746_v47  ;;  %3438 = vmatprep.mubr.bf16.mxu1 %v13787_v61  ;;  %v1766_v47 = vld [vmem:[#allocation11 + $0x2d8] sm:$0xff] }
 0x357   : > { %3655 = vmatmul.mubr.bf16.gmra.mrb[76].mxu0 %v13727_v49  ;;  %3719 = vmatprep.subr.bf16.mxu1 %v9755_v44  ;;  %v1773_v44 = vld [vmem:[#allocation11 + $0x310] sm:$0xff]  ;;  %v9789_v5 = vcombine.high %v1766_v47, %v1770_v18 }
 0x358   : > { %3664 = vmatprep.mubr.bf16.mxu0 %v13787_v61  ;;  %3944 = vmatpush1.bf16.msra.mxu0 %v9748_v45  ;;  %v9787_v45 = vcombine.high %v1765_v30, %v1769_v19  ;;  %v9795_v2 = vcombine.high %v1773_v44, %v1777_v46  ;;  %v9794_v4 = vcombine.low %v1773_v44, %v1777_v46  ;;  %v1809_v44 = vld [vmem:[#allocation11 + $0x430] sm:$0xff] }
 0x359   : > { %3945 = vmatprep.subr.bf16.mxu0 %v9757_v28  ;;  %v9786_v28 = vcombine.low %v1765_v30, %v1769_v19  ;;  %v1801_v30 = vld [vmem:[#allocation11 + $0x3f0] sm:$0xff] }
 0x35a   : > { %3720 = vmatpush1.bf16.msra.mxu1 %v9754_v0  ;;  %v1774_v0 = vld [vmem:[#allocation11 + $0x318] sm:$0xff] }
 0x35b   : > { %3721 = vmatprep.subr.bf16.mxu1 %v9763_v26  ;;  %v9788_v26 = vcombine.low %v1766_v47, %v1770_v18  ;;  %v9796_v35 = vcombine.low %v1774_v0, %v1778_v3  ;;  %v1802_v47 = vld [vmem:[#allocation11 + $0x3f8] sm:$0xff] }
 0x35c   : > { %3946 = vmatpush1.bf16.msra.mxu0 %v9756_v7  ;;  %v9797_v7 = vcombine.high %v1774_v0, %v1778_v3  ;;  %v1810_v0 = vld [vmem:[#allocation11 + $0x438] sm:$0xff] }
 0x35d   : > { %3439 = vmatmul.mubr.bf16.gmra.mrb[48].mxu1 %v13770_v27  ;;  %3947 = vmatprep.subr.bf16.mxu0 %v9765_v60  ;;  %v1781_v60 = vld [vmem:[#allocation11 + $0x350] sm:$0xff] }
 0x35e   : > { %3722 = vmatpush1.bf16.msra.mxu1 %v9762_v24  ;;  %3448 = vmatprep.mubr.bf16.mxu1 %v13832_v10  ;;  %v1782_v24 = vld [vmem:[#allocation11 + $0x358] sm:$0xff] }
 0x35f   : > { %3665 = vmatmul.mubr.bf16.gmra.mrb[80].mxu0 %v13770_v27  ;;  %3723 = vmatprep.subr.bf16.mxu1 %v9771_v16  ;;  %v1789_v16 = vld [vmem:[#allocation11 + $0x390] sm:$0xff]  ;;  %v9805_v55 = vcombine.high %v1782_v24, %v1786_v29 }
 0x360   : > { %3674 = vmatprep.mubr.bf16.mxu0 %v13832_v10  ;;  %3948 = vmatpush1.bf16.msra.mxu0 %v9764_v32  ;;  %v9803_v32 = vcombine.high %v1781_v60, %v1785_v50  ;;  %v9811_v51 = vcombine.high %v1789_v16, %v1793_v42  ;;  %v9810_v19 = vcombine.low %v1789_v16, %v1793_v42  ;;  %v1825_v16 = vld [vmem:[#allocation11 + $0x4b0] sm:$0xff] }
 0x361   : > { %3949 = vmatprep.subr.bf16.mxu0 %v9773_v39  ;;  %v9802_v39 = vcombine.low %v1781_v60, %v1785_v50 }
 0x362   : > { %3724 = vmatpush1.bf16.msra.mxu1 %v9770_v40  ;;  %v1790_v40 = vld [vmem:[#allocation11 + $0x398] sm:$0xff] }
 0x363   : > { %3725 = vmatprep.subr.bf16.mxu1 %v9779_v59  ;;  %v9804_v59 = vcombine.low %v1782_v24, %v1786_v29  ;;  %v9812_v18 = vcombine.low %v1790_v40, %v1794_v33  ;;  %v1818_v24 = vld [vmem:[#allocation11 + $0x478] sm:$0xff] }
 0x364   : > { %3950 = vmatpush1.bf16.msra.mxu0 %v9772_v17  ;;  %v9813_v17 = vcombine.high %v1790_v40, %v1794_v33 }
 0x365   : > { %3449 = vmatmul.mubr.bf16.gmra.mrb[52].mxu1 %v13818_v6  ;;  %3951 = vmatprep.subr.bf16.mxu0 %v9781_v21  ;;  %v1797_v21 = vld [vmem:[#allocation11 + $0x3d0] sm:$0xff] }
 0x366   : > { %3726 = vmatpush1.bf16.msra.mxu1 %v9778_v56  ;;  %3458 = vmatprep.mubr.bf16.mxu1 %v13879_v54  ;;  %v1798_v56 = vld [vmem:[#allocation11 + $0x3d8] sm:$0xff] }
 0x367   : > { %3675 = vmatmul.mubr.bf16.gmra.mrb[84].mxu0 %v13818_v6  ;;  %3727 = vmatprep.subr.bf16.mxu1 %v9787_v45  ;;  %v1805_v45 = vld [vmem:[#allocation11 + $0x410] sm:$0xff]  ;;  %v9821_v46 = vcombine.high %v1798_v56, %v1802_v47 }
 0x368   : > { %3684 = vmatprep.mubr.bf16.mxu0 %v13879_v54  ;;  %3952 = vmatpush1.bf16.msra.mxu0 %v9780_v58  ;;  %v9819_v58 = vcombine.high %v1797_v21, %v1801_v30  ;;  %v9827_v3 = vcombine.high %v1805_v45, %v1809_v44  ;;  %v9826_v50 = vcombine.low %v1805_v45, %v1809_v44  ;;  %v1838_v45 = vld [vmem:[#allocation11 + $0x518] sm:$0xff] }
 0x369   : > { %3953 = vmatprep.subr.bf16.mxu0 %v9789_v5  ;;  %v9818_v5 = vcombine.low %v1797_v21, %v1801_v30  ;;  %v1830_v30 = vld [vmem:[#allocation11 + $0x4d8] sm:$0xff] }
 0x36a   : > { %3728 = vmatpush1.bf16.msra.mxu1 %v9786_v28  ;;  %v1806_v28 = vld [vmem:[#allocation11 + $0x418] sm:$0xff] }
 0x36b   : > { %3729 = vmatprep.subr.bf16.mxu1 %v9795_v2  ;;  %v9820_v2 = vcombine.low %v1798_v56, %v1802_v47  ;;  %v9829_v60 = vcombine.high %v1806_v28, %v1810_v0  ;;  %v1842_v44 = vld [vmem:[#allocation11 + $0x538] sm:$0xff] }
 0x36c   : > { %3954 = vmatpush1.bf16.msra.mxu0 %v9788_v26  ;;  %v1813_v26 = vld [vmem:[#allocation11 + $0x450] sm:$0xff] }
 0x36d   : > { %3459 = vmatmul.mubr.bf16.gmra.mrb[56].mxu1 %v13868_v14  ;;  %3955 = vmatprep.subr.bf16.mxu0 %v9797_v7  ;;  %v1817_v7 = vld [vmem:[#allocation11 + $0x470] sm:$0xff] }
 0x36e   : > { %3730 = vmatpush1.bf16.msra.mxu1 %v9794_v4  ;;  %3468 = vmatprep.mubr.bf16.mxu1 %v13926_v11  ;;  %v1814_v4 = vld [vmem:[#allocation11 + $0x458] sm:$0xff]  ;;  %v9835_v29 = vcombine.high %v1813_v26, %v1817_v7  ;;  %v9834_v42 = vcombine.low %v1813_v26, %v1817_v7 }
 0x36f   : > { %3685 = vmatmul.mubr.bf16.gmra.mrb[88].mxu0 %v13868_v14  ;;  %3731 = vmatprep.subr.bf16.mxu1 %v9803_v32  ;;  %v1821_v32 = vld [vmem:[#allocation11 + $0x490] sm:$0xff]  ;;  %v9836_v33 = vcombine.low %v1814_v4, %v1818_v24  ;;  %v1846_v26 = vld [vmem:[#allocation11 + $0x558] sm:$0xff] }
 0x370   : > { %3694 = vmatprep.mubr.bf16.mxu0 %v13926_v11  ;;  %3956 = vmatpush1.bf16.msra.mxu0 %v9796_v35  ;;  %v9828_v35 = vcombine.low %v1806_v28, %v1810_v0  ;;  %v9843_v40 = vcombine.high %v1821_v32, %v1825_v16  ;;  %v9842_v21 = vcombine.low %v1821_v32, %v1825_v16  ;;  %v1845_v28 = vld [vmem:[#allocation11 + $0x550] sm:$0xff]  ;;  %v1850_v7 = vld [vmem:[#allocation11 + $0x578] sm:$0xff] }
 0x371   : > { %3957 = vmatprep.subr.bf16.mxu0 %v9805_v55  ;;  %v1822_v55 = vld [vmem:[#allocation11 + $0x498] sm:$0xff]  ;;  %v1849_v0 = vld [vmem:[#allocation11 + $0x570] sm:$0xff]  ;;  %v9868_v16 = vcombine.low %v1846_v26, %v1850_v7 }
 0x372   : > { %3732 = vmatpush1.bf16.msra.mxu1 %v9802_v39  ;;  %v1826_v39 = vld [vmem:[#allocation11 + $0x4b8] sm:$0xff] }
 0x373   : > { %3733 = vmatprep.subr.bf16.mxu1 %v9811_v51  ;;  %v1829_v51 = vld [vmem:[#allocation11 + $0x4d0] sm:$0xff]  ;;  %v9844_v47 = vcombine.low %v1822_v55, %v1826_v39 }
 0x374   : > { %3958 = vmatpush1.bf16.msra.mxu0 %v9804_v59  ;;  %v1833_v59 = vld [vmem:[#allocation11 + $0x4f0] sm:$0xff] }
 0x375   : > { %3469 = vmatmul.mubr.bf16.gmra.mrb[60].mxu1 %v13918_v38  ;;  %3959 = vmatprep.subr.bf16.mxu0 %v9813_v17  ;;  %v9845_v17 = vcombine.high %v1822_v55, %v1826_v39  ;;  %v9851_v56 = vcombine.high %v1829_v51, %v1833_v59 }
 0x376   : > { %3734 = vmatpush1.bf16.msra.mxu1 %v9810_v19  ;;  %3737 = vmatprep.mubr.bf16.mxu1 %v13595_v13  ;;  %v1834_v19 = vld [vmem:[#allocation11 + $0x4f8] sm:$0xff] }
 0x377   : > { %3695 = vmatmul.mubr.bf16.gmra.mrb[92].mxu0 %v13918_v38  ;;  %3735 = vmatprep.subr.bf16.mxu1 %v9819_v58  ;;  %v9850_v58 = vcombine.low %v1829_v51, %v1833_v59 }
 0x378   : > { %3963 = vmatprep.mubr.bf16.mxu0 %v13595_v13  ;;  %3960 = vmatpush1.bf16.msra.mxu0 %v9812_v18  ;;  %v9837_v13 = vcombine.high %v1814_v4, %v1818_v24  ;;  %v1837_v18 = vld [vmem:[#allocation11 + $0x510] sm:$0xff]  ;;  %v9866_v24 = vcombine.low %v1845_v28, %v1849_v0 }
 0x379   : > { %3961 = vmatprep.subr.bf16.mxu0 %v9821_v46  ;;  %v1853_v4 = vld [vmem:[#allocation11 + $0x590] sm:$0xff] }
 0x37a   : > { %3736 = vmatpush1.bf16.msra.mxu1 %v9818_v5  ;;  %v9852_v5 = vcombine.low %v1830_v30, %v1834_v19 }
 0x37b   : > { %3818 = vmatprep.subr.bf16.mxu1 %v9827_v3  ;;  %v9861_v3 = vcombine.high %v1838_v45, %v1842_v44 }
 0x37c   : > { %3962 = vmatpush1.bf16.msra.mxu0 %v9820_v2 }
 0x37d   : > { %3738 = vmatmul.mubr.bf16.vlgmr.msra.gmra.mrb[64].mxu1 %v13591_v1  ;;  %4044 = vmatprep.subr.bf16.mxu0 %v9829_v60  ;;  %v9867_v60 = vcombine.high %v1845_v28, %v1849_v0  ;;  %v1885_v28 = vld [vmem:[#allocation11 + $0x690] sm:$0xff] }
 0x37e   : > { %3819 = vmatpush1.bf16.msra.mxu1 %v9826_v50  ;;  %3747 = vmatprep.mubr.bf16.mxu1 %v13642_v31  ;;  %v9860_v50 = vcombine.low %v1838_v45, %v1842_v44  ;;  %v1878_v45 = vld [vmem:[#allocation11 + $0x658] sm:$0xff] }
 0x37f   : > { %3964 = vmatmul.mubr.bf16.vlgmr.msra.gmra.mrb[96].mxu0 %v13591_v1  ;;  %3820 = vmatprep.subr.bf16.mxu1 %v9835_v29  ;;  %v1841_v1 = vld [vmem:[#allocation11 + $0x530] sm:$0xff]  ;;  %v1854_v29 = vld [vmem:[#allocation11 + $0x598] sm:$0xff] }
 0x380   : > { %3973 = vmatprep.mubr.bf16.mxu0 %v13642_v31  ;;  %4045 = vmatpush1.bf16.msra.mxu0 %v9828_v35  ;;  %v9853_v31 = vcombine.high %v1830_v30, %v1834_v19  ;;  %v9859_v46 = vcombine.high %v1837_v18, %v1841_v1  ;;  %v9858_v2 = vcombine.low %v1837_v18, %v1841_v1  ;;  %v1858_v35 = vld [vmem:[#allocation11 + $0x5b8] sm:$0xff]  ;;  %v1877_v18 = vld [vmem:[#allocation11 + $0x650] sm:$0xff] }
 0x381   : > { %4046 = vmatprep.subr.bf16.mxu0 %v9837_v13  ;;  %v1861_v13 = vld [vmem:[#allocation11 + $0x5d0] sm:$0xff]  ;;  %v9877_v55 = vcombine.high %v1854_v29, %v1858_v35  ;;  %v9876_v59 = vcombine.low %v1854_v29, %v1858_v35  ;;  %v1870_v30 = vld [vmem:[#allocation11 + $0x618] sm:$0xff] }
 0x382   : > { %3821 = vmatpush1.bf16.msra.mxu1 %v9834_v42  ;;  %v1865_v42 = vld [vmem:[#allocation11 + $0x5f0] sm:$0xff]  ;;  %v1874_v19 = vld [vmem:[#allocation11 + $0x638] sm:$0xff] }
 0x383   : > { %3822 = vmatprep.subr.bf16.mxu1 %v9843_v40  ;;  %v1862_v40 = vld [vmem:[#allocation11 + $0x5d8] sm:$0xff]  ;;  %v9883_v51 = vcombine.high %v1861_v13, %v1865_v42  ;;  %v1881_v1 = vld [vmem:[#allocation11 + $0x670] sm:$0xff] }
 0x384   : > { %4047 = vmatpush1.bf16.msra.mxu0 %v9836_v33  ;;  %v1866_v33 = vld [vmem:[#allocation11 + $0x5f8] sm:$0xff]  ;;  %v9898_v0 = vcombine.low %v1877_v18, %v1881_v1 }
 0x385   : > { %3748 = vmatmul.mubr.bf16.gmra.mrb[68].mxu1 %v13624_v22  ;;  %4048 = vmatprep.subr.bf16.mxu0 %v9845_v17  ;;  %v1869_v17 = vld [vmem:[#allocation11 + $0x610] sm:$0xff]  ;;  %v1882_v44 = vld [vmem:[#allocation11 + $0x678] sm:$0xff] }
 0x386   : > { %3823 = vmatpush1.bf16.msra.mxu1 %v9842_v21  ;;  %3757 = vmatprep.mubr.bf16.mxu1 %v13683_v20  ;;  %v9882_v21 = vcombine.low %v1861_v13, %v1865_v42  ;;  %v1902_v42 = vld [vmem:[#allocation11 + $0x718] sm:$0xff] }
 0x387   : > { %3974 = vmatmul.mubr.bf16.gmra.mrb[100].mxu0 %v13624_v22  ;;  %3824 = vmatprep.subr.bf16.mxu1 %v9851_v56  ;;  %v1857_v22 = vld [vmem:[#allocation11 + $0x5b0] sm:$0xff] }
 0x388   : > { %3983 = vmatprep.mubr.bf16.mxu0 %v13683_v20  ;;  %4049 = vmatpush1.bf16.msra.mxu0 %v9844_v47  ;;  %v9869_v20 = vcombine.high %v1846_v26, %v1850_v7  ;;  %v9875_v32 = vcombine.high %v1853_v4, %v1857_v22  ;;  %v9874_v39 = vcombine.low %v1853_v4, %v1857_v22 }
 0x389   : > { %4050 = vmatprep.subr.bf16.mxu0 %v9853_v31  ;;  %v9884_v47 = vcombine.low %v1862_v40, %v1866_v33  ;;  %v9893_v31 = vcombine.high %v1870_v30, %v1874_v19  ;;  %v9900_v7 = vcombine.low %v1878_v45, %v1882_v44 }
 0x38a   : > { %3825 = vmatpush1.bf16.msra.mxu1 %v9850_v58 }
 0x38b   : > { %3826 = vmatprep.subr.bf16.mxu1 %v9859_v46  ;;  %v9899_v46 = vcombine.high %v1877_v18, %v1881_v1  ;;  %v1918_v18 = vld [vmem:[#allocation11 + $0x798] sm:$0xff] }
 0x38c   : > { %4051 = vmatpush1.bf16.msra.mxu0 %v9852_v5  ;;  %v9892_v5 = vcombine.low %v1870_v30, %v1874_v19  ;;  %v1917_v19 = vld [vmem:[#allocation11 + $0x790] sm:$0xff]  ;;  %v1922_v1 = vld [vmem:[#allocation11 + $0x7b8] sm:$0xff] }
 0x38d   : > { %3758 = vmatmul.mubr.bf16.gmra.mrb[72].mxu1 %v13674_v37  ;;  %4052 = vmatprep.subr.bf16.mxu0 %v9861_v3  ;;  %v1886_v3 = vld [vmem:[#allocation11 + $0x698] sm:$0xff] }
 0x38e   : > { %3827 = vmatpush1.bf16.msra.mxu1 %v9858_v2  ;;  %3767 = vmatprep.mubr.bf16.mxu1 %v13729_v23  ;;  %v1890_v2 = vld [vmem:[#allocation11 + $0x6b8] sm:$0xff] }
 0x38f   : > { %3984 = vmatmul.mubr.bf16.gmra.mrb[104].mxu0 %v13674_v37  ;;  %3828 = vmatprep.subr.bf16.mxu1 %v9867_v60  ;;  %v1873_v37 = vld [vmem:[#allocation11 + $0x630] sm:$0xff]  ;;  %v9909_v4 = vcombine.high %v1886_v3, %v1890_v2  ;;  %v9908_v35 = vcombine.low %v1886_v3, %v1890_v2  ;;  %v11578_v3 = vld [vmem:[#allocation14 + $0x4] ss:$28 sps:$4 sm:$0xff]  }
 0x390   : > { %3993 = vmatprep.mubr.bf16.mxu0 %v13729_v23  ;;  %4053 = vmatpush1.bf16.msra.mxu0 %v9860_v50  ;;  %v9885_v23 = vcombine.high %v1862_v40, %v1866_v33  ;;  %v9891_v56 = vcombine.high %v1869_v17, %v1873_v37  ;;  %v9890_v58 = vcombine.low %v1869_v17, %v1873_v37  ;;  %v1893_v60 = vld [vmem:[#allocation11 + $0x6d0] sm:$0xff]  ;;  %v1910_v37 = vld [vmem:[#allocation11 + $0x758] sm:$0xff] }
 0x391   : > { %4054 = vmatprep.subr.bf16.mxu0 %v9869_v20  ;;  %v1897_v50 = vld [vmem:[#allocation11 + $0x6f0] sm:$0xff]  ;;  %v1894_v20 = vld [vmem:[#allocation11 + $0x6d8] sm:$0xff] }
 0x392   : > { %3829 = vmatpush1.bf16.msra.mxu1 %v9866_v24  ;;  %v1898_v24 = vld [vmem:[#allocation11 + $0x6f8] sm:$0xff]  ;;  %v9915_v29 = vcombine.high %v1893_v60, %v1897_v50  ;;  %v9914_v13 = vcombine.low %v1893_v60, %v1897_v50  ;;  %v1909_v33 = vld [vmem:[#allocation11 + $0x750] sm:$0xff]  ;;  %v11584_v60 = vld [vmem:[#allocation14 + $0x3c] ss:$28 sps:$4 sm:$0xff]  }
 0x393   : > { %3830 = vmatprep.subr.bf16.mxu1 %v9875_v32  ;;  %v1901_v32 = vld [vmem:[#allocation11 + $0x710] sm:$0xff]  ;;  %v9916_v40 = vcombine.low %v1894_v20, %v1898_v24 }
 0x394   : > { %4055 = vmatpush1.bf16.msra.mxu0 %v9868_v16  ;;  %v15319_v16 = vld [vmem:[#allocation29_spill] sm:$0xff]  ;;  %v11579_v50 = vld [vmem:[#allocation14 + $0x8] ss:$28 sps:$4 sm:$0xff]  }
 0x395   : > { %3768 = vmatmul.mubr.bf16.gmra.mrb[76].mxu1 %v13725_v48  ;;  %4056 = vmatprep.subr.bf16.mxu0 %v9877_v55  ;;  %v1906_v55 = vld [vmem:[#allocation11 + $0x738] sm:$0xff] }
 0x396   : > { %3831 = vmatpush1.bf16.msra.mxu1 %v9874_v39  ;;  %3777 = vmatprep.mubr.bf16.mxu1 %v13780_v34  ;;  %v9924_v30 = vcombine.low %v1902_v42, %v1906_v55 }
 0x397   : > { %3994 = vmatmul.mubr.bf16.gmra.mrb[108].mxu0 %v13725_v48  ;;  %3832 = vmatprep.subr.bf16.mxu1 %v9883_v51  ;;  %v1889_v48 = vld [vmem:[#allocation11 + $0x6b0] sm:$0xff] }
 0x398   : > { %4003 = vmatprep.mubr.bf16.mxu0 %v13780_v34  ;;  %4057 = vmatpush1.bf16.msra.mxu0 %v9876_v59  ;;  %v9901_v34 = vcombine.high %v1878_v45, %v1882_v44  ;;  %v9907_v26 = vcombine.high %v1885_v28, %v1889_v48  ;;  %v9906_v22 = vcombine.low %v1885_v28, %v1889_v48  ;;  %v1913_v51 = vld [vmem:[#allocation11 + $0x770] sm:$0xff]  ;;  %v1926_v28 = vld [vmem:[#allocation11 + $0x7d8] sm:$0xff] }
 0x399   : > { %4058 = vmatprep.subr.bf16.mxu0 %v9885_v23  ;;  %v9925_v59 = vcombine.high %v1902_v42, %v1906_v55  ;;  %v1914_v23 = vld [vmem:[#allocation11 + $0x778] sm:$0xff]  ;;  %v1925_v45 = vld [vmem:[#allocation11 + $0x7d0] sm:$0xff]  ;;  %v11611_v55 = vld [vmem:[#allocation14 + $0x124] ss:$28 sps:$4 sm:$0xff]  }
 0x39a   : > { %3833 = vmatpush1.bf16.msra.mxu1 %v9882_v21  ;;  %v9931_v21 = vcombine.high %v1909_v33, %v1913_v51  ;;  %v1929_v44 = vld [vmem:[#allocation11 + $0x7f0] sm:$0xff]  ;;  %v1930_v48 = vld [vmem:[#allocation11 + $0x7f8] sm:$0xff] }
 0x39b   : > { %3834 = vmatprep.subr.bf16.mxu1 %v9891_v56  ;;  %v1921_v56 = vld [vmem:[#allocation11 + $0x7b0] sm:$0xff]  ;;  %v9948_v2 = vcombine.low %v1926_v28, %v1930_v48 }
 0x39c   : > { %4059 = vmatpush1.bf16.msra.mxu0 %v9884_v47  ;;  %v9930_v47 = vcombine.low %v1909_v33, %v1913_v51  ;;  %v11603_v42 = vld [vmem:[#allocation14 + $0xe8] ss:$28 sps:$4 sm:$0xff]   ;;  %v11612_v33 = vld [vmem:[#allocation14 + $0x150] ss:$28 sps:$4 sm:$0xff]  }
 0x39d   : > { %3778 = vmatmul.mubr.bf16.gmra.mrb[80].mxu1 %v13765_v62  ;;  %4060 = vmatprep.subr.bf16.mxu0 %v9893_v31  ;;  %v9939_v31 = vcombine.high %v1917_v19, %v1921_v56  ;;  %v11620_v51 = vld [vmem:[#allocation14 + $0x18c] ss:$28 sps:$4 sm:$0xff]  }
 0x39e   : > { %3835 = vmatpush1.bf16.msra.mxu1 %v9890_v58  ;;  %3787 = vmatprep.mubr.bf16.mxu1 %v13826_v36  ;;  %v9932_v58 = vcombine.low %v1910_v37, %v1914_v23 }
 0x39f   : > { %4004 = vmatmul.mubr.bf16.gmra.mrb[112].mxu0 %v13765_v62  ;;  %3836 = vmatprep.subr.bf16.mxu1 %v9899_v46  ;;  %v1905_v62 = vld [vmem:[#allocation11 + $0x730] sm:$0xff]  ;;  %v9941_v46 = vcombine.high %v1918_v18, %v1922_v1 }
 0x3a0   : > { %4013 = vmatprep.mubr.bf16.mxu0 %v13826_v36  ;;  %4061 = vmatpush1.bf16.msra.mxu0 %v9892_v5  ;;  %v9917_v36 = vcombine.high %v1894_v20, %v1898_v24  ;;  %v9923_v39 = vcombine.high %v1901_v32, %v1905_v62  ;;  %v9922_v17 = vcombine.low %v1901_v32, %v1905_v62  ;;  %v11593_v20 = vld [vmem:[#allocation14 + $0x7c] ss:$28 sps:$4 sm:$0xff]   ;;  %v11588_v24 = vld [vmem:[#allocation14 + $0x70] ss:$28 sps:$4 sm:$0xff]  }
 0x3a1   : > { %4062 = vmatprep.subr.bf16.mxu0 %v9901_v34  ;;  %v9938_v5 = vcombine.low %v1917_v19, %v1921_v56  ;;  %v9947_v34 = vcombine.high %v1925_v45, %v1929_v44  ;;  %v11599_v32 = vld [vmem:[#allocation14 + $0xb4] ss:$28 sps:$4 sm:$0xff]   ;;  %v11627_v19 = vld [vmem:[#allocation14 + $0x1c8] ss:$28 sps:$4 sm:$0xff]  }
 0x3a2   : > { %3837 = vmatpush1.bf16.msra.mxu1 %v9898_v0  ;;  %v9940_v0 = vcombine.low %v1918_v18, %v1922_v1  ;;  %v11597_v62 = vld [vmem:[#allocation14 + $0xb0] ss:$28 sps:$4 sm:$0xff]   ;;  %v11635_v56 = vld [vmem:[#allocation14 + $0x204] ss:$28 sps:$4 sm:$0xff]  }
 0x3a3   : > { %3838 = vmatprep.subr.bf16.mxu1 %v9907_v26  ;;  %v11581_v26 = vld [vmem:[#allocation14 + $0xc] ss:$28 sps:$4 sm:$0xff]  }
 0x3a4   : > { %4063 = vmatpush1.bf16.msra.mxu0 %v9900_v7  ;;  %v11576_v7 = vld [vmem:[#allocation14] ss:$28 sps:$4 sm:$0xff]   ;;  %v11636_v18 = vld [vmem:[#allocation14 + $0x230] ss:$28 sps:$4 sm:$0xff]  }
 0x3a5   : > { %3788 = vmatmul.mubr.bf16.gmra.mrb[84].mxu1 %v15319_v16  ;;  %4064 = vmatprep.subr.bf16.mxu0 %v9909_v4  ;;  %v11587_v4 = vld [vmem:[#allocation14 + $0x44] ss:$28 sps:$4 sm:$0xff]   ;;  %v11644_v1 = vld [vmem:[#allocation14 + $0x26c] ss:$28 sps:$4 sm:$0xff]  }
 0x3a6   : > { %3839 = vmatpush1.bf16.msra.mxu1 %v9906_v22  ;;  %3797 = vmatprep.mubr.bf16.mxu1 %v13870_v9  ;;  %v11585_v22 = vld [vmem:[#allocation14 + $0x40] ss:$28 sps:$4 sm:$0xff]  }
 0x3a7   : > { %4014 = vmatmul.mubr.bf16.gmra.mrb[116].mxu0 %v15319_v16  ;;  %3840 = vmatprep.subr.bf16.mxu1 %v9915_v29  ;;  %v11596_v29 = vld [vmem:[#allocation14 + $0xac] ss:$28 sps:$4 sm:$0xff]  }
 0x3a8   : > { %4023 = vmatprep.mubr.bf16.mxu0 %v13870_v9  ;;  %4065 = vmatpush1.bf16.msra.mxu0 %v9908_v35  ;;  %v9933_v9 = vcombine.high %v1910_v37, %v1914_v23  ;;  %v11591_v35 = vld [vmem:[#allocation14 + $0x78] ss:$28 sps:$4 sm:$0xff]   ;;  %v11605_v16 = vld [vmem:[#allocation14 + $0xec] ss:$28 sps:$4 sm:$0xff]  }
 0x3a9   : > { %4066 = vmatprep.subr.bf16.mxu0 %v9917_v36  ;;  %v11600_v36 = vld [vmem:[#allocation14 + $0xe0] ss:$28 sps:$4 sm:$0xff]   ;;  %v11621_v37 = vld [vmem:[#allocation14 + $0x190] ss:$28 sps:$4 sm:$0xff]  }
 0x3aa   : > { %3841 = vmatpush1.bf16.msra.mxu1 %v9914_v13  ;;  %v11608_v13 = vld [vmem:[#allocation14 + $0x11c] ss:$28 sps:$4 sm:$0xff]   ;;  %v11629_v23 = vld [vmem:[#allocation14 + $0x1cc] ss:$28 sps:$4 sm:$0xff]  }
 0x3ab   : > { %3842 = vmatprep.subr.bf16.mxu1 %v9923_v39  ;;  %v11609_v39 = vld [vmem:[#allocation14 + $0x120] ss:$28 sps:$4 sm:$0xff]  }
 0x3ac   : > { %4067 = vmatpush1.bf16.msra.mxu0 %v9916_v40  ;;  %v11617_v40 = vld [vmem:[#allocation14 + $0x15c] ss:$28 sps:$4 sm:$0xff]  }
 0x3ad   : > { %3798 = vmatmul.mubr.bf16.gmra.mrb[88].mxu1 %v13864_v41  ;;  %4068 = vmatprep.subr.bf16.mxu0 %v9925_v59  ;;  %v11615_v59 = vld [vmem:[#allocation14 + $0x158] ss:$28 sps:$4 sm:$0xff]  }
 0x3ae   : > { %3843 = vmatpush1.bf16.msra.mxu1 %v9922_v17  ;;  %3807 = vmatprep.mubr.bf16.mxu1 %v13921_v57  ;;  %v11623_v17 = vld [vmem:[#allocation14 + $0x194] ss:$28 sps:$4 sm:$0xff]  }
 0x3af   : > { %4024 = vmatmul.mubr.bf16.gmra.mrb[120].mxu0 %v13864_v41  ;;  %3844 = vmatprep.subr.bf16.mxu1 %v9931_v21  ;;  %v9949_v41 = vcombine.high %v1926_v28, %v1930_v48  ;;  %v11624_v21 = vld [vmem:[#allocation14 + $0x1c0] ss:$28 sps:$4 sm:$0xff]   ;;  %v11651_v28 = vld [vmem:[#allocation14 + $0x2a8] ss:$28 sps:$4 sm:$0xff]  }
 0x3b0   : > { %4033 = vmatprep.mubr.bf16.mxu0 %v13921_v57  ;;  %4069 = vmatpush1.bf16.msra.mxu0 %v9924_v30  ;;  %v9946_v57 = vcombine.low %v1925_v45, %v1929_v44  ;;  %v11632_v30 = vld [vmem:[#allocation14 + $0x1fc] ss:$28 sps:$4 sm:$0xff]   ;;  %v11645_v45 = vld [vmem:[#allocation14 + $0x270] ss:$28 sps:$4 sm:$0xff]   ;;  %v11659_v48 = vld [vmem:[#allocation14 + $0x2e4] ss:$28 sps:$4 sm:$0xff]  }
 0x3b1   : > { %4070 = vmatprep.subr.bf16.mxu0 %v9933_v9  ;;  %v11633_v9 = vld [vmem:[#allocation14 + $0x200] ss:$28 sps:$4 sm:$0xff]   ;;  %v11653_v44 = vld [vmem:[#allocation14 + $0x2ac] ss:$28 sps:$4 sm:$0xff]  }
 0x3b2   : > { %3845 = vmatpush1.bf16.msra.mxu1 %v9930_v47  ;;  %v11641_v47 = vld [vmem:[#allocation14 + $0x23c] ss:$28 sps:$4 sm:$0xff]  }
 0x3b3   : > { %3846 = vmatprep.subr.bf16.mxu1 %v9939_v31  ;;  %v11639_v31 = vld [vmem:[#allocation14 + $0x238] ss:$28 sps:$4 sm:$0xff]  }
 0x3b4   : > { %4071 = vmatpush1.bf16.msra.mxu0 %v9932_v58  ;;  %v11647_v58 = vld [vmem:[#allocation14 + $0x274] ss:$28 sps:$4 sm:$0xff]  }
 0x3b5   : > { %3808 = vmatmul.mubr.bf16.gmra.mrb[92].mxu1 %v13916_v63  ;;  %4072 = vmatprep.subr.bf16.mxu0 %v9941_v46  ;;  %v11648_v46 = vld [vmem:[#allocation14 + $0x2a0] ss:$28 sps:$4 sm:$0xff]  }
 0x3b6   : > { %3847 = vmatpush1.bf16.msra.mxu1 %v9938_v5  ;;  %3850 = vmatprep.mubr.bf16.mxu1 %v13597_v12  ;;  %v11656_v5 = vld [vmem:[#allocation14 + $0x2dc] ss:$28 sps:$4 sm:$0xff]  }
 0x3b7   : > { %4034 = vmatmul.mubr.bf16.gmra.mrb[124].mxu0 %v13916_v63  ;;  %3848 = vmatprep.subr.bf16.mxu1 %v9947_v34  ;;  %v11582_v63 = vld [vmem:[#allocation14 + $0x38] ss:$28 sps:$4 sm:$0xff]   ;;  %v11657_v34 = vld [vmem:[#allocation14 + $0x2e0] ss:$28 sps:$4 sm:$0xff]  }
 0x3b8   : > { %4073 = vmatpush1.bf16.msra.mxu0 %v9940_v0  ;;  %4076 = vmatprep.mubr.bf16.mxu0 %v13597_v12  ;;  %v11590_v12 = vld [vmem:[#allocation14 + $0x74] ss:$28 sps:$4 sm:$0xff]   ;;  %v11665_v0 = vld [vmem:[#allocation14 + $0x31c] ss:$28 sps:$4 sm:$0xff]  }
 0x3b9   : > { %4074 = vmatprep.subr.bf16.mxu0 %v9949_v41  ;;  %v11660_v41 = vld [vmem:[#allocation14 + $0x310] ss:$28 sps:$4 sm:$0xff]  }
 0x3ba   : > { %3849 = vmatpush1.bf16.msra.mxu1 %v9946_v57  ;;  %v11668_v57 = vld [vmem:[#allocation14 + $0x34c] ss:$28 sps:$4 sm:$0xff]  }
 0x3bb   : > { %7458 = vmatprep.subr.bf16.mxu1 %v11578_v3  ;;  %v11663_v3 = vld [vmem:[#allocation14 + $0x318] ss:$28 sps:$4 sm:$0xff]  }
 0x3bc   : > { %4075 = vmatpush1.bf16.msra.mxu0 %v9948_v2  ;;  %v11671_v2 = vld [vmem:[#allocation14 + $0x354] ss:$28 sps:$4 sm:$0xff]  }
 0x3bd   : > { %3851 = vmatmul.mubr.bf16.vlgmr.msra.gmra.mrb[64].mxu1 %v13593_v8  ;;  %7910 = vmatprep.subr.bf16.mxu0 %v11581_v26  ;;  %v11669_v26 = vld [vmem:[#allocation14 + $0x350] ss:$28 sps:$4 sm:$0xff]  }
 0x3be   : > { %3860 = vmatprep.mubr.bf16.mxu1 %v13646_v52  ;;  %7459 = vmatpush1.bf16.msra.mxu1 %v11576_v7  ;;  %v11677_v7 = vld [vmem:[#allocation14 + $0x38c] ss:$28 sps:$4 sm:$0xff]  }
 0x3bf   : > { %4077 = vmatmul.mubr.bf16.vlgmr.msra.gmra.mrb[96].mxu0 %v13593_v8  ;;  %7460 = vmatprep.subr.bf16.mxu1 %v11584_v60  ;;  %v11594_v8 = vld [vmem:[#allocation14 + $0xa8] ss:$28 sps:$4 sm:$0xff]   ;;  %v1931_v60 = vld [vmem:[#allocation13] sm:$0xff] }
 0x3c0   : > { %4086 = vmatprep.mubr.bf16.mxu0 %v13646_v52  ;;  %7911 = vmatpush1.bf16.msra.mxu0 %v11579_v50  ;;  %v11602_v52 = vld [vmem:[#allocation14 + $0xe4] ss:$28 sps:$4 sm:$0xff]   ;;  %v15320_v50 = vld [vmem:[#allocation25_spill] sm:$0xff] }
 0x3c1   : > { %7912 = vmatprep.subr.bf16.mxu0 %v11587_v4  ;;  %v14034_v4 = vrot.slane %v1931_v60, %v15320_v50  ;;  %v11860_v50 = vld [vmem:[#allocation14 + $0xa4c] ss:$28 sps:$4 sm:$0xff]  }
 0x3c2   : > { %7461 = vmatpush1.bf16.msra.mxu1 %v11582_v63  ;;  %v15321_v63 = vld [vmem:[#allocation27_spill] sm:$0xff] }
 0x3c3   : > { %7462 = vmatprep.subr.bf16.mxu1 %v11590_v12  ;;  %v14037_v12 = vrot.slane %v1931_v60, %v15321_v63 }
 0x3c4   : > { %7913 = vmatpush1.bf16.msra.mxu0 %v11585_v22  ;;  %v15322_v22 = vld [vmem:[#allocation26_spill] sm:$0xff] }
 0x3c5   : > { %3861 = vmatmul.mubr.bf16.gmra.mrb[68].mxu1 %v13628_v15  ;;  %7914 = vmatprep.subr.bf16.mxu0 %v11593_v20  ;;  %v14040_v20 = vrot.slane %v1931_v60, %v15322_v22 }
 0x3c6   : > { %3870 = vmatprep.mubr.bf16.mxu1 %v13685_v25  ;;  %7463 = vmatpush1.bf16.msra.mxu1 %v11588_v24 }
 0x3c7   : > { %4087 = vmatmul.mubr.bf16.gmra.mrb[100].mxu0 %v13628_v15  ;;  %7464 = vmatprep.subr.bf16.mxu1 %v11596_v29  ;;  %v11606_v15 = vld [vmem:[#allocation14 + $0x118] ss:$28 sps:$4 sm:$0xff]  }
 0x3c8   : > { %4096 = vmatprep.mubr.bf16.mxu0 %v13685_v25  ;;  %7915 = vmatpush1.bf16.msra.mxu0 %v11591_v35  ;;  %v11614_v25 = vld [vmem:[#allocation14 + $0x154] ss:$28 sps:$4 sm:$0xff]  }
 0x3c9   : > { %7916 = vmatprep.subr.bf16.mxu0 %v11599_v32 }
 0x3ca   : > { %7465 = vmatpush1.bf16.msra.mxu1 %v11594_v8 }
 0x3cb   : > { %7466 = vmatprep.subr.bf16.mxu1 %v11602_v52 }
 0x3cc   : > { %7917 = vmatpush1.bf16.msra.mxu0 %v11597_v62 }
 0x3cd   : > { %3871 = vmatmul.mubr.bf16.gmra.mrb[72].mxu1 %v13679_v53  ;;  %7918 = vmatprep.subr.bf16.mxu0 %v11605_v16 }
 0x3ce   : > { %3880 = vmatprep.mubr.bf16.mxu1 %v13745_v43  ;;  %7467 = vmatpush1.bf16.msra.mxu1 %v11600_v36 }
 0x3cf   : > { %4097 = vmatmul.mubr.bf16.gmra.mrb[104].mxu0 %v13679_v53  ;;  %7468 = vmatprep.subr.bf16.mxu1 %v11608_v13  ;;  %v11618_v53 = vld [vmem:[#allocation14 + $0x188] ss:$28 sps:$4 sm:$0xff]  }
 0x3d0   : > { %4106 = vmatprep.mubr.bf16.mxu0 %v13745_v43  ;;  %7919 = vmatpush1.bf16.msra.mxu0 %v11603_v42  ;;  %v11626_v43 = vld [vmem:[#allocation14 + $0x1c4] ss:$28 sps:$4 sm:$0xff]  }
 0x3d1   : > { %7920 = vmatprep.subr.bf16.mxu0 %v11611_v55 }
 0x3d2   : > { %7469 = vmatpush1.bf16.msra.mxu1 %v11606_v15 }
 0x3d3   : > { %7470 = vmatprep.subr.bf16.mxu1 %v11614_v25 }
 0x3d4   : > { %7921 = vmatpush1.bf16.msra.mxu0 %v11609_v39 }
 0x3d5   : > { %3881 = vmatmul.mubr.bf16.gmra.mrb[76].mxu1 %v13727_v49  ;;  %7922 = vmatprep.subr.bf16.mxu0 %v11617_v40 }
 0x3d6   : > { %3890 = vmatprep.mubr.bf16.mxu1 %v13787_v61  ;;  %7471 = vmatpush1.bf16.msra.mxu1 %v11612_v33 }
 0x3d7   : > { %4107 = vmatmul.mubr.bf16.gmra.mrb[108].mxu0 %v13727_v49  ;;  %7472 = vmatprep.subr.bf16.mxu1 %v11620_v51  ;;  %v11630_v49 = vld [vmem:[#allocation14 + $0x1f8] ss:$28 sps:$4 sm:$0xff]  }
 0x3d8   : > { %4116 = vmatprep.mubr.bf16.mxu0 %v13787_v61  ;;  %7923 = vmatpush1.bf16.msra.mxu0 %v11615_v59  ;;  %v11638_v61 = vld [vmem:[#allocation14 + $0x234] ss:$28 sps:$4 sm:$0xff]  }
 0x3d9   : > { %7924 = vmatprep.subr.bf16.mxu0 %v11623_v17 }
 0x3da   : > { %7473 = vmatpush1.bf16.msra.mxu1 %v11618_v53 }
 0x3db   : > { %7474 = vmatprep.subr.bf16.mxu1 %v11626_v43 }
 0x3dc   : > { %7925 = vmatpush1.bf16.msra.mxu0 %v11621_v37 }
 0x3dd   : > { %3891 = vmatmul.mubr.bf16.gmra.mrb[80].mxu1 %v13770_v27  ;;  %7926 = vmatprep.subr.bf16.mxu0 %v11629_v23 }
 0x3de   : > { %3900 = vmatprep.mubr.bf16.mxu1 %v13832_v10  ;;  %7475 = vmatpush1.bf16.msra.mxu1 %v11624_v21 }
 0x3df   : > { %4117 = vmatmul.mubr.bf16.gmra.mrb[112].mxu0 %v13770_v27  ;;  %7476 = vmatprep.subr.bf16.mxu1 %v11632_v30  ;;  %v11642_v27 = vld [vmem:[#allocation14 + $0x268] ss:$28 sps:$4 sm:$0xff]  }
 0x3e0   : > { %4126 = vmatprep.mubr.bf16.mxu0 %v13832_v10  ;;  %7927 = vmatpush1.bf16.msra.mxu0 %v11627_v19  ;;  %v11650_v10 = vld [vmem:[#allocation14 + $0x2a4] ss:$28 sps:$4 sm:$0xff]  }
 0x3e1   : > { %7928 = vmatprep.subr.bf16.mxu0 %v11635_v56 }
 0x3e2   : > { %7477 = vmatpush1.bf16.msra.mxu1 %v11630_v49 }
 0x3e3   : > { %7478 = vmatprep.subr.bf16.mxu1 %v11638_v61 }
 0x3e4   : > { %7929 = vmatpush1.bf16.msra.mxu0 %v11633_v9 }
 0x3e5   : > { %3901 = vmatmul.mubr.bf16.gmra.mrb[84].mxu1 %v13818_v6  ;;  %7930 = vmatprep.subr.bf16.mxu0 %v11641_v47 }
 0x3e6   : > { %3910 = vmatprep.mubr.bf16.mxu1 %v13879_v54  ;;  %7479 = vmatpush1.bf16.msra.mxu1 %v11636_v18 }
 0x3e7   : > { %4127 = vmatmul.mubr.bf16.gmra.mrb[116].mxu0 %v13818_v6  ;;  %7480 = vmatprep.subr.bf16.mxu1 %v11644_v1  ;;  %v11654_v6 = vld [vmem:[#allocation14 + $0x2d8] ss:$28 sps:$4 sm:$0xff]  }
 0x3e8   : > { %4136 = vmatprep.mubr.bf16.mxu0 %v13879_v54  ;;  %7931 = vmatpush1.bf16.msra.mxu0 %v11639_v31  ;;  %v11662_v54 = vld [vmem:[#allocation14 + $0x314] ss:$28 sps:$4 sm:$0xff]  }
 0x3e9   : > { %7932 = vmatprep.subr.bf16.mxu0 %v11647_v58 }
 0x3ea   : > { %7481 = vmatpush1.bf16.msra.mxu1 %v11642_v27 }
 0x3eb   : > { %7482 = vmatprep.subr.bf16.mxu1 %v11650_v10 }
 0x3ec   : > { %7933 = vmatpush1.bf16.msra.mxu0 %v11645_v45 }
 0x3ed   : > { %3911 = vmatmul.mubr.bf16.gmra.mrb[88].mxu1 %v13868_v14  ;;  %7934 = vmatprep.subr.bf16.mxu0 %v11653_v44 }
 0x3ee   : > { %3920 = vmatprep.mubr.bf16.mxu1 %v13926_v11  ;;  %7483 = vmatpush1.bf16.msra.mxu1 %v11648_v46 }
 0x3ef   : > { %4137 = vmatmul.mubr.bf16.gmra.mrb[120].mxu0 %v13868_v14  ;;  %7484 = vmatprep.subr.bf16.mxu1 %v11656_v5  ;;  %v11666_v14 = vld [vmem:[#allocation14 + $0x348] ss:$28 sps:$4 sm:$0xff]  }
 0x3f0   : > { %4146 = vmatprep.mubr.bf16.mxu0 %v13926_v11  ;;  %7935 = vmatpush1.bf16.msra.mxu0 %v11651_v28  ;;  %v11674_v11 = vld [vmem:[#allocation14 + $0x384] ss:$28 sps:$4 sm:$0xff]  }
 0x3f1   : > { %7936 = vmatprep.subr.bf16.mxu0 %v11659_v48 }
 0x3f2   : > { %7485 = vmatpush1.bf16.msra.mxu1 %v11654_v6 }
 0x3f3   : > { %7486 = vmatprep.subr.bf16.mxu1 %v11662_v54  ;;  %v11672_v54 = vld [vmem:[#allocation14 + $0x380] ss:$28 sps:$4 sm:$0xff]  }
 0x3f4   : > { %7937 = vmatpush1.bf16.msra.mxu0 %v11657_v34 }
 0x3f5   : > { %3921 = vmatmul.mubr.bf16.gmra.mrb[92].mxu1 %v13918_v38  ;;  %7938 = vmatprep.subr.bf16.mxu0 %v11665_v0 }
 0x3f6   : > { %7487 = vmatpush1.bf16.msra.mxu1 %v11660_v41 }
 0x3f7   : > { %4147 = vmatmul.mubr.bf16.gmra.mrb[124].mxu0 %v13918_v38  ;;  %7488 = vmatprep.subr.bf16.mxu1 %v11668_v57  ;;  %v15323_v38 = vld [vmem:[#allocation28_spill] sm:$0xff] }
 0x3f8   : > { %7939 = vmatpush1.bf16.msra.mxu0 %v11663_v3  ;;  %v14043_v24 = vrot.slane %v1931_v60, %v15323_v38  ;;  %v11675_v3 = vld [vmem:[#allocation14 + $0x388] ss:$28 sps:$4 sm:$0xff]  }
 0x3f9   : > { %7940 = vmatprep.subr.bf16.mxu0 %v11671_v2  ;;  %v11683_v60 = vld [vmem:[#allocation14 + $0x3c4] ss:$28 sps:$4 sm:$0xff]  }
 0x3fa   : > { %7489 = vmatpush1.bf16.msra.mxu1 %v11666_v14 }
 0x3fb   : > { %7571 = vmatprep.subr.bf16.mxu1 %v11674_v11  ;;  %v11680_v11 = vld [vmem:[#allocation14 + $0x3bc] ss:$28 sps:$4 sm:$0xff]  }
 0x3fc   : > { %7941 = vmatpush1.bf16.msra.mxu0 %v11669_v26 }
 0x3fd   : > { %8023 = vmatprep.subr.bf16.mxu0 %v11677_v7 }
 0x410   : > { %v3400_v29 = vpop.f32.mrb[32].mxu1 }
 0x411   : > { %v10676_v35 = vadd.f32 %v3400_v29, %v14034_v4  ;;  %v3402_v8 = vpop.f32.mrb[33].mxu1 }
 0x412   : > { %v3626_v32 = vpop.f32.mrb[64].mxu0  ;;  %v10677_v62 = vadd.f32 %v3402_v8, %v14040_v20  ;;  %v3404_v36 = vpop.f32.mrb[34].mxu1 }
 0x413   : > { %v10708_v52 = vadd.f32 %v3626_v32, %v14037_v12  ;;  %v3628_v16 = vpop.f32.mrb[65].mxu0  ;;  %vm4157_vm0 = vcmp.gt.f32.partialorder %v10676_v35, 0.0  ;;  %v4285_v13 = vmul.f32 0.2, %v10676_v35  ;;  %v10678_v55 = vadd.f32 %v3404_v36, %v14034_v4  ;;  %v3406_v25 = vpop.f32.mrb[35].mxu1 }
 0x414   : > { %v10709_v42 = vadd.f32 %v3628_v16, %v14043_v24  ;;  %v3630_v15 = vpop.f32.mrb[66].mxu0  ;;  %vm4158_vm2 = vcmp.gt.f32.partialorder %v10677_v62, 0.0  ;;  %v4286_v40 = vmul.f32 0.2, %v10677_v62  ;;  %v10679_v23 = vadd.f32 %v3406_v25, %v14040_v20 }
 0x415   : > { %vm4159_vm1 = vcmp.gt.f32.partialorder %v10708_v52, 0.0  ;;  %v4287_v39 = vmul.f32 0.2, %v10708_v52  ;;  %vm4165_vm4 = vcmp.gt.f32.partialorder %v10678_v55, 0.0  ;;  %v3632_v51 = vpop.f32.mrb[67].mxu0  ;;  %v4413_v59 = vsel %vm4157_vm0, %v10676_v35, %v4285_v13 }
 0x416   : > { %vm4160_vm3 = vcmp.gt.f32.partialorder %v10709_v42, 0.0  ;;  %v4288_v33 = vmul.f32 0.2, %v10709_v42  ;;  %v4293_v17 = vmul.f32 0.2, %v10678_v55  ;;  %v10710_v53 = vadd.f32 %v3630_v15, %v14037_v12 }
 0x417   : > { %v4415_v43 = vsel %vm4159_vm1, %v10708_v52, %v4287_v39  ;;  %v4414_v37 = vsel %vm4158_vm2, %v10677_v62, %v4286_v40  ;;  %v10711_v21 = vadd.f32 %v3632_v51, %v14043_v24  ;;  %vm4166_vm6 = vcmp.gt.f32.partialorder %v10679_v23, 0.0  ;;  %v11678_v52 = vld [vmem:[#allocation14 + $0x3b8] ss:$28 sps:$4 sm:$0xff]   ;;  %v11681_v62 = vld [vmem:[#allocation14 + $0x3c0] ss:$28 sps:$4 sm:$0xff]  }
 0x418   : > { %v4416_v30 = vsel %vm4160_vm3, %v10709_v42, %v4288_v33  ;;  %v4421_v19 = vsel %vm4165_vm4, %v10678_v55, %v4293_v17  ;;  %vm4167_vm5 = vcmp.gt.f32.partialorder %v10710_v53, 0.0  ;;  %v4295_v56 = vmul.f32 0.2, %v10710_v53  ;;  %v3410_v49 = vpop.f32.mrb[36].mxu1  ;;  %v11686_v55 = vld [vmem:[#allocation14 + $0x3f4] ss:$28 sps:$4 sm:$0xff]  }
 0x419   : > { %v14053_v61 = vpack.c.bf16 %v4421_v19, %v4413_v59  ;;  %v4294_v9 = vmul.f32 0.2, %v10679_v23  ;;  %vm4168_vm7 = vcmp.gt.f32.partialorder %v10711_v21, 0.0  ;;  %v3412_v18 = vpop.f32.mrb[37].mxu1  ;;  %v4296_v31 = vmul.f32 0.2, %v10711_v21 }
 0x41a   : > { %v3636_v47 = vpop.f32.mrb[68].mxu0  ;;  %v4423_v1 = vsel %vm4167_vm5, %v10710_v53, %v4295_v56  ;;  %v10680_v58 = vadd.f32 %v3410_v49, %v14034_v4  ;;  %v3414_v45 = vpop.f32.mrb[38].mxu1  ;;  %v10681_v5 = vadd.f32 %v3412_v18, %v14040_v20  ;;  %v11689_v15 = vld [vmem:[#allocation14 + $0x3fc] ss:$28 sps:$4 sm:$0xff]  }
 0x41b   : > { %v10712_v27 = vadd.f32 %v3636_v47, %v14037_v12  ;;  %v3638_v10 = vpop.f32.mrb[69].mxu0  ;;  %v14057_v44 = vpack.c.bf16 %v4423_v1, %v4415_v43  ;;  %v4422_v46 = vsel %vm4166_vm6, %v10679_v23, %v4294_v9  ;;  %v3416_v6 = vpop.f32.mrb[39].mxu1  ;;  %v4424_v0 = vsel %vm4168_vm7, %v10711_v21, %v4296_v31  ;;  %v11684_v9 = vld [vmem:[#allocation14 + $0x3f0] ss:$28 sps:$4 sm:$0xff]  }
 0x41c   : > { %v10713_v28 = vadd.f32 %v3638_v10, %v14043_v24  ;;  %v3640_v48 = vpop.f32.mrb[70].mxu0  ;;  %v14061_v34 = vpack.c.bf16 %v4422_v46, %v4414_v37  ;;  %vm4173_vm8 = vcmp.gt.f32.partialorder %v10680_v58, 0.0  ;;  %v4301_v41 = vmul.f32 0.2, %v10680_v58 }
 0x41d   : > { %15324 = vst [vmem:[#allocation30_spill] sm:$0xff] %v14057_v44  ;;  %v3642_v57 = vpop.f32.mrb[71].mxu0  ;;  %v14064_v2 = vpack.c.bf16 %v4424_v0, %v4416_v30  ;;  %vm4175_vm9 = vcmp.gt.f32.partialorder %v10712_v27, 0.0  ;;  %v4303_v14 = vmul.f32 0.2, %v10712_v27  ;;  %vm4174_vm10 = vcmp.gt.f32.partialorder %v10681_v5, 0.0 }
 0x41e   : > { %v4429_v26 = vsel %vm4173_vm8, %v10680_v58, %v4301_v41  ;;  %v4302_v7 = vmul.f32 0.2, %v10681_v5  ;;  %7490 = vmatprep.mubr.bf16.mxu1 %v14061_v34  ;;  %7942 = vmatprep.mubr.bf16.mxu0 %v14061_v34  ;;  %v4304_v29 = vmul.f32 0.2, %v10713_v28  ;;  %v10682_v35 = vadd.f32 %v3414_v45, %v14034_v4 }
 0x41f   : > { %15325 = vst [vmem:[#allocation31_spill] sm:$0xff] %v14064_v2  ;;  %v10714_v32 = vadd.f32 %v3640_v48, %v14037_v12  ;;  %v10683_v8 = vadd.f32 %v3416_v6, %v14040_v20  ;;  %7491 = vmatmul.mubr.bf16.vlgmr.msra.gmra.mrb[96].mxu1 %v14053_v61  ;;  %v4431_v16 = vsel %vm4175_vm9, %v10712_v27, %v4303_v14  ;;  %vm4176_vm11 = vcmp.gt.f32.partialorder %v10713_v28, 0.0  ;;  %v11692_v48 = vld [vmem:[#allocation14 + $0x42c] ss:$28 sps:$4 sm:$0xff]  }
 0x420   : > { %v4430_v36 = vsel %vm4174_vm10, %v10681_v5, %v4302_v7  ;;  %v10715_v13 = vadd.f32 %v3642_v57, %v14043_v24  ;;  %7572 = vmatpush1.bf16.msra.mxu1 %v11672_v54  ;;  %7943 = vmatmul.mubr.bf16.vlgmr.msra.gmra.mrb[128].mxu0 %v14053_v61  ;;  %v3420_v42 = vpop.f32.mrb[40].mxu1  ;;  %vm4181_vm12 = vcmp.gt.f32.partialorder %v10682_v35, 0.0  ;;  %v4309_v25 = vmul.f32 0.2, %v10682_v35  ;;  %v11690_v57 = vld [vmem:[#allocation14 + $0x428] ss:$28 sps:$4 sm:$0xff]  }
 0x421   : > { %vm4183_vm13 = vcmp.gt.f32.partialorder %v10714_v32, 0.0  ;;  %v4311_v39 = vmul.f32 0.2, %v10714_v32  ;;  %8024 = vmatpush1.bf16.msra.mxu0 %v11675_v3  ;;  %7573 = vmatprep.subr.bf16.mxu1 %v11680_v11  ;;  %vm4182_vm14 = vcmp.gt.f32.partialorder %v10683_v8, 0.0  ;;  %v4310_v40 = vmul.f32 0.2, %v10683_v8 }
 0x422   : > { %vm4184_vm15 = vcmp.gt.f32.partialorder %v10715_v13, 0.0  ;;  %v4312_v33 = vmul.f32 0.2, %v10715_v13  ;;  %8025 = vmatprep.subr.bf16.mxu0 %v11683_v60  ;;  %v4432_v51 = vsel %vm4176_vm11, %v10713_v28, %v4304_v29  ;;  %v4437_v59 = vsel %vm4181_vm12, %v10682_v35, %v4309_v25  ;;  %v3646_v43 = vpop.f32.mrb[72].mxu0  ;;  %v3422_v37 = vpop.f32.mrb[41].mxu1 }
 0x423   : > { %v4439_v17 = vsel %vm4183_vm13, %v10714_v32, %v4311_v39  ;;  %v10684_v53 = vadd.f32 %v3420_v42, %v14034_v4  ;;  %v14077_v23 = vpack.c.bf16 %v4437_v59, %v4429_v26  ;;  %v4438_v30 = vsel %vm4182_vm14, %v10683_v8, %v4310_v40  ;;  %v3648_v56 = vpop.f32.mrb[73].mxu0  ;;  %v3424_v49 = vpop.f32.mrb[42].mxu1  ;;  %v11687_v28 = vld [vmem:[#allocation14 + $0x3f8] ss:$28 sps:$4 sm:$0xff]   ;;  %v11693_v26 = vld [vmem:[#allocation14 + $0x430] ss:$28 sps:$4 sm:$0xff]  }
 0x424   : > { %v14079_v21 = vpack.c.bf16 %v4439_v17, %v4431_v16  ;;  %v4440_v19 = vsel %vm4184_vm15, %v10715_v13, %v4312_v33  ;;  %7574 = vmatpush1.bf16.msra.mxu1 %v11678_v52  ;;  %v14081_v47 = vpack.c.bf16 %v4438_v30, %v4430_v36  ;;  %v3650_v31 = vpop.f32.mrb[74].mxu0  ;;  %v3426_v58 = vpop.f32.mrb[43].mxu1  ;;  %v10716_v27 = vadd.f32 %v3646_v43, %v14037_v12  ;;  %v11695_v3 = vld [vmem:[#allocation14 + $0x434] ss:$28 sps:$4 sm:$0xff]   ;;  %v11698_v29 = vld [vmem:[#allocation14 + $0x464] ss:$28 sps:$4 sm:$0xff]  }
 0x425   : > { %v14083_v18 = vpack.c.bf16 %v4440_v19, %v4432_v51  ;;  %vm4189_vm0 = vcmp.gt.f32.partialorder %v10684_v53, 0.0  ;;  %v4317_v1 = vmul.f32 0.2, %v10684_v53  ;;  %8026 = vmatpush1.bf16.msra.mxu0 %v11681_v62  ;;  %7575 = vmatprep.subr.bf16.mxu1 %v11686_v55  ;;  %v10685_v10 = vadd.f32 %v3422_v37, %v14040_v20  ;;  %v3652_v5 = vpop.f32.mrb[75].mxu0  ;;  %v11701_v35 = vld [vmem:[#allocation14 + $0x46c] ss:$28 sps:$4 sm:$0xff]  }
 0x426   : > { %15326 = vst [vmem:[#allocation32_spill] sm:$0xff] %v14079_v21  ;;  %v10717_v45 = vadd.f32 %v3648_v56, %v14043_v24  ;;  %v10686_v46 = vadd.f32 %v3424_v49, %v14034_v4  ;;  %8027 = vmatprep.subr.bf16.mxu0 %v11689_v15  ;;  %v10718_v54 = vadd.f32 %v3650_v31, %v14037_v12  ;;  %vm4191_vm1 = vcmp.gt.f32.partialorder %v10716_v27, 0.0  ;;  %v11699_v31 = vld [vmem:[#allocation14 + $0x468] ss:$28 sps:$4 sm:$0xff]  }
 0x427   : > { %15327 = vst [vmem:[#allocation33_spill] sm:$0xff] %v14083_v18  ;;  %v4445_v6 = vsel %vm4189_vm0, %v10684_v53, %v4317_v1  ;;  %v10687_v0 = vadd.f32 %v3426_v58, %v14040_v20  ;;  %v10719_v41 = vadd.f32 %v3652_v5, %v14043_v24  ;;  %7500 = vmatprep.mubr.bf16.mxu1 %v14081_v47  ;;  %v4319_v14 = vmul.f32 0.2, %v10716_v27  ;;  %v11696_v1 = vld [vmem:[#allocation14 + $0x460] ss:$28 sps:$4 sm:$0xff]  }
 0x428   : > { %vm4190_vm2 = vcmp.gt.f32.partialorder %v10685_v10, 0.0  ;;  %v4318_v11 = vmul.f32 0.2, %v10685_v10  ;;  %7952 = vmatprep.mubr.bf16.mxu0 %v14081_v47  ;;  %7501 = vmatmul.mubr.bf16.gmra.mrb[100].mxu1 %v14077_v23  ;;  %vm4192_vm3 = vcmp.gt.f32.partialorder %v10717_v45, 0.0  ;;  %v4320_v7 = vmul.f32 0.2, %v10717_v45 }
 0x429   : > { %vm4197_vm4 = vcmp.gt.f32.partialorder %v10686_v46, 0.0  ;;  %v4325_v60 = vmul.f32 0.2, %v10686_v46  ;;  %7576 = vmatpush1.bf16.msra.mxu1 %v11684_v9  ;;  %7953 = vmatmul.mubr.bf16.gmra.mrb[132].mxu0 %v14077_v23  ;;  %v4447_v32 = vsel %vm4191_vm1, %v10716_v27, %v4319_v14  ;;  %vm4199_vm5 = vcmp.gt.f32.partialorder %v10718_v54, 0.0  ;;  %v3430_v62 = vpop.f32.mrb[44].mxu1 }
 0x42a   : > { %v4446_v8 = vsel %vm4190_vm2, %v10685_v10, %v4318_v11  ;;  %v4327_v52 = vmul.f32 0.2, %v10718_v54  ;;  %8028 = vmatpush1.bf16.msra.mxu0 %v11687_v28  ;;  %7577 = vmatprep.subr.bf16.mxu1 %v11692_v48  ;;  %v3656_v16 = vpop.f32.mrb[76].mxu0  ;;  %v4448_v36 = vsel %vm4192_vm3, %v10717_v45, %v4320_v7  ;;  %vm4198_vm6 = vcmp.gt.f32.partialorder %v10687_v0, 0.0  ;;  %v3432_v55 = vpop.f32.mrb[45].mxu1 }
 0x42b   : > { %v4453_v13 = vsel %vm4197_vm4, %v10686_v46, %v4325_v60  ;;  %v4326_v42 = vmul.f32 0.2, %v10687_v0  ;;  %8029 = vmatprep.subr.bf16.mxu0 %v11695_v3  ;;  %v3658_v15 = vpop.f32.mrb[77].mxu0  ;;  %vm4200_vm7 = vcmp.gt.f32.partialorder %v10719_v41, 0.0  ;;  %v4328_v40 = vmul.f32 0.2, %v10719_v41 }
 0x42c   : > { %v14097_v25 = vpack.c.bf16 %v4453_v13, %v4445_v6  ;;  %v4455_v39 = vsel %vm4199_vm5, %v10718_v54, %v4327_v52  ;;  %v3434_v33 = vpop.f32.mrb[46].mxu1  ;;  %v3660_v51 = vpop.f32.mrb[78].mxu0  ;;  %v10688_v53 = vadd.f32 %v3430_v62, %v14034_v4  ;;  %v10720_v43 = vadd.f32 %v3656_v16, %v14037_v12  ;;  %v11704_v58 = vld [vmem:[#allocation14 + $0x49c] ss:$28 sps:$4 sm:$0xff]   ;;  %v11707_v45 = vld [vmem:[#allocation14 + $0x4a4] ss:$28 sps:$4 sm:$0xff]  }
 0x42d   : > { %v14099_v59 = vpack.c.bf16 %v4455_v39, %v4447_v32  ;;  %v4454_v17 = vsel %vm4198_vm6, %v10687_v0, %v4326_v42  ;;  %7578 = vmatpush1.bf16.msra.mxu1 %v11690_v57  ;;  %v3436_v37 = vpop.f32.mrb[47].mxu1  ;;  %v3662_v30 = vpop.f32.mrb[79].mxu0  ;;  %v4456_v56 = vsel %vm4200_vm7, %v10719_v41, %v4328_v40  ;;  %v10689_v49 = vadd.f32 %v3432_v55, %v14040_v20  ;;  %v11702_v28 = vld [vmem:[#allocation14 + $0x498] ss:$28 sps:$4 sm:$0xff]   ;;  %v11705_v3 = vld [vmem:[#allocation14 + $0x4a0] ss:$28 sps:$4 sm:$0xff]  }
 0x42e   : > { %v14103_v19 = vpack.c.bf16 %v4454_v17, %v4446_v8  ;;  %v10721_v9 = vadd.f32 %v3658_v15, %v14043_v24  ;;  %8030 = vmatpush1.bf16.msra.mxu0 %v11693_v26  ;;  %v14107_v27 = vpack.c.bf16 %v4456_v56, %v4448_v36  ;;  %vm4205_vm8 = vcmp.gt.f32.partialorder %v10688_v53, 0.0  ;;  %7579 = vmatprep.subr.bf16.mxu1 %v11698_v29  ;;  %v11713_v32 = vld [vmem:[#allocation14 + $0x4dc] ss:$28 sps:$4 sm:$0xff]  }
 0x42f   : > { %15328 = vst [vmem:[#allocation34_spill] sm:$0xff] %v14099_v59  ;;  %v4333_v10 = vmul.f32 0.2, %v10688_v53  ;;  %vm4207_vm9 = vcmp.gt.f32.partialorder %v10720_v43, 0.0  ;;  %8031 = vmatprep.subr.bf16.mxu0 %v11701_v35  ;;  %v4335_v46 = vmul.f32 0.2, %v10720_v43  ;;  %v10690_v54 = vadd.f32 %v3434_v33, %v14034_v4 }
 0x430   : > { %15329 = vst [vmem:[#allocation54_spill] sm:$0xff] %v14107_v27  ;;  %vm4206_vm10 = vcmp.gt.f32.partialorder %v10689_v49, 0.0  ;;  %v4334_v5 = vmul.f32 0.2, %v10689_v49  ;;  %vm4208_vm11 = vcmp.gt.f32.partialorder %v10721_v9, 0.0  ;;  %7510 = vmatprep.mubr.bf16.mxu1 %v14103_v19  ;;  %7962 = vmatprep.mubr.bf16.mxu0 %v14103_v19  ;;  %v10722_v0 = vadd.f32 %v3660_v51, %v14037_v12  ;;  %v3440_v41 = vpop.f32.mrb[48].mxu1 }
 0x431   : > { %v4461_v48 = vsel %vm4205_vm8, %v10688_v53, %v4333_v10  ;;  %v4336_v6 = vmul.f32 0.2, %v10721_v9  ;;  %7511 = vmatmul.mubr.bf16.gmra.mrb[104].mxu1 %v14097_v25  ;;  %7963 = vmatmul.mubr.bf16.gmra.mrb[136].mxu0 %v14097_v25  ;;  %v4463_v14 = vsel %vm4207_vm9, %v10720_v43, %v4335_v46  ;;  %v10691_v26 = vadd.f32 %v3436_v37, %v14040_v20  ;;  %v3442_v60 = vpop.f32.mrb[49].mxu1  ;;  %v11710_v35 = vld [vmem:[#allocation14 + $0x4d4] ss:$28 sps:$4 sm:$0xff]  }
 0x432   : > { %v3666_v57 = vpop.f32.mrb[80].mxu0  ;;  %v4462_v11 = vsel %vm4206_vm10, %v10689_v49, %v4334_v5  ;;  %v10723_v7 = vadd.f32 %v3662_v30, %v14043_v24  ;;  %7580 = vmatpush1.bf16.msra.mxu1 %v11696_v1  ;;  %vm4213_vm12 = vcmp.gt.f32.partialorder %v10690_v54, 0.0  ;;  %v4341_v52 = vmul.f32 0.2, %v10690_v54  ;;  %8032 = vmatpush1.bf16.msra.mxu0 %v11699_v31  ;;  %v3444_v62 = vpop.f32.mrb[50].mxu1 }
 0x433   : > { %v3668_v29 = vpop.f32.mrb[81].mxu0  ;;  %v4464_v8 = vsel %vm4208_vm11, %v10721_v9, %v4336_v6  ;;  %vm4215_vm13 = vcmp.gt.f32.partialorder %v10722_v0, 0.0  ;;  %7581 = vmatprep.subr.bf16.mxu1 %v11704_v58  ;;  %v4343_v36 = vmul.f32 0.2, %v10722_v0  ;;  %vm4214_vm14 = vcmp.gt.f32.partialorder %v10691_v26, 0.0  ;;  %8033 = vmatprep.subr.bf16.mxu0 %v11707_v45  ;;  %v3446_v40 = vpop.f32.mrb[51].mxu1 }
 0x434   : > { %v3670_v16 = vpop.f32.mrb[82].mxu0  ;;  %v4342_v13 = vmul.f32 0.2, %v10691_v26  ;;  %vm4216_vm15 = vcmp.gt.f32.partialorder %v10723_v7, 0.0  ;;  %v4469_v42 = vsel %vm4213_vm12, %v10690_v54, %v4341_v52  ;;  %v4344_v55 = vmul.f32 0.2, %v10723_v7 }
 0x435   : > { %v10692_v15 = vadd.f32 %v3440_v41, %v14034_v4  ;;  %v10724_v39 = vadd.f32 %v3666_v57, %v14037_v12  ;;  %v3672_v33 = vpop.f32.mrb[83].mxu0  ;;  %v14122_v51 = vpack.c.bf16 %v4469_v42, %v4461_v48  ;;  %v4471_v17 = vsel %vm4215_vm13, %v10722_v0, %v4343_v36  ;;  %v11708_v37 = vld [vmem:[#allocation14 + $0x4d0] ss:$28 sps:$4 sm:$0xff]   ;;  %v11711_v30 = vld [vmem:[#allocation14 + $0x4d8] ss:$28 sps:$4 sm:$0xff]  }
 0x436   : > { %v4470_v53 = vsel %vm4214_vm14, %v10691_v26, %v4342_v13  ;;  %7582 = vmatpush1.bf16.msra.mxu1 %v11702_v28  ;;  %v10693_v43 = vadd.f32 %v3442_v60, %v14040_v20  ;;  %v14126_v56 = vpack.c.bf16 %v4471_v17, %v4463_v14  ;;  %v4472_v9 = vsel %vm4216_vm15, %v10723_v7, %v4344_v55  ;;  %v11716_v1 = vld [vmem:[#allocation14 + $0x50c] ss:$28 sps:$4 sm:$0xff]   ;;  %v11719_v31 = vld [vmem:[#allocation14 + $0x514] ss:$28 sps:$4 sm:$0xff]   ;;  %v11722_v60 = vld [vmem:[#allocation14 + $0x544] ss:$28 sps:$4 sm:$0xff]  }
 0x437   : > { %v14128_v49 = vpack.c.bf16 %v4470_v53, %v4462_v11  ;;  %vm4221_vm0 = vcmp.gt.f32.partialorder %v10692_v15, 0.0  ;;  %8034 = vmatpush1.bf16.msra.mxu0 %v11705_v3  ;;  %7583 = vmatprep.subr.bf16.mxu1 %v11710_v35  ;;  %v14131_v58 = vpack.c.bf16 %v4472_v9, %v4464_v8  ;;  %v4349_v10 = vmul.f32 0.2, %v10692_v15  ;;  %v11714_v6 = vld [vmem:[#allocation14 + $0x508] ss:$28 sps:$4 sm:$0xff]  }
 0x438   : > { %15330 = vst [vmem:[#allocation53_spill] sm:$0xff] %v14126_v56  ;;  %vm4223_vm1 = vcmp.gt.f32.partialorder %v10724_v39, 0.0  ;;  %v4351_v45 = vmul.f32 0.2, %v10724_v39  ;;  %8035 = vmatprep.subr.bf16.mxu0 %v11713_v32  ;;  %v3450_v46 = vpop.f32.mrb[52].mxu1  ;;  %vm4222_vm2 = vcmp.gt.f32.partialorder %v10693_v43, 0.0  ;;  %v10725_v28 = vadd.f32 %v3668_v29, %v14043_v24 }
 0x439   : > { %15331 = vst [vmem:[#allocation35_spill] sm:$0xff] %v14131_v58  ;;  %v4350_v5 = vmul.f32 0.2, %v10693_v43  ;;  %v10694_v48 = vadd.f32 %v3444_v62, %v14034_v4  ;;  %7520 = vmatprep.mubr.bf16.mxu1 %v14128_v49  ;;  %7972 = vmatprep.mubr.bf16.mxu0 %v14128_v49  ;;  %v3452_v0 = vpop.f32.mrb[53].mxu1  ;;  %v4477_v41 = vsel %vm4221_vm0, %v10692_v15, %v4349_v10  ;;  %v11717_v11 = vld [vmem:[#allocation14 + $0x510] ss:$28 sps:$4 sm:$0xff]  }
 0x43a   : > { %v3676_v54 = vpop.f32.mrb[84].mxu0  ;;  %v4479_v57 = vsel %vm4223_vm1, %v10724_v39, %v4351_v45  ;;  %v10726_v3 = vadd.f32 %v3670_v16, %v14037_v12  ;;  %v10695_v14 = vadd.f32 %v3446_v40, %v14040_v20  ;;  %7521 = vmatmul.mubr.bf16.gmra.mrb[108].mxu1 %v14122_v51  ;;  %v3454_v7 = vpop.f32.mrb[54].mxu1  ;;  %vm4224_vm3 = vcmp.gt.f32.partialorder %v10725_v28, 0.0  ;;  %7973 = vmatmul.mubr.bf16.gmra.mrb[140].mxu0 %v14122_v51  ;;  %v11725_v15 = vld [vmem:[#allocation14 + $0x54c] ss:$28 sps:$4 sm:$0xff]  }
 0x43b   : > { %v3678_v26 = vpop.f32.mrb[85].mxu0  ;;  %v4478_v29 = vsel %vm4222_vm2, %v10693_v43, %v4350_v5  ;;  %v4352_v35 = vmul.f32 0.2, %v10725_v28  ;;  %vm4229_vm4 = vcmp.gt.f32.partialorder %v10694_v48, 0.0  ;;  %7584 = vmatpush1.bf16.msra.mxu1 %v11708_v37  ;;  %v14143_v8 = vpop.f32.mrb[55].mxu1  ;;  %8036 = vmatpush1.bf16.msra.mxu0 %v11711_v30  ;;  %v10727_v13 = vadd.f32 %v3672_v33, %v14043_v24 }
 0x43c   : > { %v3680_v32 = vpop.f32.mrb[86].mxu0  ;;  %v4357_v52 = vmul.f32 0.2, %v10694_v48  ;;  %vm4231_vm5 = vcmp.gt.f32.partialorder %v10726_v3, 0.0  ;;  %v4359_v62 = vmul.f32 0.2, %v10726_v3  ;;  %7585 = vmatprep.subr.bf16.mxu1 %v11716_v1  ;;  %v10696_v42 = vadd.f32 %v3450_v46, %v14034_v4  ;;  %8037 = vmatprep.subr.bf16.mxu0 %v11719_v31 }
 0x43d   : > { %vm4230_vm6 = vcmp.gt.f32.partialorder %v10695_v14, 0.0  ;;  %v4480_v16 = vsel %vm4224_vm3, %v10725_v28, %v4352_v35  ;;  %v4358_v36 = vmul.f32 0.2, %v10695_v14  ;;  %v3682_v55 = vpop.f32.mrb[87].mxu0  ;;  %v10728_v17 = vadd.f32 %v3676_v54, %v14037_v12  ;;  %v11720_v33 = vld [vmem:[#allocation14 + $0x540] ss:$28 sps:$4 sm:$0xff]  }
 0x43e   : > { %v4485_v39 = vsel %vm4229_vm4, %v10694_v48, %v4357_v52  ;;  %v4487_v40 = vsel %vm4231_vm5, %v10726_v3, %v4359_v62  ;;  %v10697_v53 = vadd.f32 %v3452_v0, %v14040_v20  ;;  %vm4232_vm7 = vcmp.gt.f32.partialorder %v10727_v13, 0.0  ;;  %v11723_v9 = vld [vmem:[#allocation14 + $0x548] ss:$28 sps:$4 sm:$0xff]   ;;  %v11728_v0 = vld [vmem:[#allocation14 + $0x57c] ss:$28 sps:$4 sm:$0xff]  }
 0x43f   : > { %v14150_v43 = vpack.c.bf16 %v4485_v39, %v4477_v41  ;;  %v14152_v37 = vpack.c.bf16 %v4487_v40, %v4479_v57  ;;  %v4486_v30 = vsel %vm4230_vm6, %v10695_v14, %v4358_v36  ;;  %7586 = vmatpush1.bf16.msra.mxu1 %v11714_v6  ;;  %v4360_v31 = vmul.f32 0.2, %v10727_v13  ;;  %8038 = vmatpush1.bf16.msra.mxu0 %v11717_v11  ;;  %v11731_v57 = vld [vmem:[#allocation14 + $0x584] ss:$28 sps:$4 sm:$0xff]   ;;  %v11726_v35 = vld [vmem:[#allocation14 + $0x578] ss:$28 sps:$4 sm:$0xff]  }
 0x440   : > { %v14155_v1 = vpack.c.bf16 %v4486_v30, %v4478_v29  ;;  %vm4237_vm8 = vcmp.gt.f32.partialorder %v10696_v42, 0.0  ;;  %v4365_v10 = vmul.f32 0.2, %v10696_v42  ;;  %7587 = vmatprep.subr.bf16.mxu1 %v11722_v60  ;;  %v3460_v45 = vpop.f32.mrb[56].mxu1  ;;  %vm4239_vm9 = vcmp.gt.f32.partialorder %v10728_v17, 0.0  ;;  %8039 = vmatprep.subr.bf16.mxu0 %v11725_v15 }
 0x441   : > { %15332 = vst [vmem:[#allocation36_spill] sm:$0xff] %v14152_v37  ;;  %v4367_v46 = vmul.f32 0.2, %v10728_v17  ;;  %vm4238_vm10 = vcmp.gt.f32.partialorder %v10697_v53, 0.0  ;;  %v4366_v5 = vmul.f32 0.2, %v10697_v53  ;;  %v4488_v28 = vsel %vm4232_vm7, %v10727_v13, %v4360_v31 }
 0x442   : > { %v4493_v48 = vsel %vm4237_vm8, %v10696_v42, %v4365_v10  ;;  %v10729_v6 = vadd.f32 %v3678_v26, %v14043_v24  ;;  %v10698_v54 = vadd.f32 %v3454_v7, %v14034_v4  ;;  %7530 = vmatprep.mubr.bf16.mxu1 %v14155_v1  ;;  %v3686_v41 = vpop.f32.mrb[88].mxu0  ;;  %v3462_v3 = vpop.f32.mrb[57].mxu1  ;;  %v14161_v14 = vpack.c.bf16 %v4488_v28, %v4480_v16  ;;  %v11729_v52 = vld [vmem:[#allocation14 + $0x580] ss:$28 sps:$4 sm:$0xff]   ;;  %v11734_v31 = vld [vmem:[#allocation14 + $0x5b4] ss:$28 sps:$4 sm:$0xff]  }
 0x443   : > { %v4495_v11 = vsel %vm4239_vm9, %v10728_v17, %v4367_v46  ;;  %v4494_v60 = vsel %vm4238_vm10, %v10697_v53, %v4366_v5  ;;  %v10730_v29 = vadd.f32 %v3680_v32, %v14037_v12  ;;  %7982 = vmatprep.mubr.bf16.mxu0 %v14155_v1  ;;  %v3688_v62 = vpop.f32.mrb[89].mxu0  ;;  %v3464_v26 = vpop.f32.mrb[58].mxu1  ;;  %7531 = vmatmul.mubr.bf16.gmra.mrb[112].mxu1 %v14150_v43 }
 0x444   : > { %15333 = vst [vmem:[#allocation37_spill] sm:$0xff] %v14161_v14  ;;  %vm4240_vm11 = vcmp.gt.f32.partialorder %v10729_v6, 0.0  ;;  %v4368_v7 = vmul.f32 0.2, %v10729_v6  ;;  %vm4245_vm12 = vcmp.gt.f32.partialorder %v10698_v54, 0.0  ;;  %7983 = vmatmul.mubr.bf16.gmra.mrb[144].mxu0 %v14150_v43  ;;  %v10699_v13 = vadd.f32 %v14143_v8, %v14040_v20  ;;  %7588 = vmatpush1.bf16.msra.mxu1 %v11720_v33  ;;  %v3690_v42 = vpop.f32.mrb[90].mxu0 }
 0x445   : > { %v4373_v36 = vmul.f32 0.2, %v10698_v54  ;;  %vm4247_vm13 = vcmp.gt.f32.partialorder %v10730_v29, 0.0  ;;  %v4375_v16 = vmul.f32 0.2, %v10730_v29  ;;  %v10731_v32 = vadd.f32 %v3682_v55, %v14043_v24  ;;  %8040 = vmatpush1.bf16.msra.mxu0 %v11723_v9  ;;  %v3466_v15 = vpop.f32.mrb[59].mxu1  ;;  %7589 = vmatprep.subr.bf16.mxu1 %v11728_v0 }
 0x446   : > { %v4496_v39 = vsel %vm4240_vm11, %v10729_v6, %v4368_v7  ;;  %v10700_v17 = vadd.f32 %v3460_v45, %v14034_v4  ;;  %v10732_v53 = vadd.f32 %v3686_v41, %v14037_v12  ;;  %v3692_v30 = vpop.f32.mrb[91].mxu0  ;;  %vm4246_vm14 = vcmp.gt.f32.partialorder %v10699_v13, 0.0  ;;  %8041 = vmatprep.subr.bf16.mxu0 %v11731_v57  ;;  %v11737_v55 = vld [vmem:[#allocation14 + $0x5bc] ss:$28 sps:$4 sm:$0xff]  }
 0x447   : > { %v4501_v40 = vsel %vm4245_vm12, %v10698_v54, %v4373_v36  ;;  %v4503_v46 = vsel %vm4247_vm13, %v10730_v29, %v4375_v16  ;;  %v4374_v8 = vmul.f32 0.2, %v10699_v13  ;;  %vm4248_vm15 = vcmp.gt.f32.partialorder %v10731_v32, 0.0  ;;  %v11735_v29 = vld [vmem:[#allocation14 + $0x5b8] ss:$28 sps:$4 sm:$0xff]  }
 0x448   : > { %v14172_v10 = vpack.c.bf16 %v4501_v40, %v4493_v48  ;;  %v14175_v33 = vpack.c.bf16 %v4503_v46, %v4495_v11  ;;  %v4376_v9 = vmul.f32 0.2, %v10731_v32  ;;  %vm4253_vm0 = vcmp.gt.f32.partialorder %v10700_v17, 0.0  ;;  %v3470_v5 = vpop.f32.mrb[60].mxu1  ;;  %7590 = vmatpush1.bf16.msra.mxu1 %v11726_v35  ;;  %v11732_v11 = vld [vmem:[#allocation14 + $0x5b0] ss:$28 sps:$4 sm:$0xff]  }
 0x449   : > { %v4502_v28 = vsel %vm4246_vm14, %v10699_v13, %v4374_v8  ;;  %v4381_v45 = vmul.f32 0.2, %v10700_v17  ;;  %vm4255_vm1 = vcmp.gt.f32.partialorder %v10732_v53, 0.0  ;;  %v4383_v6 = vmul.f32 0.2, %v10732_v53  ;;  %8042 = vmatpush1.bf16.msra.mxu0 %v11729_v52  ;;  %7591 = vmatprep.subr.bf16.mxu1 %v11734_v31  ;;  %v3472_v7 = vpop.f32.mrb[61].mxu1 }
 0x44a   : > { %15334 = vst [vmem:[#allocation38_spill] sm:$0xff] %v14175_v33  ;;  %v3696_v48 = vpop.f32.mrb[92].mxu0  ;;  %v14177_v54 = vpack.c.bf16 %v4502_v28, %v4494_v60  ;;  %v4504_v0 = vsel %vm4248_vm15, %v10731_v32, %v4376_v9  ;;  %v10701_v41 = vadd.f32 %v3462_v3, %v14040_v20  ;;  %v10733_v57 = vadd.f32 %v3688_v62, %v14043_v24  ;;  %v11740_v60 = vld [vmem:[#allocation14 + $0x5ec] ss:$28 sps:$4 sm:$0xff]   ;;  %v11743_v32 = vld [vmem:[#allocation14 + $0x5f4] ss:$28 sps:$4 sm:$0xff]  }
 0x44b   : > { %v3698_v36 = vpop.f32.mrb[93].mxu0  ;;  %v14181_v16 = vpack.c.bf16 %v4504_v0, %v4496_v39  ;;  %v4509_v13 = vsel %vm4253_vm0, %v10700_v17, %v4381_v45  ;;  %v4511_v35 = vsel %vm4255_vm1, %v10732_v53, %v4383_v6  ;;  %v10702_v52 = vadd.f32 %v3464_v26, %v14034_v4  ;;  %8043 = vmatprep.subr.bf16.mxu0 %v11737_v55  ;;  %v3474_v40 = vpop.f32.mrb[62].mxu1  ;;  %v11738_v28 = vld [vmem:[#allocation14 + $0x5e8] ss:$28 sps:$4 sm:$0xff]   ;;  %v11741_v45 = vld [vmem:[#allocation14 + $0x5f0] ss:$28 sps:$4 sm:$0xff]  }
 0x44c   : > { %v14186_v3 = vpop.f32.mrb[94].mxu0  ;;  %vm4254_vm2 = vcmp.gt.f32.partialorder %v10701_v41, 0.0  ;;  %v4382_v62 = vmul.f32 0.2, %v10701_v41  ;;  %vm4256_vm3 = vcmp.gt.f32.partialorder %v10733_v57, 0.0  ;;  %7540 = vmatprep.mubr.bf16.mxu1 %v14177_v54  ;;  %7992 = vmatprep.mubr.bf16.mxu0 %v14177_v54  ;;  %v10734_v17 = vadd.f32 %v3690_v42, %v14037_v12  ;;  %v3476_v53 = vpop.f32.mrb[63].mxu1 }
 0x44d   : > { %15335 = vst [vmem:[#allocation39_spill] sm:$0xff] %v14181_v16  ;;  %v4384_v31 = vmul.f32 0.2, %v10733_v57  ;;  %vm4261_vm4 = vcmp.gt.f32.partialorder %v10702_v52, 0.0  ;;  %v4389_v39 = vmul.f32 0.2, %v10702_v52  ;;  %v10703_v26 = vadd.f32 %v3466_v15, %v14040_v20  ;;  %7541 = vmatmul.mubr.bf16.gmra.mrb[116].mxu1 %v14172_v10  ;;  %7993 = vmatmul.mubr.bf16.gmra.mrb[148].mxu0 %v14172_v10 }
 0x44e   : > { %v3702_v46 = vpop.f32.mrb[95].mxu0  ;;  %v4510_v8 = vsel %vm4254_vm2, %v10701_v41, %v4382_v62  ;;  %v10735_v9 = vadd.f32 %v3692_v30, %v14043_v24  ;;  %7592 = vmatpush1.bf16.msra.mxu1 %v11732_v11  ;;  %8044 = vmatpush1.bf16.msra.mxu0 %v11735_v29  ;;  %v11746_v6 = vld [vmem:[#allocation14 + $0x624] ss:$28 sps:$4 sm:$0xff]   ;;  %vm4263_vm5 = vcmp.gt.f32.partialorder %v10734_v17, 0.0  ;;  %v4391_v42 = vmul.f32 0.2, %v10734_v17 }
 0x44f   : > { %v4512_v55 = vsel %vm4256_vm3, %v10733_v57, %v4384_v31  ;;  %v4517_v0 = vsel %vm4261_vm4, %v10702_v52, %v4389_v39  ;;  %vm4262_vm6 = vcmp.gt.f32.partialorder %v10703_v26, 0.0  ;;  %7593 = vmatprep.subr.bf16.mxu1 %v11740_v60  ;;  %8045 = vmatprep.subr.bf16.mxu0 %v11743_v32  ;;  %v11749_v15 = vld [vmem:[#allocation14 + $0x62c] ss:$28 sps:$4 sm:$0xff]   ;;  %v4390_v22 = vmul.f32 0.2, %v10703_v26 }
 0x450   : > { %v14196_v38 = vpack.c.bf16 %v4517_v0, %v4509_v13  ;;  %vm4264_vm7 = vcmp.gt.f32.partialorder %v10735_v9, 0.0  ;;  %v4392_v41 = vmul.f32 0.2, %v10735_v9  ;;  %v4519_v57 = vsel %vm4263_vm5, %v10734_v17, %v4391_v42  ;;  %v11744_v32 = vld [vmem:[#allocation14 + $0x620] ss:$28 sps:$4 sm:$0xff]  }
 0x451   : > { %v10704_v30 = vadd.f32 %v3470_v5, %v14034_v4  ;;  %v10736_v11 = vadd.f32 %v3696_v48, %v14037_v12  ;;  %v10705_v29 = vadd.f32 %v3472_v7, %v14040_v20  ;;  %v14201_v62 = vpack.c.bf16 %v4519_v57, %v4511_v35  ;;  %v11747_v5 = vld [vmem:[#allocation14 + $0x628] ss:$28 sps:$4 sm:$0xff]   ;;  %v11752_v48 = vld [vmem:[#allocation14 + $0x65c] ss:$28 sps:$4 sm:$0xff]  }
 0x452   : > { %15336 = vst [vmem:[#allocation40_spill] sm:$0xff] %v14196_v38  ;;  %v4518_v52 = vsel %vm4262_vm6, %v10703_v26, %v4390_v22  ;;  %v4520_v31 = vsel %vm4264_vm7, %v10735_v9, %v4392_v41  ;;  %7594 = vmatpush1.bf16.msra.mxu1 %v11738_v28  ;;  %v10737_v60 = vadd.f32 %v3698_v36, %v14043_v24  ;;  %v11755_v7 = vld [vmem:[#allocation14 + $0x664] ss:$28 sps:$4 sm:$0xff]   ;;  %v11750_v36 = vld [vmem:[#allocation14 + $0x658] ss:$28 sps:$4 sm:$0xff]  }
 0x453   : > { %15337 = vst [vmem:[#allocation41_spill] sm:$0xff] %v14201_v62  ;;  %v14204_v13 = vpack.c.bf16 %v4518_v52, %v4510_v8  ;;  %v14206_v39 = vpack.c.bf16 %v4520_v31, %v4512_v55  ;;  %vm4269_vm8 = vcmp.gt.f32.partialorder %v10704_v30, 0.0  ;;  %v4397_v17 = vmul.f32 0.2, %v10704_v30  ;;  %8046 = vmatpush1.bf16.msra.mxu0 %v11741_v45  ;;  %7595 = vmatprep.subr.bf16.mxu1 %v11746_v6  ;;  %v11753_v28 = vld [vmem:[#allocation14 + $0x660] ss:$28 sps:$4 sm:$0xff]  }
 0x454   : > { %vm4271_vm9 = vcmp.gt.f32.partialorder %v10736_v11, 0.0  ;;  %8047 = vmatprep.subr.bf16.mxu0 %v11749_v15  ;;  %v4399_v35 = vmul.f32 0.2, %v10736_v11  ;;  %vm4270_vm10 = vcmp.gt.f32.partialorder %v10705_v29, 0.0  ;;  %v4398_v22 = vmul.f32 0.2, %v10705_v29 }
 0x455   : > { %15338 = vst [vmem:[#allocation42_spill] sm:$0xff] %v14206_v39  ;;  %v10706_v26 = vadd.f32 %v3474_v40, %v14034_v4  ;;  %7550 = vmatprep.mubr.bf16.mxu1 %v14204_v13  ;;  %8002 = vmatprep.mubr.bf16.mxu0 %v14204_v13  ;;  %v4525_v8 = vsel %vm4269_vm8, %v10704_v30, %v4397_v17  ;;  %vm4272_vm11 = vcmp.gt.f32.partialorder %v10737_v60, 0.0  ;;  %v11758_v45 = vld [vmem:[#allocation14 + $0x694] ss:$28 sps:$4 sm:$0xff]   ;;  %v4400_v6 = vmul.f32 0.2, %v10737_v60 }
 0x456   : > { %v10738_v55 = vadd.f32 %v14186_v3, %v14037_v12  ;;  %v10707_v9 = vadd.f32 %v3476_v53, %v14040_v20  ;;  %7551 = vmatmul.mubr.bf16.gmra.mrb[120].mxu1 %v14196_v38  ;;  %v10739_v40 = vadd.f32 %v3702_v46, %v14043_v24  ;;  %8003 = vmatmul.mubr.bf16.gmra.mrb[152].mxu0 %v14196_v38  ;;  %v11761_v41 = vld [vmem:[#allocation14 + $0x69c] ss:$28 sps:$4 sm:$0xff]  }
 0x457   : > { %vm4277_vm12 = vcmp.gt.f32.partialorder %v10706_v26, 0.0  ;;  %v4405_v4 = vmul.f32 0.2, %v10706_v26  ;;  %7596 = vmatpush1.bf16.msra.mxu1 %v11744_v32  ;;  %8048 = vmatpush1.bf16.msra.mxu0 %v11747_v5  ;;  %v4527_v12 = vsel %vm4271_vm9, %v10736_v11, %v4399_v35  ;;  %v4526_v53 = vsel %vm4270_vm10, %v10705_v29, %v4398_v22  ;;  %v11756_v11 = vld [vmem:[#allocation14 + $0x690] ss:$28 sps:$4 sm:$0xff]  }
 0x458   : > { %vm4279_vm13 = vcmp.gt.f32.partialorder %v10738_v55, 0.0  ;;  %v4407_v0 = vmul.f32 0.2, %v10738_v55  ;;  %vm4278_vm14 = vcmp.gt.f32.partialorder %v10707_v9, 0.0  ;;  %v4406_v42 = vmul.f32 0.2, %v10707_v9  ;;  %7597 = vmatprep.subr.bf16.mxu1 %v11752_v48  ;;  %8049 = vmatprep.subr.bf16.mxu0 %v11755_v7 }
 0x459   : > { %v4533_v20 = vsel %vm4277_vm12, %v10706_v26, %v4405_v4  ;;  %vm4280_vm15 = vcmp.gt.f32.partialorder %v10739_v40, 0.0  ;;  %v4408_v3 = vmul.f32 0.2, %v10739_v40  ;;  %v4528_v57 = vsel %vm4272_vm11, %v10737_v60, %v4400_v6  ;;  %v11759_v17 = vld [vmem:[#allocation14 + $0x698] ss:$28 sps:$4 sm:$0xff]  }
 0x45a   : > { %v14220_v15 = vpack.c.bf16 %v4533_v20, %v4525_v8  ;;  %v4535_v24 = vsel %vm4279_vm13, %v10738_v55, %v4407_v0  ;;  %v4534_v46 = vsel %vm4278_vm14, %v10707_v9, %v4406_v42  ;;  %v11764_v29 = vld [vmem:[#allocation14 + $0x6cc] ss:$28 sps:$4 sm:$0xff]   ;;  %v11767_v60 = vld [vmem:[#allocation14 + $0x6d4] ss:$28 sps:$4 sm:$0xff]   ;;  %v11770_v7 = vld [vmem:[#allocation14 + $0x704] ss:$28 sps:$4 sm:$0xff]  }
 0x45b   : > { %v14223_v30 = vpack.c.bf16 %v4535_v24, %v4527_v12  ;;  %v14225_v52 = vpack.c.bf16 %v4534_v46, %v4526_v53  ;;  %v4536_v31 = vsel %vm4280_vm15, %v10739_v40, %v4408_v3  ;;  %7598 = vmatpush1.bf16.msra.mxu1 %v11750_v36  ;;  %8050 = vmatpush1.bf16.msra.mxu0 %v11753_v28  ;;  %v11762_v5 = vld [vmem:[#allocation14 + $0x6c8] ss:$28 sps:$4 sm:$0xff]   ;;  %v11765_v48 = vld [vmem:[#allocation14 + $0x6d0] ss:$28 sps:$4 sm:$0xff]   ;;  %v11768_v22 = vld [vmem:[#allocation14 + $0x700] ss:$28 sps:$4 sm:$0xff]  }
 0x45c   : > { %15339 = vst [vmem:[#allocation45_spill] sm:$0xff] %v14220_v15  ;;  %v14227_v32 = vpack.c.bf16 %v4536_v31, %v4528_v57  ;;  %7599 = vmatprep.subr.bf16.mxu1 %v11758_v45  ;;  %8051 = vmatprep.subr.bf16.mxu0 %v11761_v41  ;;  %v11773_v35 = vld [vmem:[#allocation14 + $0x70c] ss:$28 sps:$4 sm:$0xff]   ;;  %v11776_v36 = vld [vmem:[#allocation14 + $0x73c] ss:$28 sps:$4 sm:$0xff]  }
 0x45d   : > { %15340 = vst [vmem:[#allocation46_spill] sm:$0xff] %v14223_v30  ;;  %15341 = vst [vmem:[#allocation43_spill] sm:$0xff] %v14225_v52  ;;  %7560 = vmatprep.mubr.bf16.mxu1 %v14225_v52  ;;  %8012 = vmatprep.mubr.bf16.mxu0 %v14225_v52  ;;  %v11771_v26 = vld [vmem:[#allocation14 + $0x708] ss:$28 sps:$4 sm:$0xff]   ;;  %v11774_v55 = vld [vmem:[#allocation14 + $0x738] ss:$28 sps:$4 sm:$0xff]  }
 0x45e   : > { %15342 = vst [vmem:[#allocation44_spill] sm:$0xff] %v14227_v32  ;;  %7561 = vmatmul.mubr.bf16.gmra.mrb[124].mxu1 %v14220_v15  ;;  %8013 = vmatmul.mubr.bf16.gmra.mrb[156].mxu0 %v14220_v15  ;;  %v11779_v8 = vld [vmem:[#allocation14 + $0x744] ss:$28 sps:$4 sm:$0xff]   ;;  %v11782_v9 = vld [vmem:[#allocation14 + $0x774] ss:$28 sps:$4 sm:$0xff]  }
 0x45f   : > { %7600 = vmatpush1.bf16.msra.mxu1 %v11756_v11  ;;  %7603 = vmatprep.mubr.bf16.mxu1 %v14064_v2  ;;  %v11777_v28 = vld [vmem:[#allocation14 + $0x740] ss:$28 sps:$4 sm:$0xff]   ;;  %v11780_v6 = vld [vmem:[#allocation14 + $0x770] ss:$28 sps:$4 sm:$0xff]   ;;  %v11783_v4 = vld [vmem:[#allocation14 + $0x778] ss:$28 sps:$4 sm:$0xff]  }
 0x460   : > { %8052 = vmatpush1.bf16.msra.mxu0 %v11759_v17  ;;  %8055 = vmatprep.mubr.bf16.mxu0 %v14064_v2  ;;  %v11785_v45 = vld [vmem:[#allocation14 + $0x77c] ss:$28 sps:$4 sm:$0xff]   ;;  %v11788_v40 = vld [vmem:[#allocation14 + $0x7ac] ss:$28 sps:$4 sm:$0xff]   ;;  %v11791_v0 = vld [vmem:[#allocation14 + $0x7b4] ss:$28 sps:$4 sm:$0xff]  }
 0x461   : > { %7601 = vmatprep.subr.bf16.mxu1 %v11764_v29  ;;  %8053 = vmatprep.subr.bf16.mxu0 %v11767_v60  ;;  %v11786_v42 = vld [vmem:[#allocation14 + $0x7a8] ss:$28 sps:$4 sm:$0xff]   ;;  %v11789_v20 = vld [vmem:[#allocation14 + $0x7b0] ss:$28 sps:$4 sm:$0xff]   ;;  %v11792_v53 = vld [vmem:[#allocation14 + $0x7e0] ss:$28 sps:$4 sm:$0xff]  }
 0x462   : > { %v11794_v12 = vld [vmem:[#allocation14 + $0x7e4] ss:$28 sps:$4 sm:$0xff]   ;;  %v11797_v3 = vld [vmem:[#allocation14 + $0x7ec] ss:$28 sps:$4 sm:$0xff]   ;;  %v11800_v46 = vld [vmem:[#allocation14 + $0x81c] ss:$28 sps:$4 sm:$0xff]  }
 0x463   : > { %7602 = vmatpush1.bf16.msra.mxu1 %v11762_v5  ;;  %v11795_v24 = vld [vmem:[#allocation14 + $0x7e8] ss:$28 sps:$4 sm:$0xff]   ;;  %v11798_v57 = vld [vmem:[#allocation14 + $0x818] ss:$28 sps:$4 sm:$0xff]   ;;  %v11801_v11 = vld [vmem:[#allocation14 + $0x820] ss:$28 sps:$4 sm:$0xff]  }
 0x464   : > { %8054 = vmatpush1.bf16.msra.mxu0 %v11765_v48  ;;  %7684 = vmatprep.subr.bf16.mxu1 %v11770_v7  ;;  %v11803_v41 = vld [vmem:[#allocation14 + $0x824] ss:$28 sps:$4 sm:$0xff]   ;;  %v11806_v31 = vld [vmem:[#allocation14 + $0x854] ss:$28 sps:$4 sm:$0xff]   ;;  %v11809_v17 = vld [vmem:[#allocation14 + $0x85c] ss:$28 sps:$4 sm:$0xff]  }
 0x465   : > { %8136 = vmatprep.subr.bf16.mxu0 %v11773_v35  ;;  %v11804_v29 = vld [vmem:[#allocation14 + $0x850] ss:$28 sps:$4 sm:$0xff]   ;;  %v11807_v60 = vld [vmem:[#allocation14 + $0x858] ss:$28 sps:$4 sm:$0xff]   ;;  %v11810_v7 = vld [vmem:[#allocation14 + $0x888] ss:$28 sps:$4 sm:$0xff]  }
 0x466   : > { %7604 = vmatmul.mubr.bf16.vlgmr.msra.gmra.mrb[96].mxu1 %v14057_v44  ;;  %v11812_v5 = vld [vmem:[#allocation14 + $0x88c] ss:$28 sps:$4 sm:$0xff]   ;;  %v11815_v48 = vld [vmem:[#allocation14 + $0x894] ss:$28 sps:$4 sm:$0xff]   ;;  %v11818_v35 = vld [vmem:[#allocation14 + $0x8c4] ss:$28 sps:$4 sm:$0xff]  }
 0x467   : > { %7685 = vmatpush1.bf16.msra.mxu1 %v11768_v22  ;;  %8056 = vmatmul.mubr.bf16.vlgmr.msra.gmra.mrb[128].mxu0 %v14057_v44  ;;  %v11813_v22 = vld [vmem:[#allocation14 + $0x890] ss:$28 sps:$4 sm:$0xff]  }
 0x468   : > { %7613 = vmatprep.mubr.bf16.mxu1 %v14083_v18  ;;  %8065 = vmatprep.mubr.bf16.mxu0 %v14083_v18 }
 0x469   : > { %8137 = vmatpush1.bf16.msra.mxu0 %v11771_v26  ;;  %7686 = vmatprep.subr.bf16.mxu1 %v11776_v36  ;;  %v11821_v26 = vld [vmem:[#allocation14 + $0x8cc] ss:$28 sps:$4 sm:$0xff]   ;;  %v11816_v36 = vld [vmem:[#allocation14 + $0x8c0] ss:$28 sps:$4 sm:$0xff]  }
 0x46a   : > { %8138 = vmatprep.subr.bf16.mxu0 %v11779_v8  ;;  %v11819_v8 = vld [vmem:[#allocation14 + $0x8c8] ss:$28 sps:$4 sm:$0xff]  }
 0x46b   : > { %7687 = vmatpush1.bf16.msra.mxu1 %v11774_v55  ;;  %v11824_v55 = vld [vmem:[#allocation14 + $0x8fc] ss:$28 sps:$4 sm:$0xff]  }
 0x46c   : > { %7688 = vmatprep.subr.bf16.mxu1 %v11782_v9  ;;  %v11827_v9 = vld [vmem:[#allocation14 + $0x904] ss:$28 sps:$4 sm:$0xff]  }
 0x46d   : > { %8139 = vmatpush1.bf16.msra.mxu0 %v11777_v28  ;;  %v11822_v28 = vld [vmem:[#allocation14 + $0x8f8] ss:$28 sps:$4 sm:$0xff]  }
 0x46e   : > { %7614 = vmatmul.mubr.bf16.gmra.mrb[100].mxu1 %v14079_v21  ;;  %8140 = vmatprep.subr.bf16.mxu0 %v11785_v45  ;;  %v11830_v45 = vld [vmem:[#allocation14 + $0x934] ss:$28 sps:$4 sm:$0xff]  }
 0x46f   : > { %7689 = vmatpush1.bf16.msra.mxu1 %v11780_v6  ;;  %8066 = vmatmul.mubr.bf16.gmra.mrb[132].mxu0 %v14079_v21  ;;  %v11825_v6 = vld [vmem:[#allocation14 + $0x900] ss:$28 sps:$4 sm:$0xff]  }
 0x470   : > { %7623 = vmatprep.mubr.bf16.mxu1 %v14107_v27  ;;  %8075 = vmatprep.mubr.bf16.mxu0 %v14107_v27 }
 0x471   : > { %8141 = vmatpush1.bf16.msra.mxu0 %v11783_v4  ;;  %7690 = vmatprep.subr.bf16.mxu1 %v11788_v40  ;;  %v15343_v4 = vld [vmem:[#allocation24_spill] sm:$0xff] }
 0x472   : > { %8142 = vmatprep.subr.bf16.mxu0 %v11791_v0  ;;  %v15119_v40 = vsub.s32 4, %v15343_v4  ;;  %v11833_v0 = vld [vmem:[#allocation14 + $0x93c] ss:$28 sps:$4 sm:$0xff]  }
 0x473   : > { %7691 = vmatpush1.bf16.msra.mxu1 %v11786_v42  ;;  %v15118_v42 = vsub.s32 5, %v15343_v4 }
 0x474   : > { %7692 = vmatprep.subr.bf16.mxu1 %v11794_v12  ;;  %v11828_v12 = vld [vmem:[#allocation14 + $0x930] ss:$28 sps:$4 sm:$0xff]  }
 0x475   : > { %8143 = vmatpush1.bf16.msra.mxu0 %v11789_v20  ;;  %v15120_v20 = vsub.s32 6, %v15343_v4 }
 0x476   : > { %7624 = vmatmul.mubr.bf16.gmra.mrb[104].mxu1 %v14099_v59  ;;  %8144 = vmatprep.subr.bf16.mxu0 %v11797_v3  ;;  %v1963_v3 = vsub.s32 7, %v15343_v4 }
 0x477   : > { %7693 = vmatpush1.bf16.msra.mxu1 %v11792_v53  ;;  %8076 = vmatmul.mubr.bf16.gmra.mrb[136].mxu0 %v14099_v59  ;;  %v11831_v53 = vld [vmem:[#allocation14 + $0x938] ss:$28 sps:$4 sm:$0xff]   ;;  %v11899_v59 = vld [vmem:[#allocation14 + $0xba4] ss:$28 sps:$4 sm:$0xff]  }
 0x478   : > { %7633 = vmatprep.mubr.bf16.mxu1 %v14131_v58  ;;  %8085 = vmatprep.mubr.bf16.mxu0 %v14131_v58  ;;  %v11894_v58 = vld [vmem:[#allocation14 + $0xb98] ss:$28 sps:$4 sm:$0xff]  }
 0x479   : > { %8145 = vmatpush1.bf16.msra.mxu0 %v11795_v24  ;;  %7694 = vmatprep.subr.bf16.mxu1 %v11800_v46  ;;  %v11836_v24 = vld [vmem:[#allocation14 + $0x96c] ss:$28 sps:$4 sm:$0xff]   ;;  %v12440_v46 = vld [vmem:[#allocation13] sm:$0xff] }
 0x47a   : > { %8146 = vmatprep.subr.bf16.mxu0 %v11803_v41  ;;  %v14261_v41 = vrot.slane %v12440_v46, %v15119_v40 }
 0x47b   : > { %7695 = vmatpush1.bf16.msra.mxu1 %v11798_v57  ;;  %v11839_v57 = vld [vmem:[#allocation14 + $0x974] ss:$28 sps:$4 sm:$0xff]  }
 0x47c   : > { %7696 = vmatprep.subr.bf16.mxu1 %v11806_v31  ;;  %v14266_v31 = vrot.slane %v12440_v46, %v15118_v42 }
 0x47d   : > { %8147 = vmatpush1.bf16.msra.mxu0 %v11801_v11  ;;  %v11834_v11 = vld [vmem:[#allocation14 + $0x968] ss:$28 sps:$4 sm:$0xff]  }
 0x47e   : > { %7634 = vmatmul.mubr.bf16.gmra.mrb[108].mxu1 %v14126_v56  ;;  %8148 = vmatprep.subr.bf16.mxu0 %v11809_v17  ;;  %v14271_v17 = vrot.slane %v12440_v46, %v15120_v20 }
 0x47f   : > { %7697 = vmatpush1.bf16.msra.mxu1 %v11804_v29  ;;  %8086 = vmatmul.mubr.bf16.gmra.mrb[140].mxu0 %v14126_v56  ;;  %v11842_v29 = vld [vmem:[#allocation14 + $0x9a4] ss:$28 sps:$4 sm:$0xff]  }
 0x480   : > { %7643 = vmatprep.mubr.bf16.mxu1 %v14161_v14  ;;  %8095 = vmatprep.mubr.bf16.mxu0 %v14161_v14  ;;  %v11882_v14 = vld [vmem:[#allocation14 + $0xb28] ss:$28 sps:$4 sm:$0xff]  }
 0x481   : > { %8149 = vmatpush1.bf16.msra.mxu0 %v11807_v60  ;;  %7698 = vmatprep.subr.bf16.mxu1 %v11812_v5  ;;  %v14275_v5 = vrot.slane %v12440_v46, %v1963_v3 }
 0x482   : > { %8150 = vmatprep.subr.bf16.mxu0 %v11815_v48  ;;  %v11837_v48 = vld [vmem:[#allocation14 + $0x970] ss:$28 sps:$4 sm:$0xff]  }
 0x483   : > { %7699 = vmatpush1.bf16.msra.mxu1 %v11810_v7 }
 0x484   : > { %7700 = vmatprep.subr.bf16.mxu1 %v11818_v35 }
 0x485   : > { %8151 = vmatpush1.bf16.msra.mxu0 %v11813_v22  ;;  %v11840_v22 = vld [vmem:[#allocation14 + $0x9a0] ss:$28 sps:$4 sm:$0xff]  }
 0x486   : > { %7644 = vmatmul.mubr.bf16.gmra.mrb[112].mxu1 %v14152_v37  ;;  %8152 = vmatprep.subr.bf16.mxu0 %v11821_v26  ;;  %v11845_v26 = vld [vmem:[#allocation14 + $0x9ac] ss:$28 sps:$4 sm:$0xff]  }
 0x487   : > { %7701 = vmatpush1.bf16.msra.mxu1 %v11816_v36  ;;  %8096 = vmatmul.mubr.bf16.gmra.mrb[144].mxu0 %v14152_v37  ;;  %v11879_v37 = vld [vmem:[#allocation14 + $0xaf8] ss:$28 sps:$4 sm:$0xff]  }
 0x488   : > { %7653 = vmatprep.mubr.bf16.mxu1 %v14181_v16  ;;  %8105 = vmatprep.mubr.bf16.mxu0 %v14181_v16  ;;  %v11881_v16 = vld [vmem:[#allocation14 + $0xafc] ss:$28 sps:$4 sm:$0xff]  }
 0x489   : > { %8153 = vmatpush1.bf16.msra.mxu0 %v11819_v8  ;;  %7702 = vmatprep.subr.bf16.mxu1 %v11824_v55 }
 0x48a   : > { %8154 = vmatprep.subr.bf16.mxu0 %v11827_v9  ;;  %v11843_v9 = vld [vmem:[#allocation14 + $0x9a8] ss:$28 sps:$4 sm:$0xff]  }
 0x48b   : > { %7703 = vmatpush1.bf16.msra.mxu1 %v11822_v28  ;;  %v11848_v28 = vld [vmem:[#allocation14 + $0x9dc] ss:$28 sps:$4 sm:$0xff]  }
 0x48c   : > { %7704 = vmatprep.subr.bf16.mxu1 %v11830_v45 }
 0x48d   : > { %8155 = vmatpush1.bf16.msra.mxu0 %v11825_v6 }
 0x48e   : > { %7654 = vmatmul.mubr.bf16.gmra.mrb[116].mxu1 %v14175_v33  ;;  %8156 = vmatprep.subr.bf16.mxu0 %v11833_v0 }
 0x48f   : > { %7705 = vmatpush1.bf16.msra.mxu1 %v11828_v12  ;;  %8106 = vmatmul.mubr.bf16.gmra.mrb[148].mxu0 %v14175_v33 }
 0x490   : > { %7663 = vmatprep.mubr.bf16.mxu1 %v14206_v39  ;;  %8115 = vmatprep.mubr.bf16.mxu0 %v14206_v39  ;;  %v3852_v60 = vpop.f32.mrb[64].mxu1 }
 0x491   : > { %8157 = vmatpush1.bf16.msra.mxu0 %v11831_v53  ;;  %7706 = vmatprep.subr.bf16.mxu1 %v11836_v24  ;;  %v10740_v7 = vadd.f32 %v3852_v60, %v14261_v41  ;;  %v3854_v35 = vpop.f32.mrb[65].mxu1  ;;  %v11851_v53 = vld [vmem:[#allocation14 + $0x9e4] ss:$28 sps:$4 sm:$0xff]  }
 0x492   : > { %8158 = vmatprep.subr.bf16.mxu0 %v11839_v57  ;;  %v4078_v36 = vpop.f32.mrb[96].mxu0  ;;  %v10741_v8 = vadd.f32 %v3854_v35, %v14266_v31  ;;  %v3856_v55 = vpop.f32.mrb[66].mxu1 }
 0x493   : > { %7707 = vmatpush1.bf16.msra.mxu1 %v11834_v11  ;;  %vm4161_vm0 = vcmp.gt.f32.partialorder %v10740_v7, 0.0  ;;  %v4289_v45 = vmul.f32 0.2, %v10740_v7  ;;  %v10772_v6 = vadd.f32 %v4078_v36, %v14271_v17  ;;  %v4080_v0 = vpop.f32.mrb[97].mxu0  ;;  %v10742_v12 = vadd.f32 %v3856_v55, %v14261_v41  ;;  %v3858_v3 = vpop.f32.mrb[67].mxu1 }
 0x494   : > { %7708 = vmatprep.subr.bf16.mxu1 %v11842_v29  ;;  %vm4162_vm1 = vcmp.gt.f32.partialorder %v10741_v8, 0.0  ;;  %v4290_v24 = vmul.f32 0.2, %v10741_v8  ;;  %v10773_v46 = vadd.f32 %v4080_v0, %v14275_v5  ;;  %v4082_v57 = vpop.f32.mrb[98].mxu0  ;;  %v10743_v60 = vadd.f32 %v3858_v3, %v14266_v31  ;;  %v11846_v0 = vld [vmem:[#allocation14 + $0x9d8] ss:$28 sps:$4 sm:$0xff]  }
 0x495   : > { %8159 = vmatpush1.bf16.msra.mxu0 %v11837_v48  ;;  %v4417_v11 = vsel %vm4161_vm0, %v10740_v7, %v4289_v45  ;;  %vm4163_vm2 = vcmp.gt.f32.partialorder %v10772_v6, 0.0  ;;  %v4291_v35 = vmul.f32 0.2, %v10772_v6  ;;  %vm4169_vm3 = vcmp.gt.f32.partialorder %v10742_v12, 0.0  ;;  %v4084_v42 = vpop.f32.mrb[99].mxu0 }
 0x496   : > { %7664 = vmatmul.mubr.bf16.gmra.mrb[120].mxu1 %v14201_v62  ;;  %8160 = vmatprep.subr.bf16.mxu0 %v11845_v26  ;;  %v4418_v36 = vsel %vm4162_vm1, %v10741_v8, %v4290_v24  ;;  %vm4164_vm4 = vcmp.gt.f32.partialorder %v10773_v46, 0.0  ;;  %v4292_v29 = vmul.f32 0.2, %v10773_v46  ;;  %v4297_v55 = vmul.f32 0.2, %v10742_v12 }
 0x497   : > { %7709 = vmatpush1.bf16.msra.mxu1 %v11840_v22  ;;  %8116 = vmatmul.mubr.bf16.gmra.mrb[152].mxu0 %v14201_v62  ;;  %v4419_v40 = vsel %vm4163_vm2, %v10772_v6, %v4291_v35  ;;  %v10774_v3 = vadd.f32 %v4082_v57, %v14271_v17  ;;  %vm4170_vm5 = vcmp.gt.f32.partialorder %v10743_v60, 0.0  ;;  %v4298_v48 = vmul.f32 0.2, %v10743_v60  ;;  %v11849_v7 = vld [vmem:[#allocation14 + $0x9e0] ss:$28 sps:$4 sm:$0xff]  }
 0x498   : > { %7673 = vmatprep.mubr.bf16.mxu1 %v14227_v32  ;;  %8125 = vmatprep.mubr.bf16.mxu0 %v14227_v32  ;;  %v4420_v45 = vsel %vm4164_vm4, %v10773_v46, %v4292_v29  ;;  %v4425_v26 = vsel %vm4169_vm3, %v10742_v12, %v4297_v55  ;;  %v10775_v8 = vadd.f32 %v4084_v42, %v14275_v5  ;;  %v11854_v24 = vld [vmem:[#allocation14 + $0xa14] ss:$28 sps:$4 sm:$0xff]   ;;  %v3862_v22 = vpop.f32.mrb[68].mxu1  ;;  %v11857_v35 = vld [vmem:[#allocation14 + $0xa1c] ss:$28 sps:$4 sm:$0xff]  }
 0x499   : > { %8161 = vmatpush1.bf16.msra.mxu0 %v11843_v9  ;;  %7710 = vmatprep.subr.bf16.mxu1 %v11848_v28  ;;  %v14290_v20 = vpack.c.bf16 %v4425_v26, %v4417_v11  ;;  %vm4171_vm6 = vcmp.gt.f32.partialorder %v10774_v3, 0.0  ;;  %v4299_v6 = vmul.f32 0.2, %v10774_v3  ;;  %v4426_v57 = vsel %vm4170_vm5, %v10743_v60, %v4298_v48  ;;  %v3864_v4 = vpop.f32.mrb[69].mxu1  ;;  %v11852_v9 = vld [vmem:[#allocation14 + $0xa10] ss:$28 sps:$4 sm:$0xff]  }
 0x49a   : > { %8162 = vmatprep.subr.bf16.mxu0 %v11851_v53  ;;  %v14292_v63 = vpack.c.bf16 %v4426_v57, %v4418_v36  ;;  %vm4172_vm7 = vcmp.gt.f32.partialorder %v10775_v8, 0.0  ;;  %v4300_v46 = vmul.f32 0.2, %v10775_v8  ;;  %v10744_v12 = vadd.f32 %v3862_v22, %v14261_v41  ;;  %v4088_v29 = vpop.f32.mrb[100].mxu0  ;;  %v3866_v42 = vpop.f32.mrb[70].mxu1 }
 0x49b   : > { %15344 = vst [vmem:[#allocation49_spill] sm:$0xff] %v14290_v20  ;;  %7711 = vmatpush1.bf16.msra.mxu1 %v11846_v0  ;;  %v4427_v55 = vsel %vm4171_vm6, %v10774_v3, %v4299_v6  ;;  %v11855_v28 = vld [vmem:[#allocation14 + $0xa18] ss:$28 sps:$4 sm:$0xff]   ;;  %v10776_v11 = vadd.f32 %v4088_v29, %v14271_v17  ;;  %v10745_v26 = vadd.f32 %v3864_v4, %v14266_v31  ;;  %v4090_v60 = vpop.f32.mrb[101].mxu0  ;;  %v3868_v53 = vpop.f32.mrb[71].mxu1 }
 0x49c   : > { %15345 = vst [vmem:[#allocation50_spill] sm:$0xff] %v14292_v63  ;;  %v10746_v48 = vadd.f32 %v3866_v42, %v14261_v41  ;;  %v14298_v36 = vpack.c.bf16 %v4427_v55, %v4419_v40  ;;  %v4428_v57 = vsel %vm4172_vm7, %v10775_v8, %v4300_v46  ;;  %7712 = vmatprep.subr.bf16.mxu1 %v11854_v24  ;;  %vm4177_vm8 = vcmp.gt.f32.partialorder %v10744_v12, 0.0  ;;  %v4092_v32 = vpop.f32.mrb[102].mxu0  ;;  %v11858_v3 = vld [vmem:[#allocation14 + $0xa48] ss:$28 sps:$4 sm:$0xff]  }
 0x49d   : > { %v4305_v22 = vmul.f32 0.2, %v10744_v12  ;;  %8163 = vmatpush1.bf16.msra.mxu0 %v11849_v7  ;;  %v14300_v0 = vpack.c.bf16 %v4428_v57, %v4420_v45  ;;  %vm4179_vm9 = vcmp.gt.f32.partialorder %v10776_v11, 0.0  ;;  %v4307_v6 = vmul.f32 0.2, %v10776_v11  ;;  %v4094_v4 = vpop.f32.mrb[103].mxu0 }
 0x49e   : > { %vm4178_vm10 = vcmp.gt.f32.partialorder %v10745_v26, 0.0  ;;  %7674 = vmatmul.mubr.bf16.gmra.mrb[124].mxu1 %v14223_v30  ;;  %8164 = vmatprep.subr.bf16.mxu0 %v11857_v35  ;;  %v11863_v40 = vld [vmem:[#allocation14 + $0xa54] ss:$28 sps:$4 sm:$0xff]   ;;  %v4306_v42 = vmul.f32 0.2, %v10745_v26  ;;  %v10777_v8 = vadd.f32 %v4090_v60, %v14275_v5  ;;  %vm4185_vm11 = vcmp.gt.f32.partialorder %v10746_v48, 0.0 }
 0x49f   : > { %v4433_v29 = vsel %vm4177_vm8, %v10744_v12, %v4305_v22  ;;  %7713 = vmatpush1.bf16.msra.mxu1 %v11852_v9  ;;  %8126 = vmatmul.mubr.bf16.gmra.mrb[156].mxu0 %v14223_v30  ;;  %v4435_v7 = vsel %vm4179_vm9, %v10776_v11, %v4307_v6  ;;  %v11861_v45 = vld [vmem:[#allocation14 + $0xa50] ss:$28 sps:$4 sm:$0xff]   ;;  %v4313_v24 = vmul.f32 0.2, %v10746_v48  ;;  %v10778_v46 = vadd.f32 %v4092_v32, %v14271_v17  ;;  %v11866_v57 = vld [vmem:[#allocation14 + $0xa84] ss:$28 sps:$4 sm:$0xff]  }
 0x4a0   : > { %v10747_v55 = vadd.f32 %v3868_v53, %v14266_v31  ;;  %7714 = vmatprep.subr.bf16.mxu1 %v11860_v50  ;;  %v4434_v35 = vsel %vm4178_vm10, %v10745_v26, %v4306_v42  ;;  %vm4180_vm12 = vcmp.gt.f32.partialorder %v10777_v8, 0.0  ;;  %v4308_v12 = vmul.f32 0.2, %v10777_v8  ;;  %7716 = vmatprep.mubr.bf16.mxu1 %v14292_v63  ;;  %v11869_v9 = vld [vmem:[#allocation14 + $0xa8c] ss:$28 sps:$4 sm:$0xff]   ;;  %v3872_v60 = vpop.f32.mrb[72].mxu1 }
 0x4a1   : > { %v10779_v22 = vadd.f32 %v4094_v4, %v14275_v5  ;;  %8165 = vmatpush1.bf16.msra.mxu0 %v11855_v28  ;;  %v4441_v11 = vsel %vm4185_vm11, %v10746_v48, %v4313_v24  ;;  %vm4187_vm13 = vcmp.gt.f32.partialorder %v10778_v46, 0.0  ;;  %v4315_v6 = vmul.f32 0.2, %v10778_v46  ;;  %8168 = vmatprep.mubr.bf16.mxu0 %v14292_v63  ;;  %v3874_v32 = vpop.f32.mrb[73].mxu1  ;;  %v11864_v28 = vld [vmem:[#allocation14 + $0xa80] ss:$28 sps:$4 sm:$0xff]  }
 0x4a2   : > { %vm4186_vm14 = vcmp.gt.f32.partialorder %v10747_v55, 0.0  ;;  %8166 = vmatprep.subr.bf16.mxu0 %v11863_v40  ;;  %v4436_v50 = vsel %vm4180_vm12, %v10777_v8, %v4308_v12  ;;  %v14312_v26 = vpack.c.bf16 %v4441_v11, %v4433_v29  ;;  %v4314_v53 = vmul.f32 0.2, %v10747_v55  ;;  %v4098_v4 = vpop.f32.mrb[104].mxu0  ;;  %v3876_v42 = vpop.f32.mrb[74].mxu1 }
 0x4a3   : > { %vm4188_vm15 = vcmp.gt.f32.partialorder %v10779_v22, 0.0  ;;  %7715 = vmatpush1.bf16.msra.mxu1 %v11858_v3  ;;  %v4443_v30 = vsel %vm4187_vm13, %v10778_v46, %v4315_v6  ;;  %v4316_v62 = vmul.f32 0.2, %v10779_v22  ;;  %v10748_v48 = vadd.f32 %v3872_v60, %v14261_v41  ;;  %v4100_v39 = vpop.f32.mrb[105].mxu0  ;;  %v3878_v33 = vpop.f32.mrb[75].mxu1 }
 0x4a4   : > { %15346 = vst [vmem:[#allocation47_spill] sm:$0xff] %v14312_v26  ;;  %v10780_v24 = vadd.f32 %v4098_v4, %v14271_v17  ;;  %v14316_v63 = vpack.c.bf16 %v4443_v30, %v4435_v7  ;;  %v4442_v40 = vsel %vm4186_vm14, %v10747_v55, %v4314_v53  ;;  %7797 = vmatprep.subr.bf16.mxu1 %v11866_v57  ;;  %v11867_v29 = vld [vmem:[#allocation14 + $0xa88] ss:$28 sps:$4 sm:$0xff]   ;;  %v11872_v8 = vld [vmem:[#allocation14 + $0xabc] ss:$28 sps:$4 sm:$0xff]   ;;  %v4102_v46 = vpop.f32.mrb[106].mxu0 }
 0x4a5   : > { %v10749_v12 = vadd.f32 %v3874_v32, %v14266_v31  ;;  %v10781_v3 = vadd.f32 %v4100_v39, %v14275_v5  ;;  %8167 = vmatpush1.bf16.msra.mxu0 %v11861_v45  ;;  %v14321_v11 = vpack.c.bf16 %v4442_v40, %v4434_v35  ;;  %v4444_v60 = vsel %vm4188_vm15, %v10779_v22, %v4316_v62  ;;  %v11870_v6 = vld [vmem:[#allocation14 + $0xab8] ss:$28 sps:$4 sm:$0xff]   ;;  %v4104_v30 = vpop.f32.mrb[107].mxu0  ;;  %v11875_v57 = vld [vmem:[#allocation14 + $0xac4] ss:$28 sps:$4 sm:$0xff]  }
 0x4a6   : > { %vm4193_vm0 = vcmp.gt.f32.partialorder %v10748_v48, 0.0  ;;  %v4321_v4 = vmul.f32 0.2, %v10748_v48  ;;  %v14324_v7 = vpack.c.bf16 %v4444_v60, %v4436_v50  ;;  %7717 = vmatmul.mubr.bf16.vlgmr.msra.gmra.mrb[96].mxu1 %v14290_v20  ;;  %8249 = vmatprep.subr.bf16.mxu0 %v11869_v9  ;;  %vm4195_vm1 = vcmp.gt.f32.partialorder %v10780_v24, 0.0  ;;  %v11873_v22 = vld [vmem:[#allocation14 + $0xac0] ss:$28 sps:$4 sm:$0xff]  }
 0x4a7   : > { %15347 = vst [vmem:[#allocation48_spill] sm:$0xff] %v14321_v11  ;;  %v4323_v55 = vmul.f32 0.2, %v10780_v24  ;;  %vm4194_vm2 = vcmp.gt.f32.partialorder %v10749_v12, 0.0  ;;  %7798 = vmatpush1.bf16.msra.mxu1 %v11864_v28  ;;  %v4322_v45 = vmul.f32 0.2, %v10749_v12  ;;  %7726 = vmatprep.mubr.bf16.mxu1 %v14321_v11  ;;  %v10750_v32 = vadd.f32 %v3876_v42, %v14261_v41 }
 0x4a8   : > { %v4449_v39 = vsel %vm4193_vm0, %v10748_v48, %v4321_v4  ;;  %vm4196_vm3 = vcmp.gt.f32.partialorder %v10781_v3, 0.0  ;;  %v4324_v35 = vmul.f32 0.2, %v10781_v3  ;;  %8169 = vmatmul.mubr.bf16.vlgmr.msra.gmra.mrb[128].mxu0 %v14290_v20  ;;  %7799 = vmatprep.subr.bf16.mxu1 %v11872_v8  ;;  %v10782_v9 = vadd.f32 %v4102_v46, %v14271_v17  ;;  %v11878_v50 = vld [vmem:[#allocation14 + $0xaf4] ss:$28 sps:$4 sm:$0xff]   ;;  %v3882_v53 = vpop.f32.mrb[76].mxu1 }
 0x4a9   : > { %v4451_v62 = vsel %vm4195_vm1, %v10780_v24, %v4323_v55  ;;  %8250 = vmatpush1.bf16.msra.mxu0 %v11867_v29  ;;  %v4450_v28 = vsel %vm4194_vm2, %v10749_v12, %v4322_v45  ;;  %v10751_v40 = vadd.f32 %v3878_v33, %v14266_v31  ;;  %v10783_v60 = vadd.f32 %v4104_v30, %v14275_v5  ;;  %v11876_v4 = vld [vmem:[#allocation14 + $0xaf0] ss:$28 sps:$4 sm:$0xff]   ;;  %v3884_v20 = vpop.f32.mrb[77].mxu1 }
 0x4aa   : > { %v4452_v48 = vsel %vm4196_vm3, %v10781_v3, %v4324_v35  ;;  %8251 = vmatprep.subr.bf16.mxu0 %v11875_v57  ;;  %vm4201_vm4 = vcmp.gt.f32.partialorder %v10750_v32, 0.0  ;;  %v4329_v24 = vmul.f32 0.2, %v10750_v32  ;;  %vm4203_vm5 = vcmp.gt.f32.partialorder %v10782_v9, 0.0  ;;  %8178 = vmatprep.mubr.bf16.mxu0 %v14321_v11  ;;  %v11884_v33 = vld [vmem:[#allocation14 + $0xb2c] ss:$28 sps:$4 sm:$0xff]  }
 0x4ab   : > { %v4331_v42 = vmul.f32 0.2, %v10782_v9  ;;  %7800 = vmatpush1.bf16.msra.mxu1 %v11870_v6  ;;  %vm4202_vm6 = vcmp.gt.f32.partialorder %v10751_v40, 0.0  ;;  %v4330_v29 = vmul.f32 0.2, %v10751_v40  ;;  %vm4204_vm7 = vcmp.gt.f32.partialorder %v10783_v60, 0.0 }
 0x4ac   : > { %v4332_v8 = vmul.f32 0.2, %v10783_v60  ;;  %v4457_v12 = vsel %vm4201_vm4, %v10750_v32, %v4329_v24  ;;  %7801 = vmatprep.subr.bf16.mxu1 %v11878_v50  ;;  %v10752_v46 = vadd.f32 %v3882_v53, %v14261_v41  ;;  %v4108_v30 = vpop.f32.mrb[108].mxu0  ;;  %v10753_v55 = vadd.f32 %v3884_v20, %v14266_v31  ;;  %v3886_v57 = vpop.f32.mrb[78].mxu1  ;;  %v11885_v53 = vld [vmem:[#allocation14 + $0xb30] ss:$28 sps:$4 sm:$0xff]  }
 0x4ad   : > { %v4459_v3 = vsel %vm4203_vm5, %v10782_v9, %v4331_v42  ;;  %8252 = vmatpush1.bf16.msra.mxu0 %v11873_v22  ;;  %v14337_v45 = vpack.c.bf16 %v4457_v12, %v4449_v39  ;;  %v4458_v6 = vsel %vm4202_vm6, %v10751_v40, %v4330_v29  ;;  %v4110_v56 = vpop.f32.mrb[109].mxu0  ;;  %v3888_v32 = vpop.f32.mrb[79].mxu1  ;;  %v11887_v22 = vld [vmem:[#allocation14 + $0xb34] ss:$28 sps:$4 sm:$0xff]   ;;  %v11893_v42 = vld [vmem:[#allocation14 + $0xb6c] ss:$28 sps:$4 sm:$0xff]  }
 0x4ae   : > { %v14339_v35 = vpack.c.bf16 %v4459_v3, %v4451_v62  ;;  %v4460_v11 = vsel %vm4204_vm7, %v10783_v60, %v4332_v8  ;;  %v14341_v9 = vpack.c.bf16 %v4458_v6, %v4450_v28  ;;  %7727 = vmatmul.mubr.bf16.gmra.mrb[100].mxu1 %v14312_v26  ;;  %8253 = vmatprep.subr.bf16.mxu0 %v11881_v16  ;;  %vm4209_vm8 = vcmp.gt.f32.partialorder %v10752_v46, 0.0  ;;  %v4112_v39 = vpop.f32.mrb[110].mxu0 }
 0x4af   : > { %15348 = vst [vmem:[#allocation51_spill] sm:$0xff] %v14337_v45  ;;  %v14343_v50 = vpack.c.bf16 %v4460_v11, %v4452_v48  ;;  %v4337_v20 = vmul.f32 0.2, %v10752_v46  ;;  %7802 = vmatpush1.bf16.msra.mxu1 %v11876_v4  ;;  %v10784_v62 = vadd.f32 %v4108_v30, %v14271_v17  ;;  %vm4210_vm9 = vcmp.gt.f32.partialorder %v10753_v55, 0.0  ;;  %v4114_v24 = vpop.f32.mrb[111].mxu0 }
 0x4b0   : > { %15349 = vst [vmem:[#allocation52_spill] sm:$0xff] %v14341_v9  ;;  %v4338_v40 = vmul.f32 0.2, %v10753_v55  ;;  %v10785_v60 = vadd.f32 %v4110_v56, %v14275_v5  ;;  %8179 = vmatmul.mubr.bf16.gmra.mrb[132].mxu0 %v14312_v26  ;;  %7803 = vmatprep.subr.bf16.mxu1 %v11884_v33  ;;  %v10754_v28 = vadd.f32 %v3886_v57, %v14261_v41  ;;  %v11890_v48 = vld [vmem:[#allocation14 + $0xb64] ss:$28 sps:$4 sm:$0xff]   ;;  %v3892_v29 = vpop.f32.mrb[80].mxu1 }
 0x4b1   : > { %v4465_v11 = vsel %vm4209_vm8, %v10752_v46, %v4337_v20  ;;  %v10786_v16 = vadd.f32 %v4112_v39, %v14271_v17  ;;  %8254 = vmatpush1.bf16.msra.mxu0 %v11879_v37  ;;  %vm4211_vm10 = vcmp.gt.f32.partialorder %v10784_v62, 0.0  ;;  %v4339_v4 = vmul.f32 0.2, %v10784_v62  ;;  %7736 = vmatprep.mubr.bf16.mxu1 %v14341_v9  ;;  %v3894_v56 = vpop.f32.mrb[81].mxu1  ;;  %v11888_v57 = vld [vmem:[#allocation14 + $0xb60] ss:$28 sps:$4 sm:$0xff]  }
 0x4b2   : > { %v4466_v8 = vsel %vm4210_vm9, %v10753_v55, %v4338_v40  ;;  %vm4212_vm11 = vcmp.gt.f32.partialorder %v10785_v60, 0.0  ;;  %8255 = vmatprep.subr.bf16.mxu0 %v11887_v22  ;;  %v4340_v12 = vmul.f32 0.2, %v10785_v60  ;;  %vm4217_vm12 = vcmp.gt.f32.partialorder %v10754_v28, 0.0  ;;  %8188 = vmatprep.mubr.bf16.mxu0 %v14341_v9  ;;  %v4118_v55 = vpop.f32.mrb[112].mxu0  ;;  %v3896_v6 = vpop.f32.mrb[82].mxu1 }
 0x4b3   : > { %v4345_v3 = vmul.f32 0.2, %v10754_v28  ;;  %vm4219_vm13 = vcmp.gt.f32.partialorder %v10786_v16, 0.0  ;;  %v4467_v33 = vsel %vm4211_vm10, %v10784_v62, %v4339_v4  ;;  %7804 = vmatpush1.bf16.msra.mxu1 %v11882_v14  ;;  %v4347_v46 = vmul.f32 0.2, %v10786_v16  ;;  %v4120_v62 = vpop.f32.mrb[113].mxu0 }
 0x4b4   : > { %v10755_v30 = vadd.f32 %v3888_v32, %v14266_v31  ;;  %v10787_v37 = vadd.f32 %v4114_v24, %v14275_v5  ;;  %v4468_v20 = vsel %vm4212_vm11, %v10785_v60, %v4340_v12  ;;  %7805 = vmatprep.subr.bf16.mxu1 %v11890_v48  ;;  %v11891_v22 = vld [vmem:[#allocation14 + $0xb68] ss:$28 sps:$4 sm:$0xff]   ;;  %v11896_v40 = vld [vmem:[#allocation14 + $0xb9c] ss:$28 sps:$4 sm:$0xff]   ;;  %v10756_v26 = vadd.f32 %v3892_v29, %v14261_v41  ;;  %v3898_v14 = vpop.f32.mrb[83].mxu1  ;;  %v4122_v60 = vpop.f32.mrb[114].mxu0 }
 0x4b5   : > { %v4473_v39 = vsel %vm4217_vm12, %v10754_v28, %v4345_v3  ;;  %v10788_v9 = vadd.f32 %v4118_v55, %v14271_v17  ;;  %8256 = vmatpush1.bf16.msra.mxu0 %v11885_v53  ;;  %v4475_v32 = vsel %vm4219_vm13, %v10786_v16, %v4347_v46  ;;  %v4124_v29 = vpop.f32.mrb[115].mxu0  ;;  %v10757_v46 = vadd.f32 %v3894_v56, %v14266_v31  ;;  %v11902_v55 = vld [vmem:[#allocation14 + $0xbd4] ss:$28 sps:$4 sm:$0xff]  }
 0x4b6   : > { %v14358_v4 = vpack.c.bf16 %v4473_v39, %v4465_v11  ;;  %vm4218_vm14 = vcmp.gt.f32.partialorder %v10755_v30, 0.0  ;;  %v4346_v24 = vmul.f32 0.2, %v10755_v30  ;;  %v14361_v28 = vpack.c.bf16 %v4475_v32, %v4467_v33  ;;  %7737 = vmatmul.mubr.bf16.gmra.mrb[104].mxu1 %v14337_v45  ;;  %8257 = vmatprep.subr.bf16.mxu0 %v11893_v42  ;;  %v11897_v33 = vld [vmem:[#allocation14 + $0xba0] ss:$28 sps:$4 sm:$0xff]  }
 0x4b7   : > { %vm4220_vm15 = vcmp.gt.f32.partialorder %v10787_v37, 0.0  ;;  %v4348_v48 = vmul.f32 0.2, %v10787_v37  ;;  %vm4225_vm0 = vcmp.gt.f32.partialorder %v10756_v26, 0.0  ;;  %7806 = vmatpush1.bf16.msra.mxu1 %v11888_v57  ;;  %v4353_v53 = vmul.f32 0.2, %v10756_v26 }
 0x4b8   : > { %15350 = vst [vmem:[#allocation29_spill] sm:$0xff] %v14358_v4  ;;  %v4474_v12 = vsel %vm4218_vm14, %v10755_v30, %v4346_v24  ;;  %vm4227_vm1 = vcmp.gt.f32.partialorder %v10788_v9, 0.0  ;;  %v4355_v11 = vmul.f32 0.2, %v10788_v9  ;;  %8189 = vmatmul.mubr.bf16.gmra.mrb[136].mxu0 %v14337_v45  ;;  %7807 = vmatprep.subr.bf16.mxu1 %v11896_v40  ;;  %v3902_v39 = vpop.f32.mrb[84].mxu1  ;;  %v10789_v57 = vadd.f32 %v4120_v62, %v14275_v5 }
 0x4b9   : > { %v14364_v16 = vpack.c.bf16 %v4474_v12, %v4466_v8  ;;  %v4476_v3 = vsel %vm4220_vm15, %v10787_v37, %v4348_v48  ;;  %8258 = vmatpush1.bf16.msra.mxu0 %v11891_v22  ;;  %v4481_v42 = vsel %vm4225_vm0, %v10756_v26, %v4353_v53  ;;  %v11900_v24 = vld [vmem:[#allocation14 + $0xbd0] ss:$28 sps:$4 sm:$0xff]   ;;  %v11905_v8 = vld [vmem:[#allocation14 + $0xbdc] ss:$28 sps:$4 sm:$0xff]   ;;  %v3904_v12 = vpop.f32.mrb[85].mxu1  ;;  %vm4226_vm2 = vcmp.gt.f32.partialorder %v10757_v46, 0.0 }
 0x4ba   : > { %v14368_v32 = vpack.c.bf16 %v4476_v3, %v4468_v20  ;;  %v4483_v30 = vsel %vm4227_vm1, %v10788_v9, %v4355_v11  ;;  %8259 = vmatprep.subr.bf16.mxu0 %v11899_v59  ;;  %v4354_v37 = vmul.f32 0.2, %v10757_v46  ;;  %v10758_v40 = vadd.f32 %v3896_v6, %v14261_v41  ;;  %v11908_v20 = vld [vmem:[#allocation14 + $0xc0c] ss:$28 sps:$4 sm:$0xff]   ;;  %v4128_v48 = vpop.f32.mrb[116].mxu0  ;;  %v3906_v22 = vpop.f32.mrb[86].mxu1 }
 0x4bb   : > { %15351 = vst [vmem:[#allocation55_spill] sm:$0xff] %v14364_v16  ;;  %v10790_v56 = vadd.f32 %v4122_v60, %v14271_v17  ;;  %7746 = vmatprep.mubr.bf16.mxu1 %v14364_v16  ;;  %7808 = vmatpush1.bf16.msra.mxu1 %v11894_v58  ;;  %vm4228_vm3 = vcmp.gt.f32.partialorder %v10789_v57, 0.0  ;;  %v4356_v26 = vmul.f32 0.2, %v10789_v57  ;;  %v10759_v9 = vadd.f32 %v3898_v14, %v14266_v31  ;;  %v11903_v59 = vld [vmem:[#allocation14 + $0xbd8] ss:$28 sps:$4 sm:$0xff]  }
 0x4bc   : > { %v10791_v62 = vadd.f32 %v4124_v29, %v14275_v5  ;;  %8198 = vmatprep.mubr.bf16.mxu0 %v14364_v16  ;;  %v4130_v53 = vpop.f32.mrb[117].mxu0  ;;  %v3908_v11 = vpop.f32.mrb[87].mxu1  ;;  %v4482_v6 = vsel %vm4226_vm2, %v10757_v46, %v4354_v37  ;;  %vm4233_vm4 = vcmp.gt.f32.partialorder %v10758_v40, 0.0  ;;  %v4361_v60 = vmul.f32 0.2, %v10758_v40  ;;  %7809 = vmatprep.subr.bf16.mxu1 %v11902_v55 }
 0x4bd   : > { %vm4235_vm5 = vcmp.gt.f32.partialorder %v10790_v56, 0.0  ;;  %v4132_v3 = vpop.f32.mrb[118].mxu0  ;;  %v4484_v45 = vsel %vm4228_vm3, %v10789_v57, %v4356_v26  ;;  %8260 = vmatpush1.bf16.msra.mxu0 %v11897_v33  ;;  %v4363_v58 = vmul.f32 0.2, %v10790_v56  ;;  %vm4234_vm6 = vcmp.gt.f32.partialorder %v10759_v9, 0.0 }
 0x4be   : > { %v4362_v27 = vmul.f32 0.2, %v10759_v9  ;;  %v4134_v14 = vpop.f32.mrb[119].mxu0  ;;  %v4489_v21 = vsel %vm4233_vm4, %v10758_v40, %v4361_v60  ;;  %vm4236_vm7 = vcmp.gt.f32.partialorder %v10791_v62, 0.0  ;;  %v4364_v29 = vmul.f32 0.2, %v10791_v62  ;;  %7747 = vmatmul.mubr.bf16.gmra.mrb[108].mxu1 %v14358_v4  ;;  %8261 = vmatprep.subr.bf16.mxu0 %v11905_v8 }
 0x4bf   : > { %v10760_v16 = vadd.f32 %v3902_v39, %v14261_v41  ;;  %v11911_v46 = vld [vmem:[#allocation14 + $0xc14] ss:$28 sps:$4 sm:$0xff]   ;;  %v14381_v37 = vpack.c.bf16 %v4489_v21, %v4481_v42  ;;  %v4491_v55 = vsel %vm4235_vm5, %v10790_v56, %v4363_v58  ;;  %7810 = vmatpush1.bf16.msra.mxu1 %v11900_v24  ;;  %v11906_v33 = vld [vmem:[#allocation14 + $0xc08] ss:$28 sps:$4 sm:$0xff]   ;;  %v10792_v57 = vadd.f32 %v4128_v48, %v14271_v17 }
 0x4c0   : > { %v4490_v15 = vsel %vm4234_vm6, %v10759_v9, %v4362_v27  ;;  %v14385_v26 = vpack.c.bf16 %v4491_v55, %v4483_v30  ;;  %v4492_v60 = vsel %vm4236_vm7, %v10791_v62, %v4364_v29  ;;  %8199 = vmatmul.mubr.bf16.gmra.mrb[140].mxu0 %v14358_v4  ;;  %7811 = vmatprep.subr.bf16.mxu1 %v11908_v20  ;;  %v11909_v39 = vld [vmem:[#allocation14 + $0xc10] ss:$28 sps:$4 sm:$0xff]   ;;  %v11914_v8 = vld [vmem:[#allocation14 + $0xc44] ss:$28 sps:$4 sm:$0xff]   ;;  %v3912_v21 = vpop.f32.mrb[88].mxu1 }
 0x4c1   : > { %15352 = vst [vmem:[#allocation56_spill] sm:$0xff] %v14381_v37  ;;  %v14387_v40 = vpack.c.bf16 %v4490_v15, %v4482_v6  ;;  %vm4241_vm8 = vcmp.gt.f32.partialorder %v10760_v16, 0.0  ;;  %v14390_v42 = vpack.c.bf16 %v4492_v60, %v4484_v45  ;;  %8262 = vmatpush1.bf16.msra.mxu0 %v11903_v59  ;;  %v4369_v27 = vmul.f32 0.2, %v10760_v16  ;;  %v14392_v56 = vpop.f32.mrb[89].mxu1 }
 0x4c2   : > { %vm4243_vm9 = vcmp.gt.f32.partialorder %v10792_v57, 0.0  ;;  %v4371_v24 = vmul.f32 0.2, %v10792_v57  ;;  %8263 = vmatprep.subr.bf16.mxu0 %v11911_v46  ;;  %v10761_v15 = vadd.f32 %v3904_v12, %v14266_v31  ;;  %v10793_v30 = vadd.f32 %v4130_v53, %v14275_v5  ;;  %v11912_v9 = vld [vmem:[#allocation14 + $0xc40] ss:$28 sps:$4 sm:$0xff]   ;;  %v4138_v6 = vpop.f32.mrb[120].mxu0 }
 0x4c3   : > { %15353 = vst [vmem:[#allocation57_spill] sm:$0xff] %v14387_v40  ;;  %v10762_v48 = vadd.f32 %v3906_v22, %v14261_v41  ;;  %v10794_v20 = vadd.f32 %v4132_v3, %v14271_v17  ;;  %v11917_v62 = vld [vmem:[#allocation14 + $0xc4c] ss:$28 sps:$4 sm:$0xff]   ;;  %v3916_v45 = vpop.f32.mrb[90].mxu1  ;;  %v4497_v59 = vsel %vm4241_vm8, %v10760_v16, %v4369_v27  ;;  %7812 = vmatpush1.bf16.msra.mxu1 %v11906_v33  ;;  %v11920_v12 = vld [vmem:[#allocation14 + $0xc7c] ss:$28 sps:$4 sm:$0xff]  }
 0x4c4   : > { %v4499_v58 = vsel %vm4243_vm9, %v10792_v57, %v4371_v24  ;;  %v10763_v29 = vadd.f32 %v3908_v11, %v14266_v31  ;;  %v10795_v46 = vadd.f32 %v4134_v14, %v14275_v5  ;;  %v11915_v55 = vld [vmem:[#allocation14 + $0xc48] ss:$28 sps:$4 sm:$0xff]   ;;  %v4140_v60 = vpop.f32.mrb[121].mxu0  ;;  %v14401_v53 = vpop.f32.mrb[91].mxu1  ;;  %vm4242_vm10 = vcmp.gt.f32.partialorder %v10761_v15, 0.0  ;;  %7756 = vmatprep.mubr.bf16.mxu1 %v14387_v40  ;;  %7813 = vmatprep.subr.bf16.mxu1 %v11914_v8 }
 0x4c5   : > { %v4370_v22 = vmul.f32 0.2, %v10761_v15  ;;  %vm4244_vm11 = vcmp.gt.f32.partialorder %v10793_v30, 0.0  ;;  %v4372_v3 = vmul.f32 0.2, %v10793_v30  ;;  %8264 = vmatpush1.bf16.msra.mxu0 %v11909_v39  ;;  %vm4249_vm12 = vcmp.gt.f32.partialorder %v10762_v48, 0.0  ;;  %8208 = vmatprep.mubr.bf16.mxu0 %v14387_v40 }
 0x4c6   : > { %v4377_v16 = vmul.f32 0.2, %v10762_v48  ;;  %vm4251_vm13 = vcmp.gt.f32.partialorder %v10794_v20, 0.0  ;;  %v4379_v33 = vmul.f32 0.2, %v10794_v20  ;;  %vm4250_vm14 = vcmp.gt.f32.partialorder %v10763_v29, 0.0  ;;  %7757 = vmatmul.mubr.bf16.gmra.mrb[112].mxu1 %v14381_v37  ;;  %8265 = vmatprep.subr.bf16.mxu0 %v11917_v62 }
 0x4c7   : > { %v4498_v11 = vsel %vm4242_vm10, %v10761_v15, %v4370_v22  ;;  %v4500_v14 = vsel %vm4244_vm11, %v10793_v30, %v4372_v3  ;;  %v4378_v57 = vmul.f32 0.2, %v10763_v29  ;;  %v11923_v27 = vld [vmem:[#allocation14 + $0xc84] ss:$28 sps:$4 sm:$0xff]   ;;  %v4142_v24 = vpop.f32.mrb[122].mxu0  ;;  %vm4252_vm15 = vcmp.gt.f32.partialorder %v10795_v46, 0.0  ;;  %7814 = vmatpush1.bf16.msra.mxu1 %v11912_v9 }
 0x4c8   : > { %v4505_v4 = vsel %vm4249_vm12, %v10762_v48, %v4377_v16  ;;  %v4507_v18 = vsel %vm4251_vm13, %v10794_v20, %v4379_v33  ;;  %v4380_v8 = vmul.f32 0.2, %v10795_v46  ;;  %v11918_v39 = vld [vmem:[#allocation14 + $0xc78] ss:$28 sps:$4 sm:$0xff]   ;;  %v4144_v52 = vpop.f32.mrb[123].mxu0  ;;  %8209 = vmatmul.mubr.bf16.gmra.mrb[144].mxu0 %v14381_v37  ;;  %7815 = vmatprep.subr.bf16.mxu1 %v11920_v12  ;;  %v3922_v22 = vpop.f32.mrb[92].mxu1  ;;  %v10764_v48 = vadd.f32 %v3912_v21, %v14261_v41 }
 0x4c9   : > { %v14406_v44 = vpack.c.bf16 %v4505_v4, %v4497_v59  ;;  %v14408_v38 = vpack.c.bf16 %v4507_v18, %v4499_v58  ;;  %v4506_v15 = vsel %vm4250_vm14, %v10763_v29, %v4378_v57  ;;  %v11926_v30 = vld [vmem:[#allocation14 + $0xcb4] ss:$28 sps:$4 sm:$0xff]   ;;  %8266 = vmatpush1.bf16.msra.mxu0 %v11915_v55  ;;  %v10796_v20 = vadd.f32 %v4138_v6, %v14271_v17  ;;  %v11921_v9 = vld [vmem:[#allocation14 + $0xc80] ss:$28 sps:$4 sm:$0xff]   ;;  %v3924_v4 = vpop.f32.mrb[93].mxu1 }
 0x4ca   : > { %v14411_v62 = vpack.c.bf16 %v4506_v15, %v4498_v11  ;;  %v4508_v3 = vsel %vm4252_vm15, %v10795_v46, %v4380_v8  ;;  %v11924_v16 = vld [vmem:[#allocation14 + $0xcb0] ss:$28 sps:$4 sm:$0xff]   ;;  %8267 = vmatprep.subr.bf16.mxu0 %v11923_v27  ;;  %v10765_v18 = vadd.f32 %v14392_v56, %v14266_v31  ;;  %v10797_v58 = vadd.f32 %v4140_v60, %v14275_v5  ;;  %v11929_v12 = vld [vmem:[#allocation14 + $0xcbc] ss:$28 sps:$4 sm:$0xff]   ;;  %v4148_v55 = vpop.f32.mrb[124].mxu0  ;;  %v14421_v33 = vpop.f32.mrb[94].mxu1 }
 0x4cb   : > { %15354 = vst [vmem:[#allocation58_spill] sm:$0xff] %v14406_v44  ;;  %v14415_v59 = vpack.c.bf16 %v4508_v3, %v4500_v14  ;;  %v10766_v29 = vadd.f32 %v3916_v45, %v14261_v41  ;;  %v11932_v46 = vld [vmem:[#allocation14 + $0xcec] ss:$28 sps:$4 sm:$0xff]   ;;  %vm4257_vm0 = vcmp.gt.f32.partialorder %v10764_v48, 0.0  ;;  %v4385_v21 = vmul.f32 0.2, %v10764_v48  ;;  %7816 = vmatpush1.bf16.msra.mxu1 %v11918_v39 }
 0x4cc   : > { %15355 = vst [vmem:[#allocation59_spill] sm:$0xff] %v14411_v62  ;;  %vm4259_vm1 = vcmp.gt.f32.partialorder %v10796_v20, 0.0  ;;  %v4387_v6 = vmul.f32 0.2, %v10796_v20  ;;  %7766 = vmatprep.mubr.bf16.mxu1 %v14411_v62  ;;  %v11927_v11 = vld [vmem:[#allocation14 + $0xcb8] ss:$28 sps:$4 sm:$0xff]   ;;  %7817 = vmatprep.subr.bf16.mxu1 %v11926_v30  ;;  %v10798_v39 = vadd.f32 %v4142_v24, %v14271_v17  ;;  %v10767_v15 = vadd.f32 %v14401_v53, %v14266_v31 }
 0x4cd   : > { %vm4258_vm2 = vcmp.gt.f32.partialorder %v10765_v18, 0.0  ;;  %v4386_v14 = vmul.f32 0.2, %v10765_v18  ;;  %v4388_v56 = vmul.f32 0.2, %v10797_v58  ;;  %8218 = vmatprep.mubr.bf16.mxu0 %v14411_v62  ;;  %8268 = vmatpush1.bf16.msra.mxu0 %v11921_v9  ;;  %vm4265_vm3 = vcmp.gt.f32.partialorder %v10766_v29, 0.0 }
 0x4ce   : > { %v4393_v45 = vmul.f32 0.2, %v10766_v29  ;;  %v4150_v60 = vpop.f32.mrb[125].mxu0  ;;  %v3928_v57 = vpop.f32.mrb[95].mxu1  ;;  %v4513_v27 = vsel %vm4257_vm0, %v10764_v48, %v4385_v21  ;;  %v4515_v8 = vsel %vm4259_vm1, %v10796_v20, %v4387_v6  ;;  %7767 = vmatmul.mubr.bf16.gmra.mrb[116].mxu1 %v14406_v44  ;;  %v11935_v3 = vld [vmem:[#allocation14 + $0xcf4] ss:$28 sps:$4 sm:$0xff]   ;;  %v10799_v37 = vadd.f32 %v4144_v52, %v14275_v5  ;;  %8269 = vmatprep.subr.bf16.mxu0 %v11929_v12 }
 0x4cf   : > { %v4152_v30 = vpop.f32.mrb[126].mxu0  ;;  %v4514_v62 = vsel %vm4258_vm2, %v10765_v18, %v4386_v14  ;;  %vm4260_vm4 = vcmp.gt.f32.partialorder %v10797_v58, 0.0  ;;  %7818 = vmatpush1.bf16.msra.mxu1 %v11924_v16  ;;  %v11930_v48 = vld [vmem:[#allocation14 + $0xce8] ss:$28 sps:$4 sm:$0xff]   ;;  %v11933_v21 = vld [vmem:[#allocation14 + $0xcf0] ss:$28 sps:$4 sm:$0xff]   ;;  %v10768_v52 = vadd.f32 %v3922_v22, %v14261_v41  ;;  %v10800_v12 = vadd.f32 %v4148_v55, %v14271_v17 }
 0x4d0   : > { %v4521_v9 = vsel %vm4265_vm3, %v10766_v29, %v4393_v45  ;;  %v4154_v20 = vpop.f32.mrb[127].mxu0  ;;  %vm4267_vm5 = vcmp.gt.f32.partialorder %v10798_v39, 0.0  ;;  %v4395_v24 = vmul.f32 0.2, %v10798_v39  ;;  %vm4266_vm6 = vcmp.gt.f32.partialorder %v10767_v15, 0.0  ;;  %8219 = vmatmul.mubr.bf16.gmra.mrb[148].mxu0 %v14406_v44  ;;  %7819 = vmatprep.subr.bf16.mxu1 %v11932_v46 }
 0x4d1   : > { %v14433_v6 = vpack.c.bf16 %v4521_v9, %v4513_v27  ;;  %v11938_v53 = vld [vmem:[#allocation14 + $0xd24] ss:$28 sps:$4 sm:$0xff]   ;;  %v4394_v40 = vmul.f32 0.2, %v10767_v15  ;;  %vm4268_vm7 = vcmp.gt.f32.partialorder %v10799_v37, 0.0  ;;  %8270 = vmatpush1.bf16.msra.mxu0 %v11927_v11  ;;  %v4516_v16 = vsel %vm4260_vm4, %v10797_v58, %v4388_v56 }
 0x4d2   : > { %v4396_v18 = vmul.f32 0.2, %v10799_v37  ;;  %v4523_v29 = vsel %vm4267_vm5, %v10798_v39, %v4395_v24  ;;  %8271 = vmatprep.subr.bf16.mxu0 %v11935_v3  ;;  %v10769_v14 = vadd.f32 %v3924_v4, %v14266_v31  ;;  %v10801_v46 = vadd.f32 %v4150_v60, %v14275_v5  ;;  %v11941_v44 = vld [vmem:[#allocation14 + $0xd2c] ss:$28 sps:$4 sm:$0xff]   ;;  %v11936_v22 = vld [vmem:[#allocation14 + $0xd20] ss:$28 sps:$4 sm:$0xff]  }
 0x4d3   : > { %v14440_v45 = vpack.c.bf16 %v4523_v29, %v4515_v8  ;;  %v4522_v27 = vsel %vm4266_vm6, %v10767_v15, %v4394_v40  ;;  %7820 = vmatpush1.bf16.msra.mxu1 %v11930_v48  ;;  %v11939_v58 = vld [vmem:[#allocation14 + $0xd28] ss:$28 sps:$4 sm:$0xff]   ;;  %vm4273_vm8 = vcmp.gt.f32.partialorder %v10768_v52, 0.0  ;;  %v4401_v55 = vmul.f32 0.2, %v10768_v52 }
 0x4d4   : > { %v4524_v9 = vsel %vm4268_vm7, %v10799_v37, %v4396_v18  ;;  %v14443_v2 = vpack.c.bf16 %v4522_v27, %v4514_v62  ;;  %7821 = vmatprep.subr.bf16.mxu1 %v11938_v53  ;;  %vm4275_vm9 = vcmp.gt.f32.partialorder %v10800_v12, 0.0  ;;  %v11944_v4 = vld [vmem:[#allocation14 + $0xd5c] ss:$28 sps:$4 sm:$0xff]   ;;  %v4403_v56 = vmul.f32 0.2, %v10800_v12 }
 0x4d5   : > { %v14445_v11 = vpack.c.bf16 %v4524_v9, %v4516_v16  ;;  %8272 = vmatpush1.bf16.msra.mxu0 %v11933_v21  ;;  %v10770_v37 = vadd.f32 %v14421_v33, %v14261_v41  ;;  %v10802_v40 = vadd.f32 %v4152_v30, %v14271_v17  ;;  %v10771_v60 = vadd.f32 %v3928_v57, %v14266_v31  ;;  %v11942_v62 = vld [vmem:[#allocation14 + $0xd58] ss:$28 sps:$4 sm:$0xff]   ;;  %v11947_v8 = vld [vmem:[#allocation14 + $0xd64] ss:$28 sps:$4 sm:$0xff]  }
 0x4d6   : > { %7776 = vmatprep.mubr.bf16.mxu1 %v14443_v2  ;;  %8228 = vmatprep.mubr.bf16.mxu0 %v14443_v2  ;;  %vm4274_vm10 = vcmp.gt.f32.partialorder %v10769_v14, 0.0  ;;  %v4402_v39 = vmul.f32 0.2, %v10769_v14  ;;  %vm4276_vm11 = vcmp.gt.f32.partialorder %v10801_v46, 0.0  ;;  %v10803_v15 = vadd.f32 %v4154_v20, %v14275_v5  ;;  %v11945_v3 = vld [vmem:[#allocation14 + $0xd60] ss:$28 sps:$4 sm:$0xff]  }
 0x4d7   : > { %7777 = vmatmul.mubr.bf16.gmra.mrb[120].mxu1 %v14433_v6  ;;  %8273 = vmatprep.subr.bf16.mxu0 %v11941_v44  ;;  %v11950_v41 = vld [vmem:[#allocation14 + $0xd94] ss:$28 sps:$4 sm:$0xff]   ;;  %v4404_v33 = vmul.f32 0.2, %v10801_v46  ;;  %vm4281_vm12 = vcmp.gt.f32.partialorder %v10770_v37, 0.0  ;;  %vm4283_vm13 = vcmp.gt.f32.partialorder %v10802_v40, 0.0  ;;  %v4529_v5 = vsel %vm4273_vm8, %v10768_v52, %v4401_v55 }
 0x4d8   : > { %v4409_v17 = vmul.f32 0.2, %v10770_v37  ;;  %7822 = vmatpush1.bf16.msra.mxu1 %v11936_v22  ;;  %8229 = vmatmul.mubr.bf16.gmra.mrb[152].mxu0 %v14433_v6  ;;  %v4411_v31 = vmul.f32 0.2, %v10802_v40  ;;  %vm4282_vm14 = vcmp.gt.f32.partialorder %v10771_v60, 0.0  ;;  %vm4284_vm15 = vcmp.gt.f32.partialorder %v10803_v15, 0.0 }
 0x4d9   : > { %v4410_v57 = vmul.f32 0.2, %v10771_v60  ;;  %8274 = vmatpush1.bf16.msra.mxu0 %v11939_v58  ;;  %7823 = vmatprep.subr.bf16.mxu1 %v11944_v4  ;;  %v4531_v30 = vsel %vm4275_vm9, %v10800_v12, %v4403_v56  ;;  %v4412_v48 = vmul.f32 0.2, %v10803_v15  ;;  %v4530_v21 = vsel %vm4274_vm10, %v10769_v14, %v4402_v39  ;;  %v11953_v18 = vld [vmem:[#allocation14 + $0xd9c] ss:$28 sps:$4 sm:$0xff]  }
 0x4da   : > { %v4537_v44 = vsel %vm4281_vm12, %v10770_v37, %v4409_v17  ;;  %8275 = vmatprep.subr.bf16.mxu0 %v11947_v8  ;;  %v4539_v24 = vsel %vm4283_vm13, %v10802_v40, %v4411_v31  ;;  %v4532_v16 = vsel %vm4276_vm11, %v10801_v46, %v4404_v33  ;;  %v11948_v12 = vld [vmem:[#allocation14 + $0xd90] ss:$28 sps:$4 sm:$0xff]   ;;  %v11951_v14 = vld [vmem:[#allocation14 + $0xd98] ss:$28 sps:$4 sm:$0xff]   ;;  %v11954_v58 = vld [vmem:[#allocation14 + $0xdc8] ss:$28 sps:$4 sm:$0xff]  }
 0x4db   : > { %v14459_v20 = vpack.c.bf16 %v4537_v44, %v4529_v5  ;;  %v4538_v53 = vsel %vm4282_vm14, %v10771_v60, %v4410_v57  ;;  %v14463_v29 = vpack.c.bf16 %v4539_v24, %v4531_v30  ;;  %v4540_v52 = vsel %vm4284_vm15, %v10803_v15, %v4412_v48  ;;  %v11956_v22 = vld [vmem:[#allocation14 + $0xdcc] ss:$28 sps:$4 sm:$0xff]   ;;  %v11959_v46 = vld [vmem:[#allocation14 + $0xdd4] ss:$28 sps:$4 sm:$0xff]   ;;  %v11968_v39 = vld [vmem:[#allocation14 + $0x84] ss:$28 sps:$4 sm:$0xff]  }
 0x4dc   : > { %v14465_v27 = vpack.c.bf16 %v4538_v53, %v4530_v21  ;;  %7824 = vmatpush1.bf16.msra.mxu1 %v11942_v62  ;;  %v14468_v9 = vpack.c.bf16 %v4540_v52, %v4532_v16  ;;  %v11957_v55 = vld [vmem:[#allocation14 + $0xdd0] ss:$28 sps:$4 sm:$0xff]   ;;  %v11987_v56 = vld [vmem:[#allocation14 + $0x1d8] ss:$28 sps:$4 sm:$0xff]   ;;  %v11963_v8 = vld [vmem:[#allocation14 + $0x48] ss:$28 sps:$4 sm:$0xff]  }
 0x4dd   : > { %8276 = vmatpush1.bf16.msra.mxu0 %v11945_v3  ;;  %7825 = vmatprep.subr.bf16.mxu1 %v11950_v41  ;;  %v11962_v4 = vld [vmem:[#allocation14 + $0x14] ss:$28 sps:$4 sm:$0xff]   ;;  %v11965_v40 = vld [vmem:[#allocation14 + $0x4c] ss:$28 sps:$4 sm:$0xff]   ;;  %v11966_v41 = vld [vmem:[#allocation14 + $0x80] ss:$28 sps:$4 sm:$0xff]  }
 0x4de   : > { %7786 = vmatprep.mubr.bf16.mxu1 %v14465_v27  ;;  %8238 = vmatprep.mubr.bf16.mxu0 %v14465_v27  ;;  %v11960_v37 = vld [vmem:[#allocation14 + $0x10] ss:$28 sps:$4 sm:$0xff]   ;;  %v11988_v60 = vld [vmem:[#allocation14 + $0x18] ss:$28 sps:$4 sm:$0xff]   ;;  %v11997_v3 = vld [vmem:[#allocation14 + $0x248] ss:$28 sps:$4 sm:$0xff]  }
 0x4df   : > { %7787 = vmatmul.mubr.bf16.gmra.mrb[124].mxu1 %v14459_v20  ;;  %8277 = vmatprep.subr.bf16.mxu0 %v11953_v18  ;;  %v11992_v62 = vld [vmem:[#allocation14 + $0x210] ss:$28 sps:$4 sm:$0xff]   ;;  %v11971_v33 = vld [vmem:[#allocation14 + $0xbc] ss:$28 sps:$4 sm:$0xff]   ;;  %v11998_v17 = vld [vmem:[#allocation14 + $0x88] ss:$28 sps:$4 sm:$0xff]  }
 0x4e0   : > { %7826 = vmatpush1.bf16.msra.mxu1 %v11948_v12  ;;  %8239 = vmatmul.mubr.bf16.gmra.mrb[156].mxu0 %v14459_v20  ;;  %v11993_v15 = vld [vmem:[#allocation14 + $0x50] ss:$28 sps:$4 sm:$0xff]   ;;  %v12002_v31 = vld [vmem:[#allocation14 + $0x280] ss:$28 sps:$4 sm:$0xff]   ;;  %v11969_v57 = vld [vmem:[#allocation14 + $0xb8] ss:$28 sps:$4 sm:$0xff]  }
 0x4e1   : > { %7829 = vmatprep.mubr.bf16.mxu1 %v14300_v0  ;;  %8278 = vmatpush1.bf16.msra.mxu0 %v11951_v14  ;;  %v11974_v5 = vld [vmem:[#allocation14 + $0xf4] ss:$28 sps:$4 sm:$0xff]   ;;  %v12003_v30 = vld [vmem:[#allocation14 + $0xc0] ss:$28 sps:$4 sm:$0xff]   ;;  %v11977_v21 = vld [vmem:[#allocation14 + $0x12c] ss:$28 sps:$4 sm:$0xff]  }
 0x4e2   : > { %8281 = vmatprep.mubr.bf16.mxu0 %v14300_v0  ;;  %7827 = vmatprep.subr.bf16.mxu1 %v11956_v22  ;;  %v12007_v44 = vld [vmem:[#allocation14 + $0x2b8] ss:$28 sps:$4 sm:$0xff]   ;;  %v11972_v48 = vld [vmem:[#allocation14 + $0xf0] ss:$28 sps:$4 sm:$0xff]   ;;  %v11975_v18 = vld [vmem:[#allocation14 + $0x128] ss:$28 sps:$4 sm:$0xff]  }
 0x4e3   : > { %8279 = vmatprep.subr.bf16.mxu0 %v11959_v46  ;;  %v12008_v24 = vld [vmem:[#allocation14 + $0xf8] ss:$28 sps:$4 sm:$0xff]   ;;  %v12012_v53 = vld [vmem:[#allocation14 + $0x2f0] ss:$28 sps:$4 sm:$0xff]   ;;  %v11980_v16 = vld [vmem:[#allocation14 + $0x164] ss:$28 sps:$4 sm:$0xff]  }
 0x4e4   : > { %7828 = vmatpush1.bf16.msra.mxu1 %v11954_v58  ;;  %v12013_v52 = vld [vmem:[#allocation14 + $0x130] ss:$28 sps:$4 sm:$0xff]   ;;  %v12017_v12 = vld [vmem:[#allocation14 + $0x328] ss:$28 sps:$4 sm:$0xff]   ;;  %v11978_v14 = vld [vmem:[#allocation14 + $0x160] ss:$28 sps:$4 sm:$0xff]  }
 0x4e5   : > { %8280 = vmatpush1.bf16.msra.mxu0 %v11957_v55  ;;  %8362 = vmatprep.subr.bf16.mxu1 %v11962_v4  ;;  %v11983_v22 = vld [vmem:[#allocation14 + $0x19c] ss:$28 sps:$4 sm:$0xff]   ;;  %v12018_v46 = vld [vmem:[#allocation14 + $0x168] ss:$28 sps:$4 sm:$0xff]   ;;  %v11986_v4 = vld [vmem:[#allocation14 + $0x1d4] ss:$28 sps:$4 sm:$0xff]  }
 0x4e6   : > { %10404 = vmatprep.subr.bf16.mxu0 %v11987_v56  ;;  %v12022_v58 = vld [vmem:[#allocation14 + $0x360] ss:$28 sps:$4 sm:$0xff]   ;;  %v11981_v55 = vld [vmem:[#allocation14 + $0x198] ss:$28 sps:$4 sm:$0xff]  }
 0x4e7   : > { %7830 = vmatmul.mubr.bf16.vlgmr.msra.gmra.mrb[96].mxu1 %v14298_v36  ;;  %v12023_v56 = vld [vmem:[#allocation14 + $0x1a0] ss:$28 sps:$4 sm:$0xff]  }
 0x4e8   : > { %8282 = vmatmul.mubr.bf16.vlgmr.msra.gmra.mrb[128].mxu0 %v14298_v36  ;;  %8363 = vmatpush1.bf16.msra.mxu1 %v11960_v37  ;;  %v12039_v37 = vld [vmem:[#allocation14 + $0x558] ss:$28 sps:$4 sm:$0xff]  }
 0x4e9   : > { %7839 = vmatprep.mubr.bf16.mxu1 %v14324_v7  ;;  %8291 = vmatprep.mubr.bf16.mxu0 %v14324_v7 }
 0x4ea   : > { %8364 = vmatprep.subr.bf16.mxu1 %v11965_v40  ;;  %10405 = vmatpush3.bf16.msra.mxu0 %v11988_v60  ;;  %v11984_v40 = vld [vmem:[#allocation14 + $0x1d0] ss:$28 sps:$4 sm:$0xff]  }
 0x4eb   : > { %10406 = vmatprep.subr.bf16.mxu0 %v11992_v62  ;;  %v11991_v60 = vld [vmem:[#allocation14 + $0x20c] ss:$28 sps:$4 sm:$0xff]  }
 0x4ec   : > { %8365 = vmatpush1.bf16.msra.mxu1 %v11963_v8  ;;  %v11989_v62 = vld [vmem:[#allocation14 + $0x208] ss:$28 sps:$4 sm:$0xff]  }
 0x4ed   : > { %8366 = vmatprep.subr.bf16.mxu1 %v11968_v39  ;;  %v11996_v8 = vld [vmem:[#allocation14 + $0x244] ss:$28 sps:$4 sm:$0xff]  }
 0x4ee   : > { %10407 = vmatpush3.bf16.msra.mxu0 %v11993_v15  ;;  %v11994_v39 = vld [vmem:[#allocation14 + $0x240] ss:$28 sps:$4 sm:$0xff]  }
 0x4ef   : > { %7840 = vmatmul.mubr.bf16.gmra.mrb[100].mxu1 %v14316_v63  ;;  %10408 = vmatprep.subr.bf16.mxu0 %v11997_v3  ;;  %v12001_v15 = vld [vmem:[#allocation14 + $0x27c] ss:$28 sps:$4 sm:$0xff]  }
 0x4f0   : > { %8292 = vmatmul.mubr.bf16.gmra.mrb[132].mxu0 %v14316_v63  ;;  %8367 = vmatpush1.bf16.msra.mxu1 %v11966_v41  ;;  %v11999_v3 = vld [vmem:[#allocation14 + $0x278] ss:$28 sps:$4 sm:$0xff]  }
 0x4f1   : > { %7849 = vmatprep.mubr.bf16.mxu1 %v14343_v50  ;;  %8301 = vmatprep.mubr.bf16.mxu0 %v14343_v50  ;;  %v12006_v41 = vld [vmem:[#allocation14 + $0x2b4] ss:$28 sps:$4 sm:$0xff]  }
 0x4f2   : > { %8368 = vmatprep.subr.bf16.mxu1 %v11971_v33  ;;  %10409 = vmatpush3.bf16.msra.mxu0 %v11998_v17  ;;  %v12004_v33 = vld [vmem:[#allocation14 + $0x2b0] ss:$28 sps:$4 sm:$0xff]  }
 0x4f3   : > { %10410 = vmatprep.subr.bf16.mxu0 %v12002_v31  ;;  %v12011_v17 = vld [vmem:[#allocation14 + $0x2ec] ss:$28 sps:$4 sm:$0xff]  }
 0x4f4   : > { %8369 = vmatpush1.bf16.msra.mxu1 %v11969_v57  ;;  %v12009_v31 = vld [vmem:[#allocation14 + $0x2e8] ss:$28 sps:$4 sm:$0xff]  }
 0x4f5   : > { %8370 = vmatprep.subr.bf16.mxu1 %v11974_v5  ;;  %v12016_v57 = vld [vmem:[#allocation14 + $0x324] ss:$28 sps:$4 sm:$0xff]  }
 0x4f6   : > { %10411 = vmatpush3.bf16.msra.mxu0 %v12003_v30  ;;  %v12014_v5 = vld [vmem:[#allocation14 + $0x320] ss:$28 sps:$4 sm:$0xff]  }
 0x4f7   : > { %7850 = vmatmul.mubr.bf16.gmra.mrb[104].mxu1 %v14339_v35  ;;  %10412 = vmatprep.subr.bf16.mxu0 %v12007_v44  ;;  %v12021_v30 = vld [vmem:[#allocation14 + $0x35c] ss:$28 sps:$4 sm:$0xff]  }
 0x4f8   : > { %8302 = vmatmul.mubr.bf16.gmra.mrb[136].mxu0 %v14339_v35  ;;  %8371 = vmatpush1.bf16.msra.mxu1 %v11972_v48  ;;  %v12019_v44 = vld [vmem:[#allocation14 + $0x358] ss:$28 sps:$4 sm:$0xff]  }
 0x4f9   : > { %7859 = vmatprep.mubr.bf16.mxu1 %v14368_v32  ;;  %8311 = vmatprep.mubr.bf16.mxu0 %v14368_v32  ;;  %v12026_v48 = vld [vmem:[#allocation14 + $0x394] ss:$28 sps:$4 sm:$0xff]  }
 0x4fa   : > { %8372 = vmatprep.subr.bf16.mxu1 %v11977_v21  ;;  %10413 = vmatpush3.bf16.msra.mxu0 %v12008_v24  ;;  %v12024_v21 = vld [vmem:[#allocation14 + $0x390] ss:$28 sps:$4 sm:$0xff]  }
 0x4fb   : > { %10414 = vmatprep.subr.bf16.mxu0 %v12012_v53  ;;  %v12029_v24 = vld [vmem:[#allocation14 + $0x3cc] ss:$28 sps:$4 sm:$0xff]   ;;  %v12040_v53 = vld [vmem:[#allocation14 + $0x398] ss:$28 sps:$4 sm:$0xff]  }
 0x4fc   : > { %8373 = vmatpush1.bf16.msra.mxu1 %v11975_v18  ;;  %v12044_v18 = vld [vmem:[#allocation14 + $0x590] ss:$28 sps:$4 sm:$0xff]  }
 0x4fd   : > { %8374 = vmatprep.subr.bf16.mxu1 %v11980_v16  ;;  %v12027_v16 = vld [vmem:[#allocation14 + $0x3c8] ss:$28 sps:$4 sm:$0xff]  }
 0x4fe   : > { %10415 = vmatpush3.bf16.msra.mxu0 %v12013_v52  ;;  %v12032_v52 = vld [vmem:[#allocation14 + $0x404] ss:$28 sps:$4 sm:$0xff]  }
 0x4ff   : > { %7860 = vmatmul.mubr.bf16.gmra.mrb[108].mxu1 %v14361_v28  ;;  %10416 = vmatprep.subr.bf16.mxu0 %v12017_v12  ;;  %v12049_v12 = vld [vmem:[#allocation14 + $0x5c8] ss:$28 sps:$4 sm:$0xff]  }
 0x500   : > { %8312 = vmatmul.mubr.bf16.gmra.mrb[140].mxu0 %v14361_v28  ;;  %8375 = vmatpush1.bf16.msra.mxu1 %v11978_v14  ;;  %v12030_v14 = vld [vmem:[#allocation14 + $0x400] ss:$28 sps:$4 sm:$0xff]  }
 0x501   : > { %7869 = vmatprep.mubr.bf16.mxu1 %v14390_v42  ;;  %8321 = vmatprep.mubr.bf16.mxu0 %v14390_v42 }
 0x502   : > { %8376 = vmatprep.subr.bf16.mxu1 %v11983_v22  ;;  %10417 = vmatpush3.bf16.msra.mxu0 %v12018_v46  ;;  %v12035_v22 = vld [vmem:[#allocation14 + $0x43c] ss:$28 sps:$4 sm:$0xff]   ;;  %v12050_v46 = vld [vmem:[#allocation14 + $0x408] ss:$28 sps:$4 sm:$0xff]  }
 0x503   : > { %10418 = vmatprep.subr.bf16.mxu0 %v12022_v58  ;;  %v12038_v58 = vld [vmem:[#allocation14 + $0x474] ss:$28 sps:$4 sm:$0xff]  }
 0x504   : > { %8377 = vmatpush1.bf16.msra.mxu1 %v11981_v55  ;;  %v12055_v55 = vld [vmem:[#allocation14 + $0x440] ss:$28 sps:$4 sm:$0xff]  }
 0x505   : > { %8378 = vmatprep.subr.bf16.mxu1 %v11986_v4  ;;  %v12059_v4 = vld [vmem:[#allocation14 + $0x638] ss:$28 sps:$4 sm:$0xff]  }
 0x506   : > { %10419 = vmatpush3.bf16.msra.mxu0 %v12023_v56  ;;  %v12036_v56 = vld [vmem:[#allocation14 + $0x470] ss:$28 sps:$4 sm:$0xff]  }
 0x507   : > { %7870 = vmatmul.mubr.bf16.gmra.mrb[112].mxu1 %v14385_v26  ;;  %10468 = vmatprep.subr.bf16.mxu0 %v12039_v37  ;;  %v12043_v37 = vld [vmem:[#allocation14 + $0x4ac] ss:$28 sps:$4 sm:$0xff]  }
 0x508   : > { %8322 = vmatmul.mubr.bf16.gmra.mrb[144].mxu0 %v14385_v26  ;;  %8379 = vmatpush1.bf16.msra.mxu1 %v11984_v40  ;;  %v12060_v40 = vld [vmem:[#allocation14 + $0x478] ss:$28 sps:$4 sm:$0xff]  }
 0x509   : > { %7879 = vmatprep.mubr.bf16.mxu1 %v14415_v59  ;;  %8331 = vmatprep.mubr.bf16.mxu0 %v14415_v59 }
 0x50a   : > { %8380 = vmatprep.subr.bf16.mxu1 %v11991_v60  ;;  %v12048_v60 = vld [vmem:[#allocation14 + $0x4e4] ss:$28 sps:$4 sm:$0xff]  }
 0x50c   : > { %8381 = vmatpush1.bf16.msra.mxu1 %v11989_v62  ;;  %v12065_v62 = vld [vmem:[#allocation14 + $0x4b0] ss:$28 sps:$4 sm:$0xff]  }
 0x50d   : > { %8382 = vmatprep.subr.bf16.mxu1 %v11996_v8  ;;  %v12069_v8 = vld [vmem:[#allocation14 + $0x6a8] ss:$28 sps:$4 sm:$0xff]  }
 0x50f   : > { %7880 = vmatmul.mubr.bf16.gmra.mrb[116].mxu1 %v14408_v38 }
 0x510   : > { %8332 = vmatmul.mubr.bf16.gmra.mrb[148].mxu0 %v14408_v38  ;;  %8383 = vmatpush1.bf16.msra.mxu1 %v11994_v39  ;;  %v12046_v39 = vld [vmem:[#allocation14 + $0x4e0] ss:$28 sps:$4 sm:$0xff]  }
 0x511   : > { %7889 = vmatprep.mubr.bf16.mxu1 %v14445_v11  ;;  %8341 = vmatprep.mubr.bf16.mxu0 %v14445_v11 }
 0x512   : > { %8384 = vmatprep.subr.bf16.mxu1 %v12001_v15  ;;  %v12053_v15 = vld [vmem:[#allocation14 + $0x51c] ss:$28 sps:$4 sm:$0xff]  }
 0x514   : > { %8385 = vmatpush1.bf16.msra.mxu1 %v11999_v3  ;;  %v12070_v3 = vld [vmem:[#allocation14 + $0x4e8] ss:$28 sps:$4 sm:$0xff]  }
 0x515   : > { %8386 = vmatprep.subr.bf16.mxu1 %v12006_v41  ;;  %v12058_v41 = vld [vmem:[#allocation14 + $0x554] ss:$28 sps:$4 sm:$0xff]  }
 0x517   : > { %7890 = vmatmul.mubr.bf16.gmra.mrb[120].mxu1 %v14440_v45 }
 0x518   : > { %8342 = vmatmul.mubr.bf16.gmra.mrb[152].mxu0 %v14440_v45  ;;  %8387 = vmatpush1.bf16.msra.mxu1 %v12004_v33  ;;  %v12075_v33 = vld [vmem:[#allocation14 + $0x520] ss:$28 sps:$4 sm:$0xff]  }
 0x519   : > { %7899 = vmatprep.mubr.bf16.mxu1 %v14468_v9  ;;  %8351 = vmatprep.mubr.bf16.mxu0 %v14468_v9 }
 0x51a   : > { %8388 = vmatprep.subr.bf16.mxu1 %v12011_v17  ;;  %v12103_v17 = vld [vmem:[#allocation14 + $0x8d8] ss:$28 sps:$4 sm:$0xff]  }
 0x51c   : > { %8389 = vmatpush1.bf16.msra.mxu1 %v12009_v31  ;;  %v12056_v31 = vld [vmem:[#allocation14 + $0x550] ss:$28 sps:$4 sm:$0xff]  }
 0x51d   : > { %8390 = vmatprep.subr.bf16.mxu1 %v12016_v57  ;;  %v12063_v57 = vld [vmem:[#allocation14 + $0x58c] ss:$28 sps:$4 sm:$0xff]  }
 0x51f   : > { %7900 = vmatmul.mubr.bf16.gmra.mrb[124].mxu1 %v14463_v29 }
 0x520   : > { %8352 = vmatmul.mubr.bf16.gmra.mrb[156].mxu0 %v14463_v29  ;;  %8391 = vmatpush1.bf16.msra.mxu1 %v12014_v5  ;;  %v12066_v5 = vld [vmem:[#allocation14 + $0x5c0] ss:$28 sps:$4 sm:$0xff]  }
 0x521   : > { %8394 = vmatprep.mubr.bf16.mxu1 %v14061_v34  ;;  %8846 = vmatprep.mubr.bf16.mxu0 %v14061_v34  ;;  %v12045_v34 = vld [vmem:[#allocation14 + $0x3d0] ss:$28 sps:$4 sm:$0xff]  }
 0x522   : > { %8392 = vmatprep.subr.bf16.mxu1 %v12021_v30  ;;  %v12073_v30 = vld [vmem:[#allocation14 + $0x5fc] ss:$28 sps:$4 sm:$0xff]  }
 0x524   : > { %8393 = vmatpush1.bf16.msra.mxu1 %v12019_v44  ;;  %v12071_v44 = vld [vmem:[#allocation14 + $0x5f8] ss:$28 sps:$4 sm:$0xff]  }
 0x525   : > { %8475 = vmatprep.subr.bf16.mxu1 %v12026_v48  ;;  %v12078_v48 = vld [vmem:[#allocation14 + $0x634] ss:$28 sps:$4 sm:$0xff]  }
 0x527   : > { %8395 = vmatmul.mubr.bf16.vlgmr.msra.gmra.mrb[128].mxu1 %v14053_v61 }
 0x528   : > { %8476 = vmatpush1.bf16.msra.mxu1 %v12024_v21  ;;  %8847 = vmatmul.mubr.bf16.vlgmr.msra.gmra.mrb[160].mxu0 %v14053_v61  ;;  %v12054_v61 = vld [vmem:[#allocation14 + $0x600] ss:$28 sps:$4 sm:$0xff]   ;;  %v12081_v21 = vld [vmem:[#allocation14 + $0x66c] ss:$28 sps:$4 sm:$0xff]  }
 0x529   : > { %8404 = vmatprep.mubr.bf16.mxu1 %v14081_v47  ;;  %8854 = vmatprep.mubr.bf16.mxu0 %v14081_v47  ;;  %v12033_v47 = vld [vmem:[#allocation14 + $0x438] ss:$28 sps:$4 sm:$0xff]  }
 0x52a   : > { %8477 = vmatprep.subr.bf16.mxu1 %v12029_v24  ;;  %10469 = vmatpush3.bf16.msra.mxu0 %v12040_v53  ;;  %v12104_v24 = vld [vmem:[#allocation14 + $0x718] ss:$28 sps:$4 sm:$0xff]   ;;  %v15357_v53 = vld [vmem:[#allocation40_spill] sm:$0xff] }
 0x52b   : > { %10470 = vmatprep.subr.bf16.mxu0 %v12044_v18  ;;  %v12108_v18 = vld [vmem:[#allocation14 + $0x910] ss:$28 sps:$4 sm:$0xff]  }
 0x52c   : > { %8478 = vmatpush1.bf16.msra.mxu1 %v12027_v16  ;;  %v15358_v16 = vld [vmem:[#allocation30_spill] sm:$0xff] }
 0x52d   : > { %8479 = vmatprep.subr.bf16.mxu1 %v12032_v52  ;;  %v12079_v52 = vld [vmem:[#allocation14 + $0x668] ss:$28 sps:$4 sm:$0xff]  }
 0x52e   : > { %10471 = vmatpush3.bf16.msra.mxu0 %v12045_v34  ;;  %v15360_v34 = vld [vmem:[#allocation33_spill] sm:$0xff] }
 0x52f   : > { %8405 = vmatmul.mubr.bf16.gmra.mrb[132].mxu1 %v14077_v23  ;;  %10472 = vmatprep.subr.bf16.mxu0 %v12049_v12  ;;  %v12084_v12 = vld [vmem:[#allocation14 + $0x6a4] ss:$28 sps:$4 sm:$0xff]  }
 0x530   : > { %8480 = vmatpush1.bf16.msra.mxu1 %v12030_v14  ;;  %8855 = vmatmul.mubr.bf16.gmra.mrb[164].mxu0 %v14077_v23  ;;  %v12064_v23 = vld [vmem:[#allocation14 + $0x670] ss:$28 sps:$4 sm:$0xff]  }
 0x531   : > { %8414 = vmatprep.mubr.bf16.mxu1 %v14103_v19  ;;  %8862 = vmatprep.mubr.bf16.mxu0 %v14103_v19  ;;  %v12041_v19 = vld [vmem:[#allocation14 + $0x4a8] ss:$28 sps:$4 sm:$0xff]   ;;  %v12109_v14 = vld [vmem:[#allocation14 + $0x750] ss:$28 sps:$4 sm:$0xff]  }
 0x532   : > { %8481 = vmatprep.subr.bf16.mxu1 %v12035_v22  ;;  %10473 = vmatpush3.bf16.msra.mxu0 %v12050_v46  ;;  %v12113_v22 = vld [vmem:[#allocation14 + $0x948] ss:$28 sps:$4 sm:$0xff]   ;;  %v12082_v46 = vld [vmem:[#allocation14 + $0x6a0] ss:$28 sps:$4 sm:$0xff]  }
 0x533   : > { %10474 = vmatprep.subr.bf16.mxu0 %v12054_v61  ;;  %v12087_v61 = vld [vmem:[#allocation14 + $0x6dc] ss:$28 sps:$4 sm:$0xff]  }
 0x534   : > { %8482 = vmatpush1.bf16.msra.mxu1 %v12033_v47  ;;  %v12114_v47 = vld [vmem:[#allocation14 + $0x788] ss:$28 sps:$4 sm:$0xff]  }
 0x535   : > { %8483 = vmatprep.subr.bf16.mxu1 %v12038_v58  ;;  %v15361_v58 = vld [vmem:[#allocation45_spill] sm:$0xff] }
 0x536   : > { %10475 = vmatpush3.bf16.msra.mxu0 %v12055_v55  ;;  %v12118_v55 = vld [vmem:[#allocation14 + $0x980] ss:$28 sps:$4 sm:$0xff]  }
 0x537   : > { %8415 = vmatmul.mubr.bf16.gmra.mrb[136].mxu1 %v14097_v25  ;;  %10476 = vmatprep.subr.bf16.mxu0 %v12059_v4  ;;  %v15362_v4 = vld [vmem:[#allocation32_spill] sm:$0xff] }
 0x538   : > { %8484 = vmatpush1.bf16.msra.mxu1 %v12036_v56  ;;  %8863 = vmatmul.mubr.bf16.gmra.mrb[168].mxu0 %v14097_v25  ;;  %v12074_v25 = vld [vmem:[#allocation14 + $0x6e0] ss:$28 sps:$4 sm:$0xff]   ;;  %v12085_v56 = vld [vmem:[#allocation14 + $0x6d8] ss:$28 sps:$4 sm:$0xff]  }
 0x539   : > { %8424 = vmatprep.mubr.bf16.mxu1 %v14128_v49  ;;  %8870 = vmatprep.mubr.bf16.mxu0 %v14128_v49  ;;  %v12051_v49 = vld [vmem:[#allocation14 + $0x518] ss:$28 sps:$4 sm:$0xff]  }
 0x53a   : > { %8485 = vmatprep.subr.bf16.mxu1 %v12043_v37  ;;  %10477 = vmatpush3.bf16.msra.mxu0 %v12060_v40  ;;  %v15363_v37 = vld [vmem:[#allocation54_spill] sm:$0xff]  ;;  %v12090_v40 = vld [vmem:[#allocation14 + $0x714] ss:$28 sps:$4 sm:$0xff]  }
 0x53b   : > { %10478 = vmatprep.subr.bf16.mxu0 %v12064_v23  ;;  %v12119_v23 = vld [vmem:[#allocation14 + $0x7c0] ss:$28 sps:$4 sm:$0xff]  }
 0x53c   : > { %8486 = vmatpush1.bf16.msra.mxu1 %v12041_v19  ;;  %v12123_v19 = vld [vmem:[#allocation14 + $0x9b8] ss:$28 sps:$4 sm:$0xff]  }
 0x53d   : > { %8487 = vmatprep.subr.bf16.mxu1 %v12048_v60  ;;  %v12088_v60 = vld [vmem:[#allocation14 + $0x710] ss:$28 sps:$4 sm:$0xff]  }
 0x53e   : > { %10479 = vmatpush3.bf16.msra.mxu0 %v12065_v62  ;;  %v12093_v62 = vld [vmem:[#allocation14 + $0x74c] ss:$28 sps:$4 sm:$0xff]  }
 0x53f   : > { %8425 = vmatmul.mubr.bf16.gmra.mrb[140].mxu1 %v14122_v51  ;;  %10480 = vmatprep.subr.bf16.mxu0 %v12069_v8  ;;  %v12124_v8 = vld [vmem:[#allocation14 + $0x7f8] ss:$28 sps:$4 sm:$0xff]  }
 0x540   : > { %8488 = vmatpush1.bf16.msra.mxu1 %v12046_v39  ;;  %8871 = vmatmul.mubr.bf16.gmra.mrb[172].mxu0 %v14122_v51  ;;  %v12061_v51 = vld [vmem:[#allocation14 + $0x588] ss:$28 sps:$4 sm:$0xff]   ;;  %v12128_v39 = vld [vmem:[#allocation14 + $0x9f0] ss:$28 sps:$4 sm:$0xff]  }
 0x541   : > { %8434 = vmatprep.mubr.bf16.mxu1 %v14155_v1  ;;  %8878 = vmatprep.mubr.bf16.mxu0 %v14155_v1  ;;  %v12068_v1 = vld [vmem:[#allocation14 + $0x5c4] ss:$28 sps:$4 sm:$0xff]  }
 0x542   : > { %8489 = vmatprep.subr.bf16.mxu1 %v12053_v15  ;;  %10481 = vmatpush3.bf16.msra.mxu0 %v12070_v3  ;;  %v15364_v15 = vld [vmem:[#allocation34_spill] sm:$0xff]  ;;  %v12091_v3 = vld [vmem:[#allocation14 + $0x748] ss:$28 sps:$4 sm:$0xff]  }
 0x543   : > { %10482 = vmatprep.subr.bf16.mxu0 %v12074_v25  ;;  %v15365_v25 = vld [vmem:[#allocation35_spill] sm:$0xff] }
 0x544   : > { %8490 = vmatpush1.bf16.msra.mxu1 %v12051_v49  ;;  %v12096_v49 = vld [vmem:[#allocation14 + $0x784] ss:$28 sps:$4 sm:$0xff]  }
 0x545   : > { %8491 = vmatprep.subr.bf16.mxu1 %v12058_v41  ;;  %v12129_v41 = vld [vmem:[#allocation14 + $0x830] ss:$28 sps:$4 sm:$0xff]  }
 0x546   : > { %10483 = vmatpush3.bf16.msra.mxu0 %v12075_v33  ;;  %v12133_v33 = vld [vmem:[#allocation14 + $0xa28] ss:$28 sps:$4 sm:$0xff]  }
 0x547   : > { %8435 = vmatmul.mubr.bf16.gmra.mrb[144].mxu1 %v14150_v43  ;;  %10532 = vmatprep.subr.bf16.mxu0 %v12103_v17  ;;  %v12094_v17 = vld [vmem:[#allocation14 + $0x780] ss:$28 sps:$4 sm:$0xff]  }
 0x548   : > { %8492 = vmatpush1.bf16.msra.mxu1 %v12056_v31  ;;  %8879 = vmatmul.mubr.bf16.gmra.mrb[176].mxu0 %v14150_v43  ;;  %v15356_v43 = vld [vmem:[#allocation31_spill] sm:$0xff]  ;;  %v12099_v31 = vld [vmem:[#allocation14 + $0x7bc] ss:$28 sps:$4 sm:$0xff]  }
 0x549   : > { %8444 = vmatprep.mubr.bf16.mxu1 %v14177_v54  ;;  %8886 = vmatprep.mubr.bf16.mxu0 %v14177_v54  ;;  %v12076_v54 = vld [vmem:[#allocation14 + $0x630] ss:$28 sps:$4 sm:$0xff]  }
 0x54a   : > { %8493 = vmatprep.subr.bf16.mxu1 %v12063_v57  ;;  %v12134_v57 = vld [vmem:[#allocation14 + $0x868] ss:$28 sps:$4 sm:$0xff]  }
 0x54c   : > { %8494 = vmatpush1.bf16.msra.mxu1 %v12061_v51  ;;  %v12138_v51 = vld [vmem:[#allocation14 + $0xa60] ss:$28 sps:$4 sm:$0xff]  }
 0x54d   : > { %8495 = vmatprep.subr.bf16.mxu1 %v12068_v1  ;;  %v15366_v1 = vld [vmem:[#allocation53_spill] sm:$0xff] }
 0x54f   : > { %8445 = vmatmul.mubr.bf16.gmra.mrb[148].mxu1 %v14172_v10 }
 0x550   : > { %8496 = vmatpush1.bf16.msra.mxu1 %v12066_v5  ;;  %8887 = vmatmul.mubr.bf16.gmra.mrb[180].mxu0 %v14172_v10  ;;  %v15359_v10 = vld [vmem:[#allocation43_spill] sm:$0xff]  ;;  %v12097_v5 = vld [vmem:[#allocation14 + $0x7b8] ss:$28 sps:$4 sm:$0xff]  }
 0x551   : > { %8454 = vmatprep.mubr.bf16.mxu1 %v14204_v13  ;;  %8943 = vmatprep.mubr.bf16.mxu0 %v15356_v43 }
 0x552   : > { %8497 = vmatprep.subr.bf16.mxu1 %v12073_v30  ;;  %v15367_v30 = vld [vmem:[#allocation37_spill] sm:$0xff] }
 0x554   : > { %8498 = vmatpush1.bf16.msra.mxu1 %v12071_v44  ;;  %v12102_v44 = vld [vmem:[#allocation14 + $0x7f4] ss:$28 sps:$4 sm:$0xff]  }
 0x555   : > { %8499 = vmatprep.subr.bf16.mxu1 %v12078_v48  ;;  %v12167_v48 = vld [vmem:[#allocation14 + $0xc58] ss:$28 sps:$4 sm:$0xff]  }
 0x557   : > { %8455 = vmatmul.mubr.bf16.gmra.mrb[152].mxu1 %v15357_v53 }
 0x558   : > { %8500 = vmatpush1.bf16.msra.mxu1 %v12076_v54  ;;  %8944 = vmatmul.mubr.bf16.vlgmr.msra.gmra.mrb[184].mxu0 %v15358_v16  ;;  %v12100_v54 = vld [vmem:[#allocation14 + $0x7f0] ss:$28 sps:$4 sm:$0xff]  }
 0x559   : > { %8464 = vmatprep.mubr.bf16.mxu1 %v15359_v10  ;;  %8951 = vmatprep.mubr.bf16.mxu0 %v15360_v34 }
 0x55a   : > { %8501 = vmatprep.subr.bf16.mxu1 %v12081_v21  ;;  %10533 = vmatpush3.bf16.msra.mxu0 %v12104_v24  ;;  %v12107_v21 = vld [vmem:[#allocation14 + $0x82c] ss:$28 sps:$4 sm:$0xff]  }
 0x55b   : > { %10534 = vmatprep.subr.bf16.mxu0 %v12108_v18  ;;  %v15368_v24 = vld [vmem:[#allocation36_spill] sm:$0xff] }
 0x55c   : > { %8502 = vmatpush1.bf16.msra.mxu1 %v12079_v52  ;;  %v12105_v18 = vld [vmem:[#allocation14 + $0x828] ss:$28 sps:$4 sm:$0xff]  }
 0x55d   : > { %8503 = vmatprep.subr.bf16.mxu1 %v12084_v12  ;;  %v12112_v52 = vld [vmem:[#allocation14 + $0x864] ss:$28 sps:$4 sm:$0xff]   ;;  %v12117_v12 = vld [vmem:[#allocation14 + $0x89c] ss:$28 sps:$4 sm:$0xff]  }
 0x55e   : > { %10535 = vmatpush3.bf16.msra.mxu0 %v12109_v14  ;;  %v15370_v14 = vld [vmem:[#allocation38_spill] sm:$0xff] }
 0x55f   : > { %8465 = vmatmul.mubr.bf16.gmra.mrb[156].mxu1 %v15361_v58  ;;  %10536 = vmatprep.subr.bf16.mxu0 %v12113_v22  ;;  %v12115_v22 = vld [vmem:[#allocation14 + $0x898] ss:$28 sps:$4 sm:$0xff]  }
 0x560   : > { %8504 = vmatpush1.bf16.msra.mxu1 %v12082_v46  ;;  %8952 = vmatmul.mubr.bf16.gmra.mrb[188].mxu0 %v15362_v4  ;;  %v15371_v46 = vld [vmem:[#allocation42_spill] sm:$0xff] }
 0x561   : > { %8507 = vmatprep.mubr.bf16.mxu1 %v15356_v43  ;;  %8959 = vmatprep.mubr.bf16.mxu0 %v15363_v37  ;;  %v12139_v43 = vld [vmem:[#allocation14 + $0x8a0] ss:$28 sps:$4 sm:$0xff]  }
 0x562   : > { %8505 = vmatprep.subr.bf16.mxu1 %v12087_v61  ;;  %10537 = vmatpush3.bf16.msra.mxu0 %v12114_v47  ;;  %v12122_v61 = vld [vmem:[#allocation14 + $0x8d4] ss:$28 sps:$4 sm:$0xff]  }
 0x563   : > { %10538 = vmatprep.subr.bf16.mxu0 %v12118_v55  ;;  %v12120_v47 = vld [vmem:[#allocation14 + $0x8d0] ss:$28 sps:$4 sm:$0xff]  }
 0x564   : > { %8506 = vmatpush1.bf16.msra.mxu1 %v12085_v56  ;;  %v12127_v55 = vld [vmem:[#allocation14 + $0x90c] ss:$28 sps:$4 sm:$0xff]  }
 0x565   : > { %8588 = vmatprep.subr.bf16.mxu1 %v12090_v40  ;;  %v12125_v56 = vld [vmem:[#allocation14 + $0x908] ss:$28 sps:$4 sm:$0xff]  }
 0x566   : > { %10539 = vmatpush3.bf16.msra.mxu0 %v12119_v23  ;;  %v12132_v40 = vld [vmem:[#allocation14 + $0x944] ss:$28 sps:$4 sm:$0xff]  }
 0x567   : > { %8508 = vmatmul.mubr.bf16.vlgmr.msra.gmra.mrb[128].mxu1 %v15358_v16  ;;  %10540 = vmatprep.subr.bf16.mxu0 %v12123_v19  ;;  %v15369_v16 = vld [vmem:[#allocation39_spill] sm:$0xff]  ;;  %v12137_v19 = vld [vmem:[#allocation14 + $0x97c] ss:$28 sps:$4 sm:$0xff]  }
 0x568   : > { %8589 = vmatpush1.bf16.msra.mxu1 %v12088_v60  ;;  %8960 = vmatmul.mubr.bf16.gmra.mrb[192].mxu0 %v15364_v15  ;;  %v12130_v23 = vld [vmem:[#allocation14 + $0x940] ss:$28 sps:$4 sm:$0xff]  }
 0x569   : > { %8517 = vmatprep.mubr.bf16.mxu1 %v15360_v34  ;;  %8967 = vmatprep.mubr.bf16.mxu0 %v15365_v25  ;;  %v12110_v34 = vld [vmem:[#allocation14 + $0x860] ss:$28 sps:$4 sm:$0xff]  }
 0x56a   : > { %8590 = vmatprep.subr.bf16.mxu1 %v12093_v62  ;;  %10541 = vmatpush3.bf16.msra.mxu0 %v12124_v8  ;;  %v15374_v60 = vld [vmem:[#allocation46_spill] sm:$0xff] }
 0x56b   : > { %10542 = vmatprep.subr.bf16.mxu0 %v12128_v39  ;;  %v12135_v62 = vld [vmem:[#allocation14 + $0x978] ss:$28 sps:$4 sm:$0xff]  }
 0x56c   : > { %8591 = vmatpush1.bf16.msra.mxu1 %v12091_v3  ;;  %v15375_v8 = vld [vmem:[#allocation50_spill] sm:$0xff]  ;;  %v12142_v39 = vld [vmem:[#allocation14 + $0x9b4] ss:$28 sps:$4 sm:$0xff]   ;;  %v12145_v3 = vld [vmem:[#allocation14 + $0x9ec] ss:$28 sps:$4 sm:$0xff]  }
 0x56d   : > { %8592 = vmatprep.subr.bf16.mxu1 %v12096_v49  ;;  %v12172_v49 = vld [vmem:[#allocation14 + $0xc90] ss:$28 sps:$4 sm:$0xff]  }
 0x56e   : > { %10543 = vmatpush3.bf16.msra.mxu0 %v12129_v41  ;;  %v15376_v41 = vld [vmem:[#allocation49_spill] sm:$0xff] }
 0x56f   : > { %8518 = vmatmul.mubr.bf16.gmra.mrb[132].mxu1 %v15362_v4  ;;  %10544 = vmatprep.subr.bf16.mxu0 %v12133_v33  ;;  %v15372_v4 = vld [vmem:[#allocation41_spill] sm:$0xff]  ;;  %v12143_v33 = vld [vmem:[#allocation14 + $0x9e8] ss:$28 sps:$4 sm:$0xff]  }
 0x570   : > { %8593 = vmatpush1.bf16.msra.mxu1 %v12094_v17  ;;  %8968 = vmatmul.mubr.bf16.gmra.mrb[196].mxu0 %v15366_v1  ;;  %v15377_v17 = vld [vmem:[#allocation48_spill] sm:$0xff] }
 0x571   : > { %8527 = vmatprep.mubr.bf16.mxu1 %v15363_v37  ;;  %8975 = vmatprep.mubr.bf16.mxu0 %v15367_v30  ;;  %v15373_v37 = vld [vmem:[#allocation44_spill] sm:$0xff] }
 0x572   : > { %8594 = vmatprep.subr.bf16.mxu1 %v12099_v31  ;;  %10545 = vmatpush3.bf16.msra.mxu0 %v12134_v57  ;;  %v12148_v31 = vld [vmem:[#allocation14 + $0xa24] ss:$28 sps:$4 sm:$0xff]   ;;  %v12173_v57 = vld [vmem:[#allocation14 + $0xad0] ss:$28 sps:$4 sm:$0xff]  }
 0x573   : > { %10546 = vmatprep.subr.bf16.mxu0 %v12138_v51  ;;  %v12177_v51 = vld [vmem:[#allocation14 + $0xcc8] ss:$28 sps:$4 sm:$0xff]  }
 0x574   : > { %8595 = vmatpush1.bf16.msra.mxu1 %v12097_v5  ;;  %v12151_v5 = vld [vmem:[#allocation14 + $0xa5c] ss:$28 sps:$4 sm:$0xff]  }
 0x575   : > { %8596 = vmatprep.subr.bf16.mxu1 %v12102_v44  ;;  %v12182_v44 = vld [vmem:[#allocation14 + $0xd00] ss:$28 sps:$4 sm:$0xff]  }
 0x576   : > { %10547 = vmatpush3.bf16.msra.mxu0 %v12139_v43  ;;  %v15378_v43 = vld [vmem:[#allocation47_spill] sm:$0xff] }
 0x577   : > { %8528 = vmatmul.mubr.bf16.gmra.mrb[136].mxu1 %v15364_v15  ;;  %10596 = vmatprep.subr.bf16.mxu0 %v12167_v48  ;;  %v12140_v15 = vld [vmem:[#allocation14 + $0x9b0] ss:$28 sps:$4 sm:$0xff]   ;;  %v12149_v48 = vld [vmem:[#allocation14 + $0xa58] ss:$28 sps:$4 sm:$0xff]  }
 0x578   : > { %8597 = vmatpush1.bf16.msra.mxu1 %v12100_v54  ;;  %8976 = vmatmul.mubr.bf16.gmra.mrb[200].mxu0 %v15368_v24  ;;  %v15379_v54 = vld [vmem:[#allocation52_spill] sm:$0xff] }
 0x579   : > { %8537 = vmatprep.mubr.bf16.mxu1 %v15365_v25  ;;  %8983 = vmatprep.mubr.bf16.mxu0 %v15369_v16  ;;  %v12168_v25 = vld [vmem:[#allocation14 + $0xa98] ss:$28 sps:$4 sm:$0xff]  }
 0x57a   : > { %8598 = vmatprep.subr.bf16.mxu1 %v12107_v21  ;;  %v12154_v21 = vld [vmem:[#allocation14 + $0xa94] ss:$28 sps:$4 sm:$0xff]  }
 0x57c   : > { %8599 = vmatpush1.bf16.msra.mxu1 %v12105_v18  ;;  %v12187_v18 = vld [vmem:[#allocation14 + $0xd38] ss:$28 sps:$4 sm:$0xff]  }
 0x57d   : > { %8600 = vmatprep.subr.bf16.mxu1 %v12112_v52  ;;  %v12157_v52 = vld [vmem:[#allocation14 + $0xacc] ss:$28 sps:$4 sm:$0xff]  }
 0x57f   : > { %8538 = vmatmul.mubr.bf16.gmra.mrb[140].mxu1 %v15366_v1  ;;  %v12146_v1 = vld [vmem:[#allocation14 + $0xa20] ss:$28 sps:$4 sm:$0xff]  }
 0x580   : > { %8601 = vmatpush1.bf16.msra.mxu1 %v12110_v34  ;;  %8984 = vmatmul.mubr.bf16.gmra.mrb[204].mxu0 %v15370_v14  ;;  %v12188_v34 = vld [vmem:[#allocation14 + $0xb78] ss:$28 sps:$4 sm:$0xff]  }
 0x581   : > { %8547 = vmatprep.mubr.bf16.mxu1 %v15367_v30  ;;  %8991 = vmatprep.mubr.bf16.mxu0 %v15371_v46  ;;  %v12178_v30 = vld [vmem:[#allocation14 + $0xb08] ss:$28 sps:$4 sm:$0xff]  }
 0x582   : > { %8602 = vmatprep.subr.bf16.mxu1 %v12117_v12  ;;  %v12192_v12 = vld [vmem:[#allocation14 + $0xd70] ss:$28 sps:$4 sm:$0xff]  }
 0x584   : > { %8603 = vmatpush1.bf16.msra.mxu1 %v12115_v22  ;;  %v12155_v22 = vld [vmem:[#allocation14 + $0xac8] ss:$28 sps:$4 sm:$0xff]  }
 0x585   : > { %8604 = vmatprep.subr.bf16.mxu1 %v12122_v61  ;;  %v12160_v61 = vld [vmem:[#allocation14 + $0xb04] ss:$28 sps:$4 sm:$0xff]  }
 0x587   : > { %8548 = vmatmul.mubr.bf16.gmra.mrb[144].mxu1 %v15368_v24  ;;  %v12183_v24 = vld [vmem:[#allocation14 + $0xb40] ss:$28 sps:$4 sm:$0xff]  }
 0x588   : > { %8605 = vmatpush1.bf16.msra.mxu1 %v12120_v47  ;;  %8992 = vmatmul.mubr.bf16.gmra.mrb[208].mxu0 %v15372_v4  ;;  %v12193_v47 = vld [vmem:[#allocation14 + $0xbb0] ss:$28 sps:$4 sm:$0xff]  }
 0x589   : > { %8557 = vmatprep.mubr.bf16.mxu1 %v15369_v16  ;;  %8999 = vmatprep.mubr.bf16.mxu0 %v15373_v37  ;;  %v12152_v16 = vld [vmem:[#allocation14 + $0xa90] ss:$28 sps:$4 sm:$0xff]  }
 0x58a   : > { %8606 = vmatprep.subr.bf16.mxu1 %v12127_v55  ;;  %v12197_v55 = vld [vmem:[#allocation14 + $0xda8] ss:$28 sps:$4 sm:$0xff]  }
 0x58c   : > { %8607 = vmatpush1.bf16.msra.mxu1 %v12125_v56  ;;  %v12163_v56 = vld [vmem:[#allocation14 + $0xb3c] ss:$28 sps:$4 sm:$0xff]  }
 0x58d   : > { %8608 = vmatprep.subr.bf16.mxu1 %v12132_v40  ;;  %v12202_v40 = vld [vmem:[#allocation14 + $0xde0] ss:$28 sps:$4 sm:$0xff]  }
 0x58f   : > { %8558 = vmatmul.mubr.bf16.gmra.mrb[148].mxu1 %v15370_v14  ;;  %v15380_v14 = vld [vmem:[#allocation51_spill] sm:$0xff] }
 0x590   : > { %8609 = vmatpush1.bf16.msra.mxu1 %v12130_v23  ;;  %9000 = vmatmul.mubr.bf16.gmra.mrb[212].mxu0 %v15374_v60  ;;  %v15382_v23 = vld [vmem:[#allocation29_spill] sm:$0xff] }
 0x591   : > { %8567 = vmatprep.mubr.bf16.mxu1 %v15371_v46  ;;  %9040 = vmatprep.mubr.bf16.mxu0 %v15375_v8  ;;  %v15381_v46 = vld [vmem:[#allocation55_spill] sm:$0xff] }
 0x592   : > { %8610 = vmatprep.subr.bf16.mxu1 %v12137_v19  ;;  %v12161_v19 = vld [vmem:[#allocation14 + $0xb38] ss:$28 sps:$4 sm:$0xff]  }
 0x594   : > { %8611 = vmatpush1.bf16.msra.mxu1 %v12135_v62  ;;  %v12166_v62 = vld [vmem:[#allocation14 + $0xb74] ss:$28 sps:$4 sm:$0xff]  }
 0x595   : > { %8612 = vmatprep.subr.bf16.mxu1 %v12142_v39  ;;  %v12164_v39 = vld [vmem:[#allocation14 + $0xb70] ss:$28 sps:$4 sm:$0xff]  }
 0x597   : > { %8568 = vmatmul.mubr.bf16.gmra.mrb[152].mxu1 %v15372_v4  ;;  %v12158_v4 = vld [vmem:[#allocation14 + $0xb00] ss:$28 sps:$4 sm:$0xff]  }
 0x598   : > { %8613 = vmatpush1.bf16.msra.mxu1 %v12140_v15  ;;  %9041 = vmatmul.mubr.bf16.vlgmr.msra.gmra.mrb[216].mxu0 %v15376_v41  ;;  %v14580_v15 = vld [vmem:[#allocation16] sm:$0xff] }
 0x599   : > { %8577 = vmatprep.mubr.bf16.mxu1 %v15373_v37  ;;  %9048 = vmatprep.mubr.bf16.mxu0 %v15377_v17  ;;  %v12198_v37 = vld [vmem:[#allocation14 + $0xbe8] ss:$28 sps:$4 sm:$0xff]  }
 0x59a   : > { %8614 = vmatprep.subr.bf16.mxu1 %v12145_v3  ;;  %10597 = vmatpush3.bf16.msra.mxu0 %v12168_v25  ;;  %v12171_v3 = vld [vmem:[#allocation14 + $0xbac] ss:$28 sps:$4 sm:$0xff]   ;;  %v15384_v25 = vld [vmem:[#allocation25_spill] sm:$0xff] }
 0x59b   : > { %10598 = vmatprep.subr.bf16.mxu0 %v12172_v49  ;;  %v14585_v49 = vrot.slane %v14580_v15, %v15384_v25 }
 0x59c   : > { %8615 = vmatpush1.bf16.msra.mxu1 %v12143_v33  ;;  %v15386_v33 = vld [vmem:[#allocation27_spill] sm:$0xff] }
 0x59d   : > { %8616 = vmatprep.subr.bf16.mxu1 %v12148_v31  ;;  %v12169_v31 = vld [vmem:[#allocation14 + $0xba8] ss:$28 sps:$4 sm:$0xff]  }
 0x59e   : > { %10599 = vmatpush3.bf16.msra.mxu0 %v12173_v57  ;;  %v15387_v57 = vld [vmem:[#allocation26_spill] sm:$0xff] }
 0x59f   : > { %8578 = vmatmul.mubr.bf16.gmra.mrb[156].mxu1 %v15374_v60  ;;  %10600 = vmatprep.subr.bf16.mxu0 %v12177_v51  ;;  %v15383_v60 = vld [vmem:[#allocation57_spill] sm:$0xff]  ;;  %v14594_v51 = vrot.slane %v14580_v15, %v15387_v57 }
 0x5a0   : > { %8617 = vmatpush1.bf16.msra.mxu1 %v12146_v1  ;;  %9049 = vmatmul.mubr.bf16.gmra.mrb[220].mxu0 %v15378_v43  ;;  %v15388_v1 = vld [vmem:[#allocation59_spill] sm:$0xff] }
 0x5a1   : > { %8620 = vmatprep.mubr.bf16.mxu1 %v15375_v8  ;;  %9056 = vmatprep.mubr.bf16.mxu0 %v15379_v54  ;;  %v12203_v8 = vld [vmem:[#allocation14 + $0xc20] ss:$28 sps:$4 sm:$0xff]  }
 0x5a2   : > { %8618 = vmatprep.subr.bf16.mxu1 %v12151_v5  ;;  %10601 = vmatpush3.bf16.msra.mxu0 %v12178_v30  ;;  %v15389_v5 = vld [vmem:[#allocation28_spill] sm:$0xff] }
 0x5a3   : > { %10602 = vmatprep.subr.bf16.mxu0 %v12182_v44  ;;  %v14600_v30 = vrot.slane %v14580_v15, %v15389_v5  ;;  %v12176_v44 = vld [vmem:[#allocation14 + $0xbe4] ss:$28 sps:$4 sm:$0xff]  }
 0x5a4   : > { %8619 = vmatpush1.bf16.msra.mxu1 %v12149_v48 }
 0x5a5   : > { %8701 = vmatprep.subr.bf16.mxu1 %v12154_v21 }
 0x5a6   : > { %10603 = vmatpush3.bf16.msra.mxu0 %v12183_v24 }
 0x5a7   : > { %8621 = vmatmul.mubr.bf16.vlgmr.msra.gmra.mrb[128].mxu1 %v15376_v41  ;;  %10604 = vmatprep.subr.bf16.mxu0 %v12187_v18  ;;  %v15385_v41 = vld [vmem:[#allocation56_spill] sm:$0xff] }
 0x5a8   : > { %8702 = vmatpush1.bf16.msra.mxu1 %v12152_v16  ;;  %9057 = vmatmul.mubr.bf16.gmra.mrb[224].mxu0 %v15380_v14 }
 0x5a9   : > { %8630 = vmatprep.mubr.bf16.mxu1 %v15377_v17  ;;  %9064 = vmatprep.mubr.bf16.mxu0 %v15381_v46  ;;  %v14590_v17 = vrot.slane %v14580_v15, %v15386_v33 }
 0x5aa   : > { %8703 = vmatprep.subr.bf16.mxu1 %v12157_v52  ;;  %10605 = vmatpush3.bf16.msra.mxu0 %v12188_v34  ;;  %v12174_v34 = vld [vmem:[#allocation14 + $0xbe0] ss:$28 sps:$4 sm:$0xff]  }
 0x5ab   : > { %10606 = vmatprep.subr.bf16.mxu0 %v12192_v12 }
 0x5ac   : > { %8704 = vmatpush1.bf16.msra.mxu1 %v12155_v22 }
 0x5ad   : > { %8705 = vmatprep.subr.bf16.mxu1 %v12160_v61 }
 0x5ae   : > { %10607 = vmatpush3.bf16.msra.mxu0 %v12193_v47 }
 0x5af   : > { %8631 = vmatmul.mubr.bf16.gmra.mrb[132].mxu1 %v15378_v43  ;;  %10608 = vmatprep.subr.bf16.mxu0 %v12197_v55  ;;  %v12181_v55 = vld [vmem:[#allocation14 + $0xc1c] ss:$28 sps:$4 sm:$0xff]  }
 0x5b0   : > { %8706 = vmatpush1.bf16.msra.mxu1 %v12158_v4  ;;  %9065 = vmatmul.mubr.bf16.gmra.mrb[228].mxu0 %v15382_v23 }
 0x5b1   : > { %8640 = vmatprep.mubr.bf16.mxu1 %v15379_v54  ;;  %9072 = vmatprep.mubr.bf16.mxu0 %v15383_v60 }
 0x5b2   : > { %8707 = vmatprep.subr.bf16.mxu1 %v12163_v56  ;;  %10609 = vmatpush3.bf16.msra.mxu0 %v12198_v37  ;;  %v15390_v37 = vld [vmem:[#allocation58_spill] sm:$0xff] }
 0x5b3   : > { %10610 = vmatprep.subr.bf16.mxu0 %v12202_v40  ;;  %v12179_v40 = vld [vmem:[#allocation14 + $0xc18] ss:$28 sps:$4 sm:$0xff]  }
 0x5b4   : > { %8708 = vmatpush1.bf16.msra.mxu1 %v12161_v19  ;;  %v12186_v19 = vld [vmem:[#allocation14 + $0xc54] ss:$28 sps:$4 sm:$0xff]  }
 0x5b5   : > { %8709 = vmatprep.subr.bf16.mxu1 %v12166_v62 }
 0x5b6   : > { %10611 = vmatpush3.bf16.msra.mxu0 %v12203_v8 }
 0x5b7   : > { %8641 = vmatmul.mubr.bf16.gmra.mrb[136].mxu1 %v15380_v14 }
 0x5b8   : > { %8710 = vmatpush1.bf16.msra.mxu1 %v12164_v39  ;;  %9073 = vmatmul.mubr.bf16.gmra.mrb[232].mxu0 %v15385_v41 }
 0x5b9   : > { %8650 = vmatprep.mubr.bf16.mxu1 %v15381_v46  ;;  %9080 = vmatprep.mubr.bf16.mxu0 %v15388_v1 }
 0x5ba   : > { %v7831_v43 = vpop.f32.mrb[96].mxu1  ;;  %8711 = vmatprep.subr.bf16.mxu1 %v12171_v3 }
 0x5bb   : > { %v10804_v48 = vadd.f32 %v7831_v43, %v14585_v49  ;;  %v8283_v54 = vpop.f32.mrb[128].mxu0  ;;  %v7833_v21 = vpop.f32.mrb[97].mxu1 }
 0x5bc   : > { %v10836_v24 = vadd.f32 %v8283_v54, %v14590_v17  ;;  %v10805_v18 = vadd.f32 %v7833_v21, %v14594_v51  ;;  %v8285_v16 = vpop.f32.mrb[129].mxu0  ;;  %8712 = vmatpush1.bf16.msra.mxu1 %v12169_v31  ;;  %v7835_v52 = vpop.f32.mrb[98].mxu1  ;;  %v12191_v21 = vld [vmem:[#allocation14 + $0xc8c] ss:$28 sps:$4 sm:$0xff]  }
 0x5bd   : > { %12216 = vtanh.f32 %v10804_v48  ;;  %v10837_v12 = vadd.f32 %v8285_v16, %v14600_v30  ;;  %v10806_v14 = vadd.f32 %v7835_v52, %v14585_v49  ;;  %v8287_v22 = vpop.f32.mrb[130].mxu0  ;;  %v7837_v46 = vpop.f32.mrb[99].mxu1  ;;  %8713 = vmatprep.subr.bf16.mxu1 %v12176_v44 }
 0x5be   : > { %12218 = vtanh.f32 %v10836_v24  ;;  %v10838_v61 = vadd.f32 %v8287_v22, %v14590_v17  ;;  %v8289_v47 = vpop.f32.mrb[131].mxu0  ;;  %v10807_v4 = vadd.f32 %v7837_v46, %v14594_v51 }
 0x5bf   : > { %12220 = vtanh.f32 %v10805_v18  ;;  %8651 = vmatmul.mubr.bf16.gmra.mrb[140].mxu1 %v15382_v23  ;;  %v10839_v56 = vadd.f32 %v8289_v47, %v14600_v30 }
 0x5c0   : > { %12222 = vtanh.f32 %v10837_v12  ;;  %8714 = vmatpush1.bf16.msra.mxu1 %v12174_v34  ;;  %9081 = vmatmul.mubr.bf16.gmra.mrb[236].mxu0 %v15390_v37  ;;  %v12189_v34 = vld [vmem:[#allocation14 + $0xc88] ss:$28 sps:$4 sm:$0xff]  }
 0x5c1   : > { %12224 = vtanh.f32 %v10806_v14  ;;  %8660 = vmatprep.mubr.bf16.mxu1 %v15383_v60  ;;  %9088 = vmatprep.mubr.bf16.mxu0 %v14443_v2  ;;  %v12184_v60 = vld [vmem:[#allocation14 + $0xc50] ss:$28 sps:$4 sm:$0xff]  }
 0x5c2   : > { %12226 = vtanh.f32 %v10838_v61  ;;  %v7841_v62 = vpop.f32.mrb[100].mxu1  ;;  %8715 = vmatprep.subr.bf16.mxu1 %v12181_v55 }
 0x5c3   : > { %12228 = vtanh.f32 %v10807_v4  ;;  %v10808_v23 = vadd.f32 %v7841_v62, %v14585_v49  ;;  %v8293_v8 = vpop.f32.mrb[132].mxu0  ;;  %v7843_v39 = vpop.f32.mrb[101].mxu1  ;;  %v12194_v62 = vld [vmem:[#allocation14 + $0xcc0] ss:$28 sps:$4 sm:$0xff]  }
 0x5c4   : > { %12230 = vtanh.f32 %v10839_v56  ;;  %v10840_v3 = vadd.f32 %v8293_v8, %v14590_v17  ;;  %v10809_v25 = vadd.f32 %v7843_v39, %v14594_v51  ;;  %v8295_v33 = vpop.f32.mrb[133].mxu0  ;;  %8716 = vmatpush1.bf16.msra.mxu1 %v12179_v40  ;;  %v7845_v31 = vpop.f32.mrb[102].mxu1 }
 0x5c5   : > { %12232 = vtanh.f32 %v10808_v23  ;;  %v10841_v57 = vadd.f32 %v8295_v33, %v14600_v30  ;;  %v10810_v5 = vadd.f32 %v7845_v31, %v14585_v49  ;;  %v8297_v44 = vpop.f32.mrb[134].mxu0  ;;  %v7847_v43 = vpop.f32.mrb[103].mxu1  ;;  %8717 = vmatprep.subr.bf16.mxu1 %v12186_v19 }
 0x5c6   : > { %12234 = vtanh.f32 %v10840_v3  ;;  %v10842_v48 = vadd.f32 %v8297_v44, %v14590_v17  ;;  %v8299_v54 = vpop.f32.mrb[135].mxu0  ;;  %v10811_v18 = vadd.f32 %v7847_v43, %v14594_v51 }
 0x5c7   : > { %v12217_v24 = vpop.eup %12216  ;;  %12236 = vtanh.f32 %v10809_v25  ;;  %8661 = vmatmul.mubr.bf16.gmra.mrb[144].mxu1 %v15385_v41  ;;  %v10843_v52 = vadd.f32 %v8299_v54, %v14600_v30  ;;  %v12196_v41 = vld [vmem:[#allocation14 + $0xcc4] ss:$28 sps:$4 sm:$0xff]   ;;  %v12199_v54 = vld [vmem:[#allocation14 + $0xcf8] ss:$28 sps:$4 sm:$0xff]  }
 0x5c8   : > { %v12219_v16 = vpop.eup %12218  ;;  %9314 = vst [vmem:[%s14625_s9] sm:$0xff] %v12217_v24  ;;  %12238 = vtanh.f32 %v10841_v57  ;;  %8718 = vmatpush1.bf16.msra.mxu1 %v12184_v60  ;;  %9089 = vmatmul.mubr.bf16.gmra.mrb[240].mxu0 %v14433_v6  ;;  %v12201_v57 = vld [vmem:[#allocation14 + $0xcfc] ss:$28 sps:$4 sm:$0xff]   ;;  %v12206_v24 = vld [vmem:[#allocation14 + $0xd34] ss:$28 sps:$4 sm:$0xff]  }
 0x5c9   : > { %v12221_v12 = vpop.eup %12220  ;;  %9316 = vst [vmem:[%s14625_s9 + $0x10] sm:$0xff] %v12219_v16  ;;  %12240 = vtanh.f32 %v10810_v5  ;;  %8670 = vmatprep.mubr.bf16.mxu1 %v15388_v1  ;;  %9096 = vmatprep.mubr.bf16.mxu0 %v14465_v27 }
 0x5ca   : > { %v12223_v14 = vpop.eup %12222  ;;  %9315 = vst [vmem:[%s14625_s9 + $0x8] sm:$0xff] %v12221_v12  ;;  %12242 = vtanh.f32 %v10842_v48  ;;  %v7851_v22 = vpop.f32.mrb[104].mxu1  ;;  %8719 = vmatprep.subr.bf16.mxu1 %v12191_v21 }
 0x5cb   : > { %v12225_v46 = vpop.eup %12224  ;;  %9317 = vst [vmem:[%s14625_s9 + $0x18] sm:$0xff] %v12223_v14  ;;  %12244 = vtanh.f32 %v10811_v18  ;;  %v10812_v61 = vadd.f32 %v7851_v22, %v14585_v49  ;;  %v8303_v47 = vpop.f32.mrb[136].mxu0 }
 0x5cc   : > { %v7853_v55 = vpop.f32.mrb[105].mxu1  ;;  %v12227_v4 = vpop.eup %12226  ;;  %9321 = vst [vmem:[%s14625_s9 + $0x38] sm:$0xff] %v12225_v46  ;;  %12246 = vtanh.f32 %v10843_v52  ;;  %v10844_v1 = vadd.f32 %v8303_v47, %v14590_v17  ;;  %8720 = vmatpush1.bf16.msra.mxu1 %v12189_v34 }
 0x5cd   : > { %v10813_v56 = vadd.f32 %v7853_v55, %v14594_v51  ;;  %v8305_v40 = vpop.f32.mrb[137].mxu0  ;;  %v7855_v19 = vpop.f32.mrb[106].mxu1  ;;  %9323 = vst [vmem:[%s14625_s9 + $0x48] sm:$0xff] %v12227_v4  ;;  %12248 = vtanh.f32 %v10812_v61  ;;  %8721 = vmatprep.subr.bf16.mxu1 %v12196_v41  ;;  %v12204_v61 = vld [vmem:[#allocation14 + $0xd30] ss:$28 sps:$4 sm:$0xff]  }
 0x5ce   : > { %v12229_v23 = vpop.eup %12228  ;;  %v10845_v8 = vadd.f32 %v8305_v40, %v14600_v30  ;;  %v10814_v39 = vadd.f32 %v7855_v19, %v14585_v49  ;;  %v8307_v3 = vpop.f32.mrb[138].mxu0  ;;  %12250 = vtanh.f32 %v10844_v1 }
 0x5cf   : > { %v7857_v25 = vpop.f32.mrb[107].mxu1  ;;  %v12231_v33 = vpop.eup %12230  ;;  %9322 = vst [vmem:[%s14625_s9 + $0x40] sm:$0xff] %v12229_v23  ;;  %v10846_v31 = vadd.f32 %v8307_v3, %v14590_v17  ;;  %12252 = vtanh.f32 %v10813_v56  ;;  %8671 = vmatmul.mubr.bf16.gmra.mrb[148].mxu1 %v15390_v37  ;;  %v12209_v23 = vld [vmem:[#allocation14 + $0xd6c] ss:$28 sps:$4 sm:$0xff]  }
 0x5d0   : > { %v8309_v60 = vpop.f32.mrb[139].mxu0  ;;  %v12233_v5 = vpop.eup %12232  ;;  %9324 = vst [vmem:[%s14625_s9 + $0x50] sm:$0xff] %v12231_v33  ;;  %v10815_v44 = vadd.f32 %v7857_v25, %v14594_v51  ;;  %12254 = vtanh.f32 %v10845_v8  ;;  %8722 = vmatpush1.bf16.msra.mxu1 %v12194_v62  ;;  %9097 = vmatmul.mubr.bf16.gmra.mrb[244].mxu0 %v14459_v20  ;;  %v12207_v33 = vld [vmem:[#allocation14 + $0xd68] ss:$28 sps:$4 sm:$0xff]  }
 0x5d1   : > { %v12235_v43 = vpop.eup %12234  ;;  %9328 = vst [vmem:[%s14625_s9 + $0x70] sm:$0xff] %v12233_v5  ;;  %v10847_v48 = vadd.f32 %v8309_v60, %v14600_v30  ;;  %12256 = vtanh.f32 %v10814_v39  ;;  %8680 = vmatprep.mubr.bf16.mxu1 %v14443_v2  ;;  %9137 = vmatprep.mubr.bf16.mxu0 %v14300_v0  ;;  %v12212_v60 = vld [vmem:[#allocation14 + $0xda4] ss:$28 sps:$4 sm:$0xff]  }
 0x5d2   : > { %v12237_v21 = vpop.eup %12236  ;;  %9330 = vst [vmem:[%s14625_s9 + $0x80] sm:$0xff] %v12235_v43  ;;  %12258 = vtanh.f32 %v10846_v31  ;;  %v7861_v18 = vpop.f32.mrb[108].mxu1  ;;  %8723 = vmatprep.subr.bf16.mxu1 %v12201_v57 }
 0x5d3   : > { %v12239_v37 = vpop.eup %12238  ;;  %9329 = vst [vmem:[%s14625_s9 + $0x78] sm:$0xff] %v12237_v21  ;;  %12260 = vtanh.f32 %v10815_v44  ;;  %v10816_v52 = vadd.f32 %v7861_v18, %v14585_v49  ;;  %v8313_v34 = vpop.f32.mrb[140].mxu0  ;;  %v12210_v18 = vld [vmem:[#allocation14 + $0xda0] ss:$28 sps:$4 sm:$0xff]  }
 0x5d4   : > { %v12241_v16 = vpop.eup %12240  ;;  %9331 = vst [vmem:[%s14625_s9 + $0x88] sm:$0xff] %v12239_v37  ;;  %v7863_v12 = vpop.f32.mrb[109].mxu1  ;;  %12262 = vtanh.f32 %v10847_v48  ;;  %v10848_v2 = vadd.f32 %v8313_v34, %v14590_v17  ;;  %8724 = vmatpush1.bf16.msra.mxu1 %v12199_v54 }
 0x5d5   : > { %v12243_v41 = vpop.eup %12242  ;;  %9335 = vst [vmem:[%s14625_s9 + $0xa8] sm:$0xff] %v12241_v16  ;;  %v10817_v14 = vadd.f32 %v7863_v12, %v14594_v51  ;;  %v8315_v22 = vpop.f32.mrb[141].mxu0  ;;  %12264 = vtanh.f32 %v10816_v52  ;;  %8725 = vmatprep.subr.bf16.mxu1 %v12206_v24 }
 0x5d6   : > { %v7865_v46 = vpop.f32.mrb[110].mxu1  ;;  %v12245_v47 = vpop.eup %12244  ;;  %9337 = vst [vmem:[%s14625_s9 + $0xb8] sm:$0xff] %v12243_v41  ;;  %v10849_v55 = vadd.f32 %v8315_v22, %v14600_v30  ;;  %12266 = vtanh.f32 %v10848_v2 }
 0x5d7   : > { %v10818_v4 = vadd.f32 %v7865_v46, %v14585_v49  ;;  %v8317_v1 = vpop.f32.mrb[142].mxu0  ;;  %v7867_v56 = vpop.f32.mrb[111].mxu1  ;;  %9336 = vst [vmem:[%s14625_s9 + $0xb0] sm:$0xff] %v12245_v47  ;;  %12268 = vtanh.f32 %v10817_v14  ;;  %8681 = vmatmul.mubr.bf16.gmra.mrb[152].mxu1 %v14433_v6  ;;  %v12215_v46 = vld [vmem:[#allocation14 + $0xddc] ss:$28 sps:$4 sm:$0xff]  }
 0x5d8   : > { %v12247_v40 = vpop.eup %12246  ;;  %v10850_v19 = vadd.f32 %v8317_v1, %v14590_v17  ;;  %v8319_v62 = vpop.f32.mrb[143].mxu0  ;;  %v10819_v39 = vadd.f32 %v7867_v56, %v14594_v51  ;;  %12270 = vtanh.f32 %v10849_v55  ;;  %8726 = vmatpush1.bf16.msra.mxu1 %v12204_v61  ;;  %9138 = vmatmul.mubr.bf16.vlgmr.msra.gmra.mrb[248].mxu0 %v14298_v36  ;;  %v12213_v1 = vld [vmem:[#allocation14 + $0xdd8] ss:$28 sps:$4 sm:$0xff]  }
 0x5d9   : > { %v12249_v8 = vpop.eup %12248  ;;  %9338 = vst [vmem:[%s14625_s9 + $0xc0] sm:$0xff] %v12247_v40  ;;  %v10851_v25 = vadd.f32 %v8319_v62, %v14600_v30  ;;  %12272 = vtanh.f32 %v10818_v4  ;;  %8690 = vmatprep.mubr.bf16.mxu1 %v14465_v27  ;;  %9145 = vmatprep.mubr.bf16.mxu0 %v14324_v7 }
 0x5da   : > { %v12251_v3 = vpop.eup %12250  ;;  %9342 = vst [vmem:[%s14625_s9 + $0xe0] sm:$0xff] %v12249_v8  ;;  %12274 = vtanh.f32 %v10850_v19  ;;  %v7871_v57 = vpop.f32.mrb[112].mxu1  ;;  %8727 = vmatprep.subr.bf16.mxu1 %v12209_v23 }
 0x5db   : > { %v12253_v31 = vpop.eup %12252  ;;  %9344 = vst [vmem:[%s14625_s9 + $0xf0] sm:$0xff] %v12251_v3  ;;  %12276 = vtanh.f32 %v10819_v39  ;;  %v10820_v44 = vadd.f32 %v7871_v57, %v14585_v49  ;;  %v8323_v43 = vpop.f32.mrb[144].mxu0 }
 0x5dc   : > { %v12255_v6 = vpop.eup %12254  ;;  %9343 = vst [vmem:[%s14625_s9 + $0xe8] sm:$0xff] %v12253_v31  ;;  %v7873_v48 = vpop.f32.mrb[113].mxu1  ;;  %12278 = vtanh.f32 %v10851_v25  ;;  %v10852_v27 = vadd.f32 %v8323_v43, %v14590_v17  ;;  %8728 = vmatpush1.bf16.msra.mxu1 %v12207_v33 }
 0x5dd   : > { %v12257_v5 = vpop.eup %12256  ;;  %9345 = vst [vmem:[%s14625_s9 + $0xf8] sm:$0xff] %v12255_v6  ;;  %v10821_v21 = vadd.f32 %v7873_v48, %v14594_v51  ;;  %v8325_v24 = vpop.f32.mrb[145].mxu0  ;;  %12280 = vtanh.f32 %v10820_v44  ;;  %8729 = vmatprep.subr.bf16.mxu1 %v12212_v60  ;;  %v12441_v44 = vld [vmem:[#allocation14 + $0x1d8] ss:$28 sps:$4 sm:$0xff]  }
 0x5de   : > { %v12259_v54 = vpop.eup %12258  ;;  %9349 = vst [vmem:[%s14625_s9 + $0x118] sm:$0xff] %v12257_v5  ;;  %v7875_v37 = vpop.f32.mrb[114].mxu1  ;;  %v10853_v52 = vadd.f32 %v8325_v24, %v14600_v30  ;;  %12282 = vtanh.f32 %v10852_v27 }
 0x5df   : > { %v12261_v16 = vpop.eup %12260  ;;  %9351 = vst [vmem:[%s14625_s9 + $0x128] sm:$0xff] %v12259_v54  ;;  %v10822_v34 = vadd.f32 %v7875_v37, %v14585_v49  ;;  %v8327_v12 = vpop.f32.mrb[146].mxu0  ;;  %12284 = vtanh.f32 %v10821_v21  ;;  %8691 = vmatmul.mubr.bf16.gmra.mrb[156].mxu1 %v14459_v20 }
 0x5e0   : > { %v7877_v41 = vpop.f32.mrb[115].mxu1  ;;  %v12263_v2 = vpop.eup %12262  ;;  %9350 = vst [vmem:[%s14625_s9 + $0x120] sm:$0xff] %v12261_v16  ;;  %v10854_v14 = vadd.f32 %v8327_v12, %v14590_v17  ;;  %12286 = vtanh.f32 %v10853_v52  ;;  %8730 = vmatpush1.bf16.msra.mxu1 %v12210_v18  ;;  %9146 = vmatmul.mubr.bf16.gmra.mrb[252].mxu0 %v14316_v63  ;;  %v12442_v18 = vld [vmem:[#allocation14 + $0x18] ss:$28 sps:$4 sm:$0xff]  }
 0x5e1   : > { %v8329_v22 = vpop.f32.mrb[147].mxu0  ;;  %v12265_v61 = vpop.eup %12264  ;;  %9352 = vst [vmem:[%s14625_s9 + $0x130] sm:$0xff] %v12263_v2  ;;  %v10823_v47 = vadd.f32 %v7877_v41, %v14594_v51  ;;  %12288 = vtanh.f32 %v10822_v34  ;;  %8733 = vmatprep.mubr.bf16.mxu1 %v14300_v0  ;;  %9153 = vmatprep.mubr.bf16.mxu0 %v14343_v50  ;;  %v12443_v34 = vld [vmem:[#allocation14 + $0x210] ss:$28 sps:$4 sm:$0xff]  }
 0x5e2   : > { %v12267_v55 = vpop.eup %12266  ;;  %9356 = vst [vmem:[%s14625_s9 + $0x150] sm:$0xff] %v12265_v61  ;;  %v10855_v4 = vadd.f32 %v8329_v22, %v14600_v30  ;;  %12290 = vtanh.f32 %v10854_v14  ;;  %v7881_v20 = vpop.f32.mrb[116].mxu1  ;;  %8731 = vmatprep.subr.bf16.mxu1 %v12215_v46 }
 0x5e3   : > { %v12269_v56 = vpop.eup %12268  ;;  %9358 = vst [vmem:[%s14625_s9 + $0x160] sm:$0xff] %v12267_v55  ;;  %12292 = vtanh.f32 %v10823_v47  ;;  %v10824_v62 = vadd.f32 %v7881_v20, %v14585_v49  ;;  %v8333_v23 = vpop.f32.mrb[148].mxu0  ;;  %v12444_v55 = vld [vmem:[#allocation14 + $0x50] ss:$28 sps:$4 sm:$0xff]  }
 0x5e4   : > { %v12271_v40 = vpop.eup %12270  ;;  %9357 = vst [vmem:[%s14625_s9 + $0x158] sm:$0xff] %v12269_v56  ;;  %v7883_v8 = vpop.f32.mrb[117].mxu1  ;;  %12294 = vtanh.f32 %v10855_v4  ;;  %v10856_v0 = vadd.f32 %v8333_v23, %v14590_v17  ;;  %8732 = vmatpush1.bf16.msra.mxu1 %v12213_v1 }
 0x5e5   : > { %v12273_v19 = vpop.eup %12272  ;;  %9359 = vst [vmem:[%s14625_s9 + $0x168] sm:$0xff] %v12271_v40  ;;  %v10825_v3 = vadd.f32 %v7883_v8, %v14594_v51  ;;  %v8335_v25 = vpop.f32.mrb[149].mxu0  ;;  %12296 = vtanh.f32 %v10824_v62  ;;  %10660 = vmatprep.subr.bf16.mxu1 %v12441_v44 }
 0x5e6   : > { %v12275_v39 = vpop.eup %12274  ;;  %9363 = vst [vmem:[%s14625_s9 + $0x188] sm:$0xff] %v12273_v19  ;;  %v7885_v33 = vpop.f32.mrb[118].mxu1  ;;  %v10857_v60 = vadd.f32 %v8335_v25, %v14600_v30  ;;  %12298 = vtanh.f32 %v10856_v0  ;;  %v12445_v19 = vld [vmem:[#allocation14 + $0x248] ss:$28 sps:$4 sm:$0xff]  }
 0x5e7   : > { %v12277_v31 = vpop.eup %12276  ;;  %9365 = vst [vmem:[%s14625_s9 + $0x198] sm:$0xff] %v12275_v39  ;;  %v10826_v6 = vadd.f32 %v7885_v33, %v14585_v49  ;;  %v8337_v57 = vpop.f32.mrb[150].mxu0  ;;  %12300 = vtanh.f32 %v10825_v3  ;;  %8734 = vmatmul.mubr.bf16.vlgmr.msra.gmra.mrb[128].mxu1 %v14298_v36 }
 0x5e8   : > { %v7887_v5 = vpop.f32.mrb[119].mxu1  ;;  %v12279_v43 = vpop.eup %12278  ;;  %9364 = vst [vmem:[%s14625_s9 + $0x190] sm:$0xff] %v12277_v31  ;;  %v10858_v48 = vadd.f32 %v8337_v57, %v14590_v17  ;;  %12302 = vtanh.f32 %v10857_v60  ;;  %10668 = vmatpush3.bf16.msra.mxu1 %v12442_v18  ;;  %9154 = vmatmul.mubr.bf16.gmra.mrb[0].mxu0 %v14339_v35  ;;  %v12446_v31 = vld [vmem:[#allocation14 + $0x88] ss:$28 sps:$4 sm:$0xff]  }
 0x5e9   : > { %v8339_v54 = vpop.f32.mrb[151].mxu0  ;;  %v12281_v27 = vpop.eup %12280  ;;  %9366 = vst [vmem:[%s14625_s9 + $0x1a0] sm:$0xff] %v12279_v43  ;;  %v10827_v21 = vadd.f32 %v7887_v5, %v14594_v51  ;;  %12304 = vtanh.f32 %v10826_v6  ;;  %8743 = vmatprep.mubr.bf16.mxu1 %v14324_v7  ;;  %9161 = vmatprep.mubr.bf16.mxu0 %v14368_v32  ;;  %v12447_v6 = vld [vmem:[#allocation14 + $0x280] ss:$28 sps:$4 sm:$0xff]  }
 0x5ea   : > { %v12283_v24 = vpop.eup %12282  ;;  %9370 = vst [vmem:[%s14625_s9 + $0x1c0] sm:$0xff] %v12281_v27  ;;  %v10859_v37 = vadd.f32 %v8339_v54, %v14600_v30  ;;  %12306 = vtanh.f32 %v10858_v48  ;;  %v7891_v36 = vpop.f32.mrb[120].mxu1  ;;  %10661 = vmatprep.subr.bf16.mxu1 %v12443_v34 }
 0x5eb   : > { %v12285_v16 = vpop.eup %12284  ;;  %9372 = vst [vmem:[%s14625_s9 + $0x1d0] sm:$0xff] %v12283_v24  ;;  %12308 = vtanh.f32 %v10827_v21  ;;  %v10828_v41 = vadd.f32 %v7891_v36, %v14585_v49  ;;  %v8343_v2 = vpop.f32.mrb[152].mxu0  ;;  %v12448_v36 = vld [vmem:[#allocation14 + $0xc0] ss:$28 sps:$4 sm:$0xff]  }
 0x5ec   : > { %v12287_v52 = vpop.eup %12286  ;;  %9371 = vst [vmem:[%s14625_s9 + $0x1c8] sm:$0xff] %v12285_v16  ;;  %v7893_v14 = vpop.f32.mrb[121].mxu1  ;;  %12310 = vtanh.f32 %v10859_v37  ;;  %v10860_v7 = vadd.f32 %v8343_v2, %v14590_v17  ;;  %10669 = vmatpush3.bf16.msra.mxu1 %v12444_v55  ;;  %v12449_v2 = vld [vmem:[#allocation14 + $0x2b8] ss:$28 sps:$4 sm:$0xff]  }
 0x5ed   : > { %v12289_v12 = vpop.eup %12288  ;;  %9373 = vst [vmem:[%s14625_s9 + $0x1d8] sm:$0xff] %v12287_v52  ;;  %v10829_v46 = vadd.f32 %v7893_v14, %v14594_v51  ;;  %v8345_v61 = vpop.f32.mrb[153].mxu0  ;;  %12312 = vtanh.f32 %v10828_v41  ;;  %10662 = vmatprep.subr.bf16.mxu1 %v12445_v19  ;;  %v12453_v19 = vld [vmem:[#allocation14 + $0x328] ss:$28 sps:$4 sm:$0xff]  }
 0x5ee   : > { %v12291_v22 = vpop.eup %12290  ;;  %9377 = vst [vmem:[%s14625_s9 + $0x1f8] sm:$0xff] %v12289_v12  ;;  %v7895_v47 = vpop.f32.mrb[122].mxu1  ;;  %v10861_v1 = vadd.f32 %v8345_v61, %v14600_v30  ;;  %12314 = vtanh.f32 %v10860_v7 }
 0x5ef   : > { %v12293_v4 = vpop.eup %12292  ;;  %9379 = vst [vmem:[%s14625_s9 + $0x208] sm:$0xff] %v12291_v22  ;;  %v10830_v56 = vadd.f32 %v7895_v47, %v14585_v49  ;;  %v8347_v40 = vpop.f32.mrb[154].mxu0  ;;  %12316 = vtanh.f32 %v10829_v46  ;;  %8744 = vmatmul.mubr.bf16.gmra.mrb[132].mxu1 %v14316_v63  ;;  %v12450_v46 = vld [vmem:[#allocation14 + $0xf8] ss:$28 sps:$4 sm:$0xff]  }
 0x5f0   : > { %v7897_v20 = vpop.f32.mrb[123].mxu1  ;;  %v12295_v62 = vpop.eup %12294  ;;  %9378 = vst [vmem:[%s14625_s9 + $0x200] sm:$0xff] %v12293_v4  ;;  %v10862_v23 = vadd.f32 %v8347_v40, %v14590_v17  ;;  %12318 = vtanh.f32 %v10861_v1  ;;  %9162 = vmatmul.mubr.bf16.gmra.mrb[4].mxu0 %v14361_v28  ;;  %8753 = vmatprep.mubr.bf16.mxu1 %v14343_v50 }
 0x5f1   : > { %v8349_v8 = vpop.f32.mrb[155].mxu0  ;;  %v12297_v39 = vpop.eup %12296  ;;  %9380 = vst [vmem:[%s14625_s9 + $0x210] sm:$0xff] %v12295_v62  ;;  %v10831_v0 = vadd.f32 %v7897_v20, %v14594_v51  ;;  %12320 = vtanh.f32 %v10830_v56  ;;  %9169 = vmatprep.mubr.bf16.mxu0 %v14390_v42  ;;  %10670 = vmatpush3.bf16.msra.mxu1 %v12446_v31  ;;  %v12452_v56 = vld [vmem:[#allocation14 + $0x130] ss:$28 sps:$4 sm:$0xff]  }
 0x5f2   : > { %v12299_v3 = vpop.eup %12298  ;;  %9384 = vst [vmem:[%s14625_s9 + $0x230] sm:$0xff] %v12297_v39  ;;  %v10863_v25 = vadd.f32 %v8349_v8, %v14600_v30  ;;  %12322 = vtanh.f32 %v10862_v23  ;;  %v7901_v63 = vpop.f32.mrb[124].mxu1  ;;  %10663 = vmatprep.subr.bf16.mxu1 %v12447_v6 }
 0x5f3   : > { %v12301_v33 = vpop.eup %12300  ;;  %9386 = vst [vmem:[%s14625_s9 + $0x240] sm:$0xff] %v12299_v3  ;;  %12324 = vtanh.f32 %v10831_v0  ;;  %v10832_v50 = vadd.f32 %v7901_v63, %v14585_v49  ;;  %v8353_v5 = vpop.f32.mrb[156].mxu0  ;;  %v12454_v0 = vld [vmem:[#allocation14 + $0x168] ss:$28 sps:$4 sm:$0xff]  }
 0x5f4   : > { %v12303_v60 = vpop.eup %12302  ;;  %9385 = vst [vmem:[%s14625_s9 + $0x238] sm:$0xff] %v12301_v33  ;;  %v7903_v44 = vpop.f32.mrb[125].mxu1  ;;  %12326 = vtanh.f32 %v10863_v25  ;;  %v10864_v48 = vadd.f32 %v8353_v5, %v14590_v17  ;;  %v12455_v25 = vld [vmem:[#allocation14 + $0x360] ss:$28 sps:$4 sm:$0xff]  }
 0x5f5   : > { %v12305_v57 = vpop.eup %12304  ;;  %9387 = vst [vmem:[%s14625_s9 + $0x248] sm:$0xff] %v12303_v60  ;;  %v10833_v54 = vadd.f32 %v7903_v44, %v14594_v51  ;;  %v8355_v27 = vpop.f32.mrb[157].mxu0  ;;  %12328 = vtanh.f32 %v10832_v50  ;;  %10671 = vmatpush3.bf16.msra.mxu1 %v12448_v36 }
 0x5f6   : > { %v12307_v43 = vpop.eup %12306  ;;  %9391 = vst [vmem:[%s14625_s9 + $0x268] sm:$0xff] %v12305_v57  ;;  %v7905_v21 = vpop.f32.mrb[126].mxu1  ;;  %v10865_v37 = vadd.f32 %v8355_v27, %v14600_v30  ;;  %12330 = vtanh.f32 %v10864_v48  ;;  %10664 = vmatprep.subr.bf16.mxu1 %v12449_v2  ;;  %v12456_v57 = vld [vmem:[#allocation14 + $0x1a0] ss:$28 sps:$4 sm:$0xff]  }
 0x5f7   : > { %v12309_v24 = vpop.eup %12308  ;;  %9393 = vst [vmem:[%s14625_s9 + $0x278] sm:$0xff] %v12307_v43  ;;  %v10834_v18 = vadd.f32 %v7905_v21, %v14585_v49  ;;  %v8357_v16 = vpop.f32.mrb[158].mxu0  ;;  %12332 = vtanh.f32 %v10833_v54  ;;  %8754 = vmatmul.mubr.bf16.gmra.mrb[136].mxu1 %v14339_v35 }
 0x5f8   : > { %v7907_v52 = vpop.f32.mrb[127].mxu1  ;;  %v12311_v34 = vpop.eup %12310  ;;  %9392 = vst [vmem:[%s14625_s9 + $0x270] sm:$0xff] %v12309_v24  ;;  %v10866_v12 = vadd.f32 %v8357_v16, %v14590_v17  ;;  %12334 = vtanh.f32 %v10865_v37  ;;  %9170 = vmatmul.mubr.bf16.gmra.mrb[8].mxu0 %v14385_v26  ;;  %8763 = vmatprep.mubr.bf16.mxu1 %v14368_v32 }
 0x5f9   : > { %v8359_v41 = vpop.f32.mrb[159].mxu0  ;;  %v12313_v14 = vpop.eup %12312  ;;  %9394 = vst [vmem:[%s14625_s9 + $0x280] sm:$0xff] %v12311_v34  ;;  %v10835_v49 = vadd.f32 %v7907_v52, %v14594_v51  ;;  %12336 = vtanh.f32 %v10834_v18  ;;  %9177 = vmatprep.mubr.bf16.mxu0 %v14415_v59  ;;  %10672 = vmatpush3.bf16.msra.mxu1 %v12450_v46  ;;  %v12451_v51 = vld [vmem:[#allocation14 + $0x2f0] ss:$28 sps:$4 sm:$0xff]  }
 0x5fa   : > { %v12315_v22 = vpop.eup %12314  ;;  %9398 = vst [vmem:[%s14625_s9 + $0x2a0] sm:$0xff] %v12313_v14  ;;  %v10867_v7 = vadd.f32 %v8359_v41, %v14600_v30  ;;  %12338 = vtanh.f32 %v10866_v12  ;;  %10665 = vmatprep.subr.bf16.mxu1 %v12451_v51 }
 0x5fb   : > { %v12317_v17 = vpop.eup %12316  ;;  %9400 = vst [vmem:[%s14625_s9 + $0x2b0] sm:$0xff] %v12315_v22  ;;  %12340 = vtanh.f32 %v10835_v49  ;;  %v10420_v61 = vpop.f32.mrb[160].mxu0 }
 0x5fc   : > { %v12319_v35 = vpop.eup %12318  ;;  %9399 = vst [vmem:[%s14625_s9 + $0x2a8] sm:$0xff] %v12317_v17  ;;  %12342 = vtanh.f32 %v10867_v7  ;;  %v10421_v47 = vpop.f32.mrb[161].mxu0 }
 0x5fd   : > { %v12321_v30 = vpop.eup %12320  ;;  %9401 = vst [vmem:[%s14625_s9 + $0x2b8] sm:$0xff] %v12319_v35  ;;  %v14757_v4 = vadd.f32 %v10421_v47, %v10420_v61  ;;  %v10423_v1 = vpop.f32.mrb[162].mxu0  ;;  %10673 = vmatpush3.bf16.msra.mxu1 %v12452_v56 }
 0x5fe   : > { %v12323_v32 = vpop.eup %12322  ;;  %9405 = vst [vmem:[%s14625_s9 + $0x2d8] sm:$0xff] %v12321_v30  ;;  %v10424_v20 = vpop.f32.mrb[163].mxu0  ;;  %10666 = vmatprep.subr.bf16.mxu1 %v12453_v19 }
 0x5ff   : > { %v12325_v55 = vpop.eup %12324  ;;  %9407 = vst [vmem:[%s14625_s9 + $0x2e8] sm:$0xff] %v12323_v32  ;;  %v14761_v23 = vadd.f32 %v10424_v20, %v10423_v1  ;;  %8764 = vmatmul.mubr.bf16.gmra.mrb[140].mxu1 %v14361_v28 }
 0x600   : > { %v12327_v40 = vpop.eup %12326  ;;  %9406 = vst [vmem:[%s14625_s9 + $0x2e0] sm:$0xff] %v12325_v55  ;;  %9178 = vmatmul.mubr.bf16.gmra.mrb[12].mxu0 %v14408_v38  ;;  %8773 = vmatprep.mubr.bf16.mxu1 %v14390_v42 }
 0x601   : > { %v12329_v62 = vpop.eup %12328  ;;  %9408 = vst [vmem:[%s14625_s9 + $0x2f0] sm:$0xff] %v12327_v40  ;;  %9185 = vmatprep.mubr.bf16.mxu0 %v14445_v11  ;;  %10674 = vmatpush3.bf16.msra.mxu1 %v12454_v0 }
 0x602   : > { %v12331_v8 = vpop.eup %12330  ;;  %9412 = vst [vmem:[%s14625_s9 + $0x310] sm:$0xff] %v12329_v62  ;;  %10667 = vmatprep.subr.bf16.mxu1 %v12455_v25 }
 0x603   : > { %v12333_v39 = vpop.eup %12332  ;;  %9414 = vst [vmem:[%s14625_s9 + $0x320] sm:$0xff] %v12331_v8  ;;  %v10426_v33 = vpop.f32.mrb[164].mxu0 }
 0x604   : > { %v12335_v3 = vpop.eup %12334  ;;  %9413 = vst [vmem:[%s14625_s9 + $0x318] sm:$0xff] %v12333_v39  ;;  %v10427_v60 = vpop.f32.mrb[165].mxu0 }
 0x605   : > { %v12337_v28 = vpop.eup %12336  ;;  %9415 = vst [vmem:[%s14625_s9 + $0x328] sm:$0xff] %v12335_v3  ;;  %v10428_v63 = vadd.f32 %v10427_v60, %v10426_v33  ;;  %v10429_v6 = vpop.f32.mrb[166].mxu0  ;;  %10675 = vmatpush3.bf16.msra.mxu1 %v12456_v57 }
 0x606   : > { %v12339_v31 = vpop.eup %12338  ;;  %9419 = vst [vmem:[%s14625_s9 + $0x348] sm:$0xff] %v12337_v28  ;;  %v10430_v5 = vpop.f32.mrb[167].mxu0 }
 0x607   : > { %v12341_v42 = vpop.eup %12340  ;;  %9421 = vst [vmem:[%s14625_s9 + $0x358] sm:$0xff] %v12339_v31  ;;  %v10431_v44 = vadd.f32 %v10430_v5, %v10429_v6  ;;  %8774 = vmatmul.mubr.bf16.gmra.mrb[144].mxu1 %v14385_v26 }
 0x608   : > { %v12343_v50 = vpop.eup %12342  ;;  %9420 = vst [vmem:[%s14625_s9 + $0x350] sm:$0xff] %v12341_v42  ;;  %9186 = vmatmul.mubr.bf16.gmra.mrb[16].mxu0 %v14440_v45  ;;  %8783 = vmatprep.mubr.bf16.mxu1 %v14415_v59 }
 0x609   : > { %9422 = vst [vmem:[%s14625_s9 + $0x360] sm:$0xff] %v12343_v50  ;;  %9193 = vmatprep.mubr.bf16.mxu0 %v14468_v9 }
 0x60b   : > { %v10432_v43 = vpop.f32.mrb[168].mxu0 }
 0x60c   : > { %v10433_v48 = vpop.f32.mrb[169].mxu0 }
 0x60d   : > { %v10434_v54 = vadd.f32 %v10433_v48, %v10432_v43  ;;  %v10435_v27 = vpop.f32.mrb[170].mxu0 }
 0x60e   : > { %v10436_v21 = vpop.f32.mrb[171].mxu0 }
 0x60f   : > { %v10437_v24 = vadd.f32 %v10436_v21, %v10435_v27  ;;  %8784 = vmatmul.mubr.bf16.gmra.mrb[148].mxu1 %v14408_v38 }
 0x610   : > { %9194 = vmatmul.mubr.bf16.gmra.mrb[20].mxu0 %v14463_v29  ;;  %8793 = vmatprep.mubr.bf16.mxu1 %v14445_v11 }
 0x613   : > { %v10438_v37 = vpop.f32.mrb[172].mxu0 }
 0x614   : > { %v10439_v26 = vpop.f32.mrb[173].mxu0 }
 0x615   : > { %v10440_v18 = vadd.f32 %v10439_v26, %v10438_v37  ;;  %v10441_v16 = vpop.f32.mrb[174].mxu0 }
 0x616   : > { %v10442_v52 = vpop.f32.mrb[175].mxu0 }
 0x617   : > { %v10443_v59 = vadd.f32 %v10442_v52, %v10441_v16  ;;  %8794 = vmatmul.mubr.bf16.gmra.mrb[152].mxu1 %v14440_v45  ;;  %v15391_v45 = vld [vmem:[#allocation24_spill] sm:$0xff] }
 0x618   : > { %8803 = vmatprep.mubr.bf16.mxu1 %v14468_v9  ;;  %v15392_v9 = vsub.s32 6, %v15391_v45 }
 0x61a   : > { %v14791_v46 = vrot.slane %v14580_v15, %v15392_v9 }
 0x61b   : > { %v10444_v36 = vpop.f32.mrb[176].mxu0 }
 0x61c   : > { %v10445_v34 = vpop.f32.mrb[177].mxu0  ;;  %v8852_v32 = vadd.f32 %v14761_v23, %v14791_v46  ;;  %v8857_v1 = vadd.f32 %v10428_v63, %v14791_v46  ;;  %v8860_v20 = vadd.f32 %v10431_v44, %v14791_v46  ;;  %v8868_v28 = vadd.f32 %v10437_v24, %v14791_v46 }
 0x61d   : > { %v10446_v12 = vadd.f32 %v10445_v34, %v10444_v36  ;;  %v10447_v41 = vpop.f32.mrb[178].mxu0  ;;  %v8873_v6 = vadd.f32 %v10440_v18, %v14791_v46  ;;  %v8876_v44 = vadd.f32 %v10443_v59, %v14791_v46 }
 0x61e   : > { %v10448_v2 = vpop.f32.mrb[179].mxu0 }
 0x61f   : > { %v10449_v38 = vadd.f32 %v10448_v2, %v10447_v41  ;;  %8804 = vmatmul.mubr.bf16.gmra.mrb[156].mxu1 %v14463_v29  ;;  %v8881_v24 = vadd.f32 %v10446_v12, %v14791_v46 }
 0x620   : > { %8894 = vmatprep.mubr.bf16.mxu1 %v14204_v13  ;;  %v8849_v13 = vadd.f32 %v14757_v4, %v14791_v46 }
 0x621   : > { %v8884_v52 = vadd.f32 %v10449_v38, %v14791_v46 }
 0x623   : > { %v10450_v11 = vpop.f32.mrb[180].mxu0 }
 0x624   : > { %v10451_v14 = vpop.f32.mrb[181].mxu0 }
 0x625   : > { %v10452_v49 = vadd.f32 %v10451_v14, %v10450_v11  ;;  %v10453_v22 = vpop.f32.mrb[182].mxu0 }
 0x626   : > { %v10454_v7 = vpop.f32.mrb[183].mxu0 }
 0x627   : > { %v10455_v17 = vadd.f32 %v10454_v7, %v10453_v22  ;;  %8895 = vmatmul.mubr.bf16.vlgmr.msra.gmra.mrb[160].mxu1 %v15357_v53  ;;  %v8889_v59 = vadd.f32 %v10452_v49, %v14791_v46 }
 0x628   : > { %8902 = vmatprep.mubr.bf16.mxu1 %v15359_v10 }
 0x629   : > { %v8892_v7 = vadd.f32 %v10455_v17, %v14791_v46 }
 0x62b   : > { %v10484_v35 = vpop.f32.mrb[184].mxu0 }
 0x62c   : > { %v10485_v51 = vpop.f32.mrb[185].mxu0 }
 0x62d   : > { %v10486_v29 = vadd.f32 %v10485_v51, %v10484_v35  ;;  %v10487_v30 = vpop.f32.mrb[186].mxu0 }
 0x62e   : > { %v10488_v61 = vpop.f32.mrb[187].mxu0 }
 0x62f   : > { %v14797_v47 = vadd.f32 %v10486_v29, %v8849_v13  ;;  %v10489_v53 = vadd.f32 %v10488_v61, %v10487_v30  ;;  %8903 = vmatmul.mubr.bf16.gmra.mrb[164].mxu1 %v15361_v58  ;;  %v8865_v58 = vadd.f32 %v10434_v54, %v14791_v46 }
 0x631   : > { %v14800_v10 = vadd.f32 %v10489_v53, %v8852_v32 }
 0x633   : > { %v10490_v15 = vpop.f32.mrb[188].mxu0 }
 0x634   : > { %v10491_v55 = vpop.f32.mrb[189].mxu0 }
 0x635   : > { %v10492_v56 = vadd.f32 %v10491_v55, %v10490_v15  ;;  %v10493_v40 = vpop.f32.mrb[190].mxu0 }
 0x636   : > { %v10494_v4 = vpop.f32.mrb[191].mxu0 }
 0x637   : > { %v14804_v19 = vadd.f32 %v10492_v56, %v8857_v1  ;;  %v10495_v62 = vadd.f32 %v10494_v4, %v10493_v40 }
 0x639   : > { %v14806_v23 = vadd.f32 %v10495_v62, %v8860_v20 }
 0x63b   : > { %v10496_v8 = vpop.f32.mrb[192].mxu0 }
 0x63c   : > { %v10497_v39 = vpop.f32.mrb[193].mxu0 }
 0x63d   : > { %v10498_v0 = vadd.f32 %v10497_v39, %v10496_v8  ;;  %v10499_v3 = vpop.f32.mrb[194].mxu0 }
 0x63e   : > { %v10500_v25 = vpop.f32.mrb[195].mxu0 }
 0x63f   : > { %v14810_v33 = vadd.f32 %v10498_v0, %v8865_v58  ;;  %v10501_v31 = vadd.f32 %v10500_v25, %v10499_v3 }
 0x641   : > { %v14812_v60 = vadd.f32 %v10501_v31, %v8868_v28 }
 0x643   : > { %v10502_v42 = vpop.f32.mrb[196].mxu0 }
 0x644   : > { %v10503_v63 = vpop.f32.mrb[197].mxu0 }
 0x645   : > { %v10504_v57 = vadd.f32 %v10503_v63, %v10502_v42  ;;  %v10505_v50 = vpop.f32.mrb[198].mxu0 }
 0x646   : > { %v10506_v5 = vpop.f32.mrb[199].mxu0 }
 0x647   : > { %v14816_v43 = vadd.f32 %v10504_v57, %v8873_v6  ;;  %v10507_v48 = vadd.f32 %v10506_v5, %v10505_v50 }
 0x649   : > { %v14818_v54 = vadd.f32 %v10507_v48, %v8876_v44 }
 0x64b   : > { %v10508_v27 = vpop.f32.mrb[200].mxu0 }
 0x64c   : > { %v10509_v21 = vpop.f32.mrb[201].mxu0 }
 0x64d   : > { %v10510_v37 = vadd.f32 %v10509_v21, %v10508_v27  ;;  %v10511_v26 = vpop.f32.mrb[202].mxu0 }
 0x64e   : > { %v10512_v16 = vpop.f32.mrb[203].mxu0 }
 0x64f   : > { %v8978_v18 = vadd.f32 %v10510_v37, %v8881_v24  ;;  %v10513_v36 = vadd.f32 %v10512_v16, %v10511_v26 }
 0x651   : > { %v8981_v34 = vadd.f32 %v10513_v36, %v8884_v52 }
 0x653   : > { %v10514_v41 = vpop.f32.mrb[204].mxu0 }
 0x654   : > { %v10515_v2 = vpop.f32.mrb[205].mxu0 }
 0x655   : > { %v10516_v11 = vadd.f32 %v10515_v2, %v10514_v41  ;;  %v10517_v14 = vpop.f32.mrb[206].mxu0 }
 0x656   : > { %v10518_v22 = vpop.f32.mrb[207].mxu0 }
 0x657   : > { %v8986_v9 = vadd.f32 %v10516_v11, %v8889_v59  ;;  %v10519_v35 = vadd.f32 %v10518_v22, %v10517_v14 }
 0x659   : > { %v8989_v12 = vadd.f32 %v10519_v35, %v8892_v7 }
 0x65b   : > { %v10520_v51 = vpop.f32.mrb[208].mxu0 }
 0x65c   : > { %v10521_v13 = vpop.f32.mrb[209].mxu0 }
 0x65d   : > { %v14824_v29 = vadd.f32 %v10521_v13, %v10520_v51  ;;  %v10523_v38 = vpop.f32.mrb[210].mxu0 }
 0x65e   : > { %v10524_v30 = vpop.f32.mrb[211].mxu0 }
 0x65f   : > { %v14826_v61 = vadd.f32 %v10524_v30, %v10523_v38 }
 0x663   : > { %v10526_v32 = vpop.f32.mrb[212].mxu0 }
 0x664   : > { %v10527_v53 = vpop.f32.mrb[213].mxu0 }
 0x665   : > { %v14828_v15 = vadd.f32 %v10527_v53, %v10526_v32  ;;  %v10529_v49 = vpop.f32.mrb[214].mxu0 }
 0x666   : > { %v10530_v55 = vpop.f32.mrb[215].mxu0 }
 0x667   : > { %v14830_v1 = vadd.f32 %v10530_v55, %v10529_v49 }
 0x66b   : > { %v10548_v17 = vpop.f32.mrb[216].mxu0 }
 0x66c   : > { %v10549_v56 = vpop.f32.mrb[217].mxu0 }
 0x66d   : > { %v10550_v40 = vadd.f32 %v10549_v56, %v10548_v17  ;;  %v10551_v4 = vpop.f32.mrb[218].mxu0 }
 0x66e   : > { %v10552_v20 = vpop.f32.mrb[219].mxu0 }
 0x66f   : > { %v9043_v62 = vadd.f32 %v10550_v40, %v14797_v47  ;;  %v10553_v8 = vadd.f32 %v10552_v20, %v10551_v4 }
 0x671   : > { %v9046_v39 = vadd.f32 %v10553_v8, %v14800_v10 }
 0x673   : > { %v10554_v58 = vpop.f32.mrb[220].mxu0 }
 0x674   : > { %v10555_v0 = vpop.f32.mrb[221].mxu0 }
 0x675   : > { %v10556_v3 = vadd.f32 %v10555_v0, %v10554_v58  ;;  %v10557_v25 = vpop.f32.mrb[222].mxu0 }
 0x676   : > { %v10558_v28 = vpop.f32.mrb[223].mxu0 }
 0x677   : > { %v9051_v31 = vadd.f32 %v10556_v3, %v14804_v19  ;;  %v10559_v42 = vadd.f32 %v10558_v28, %v10557_v25 }
 0x679   : > { %v14836_v63 = vadd.f32 %v10559_v42, %v14806_v23 }
 0x67b   : > { %v10560_v6 = vpop.f32.mrb[224].mxu0 }
 0x67c   : > { %v10561_v57 = vpop.f32.mrb[225].mxu0 }
 0x67d   : > { %v10562_v50 = vadd.f32 %v10561_v57, %v10560_v6  ;;  %v10563_v5 = vpop.f32.mrb[226].mxu0 }
 0x67e   : > { %v10564_v44 = vpop.f32.mrb[227].mxu0 }
 0x67f   : > { %v14839_v47 = vadd.f32 %v10562_v50, %v14810_v33  ;;  %v10565_v10 = vadd.f32 %v10564_v44, %v10563_v5 }
 0x681   : > { %v14842_v48 = vadd.f32 %v10565_v10, %v14812_v60  ;;  %v12457_v10 = vld [vmem:[#allocation16] sm:$0xff] }
 0x683   : > { %v10566_v27 = vpop.f32.mrb[228].mxu0 }
 0x684   : > { %v10567_v21 = vpop.f32.mrb[229].mxu0 }
 0x685   : > { %v10568_v24 = vadd.f32 %v10567_v21, %v10566_v27  ;;  %v10569_v19 = vpop.f32.mrb[230].mxu0  ;;  %v15393_v27 = vsub.s32 4, %v15391_v45 }
 0x686   : > { %v10570_v37 = vpop.f32.mrb[231].mxu0 }
 0x687   : > { %v14845_v23 = vadd.f32 %v10568_v24, %v14816_v43  ;;  %v10571_v26 = vadd.f32 %v10570_v37, %v10569_v19  ;;  %v14868_v21 = vrot.slane %v12457_v10, %v15393_v27  ;;  %v15394_v24 = vsub.s32 5, %v15391_v45 }
 0x689   : > { %v14848_v16 = vadd.f32 %v10571_v26, %v14818_v54 }
 0x68b   : > { %v10572_v52 = vpop.f32.mrb[232].mxu0 }
 0x68c   : > { %v10573_v36 = vpop.f32.mrb[233].mxu0 }
 0x68d   : > { %v10574_v33 = vadd.f32 %v10573_v36, %v10572_v52  ;;  %v10575_v41 = vpop.f32.mrb[234].mxu0 }
 0x68e   : > { %v10576_v2 = vpop.f32.mrb[235].mxu0 }
 0x68f   : > { %v14850_v59 = vadd.f32 %v10574_v33, %v8978_v18  ;;  %v10577_v60 = vadd.f32 %v10576_v2, %v10575_v41 }
 0x691   : > { %v14852_v11 = vadd.f32 %v10577_v60, %v8981_v34 }
 0x693   : > { %v10578_v14 = vpop.f32.mrb[236].mxu0 }
 0x694   : > { %v10579_v22 = vpop.f32.mrb[237].mxu0 }
 0x695   : > { %v10580_v7 = vadd.f32 %v10579_v22, %v10578_v14  ;;  %v10581_v35 = vpop.f32.mrb[238].mxu0 }
 0x696   : > { %v10582_v43 = vpop.f32.mrb[239].mxu0 }
 0x697   : > { %v14854_v51 = vadd.f32 %v10580_v7, %v8986_v9  ;;  %v10583_v13 = vadd.f32 %v10582_v43, %v10581_v35 }
 0x699   : > { %v14856_v54 = vadd.f32 %v10583_v13, %v8989_v12 }
 0x69b   : > { %v10584_v38 = vpop.f32.mrb[240].mxu0 }
 0x69c   : > { %v10585_v30 = vpop.f32.mrb[241].mxu0 }
 0x69d   : > { %v14858_v32 = vadd.f32 %v10585_v30, %v10584_v38  ;;  %v10587_v53 = vpop.f32.mrb[242].mxu0 }
 0x69e   : > { %v10588_v18 = vpop.f32.mrb[243].mxu0 }
 0x69f   : > { %v14860_v49 = vadd.f32 %v10588_v18, %v10587_v53 }
 0x6a3   : > { %v10590_v34 = vpop.f32.mrb[244].mxu0 }
 0x6a4   : > { %v10591_v55 = vpop.f32.mrb[245].mxu0 }
 0x6a5   : > { %v14862_v17 = vadd.f32 %v10591_v55, %v10590_v34  ;;  %v10593_v56 = vpop.f32.mrb[246].mxu0 }
 0x6a6   : > { %v10594_v40 = vpop.f32.mrb[247].mxu0 }
 0x6a7   : > { %v14864_v4 = vadd.f32 %v10594_v40, %v10593_v56 }
 0x6ab   : > { %v10612_v9 = vpop.f32.mrb[248].mxu0 }
 0x6ac   : > { %v10613_v20 = vpop.f32.mrb[249].mxu0 }
 0x6ad   : > { %v10614_v12 = vadd.f32 %v10613_v20, %v10612_v9  ;;  %v10615_v8 = vpop.f32.mrb[250].mxu0 }
 0x6ae   : > { %v10616_v58 = vpop.f32.mrb[251].mxu0 }
 0x6af   : > { %v9140_v0 = vadd.f32 %v10614_v12, %v9043_v62  ;;  %v10617_v3 = vadd.f32 %v10616_v58, %v10615_v8  ;;  %v14872_v62 = vrot.slane %v12457_v10, %v15394_v24 }
 0x6b1   : > { %12344 = vtanh.f32 %v9140_v0  ;;  %v9143_v25 = vadd.f32 %v10617_v3, %v9046_v39 }
 0x6b3   : > { %12346 = vtanh.f32 %v9143_v25  ;;  %v10618_v28 = vpop.f32.mrb[252].mxu0 }
 0x6b4   : > { %v10619_v42 = vpop.f32.mrb[253].mxu0 }
 0x6b5   : > { %v10620_v6 = vadd.f32 %v10619_v42, %v10618_v28  ;;  %v10621_v57 = vpop.f32.mrb[254].mxu0 }
 0x6b6   : > { %v10622_v50 = vpop.f32.mrb[255].mxu0 }
 0x6b7   : > { %v9148_v5 = vadd.f32 %v10620_v6, %v9051_v31  ;;  %v10623_v44 = vadd.f32 %v10622_v50, %v10621_v57 }
 0x6b9   : > { %12348 = vtanh.f32 %v9148_v5  ;;  %v9151_v39 = vadd.f32 %v10623_v44, %v14836_v63 }
 0x6ba   : > { %v8735_v19 = vpop.f32.mrb[128].mxu1 }
 0x6bb   : > { %v12345_v37 = vpop.eup %12344  ;;  %12350 = vtanh.f32 %v9151_v39  ;;  %v10868_v26 = vadd.f32 %v8735_v19, %v14868_v21  ;;  %v10624_v31 = vpop.f32.mrb[0].mxu0 }
 0x6bc   : > { %v8737_v52 = vpop.f32.mrb[129].mxu1  ;;  %9320 = vst [vmem:[%s14625_s9 + $0x30] sm:$0xff] %v12345_v37  ;;  %v10625_v33 = vpop.f32.mrb[1].mxu0 }
 0x6bd   : > { %v10869_v36 = vadd.f32 %v8737_v52, %v14872_v62  ;;  %v8739_v41 = vpop.f32.mrb[130].mxu1  ;;  %v12347_v2 = vpop.eup %12346  ;;  %12352 = vtanh.f32 %v10868_v26  ;;  %v10626_v45 = vadd.f32 %v10625_v33, %v10624_v31 }
 0x6be   : > { %v10870_v60 = vadd.f32 %v8739_v41, %v14868_v21  ;;  %v10627_v14 = vpop.f32.mrb[2].mxu0  ;;  %v8741_v63 = vpop.f32.mrb[131].mxu1  ;;  %9327 = vst [vmem:[%s14625_s9 + $0x68] sm:$0xff] %v12347_v2 }
 0x6bf   : > { %12354 = vtanh.f32 %v10869_v36  ;;  %v10871_v22 = vadd.f32 %v8741_v63, %v14872_v62  ;;  %v10628_v7 = vpop.f32.mrb[3].mxu0  ;;  %v9156_v35 = vadd.f32 %v10626_v45, %v14839_v47 }
 0x6c0   : > { %12356 = vtanh.f32 %v10870_v60  ;;  %v10629_v43 = vadd.f32 %v10628_v7, %v10627_v14 }
 0x6c1   : > { %12358 = vtanh.f32 %v10871_v22 }
 0x6c2   : > { %12360 = vtanh.f32 %v9156_v35  ;;  %v9159_v13 = vadd.f32 %v10629_v43, %v14842_v48  ;;  %v8745_v38 = vpop.f32.mrb[132].mxu1 }
 0x6c3   : > { %v12349_v30 = vpop.eup %12348  ;;  %v10872_v53 = vadd.f32 %v8745_v38, %v14868_v21  ;;  %v10630_v18 = vpop.f32.mrb[4].mxu0 }
 0x6c4   : > { %12362 = vtanh.f32 %v9159_v13  ;;  %v8747_v34 = vpop.f32.mrb[133].mxu1  ;;  %9334 = vst [vmem:[%s14625_s9 + $0xa0] sm:$0xff] %v12349_v30  ;;  %v10631_v56 = vpop.f32.mrb[5].mxu0 }
 0x6c5   : > { %v10873_v55 = vadd.f32 %v8747_v34, %v14872_v62  ;;  %v8749_v40 = vpop.f32.mrb[134].mxu1  ;;  %v12351_v47 = vpop.eup %12350  ;;  %12364 = vtanh.f32 %v10872_v53  ;;  %v10632_v9 = vadd.f32 %v10631_v56, %v10630_v18 }
 0x6c6   : > { %v10874_v48 = vadd.f32 %v8749_v40, %v14868_v21  ;;  %v10633_v20 = vpop.f32.mrb[6].mxu0  ;;  %v8751_v12 = vpop.f32.mrb[135].mxu1  ;;  %9341 = vst [vmem:[%s14625_s9 + $0xd8] sm:$0xff] %v12351_v47 }
 0x6c7   : > { %12366 = vtanh.f32 %v10873_v55  ;;  %v10875_v8 = vadd.f32 %v8751_v12, %v14872_v62  ;;  %v10634_v58 = vpop.f32.mrb[7].mxu0  ;;  %v12353_v0 = vpop.eup %12352  ;;  %v9164_v3 = vadd.f32 %v10632_v9, %v14845_v23 }
 0x6c8   : > { %12368 = vtanh.f32 %v10874_v48  ;;  %v10635_v25 = vadd.f32 %v10634_v58, %v10633_v20  ;;  %9318 = vst [vmem:[%s14625_s9 + $0x20] sm:$0xff] %v12353_v0 }
 0x6c9   : > { %v12355_v28 = vpop.eup %12354  ;;  %12370 = vtanh.f32 %v10875_v8 }
 0x6ca   : > { %v12357_v42 = vpop.eup %12356  ;;  %9319 = vst [vmem:[%s14625_s9 + $0x28] sm:$0xff] %v12355_v28  ;;  %12372 = vtanh.f32 %v9164_v3  ;;  %v9167_v6 = vadd.f32 %v10635_v25, %v14848_v16  ;;  %v8755_v50 = vpop.f32.mrb[136].mxu1 }
 0x6cb   : > { %v12359_v57 = vpop.eup %12358  ;;  %9325 = vst [vmem:[%s14625_s9 + $0x58] sm:$0xff] %v12357_v42  ;;  %v10876_v23 = vadd.f32 %v8755_v50, %v14868_v21  ;;  %v10636_v44 = vpop.f32.mrb[8].mxu0 }
 0x6cc   : > { %v12361_v5 = vpop.eup %12360  ;;  %9326 = vst [vmem:[%s14625_s9 + $0x60] sm:$0xff] %v12359_v57  ;;  %12374 = vtanh.f32 %v9167_v6  ;;  %v8757_v10 = vpop.f32.mrb[137].mxu1 }
 0x6cd   : > { %9348 = vst [vmem:[%s14625_s9 + $0x110] sm:$0xff] %v12361_v5  ;;  %v10877_v27 = vadd.f32 %v8757_v10, %v14872_v62  ;;  %v10637_v24 = vpop.f32.mrb[9].mxu0  ;;  %v8759_v39 = vpop.f32.mrb[138].mxu1  ;;  %12376 = vtanh.f32 %v10876_v23 }
 0x6ce   : > { %v12363_v19 = vpop.eup %12362  ;;  %v10638_v16 = vadd.f32 %v10637_v24, %v10636_v44  ;;  %v10878_v37 = vadd.f32 %v8759_v39, %v14868_v21  ;;  %v10639_v26 = vpop.f32.mrb[10].mxu0 }
 0x6cf   : > { %v8761_v31 = vpop.f32.mrb[139].mxu1  ;;  %9355 = vst [vmem:[%s14625_s9 + $0x148] sm:$0xff] %v12363_v19  ;;  %12378 = vtanh.f32 %v10877_v27  ;;  %v10640_v36 = vpop.f32.mrb[11].mxu0 }
 0x6d0   : > { %v10879_v52 = vadd.f32 %v8761_v31, %v14872_v62  ;;  %v12365_v33 = vpop.eup %12364  ;;  %v9172_v41 = vadd.f32 %v10638_v16, %v14850_v59  ;;  %12380 = vtanh.f32 %v10878_v37  ;;  %v10641_v2 = vadd.f32 %v10640_v36, %v10639_v26 }
 0x6d1   : > { %v12367_v45 = vpop.eup %12366  ;;  %9332 = vst [vmem:[%s14625_s9 + $0x90] sm:$0xff] %v12365_v33 }
 0x6d2   : > { %12382 = vtanh.f32 %v10879_v52  ;;  %v12369_v60 = vpop.eup %12368  ;;  %9333 = vst [vmem:[%s14625_s9 + $0x98] sm:$0xff] %v12367_v45  ;;  %v9175_v14 = vadd.f32 %v10641_v2, %v14852_v11  ;;  %v8765_v22 = vpop.f32.mrb[140].mxu1 }
 0x6d3   : > { %12384 = vtanh.f32 %v9172_v41  ;;  %v12371_v63 = vpop.eup %12370  ;;  %9339 = vst [vmem:[%s14625_s9 + $0xc8] sm:$0xff] %v12369_v60  ;;  %v10880_v59 = vadd.f32 %v8765_v22, %v14868_v21  ;;  %v10642_v35 = vpop.f32.mrb[12].mxu0 }
 0x6d4   : > { %v12373_v7 = vpop.eup %12372  ;;  %9340 = vst [vmem:[%s14625_s9 + $0xd0] sm:$0xff] %v12371_v63  ;;  %12386 = vtanh.f32 %v9175_v14  ;;  %v8767_v43 = vpop.f32.mrb[141].mxu1 }
 0x6d5   : > { %9362 = vst [vmem:[%s14625_s9 + $0x180] sm:$0xff] %v12373_v7  ;;  %v10881_v13 = vadd.f32 %v8767_v43, %v14872_v62  ;;  %v10643_v38 = vpop.f32.mrb[13].mxu0  ;;  %v8769_v30 = vpop.f32.mrb[142].mxu1  ;;  %12388 = vtanh.f32 %v10880_v59 }
 0x6d6   : > { %v12375_v53 = vpop.eup %12374  ;;  %v10644_v11 = vadd.f32 %v10643_v38, %v10642_v35  ;;  %v10882_v18 = vadd.f32 %v8769_v30, %v14868_v21  ;;  %v10645_v34 = vpop.f32.mrb[14].mxu0 }
 0x6d7   : > { %v8771_v55 = vpop.f32.mrb[143].mxu1  ;;  %9369 = vst [vmem:[%s14625_s9 + $0x1b8] sm:$0xff] %v12375_v53  ;;  %12390 = vtanh.f32 %v10881_v13  ;;  %v10646_v40 = vpop.f32.mrb[15].mxu0 }
 0x6d8   : > { %v10883_v56 = vadd.f32 %v8771_v55, %v14872_v62  ;;  %v12377_v47 = vpop.eup %12376  ;;  %v9180_v9 = vadd.f32 %v10644_v11, %v14854_v51  ;;  %12392 = vtanh.f32 %v10882_v18  ;;  %v10647_v48 = vadd.f32 %v10646_v40, %v10645_v34 }
 0x6d9   : > { %v12379_v20 = vpop.eup %12378  ;;  %9346 = vst [vmem:[%s14625_s9 + $0x100] sm:$0xff] %v12377_v47 }
 0x6da   : > { %12394 = vtanh.f32 %v10883_v56  ;;  %v12381_v12 = vpop.eup %12380  ;;  %9347 = vst [vmem:[%s14625_s9 + $0x108] sm:$0xff] %v12379_v20  ;;  %v9183_v8 = vadd.f32 %v10647_v48, %v14856_v54  ;;  %v8775_v0 = vpop.f32.mrb[144].mxu1 }
 0x6db   : > { %12396 = vtanh.f32 %v9180_v9  ;;  %9353 = vst [vmem:[%s14625_s9 + $0x138] sm:$0xff] %v12381_v12  ;;  %v10884_v51 = vadd.f32 %v8775_v0, %v14868_v21  ;;  %v10648_v25 = vpop.f32.mrb[16].mxu0  ;;  %v8777_v28 = vpop.f32.mrb[145].mxu1 }
 0x6dc   : > { %v12383_v58 = vpop.eup %12382  ;;  %12398 = vtanh.f32 %v9183_v8  ;;  %v10885_v42 = vadd.f32 %v8777_v28, %v14872_v62  ;;  %v10649_v6 = vpop.f32.mrb[17].mxu0 }
 0x6dd   : > { %v12385_v3 = vpop.eup %12384  ;;  %9354 = vst [vmem:[%s14625_s9 + $0x140] sm:$0xff] %v12383_v58  ;;  %v8779_v57 = vpop.f32.mrb[146].mxu1  ;;  %12400 = vtanh.f32 %v10884_v51  ;;  %v14922_v54 = vadd.f32 %v10649_v6, %v10648_v25 }
 0x6de   : > { %9376 = vst [vmem:[%s14625_s9 + $0x1f0] sm:$0xff] %v12385_v3  ;;  %v12387_v50 = vpop.eup %12386  ;;  %v10886_v5 = vadd.f32 %v8779_v57, %v14868_v21  ;;  %v10651_v23 = vpop.f32.mrb[18].mxu0  ;;  %12402 = vtanh.f32 %v10885_v42 }
 0x6df   : > { %v8781_v44 = vpop.f32.mrb[147].mxu1  ;;  %9383 = vst [vmem:[%s14625_s9 + $0x228] sm:$0xff] %v12387_v50  ;;  %v10652_v27 = vpop.f32.mrb[19].mxu0 }
 0x6e0   : > { %v10887_v10 = vadd.f32 %v8781_v44, %v14872_v62  ;;  %v12389_v24 = vpop.eup %12388  ;;  %12404 = vtanh.f32 %v10886_v5  ;;  %v14927_v39 = vadd.f32 %v10652_v27, %v10651_v23 }
 0x6e1   : > { %v12391_v19 = vpop.eup %12390  ;;  %9360 = vst [vmem:[%s14625_s9 + $0x170] sm:$0xff] %v12389_v24 }
 0x6e2   : > { %12406 = vtanh.f32 %v10887_v10  ;;  %v12393_v16 = vpop.eup %12392  ;;  %9361 = vst [vmem:[%s14625_s9 + $0x178] sm:$0xff] %v12391_v19  ;;  %v8785_v26 = vpop.f32.mrb[148].mxu1 }
 0x6e3   : > { %9367 = vst [vmem:[%s14625_s9 + $0x1a8] sm:$0xff] %v12393_v16  ;;  %v10888_v52 = vadd.f32 %v8785_v26, %v14868_v21  ;;  %v10654_v36 = vpop.f32.mrb[20].mxu0  ;;  %v8787_v33 = vpop.f32.mrb[149].mxu1 }
 0x6e4   : > { %v12395_v37 = vpop.eup %12394  ;;  %v10889_v41 = vadd.f32 %v8787_v33, %v14872_v62  ;;  %v10655_v2 = vpop.f32.mrb[21].mxu0 }
 0x6e5   : > { %v12397_v31 = vpop.eup %12396  ;;  %9368 = vst [vmem:[%s14625_s9 + $0x1b0] sm:$0xff] %v12395_v37  ;;  %v8789_v45 = vpop.f32.mrb[150].mxu1  ;;  %12408 = vtanh.f32 %v10888_v52  ;;  %v14936_v14 = vadd.f32 %v10655_v2, %v10654_v36 }
 0x6e6   : > { %9390 = vst [vmem:[%s14625_s9 + $0x260] sm:$0xff] %v12397_v31  ;;  %v12399_v60 = vpop.eup %12398  ;;  %v10890_v63 = vadd.f32 %v8789_v45, %v14868_v21  ;;  %v10657_v22 = vpop.f32.mrb[22].mxu0  ;;  %12410 = vtanh.f32 %v10889_v41 }
 0x6e7   : > { %v8791_v7 = vpop.f32.mrb[151].mxu1  ;;  %9397 = vst [vmem:[%s14625_s9 + $0x298] sm:$0xff] %v12399_v60  ;;  %v10658_v35 = vpop.f32.mrb[23].mxu0 }
 0x6e8   : > { %v10891_v59 = vadd.f32 %v8791_v7, %v14872_v62  ;;  %v12401_v43 = vpop.eup %12400  ;;  %12412 = vtanh.f32 %v10890_v63  ;;  %v14941_v13 = vadd.f32 %v10658_v35, %v10657_v22 }
 0x6e9   : > { %v12403_v38 = vpop.eup %12402  ;;  %9374 = vst [vmem:[%s14625_s9 + $0x1e0] sm:$0xff] %v12401_v43 }
 0x6ea   : > { %12414 = vtanh.f32 %v10891_v59  ;;  %v12405_v30 = vpop.eup %12404  ;;  %9375 = vst [vmem:[%s14625_s9 + $0x1e8] sm:$0xff] %v12403_v38  ;;  %v8795_v11 = vpop.f32.mrb[152].mxu1 }
 0x6eb   : > { %9381 = vst [vmem:[%s14625_s9 + $0x218] sm:$0xff] %v12405_v30  ;;  %v10892_v18 = vadd.f32 %v8795_v11, %v14868_v21  ;;  %v8797_v34 = vpop.f32.mrb[153].mxu1 }
 0x6ec   : > { %v12407_v53 = vpop.eup %12406  ;;  %v10893_v55 = vadd.f32 %v8797_v34, %v14872_v62  ;;  %v8799_v56 = vpop.f32.mrb[154].mxu1 }
 0x6ed   : > { %9382 = vst [vmem:[%s14625_s9 + $0x220] sm:$0xff] %v12407_v53  ;;  %12416 = vtanh.f32 %v10892_v18  ;;  %v10894_v40 = vadd.f32 %v8799_v56, %v14868_v21  ;;  %v8801_v47 = vpop.f32.mrb[155].mxu1 }
 0x6ee   : > { %12418 = vtanh.f32 %v10893_v55  ;;  %v10895_v9 = vadd.f32 %v8801_v47, %v14872_v62 }
 0x6ef   : > { %v12409_v48 = vpop.eup %12408  ;;  %12420 = vtanh.f32 %v10894_v40 }
 0x6f0   : > { %v12411_v20 = vpop.eup %12410  ;;  %9388 = vst [vmem:[%s14625_s9 + $0x250] sm:$0xff] %v12409_v48  ;;  %12422 = vtanh.f32 %v10895_v9 }
 0x6f1   : > { %9389 = vst [vmem:[%s14625_s9 + $0x258] sm:$0xff] %v12411_v20 }
 0x6f2   : > { %v12413_v12 = vpop.eup %12412  ;;  %v8805_v58 = vpop.f32.mrb[156].mxu1 }
 0x6f3   : > { %9395 = vst [vmem:[%s14625_s9 + $0x288] sm:$0xff] %v12413_v12  ;;  %v10896_v0 = vadd.f32 %v8805_v58, %v14868_v21  ;;  %v8807_v3 = vpop.f32.mrb[157].mxu1 }
 0x6f4   : > { %v12415_v8 = vpop.eup %12414  ;;  %v10897_v51 = vadd.f32 %v8807_v3, %v14872_v62  ;;  %v8809_v25 = vpop.f32.mrb[158].mxu1 }
 0x6f5   : > { %9396 = vst [vmem:[%s14625_s9 + $0x290] sm:$0xff] %v12415_v8  ;;  %12424 = vtanh.f32 %v10896_v0  ;;  %v10898_v28 = vadd.f32 %v8809_v25, %v14868_v21  ;;  %v8811_v42 = vpop.f32.mrb[159].mxu1 }
 0x6f6   : > { %12426 = vtanh.f32 %v10897_v51  ;;  %v10899_v6 = vadd.f32 %v8811_v42, %v14872_v62 }
 0x6f7   : > { %v12417_v57 = vpop.eup %12416  ;;  %12428 = vtanh.f32 %v10898_v28 }
 0x6f8   : > { %v12419_v50 = vpop.eup %12418  ;;  %9402 = vst [vmem:[%s14625_s9 + $0x2c0] sm:$0xff] %v12417_v57  ;;  %12430 = vtanh.f32 %v10899_v6 }
 0x6f9   : > { %v12421_v5 = vpop.eup %12420  ;;  %9403 = vst [vmem:[%s14625_s9 + $0x2c8] sm:$0xff] %v12419_v50 }
 0x6fa   : > { %v12423_v23 = vpop.eup %12422  ;;  %9409 = vst [vmem:[%s14625_s9 + $0x2f8] sm:$0xff] %v12421_v5  ;;  %v10456_v44 = vpop.f32.mrb[160].mxu1 }
 0x6fb   : > { %9410 = vst [vmem:[%s14625_s9 + $0x300] sm:$0xff] %v12423_v23  ;;  %v10457_v10 = vpop.f32.mrb[161].mxu1 }
 0x6fc   : > { %v10458_v21 = vadd.f32 %v10457_v10, %v10456_v44  ;;  %v10459_v27 = vpop.f32.mrb[162].mxu1 }
 0x6fd   : > { %v10460_v24 = vpop.f32.mrb[163].mxu1 }
 0x6fe   : > { %v8897_v62 = vadd.f32 %v10458_v21, %v14791_v46  ;;  %v10461_v19 = vadd.f32 %v10460_v24, %v10459_v27 }
 0x6ff   : > { %v12425_v16 = vpop.eup %12424 }
 0x700   : > { %v12427_v37 = vpop.eup %12426  ;;  %9416 = vst [vmem:[%s14625_s9 + $0x330] sm:$0xff] %v12425_v16  ;;  %v8994_v26 = vadd.f32 %v14824_v29, %v8897_v62  ;;  %v8900_v31 = vadd.f32 %v10461_v19, %v14791_v46 }
 0x701   : > { %v12429_v52 = vpop.eup %12428  ;;  %9417 = vst [vmem:[%s14625_s9 + $0x338] sm:$0xff] %v12427_v37 }
 0x702   : > { %v12431_v36 = vpop.eup %12430  ;;  %9423 = vst [vmem:[%s14625_s9 + $0x368] sm:$0xff] %v12429_v52  ;;  %v9091_v33 = vadd.f32 %v14858_v32, %v8994_v26  ;;  %v8997_v41 = vadd.f32 %v14826_v61, %v8900_v31  ;;  %v10462_v2 = vpop.f32.mrb[164].mxu1 }
 0x703   : > { %9424 = vst [vmem:[%s14625_s9 + $0x370] sm:$0xff] %v12431_v36  ;;  %v10463_v45 = vpop.f32.mrb[165].mxu1 }
 0x704   : > { %v9188_v60 = vadd.f32 %v14922_v54, %v9091_v33  ;;  %v9094_v63 = vadd.f32 %v14860_v49, %v8997_v41  ;;  %v10464_v22 = vadd.f32 %v10463_v45, %v10462_v2  ;;  %v10465_v7 = vpop.f32.mrb[166].mxu1 }
 0x705   : > { %v10466_v29 = vpop.f32.mrb[167].mxu1 }
 0x706   : > { %12432 = vtanh.f32 %v9188_v60  ;;  %v9191_v59 = vadd.f32 %v14927_v39, %v9094_v63  ;;  %v8905_v35 = vadd.f32 %v10464_v22, %v14791_v46  ;;  %v10467_v32 = vadd.f32 %v10466_v29, %v10465_v7 }
 0x708   : > { %12434 = vtanh.f32 %v9191_v59  ;;  %v9002_v61 = vadd.f32 %v14828_v15, %v8905_v35  ;;  %v8908_v54 = vadd.f32 %v10467_v32, %v14791_v46 }
 0x70a   : > { %v9099_v49 = vadd.f32 %v14862_v17, %v9002_v61  ;;  %v9005_v43 = vadd.f32 %v14830_v1, %v8908_v54 }
 0x70c   : > { %v9196_v38 = vadd.f32 %v14936_v14, %v9099_v49  ;;  %v9102_v39 = vadd.f32 %v14864_v4, %v9005_v43 }
 0x70e   : > { %12436 = vtanh.f32 %v9196_v38  ;;  %v9199_v30 = vadd.f32 %v14941_v13, %v9102_v39 }
 0x710   : > { %v12433_v53 = vpop.eup %12432  ;;  %12438 = vtanh.f32 %v9199_v30 }
 0x711   : > { %9404 = vst [vmem:[%s14625_s9 + $0x2d0] sm:$0xff] %v12433_v53 }
 0x712   : > { %v12435_v15 = vpop.eup %12434 }
 0x713   : > { %9411 = vst [vmem:[%s14625_s9 + $0x308] sm:$0xff] %v12435_v15 }
 0x718   : > { %v12437_v46 = vpop.eup %12436 }
 0x719   : > { %9418 = vst [vmem:[%s14625_s9 + $0x340] sm:$0xff] %v12437_v46 }
 0x71a   : > { %v12439_v1 = vpop.eup %12438 }
 0x71b   : > { %9425 = vst [vmem:[%s14625_s9 + $0x378] sm:$0xff] %v12439_v1 }
 0x71c   : > { %12725 = shalt.err (!%p12722_p9)
}
 0x71d   : > { %s12726_s16 = scalar_lea.hbm %s14990_s22, 14336  ;;  %s12730_s20 = scalar_lea.hbm %s15395_s21, 28672 }
 0x71e   : > { %p12727_p4 = scmp.ne.s32.totalorder %s14990_s22, %s12726_s16  ;;  %p12731_p2 = scmp.lt.u32.totalorder %s14990_s22, %s15395_s21 }
 0x71f   : > { %p12732_p6 = scmp.lt.u32.totalorder %s12730_s20, %s12726_s16  ;;  %p12734_p10 = scmp.lt.u32.totalorder %s12726_s16, %s14990_s22 }
 0x720   : > { %p12728_p3 = pnand %p12727_p4, %p15396_p1 }
 0x721   : > { %p12733_p5 = por %p12732_p6, %p12731_p2 }
 0x722   : > { %p12729_p0 = pneg %p12728_p3 }
 0x723   : > { %p12735_p11 = por %p12734_p10, %p12733_p5 }
 0x725   : > { %p12736_p12 = pnand %p12735_p11, %p12729_p0 }
 0x727   : > { %12739 = shalt.err (!%p12736_p12)
}
 0x728   : > { %s12815_s26 = smov 896   ;;  %s12816_s14 = smov 56  }
 0x729   : > { %11352 = dma.vmem_to_hbm [thread:$0]  (%p15396_p1), %s14993_s19, 14336, %s14990_s22, %s9427_s17, %s12815_s26, %s12815_s26, %s12816_s14  }
 0x72a PF: > { %s9456_s23 = sand.u32 1, %s12782_s30   ;;  %p15397_p13 = scmp.ne.s32.totalorder %s15192_s13, 0 }
 0x72b   : > { %p15398_p8 = scmp.ge.s32.totalorder %s12794_s12, 2  ;;  %s9457_s16 = scalar_lea.sflag [#allocation4], %s9456_s23 }
 0x72d   : > { %p11384_p7 = pnand %p15398_p8, %p15397_p13 }
 0x72f   : > { %12777 = dma.done.wait (!%p11384_p7), %s9457_s16, 14336  }
 0x730   : > { %12779 = vsyncadd (!%p11384_p7), %s9457_s16, 4294952960  ;;  %p26_p9 = scmp.ge.s32.totalorder %s13093_s27, 4   ;;  %s15399_s30 = smov %s12786_s10 }
 0x731   : > { %s15400_s10 = smov %s12790_s11  ;;  %s15401_s11 = smov %s13104_s18 }
 0x732   : > { %s15402_s12 = smov %s13093_s27  ;;  %28 = sbr.rel (!%p26_p9) target bundleno = 11 (0xb), region = 133 }
 0x739   :  { %9462 = vsyncpa [#allocation3], 1 }
 0x73a   :  { %9464 = vsyncpa [#allocation3 + $0x1], 1 }
 0x73b   :  { %9465 = vsyncpa [#allocation6], 1 }
 0x73c   :  { %9466 = vsyncpa [#allocation9], 1 }
 0x73d   :  { %9467 = vsyncpa [#allocation12], 1 }
 0x73e   :  { %9468 = vsyncpa [#allocation15], 1 }
 0x73f   :  { %9469 = vsyncpa [#allocation4], 1 }
 0x740   :  { %9471 = vsyncpa [#allocation4 + $0x1], 1 }

</bundles_post_ra>
